<compile_context>
chip_gen: v7x
topology: tpu7x:2x2x1
jax: 0.10.0
libtpu: 0.0.40
codegen_flags: <defaults>
</compile_context>

<pallas_src>
import functools

import jax
import jax.numpy as jnp
from jax.experimental import pallas as pl
from jax.experimental.pallas import tpu as pltpu

NUM_CLASSES = 10  # stand-in for len(train_dataset.classes)
LANE = 128
VMEM_LIMIT = 32 * 1024 * 1024  # fits v5e/v6e (128 MiB) and v7x (64 MiB) budgets


def _round_up(x, m):
    return ((x + m - 1) // m) * m


def _choose_tm(m, tmax):
    """Largest tile <= tmax, shrunk (>=64) so the grid keeps >=2 steps (v7x)."""
    tm = tmax
    while tm > 64 and _round_up(m, tm) // tm < 2:
        tm //= 2
    return tm


# ----------------------------------------------------------------------------
# Pallas kernels
# ----------------------------------------------------------------------------
def _conv_pool_kernel(p_ref, w_ref, b_ref, o_ref, *, kk):
    """Fused conv(as matmul) + bias + ReLU + max-pool.

    p_ref : (kk, TM, K)  bf16  im2col patches, pool-window position-major
    w_ref : (K, 128)     bf16  conv weight matrix (Cout zero-padded to 128,
                               BN of the *previous* stage folded in)
    b_ref : (1, 128)     f32   bias (with previous-stage BN shift folded in)
    o_ref : (TM, 128)    bf16  pooled activations (this stage's BN deferred
                               to the next layer's weights)
    """
    tm, cp = o_ref.shape
    k = p_ref.shape[-1]
    # One long-M MXU matmul over all pool-window positions...
    y = jnp.dot(p_ref[...].reshape(kk * tm, k), w_ref[...],
                preferred_element_type=jnp.float32)
    # ...then a max-reduce over the kk pool positions (leading, untiled dim).
    m = jnp.max(y.reshape(kk, tm, cp), axis=0)
    # relu(max_u(conv_u) + b) == maxpool(relu(conv + b))  (relu monotone, b const)
    o_ref[...] = jnp.maximum(m + b_ref[...], 0.0).astype(o_ref.dtype)


def _fc_fused_kernel(x_ref, w1_ref, b1_ref, w2_ref, b2_ref, w3_ref, b3_ref, o_ref):
    """fc1+ReLU -> fc2+ReLU -> fc3 in one kernel; intermediates stay on-chip."""
    h = jnp.dot(x_ref[...], w1_ref[...], preferred_element_type=jnp.float32)
    h = jnp.maximum(h + b1_ref[...], 0.0).astype(w2_ref.dtype)
    h = jnp.dot(h, w2_ref[...], preferred_element_type=jnp.float32)
    h = jnp.maximum(h + b2_ref[...], 0.0).astype(w3_ref.dtype)
    h = jnp.dot(h, w3_ref[...], preferred_element_type=jnp.float32) + b3_ref[...]
    o_ref[...] = h.astype(o_ref.dtype)


# ----------------------------------------------------------------------------
# Layer wrappers (XLA glue = patch gather / layout; compute = Pallas kernels)
# ----------------------------------------------------------------------------
def conv_pool(x_nhwc, wmat, bias, *, kh, kw, pk, tmax=512):
    """Fused Conv2d(valid, stride 1) + bias + ReLU + MaxPool(pk,pk). NHWC in/out.

    x_nhwc carries only the REAL channels; the contraction K is padded once
    (kh*kw*C -> wmat.shape[0]) instead of per-tap channel padding.
    """
    N, H, W, C = x_nhwc.shape
    OH, OW = H - kh + 1, W - kw + 1
    PH, PW = OH // pk, OW // pk
    kk = pk * pk
    K, Cp = wmat.shape

    # im2col (XLA side), flatten order (i, j, c) to match the weight matrix.
    cols = [x_nhwc[:, i:i + OH, j:j + OW, :] for i in range(kh) for j in range(kw)]
    patches = jnp.concatenate(cols, axis=-1)               # (N, OH, OW, kh*kw*C)
    kc = kh * kw * C
    if kc < K:                                             # pad total K once
        patches = jnp.pad(patches, ((0, 0), (0, 0), (0, 0), (0, K - kc)))
    # Regroup so the pk*pk pool-window positions become the leading axis.
    p = patches[:, :PH * pk, :PW * pk, :].reshape(N, PH, pk, PW, pk, K)
    p = p.transpose(2, 4, 0, 1, 3, 5).reshape(kk, N * PH * PW, K)

    M = N * PH * PW
    tm = _choose_tm(M, tmax)
    Mp = _round_up(M, tm)
    if Mp != M:
        p = jnp.pad(p, ((0, 0), (0, Mp - M), (0, 0)))
    p = p.astype(jnp.bfloat16)

    out = pl.pallas_call(
        functools.partial(_conv_pool_kernel, kk=kk),
        out_shape=jax.ShapeDtypeStruct((Mp, Cp), jnp.bfloat16),
        grid=(Mp // tm,),
        in_specs=[
            pl.BlockSpec((kk, tm, K), lambda i: (0, i, 0)),
            pl.BlockSpec((K, Cp), lambda i: (0, 0)),
            pl.BlockSpec((1, Cp), lambda i: (0, 0)),
        ],
        out_specs=pl.BlockSpec((tm, Cp), lambda i: (i, 0)),
        compiler_params=pltpu.CompilerParams(
            dimension_semantics=("parallel",),
            vmem_limit_bytes=VMEM_LIMIT),
    )(p, wmat, bias)
    return out[:M].reshape(N, PH, PW, Cp)


def fc_head(x_flat, q):
    """Fused fc1->fc2->fc3.  x_flat: (M, 4608) bf16.  Returns (M, 128) f32."""
    M, K1 = x_flat.shape
    N1 = q["fw1"].shape[1]
    N2 = q["fw2"].shape[1]
    N3 = q["fw3"].shape[1]
    Mp = _round_up(M, 16)
    tm = min(256, Mp)
    Mp = _round_up(Mp, tm)
    if Mp != M:
        x_flat = jnp.pad(x_flat, ((0, Mp - M), (0, 0)))
    x_flat = x_flat.astype(jnp.bfloat16)

    out = pl.pallas_call(
        _fc_fused_kernel,
        out_shape=jax.ShapeDtypeStruct((Mp, N3), jnp.float32),
        grid=(Mp // tm,),
        in_specs=[
            pl.BlockSpec((tm, K1), lambda i: (i, 0)),
            pl.BlockSpec((K1, N1), lambda i: (0, 0)),
            pl.BlockSpec((1, N1), lambda i: (0, 0)),
            pl.BlockSpec((N1, N2), lambda i: (0, 0)),
            pl.BlockSpec((1, N2), lambda i: (0, 0)),
            pl.BlockSpec((N2, N3), lambda i: (0, 0)),
            pl.BlockSpec((1, N3), lambda i: (0, 0)),
        ],
        out_specs=pl.BlockSpec((tm, N3), lambda i: (i, 0)),
        compiler_params=pltpu.CompilerParams(
            dimension_semantics=("parallel",),
            vmem_limit_bytes=VMEM_LIMIT),
    )(x_flat, q["fw1"], q["fb1"], q["fw2"], q["fb2"], q["fw3"], q["fb3"])
    return out[:M]


# ----------------------------------------------------------------------------
# Parameter preparation (done once, outside the jit-hot path)
# ----------------------------------------------------------------------------
def bn_scale_shift(gamma, beta, mean, var, eps=1e-5):
    inv = gamma * jax.lax.rsqrt(var + eps)
    return inv, beta - mean * inv


def _pad_lane(v, fill=0.0):
    c = v.shape[-1]
    if c < LANE:
        v = jnp.pad(v, [(0, 0)] * (v.ndim - 1) + [(0, LANE - c)], constant_values=fill)
    return v


def _prep_conv_weight(w_oihw, k_pad, in_scale=None):
    """OIHW conv weight -> (K_pad, 128) matmul weight; optional per-input-channel
    scale (previous stage's folded BN scale)."""
    cout, cin, kh, kw = w_oihw.shape
    w = w_oihw
    if in_scale is not None:
        w = w * in_scale.reshape(1, cin, 1, 1)
    w = jnp.transpose(w, (2, 3, 1, 0))                      # (kh, kw, cin, cout)
    w = jnp.pad(w, ((0, 0), (0, 0), (0, 0), (0, LANE - cout)))
    w = w.reshape(kh * kw * cin, LANE)
    if w.shape[0] < k_pad:
        w = jnp.pad(w, ((0, k_pad - w.shape[0]), (0, 0)))
    return w.astype(jnp.bfloat16)


def prepare_params(p):
    q = {}
    s1, t1 = bn_scale_shift(p["g1"], p["be1"], p["m1"], p["v1"])
    s2, t2 = bn_scale_shift(p["g2"], p["be2"], p["m2"], p["v2"])
    s3, t3 = bn_scale_shift(p["g3"], p["be3"], p["m3"], p["v3"])

    # conv1: no preceding BN.  K = 5*5*1 = 25 -> pad to 32.
    q["cw1"] = _prep_conv_weight(p["w1"], k_pad=32)                    # (32, 128)
    q["cb1"] = _pad_lane(p["cb1"]).reshape(1, LANE).astype(jnp.float32)

    # conv2: fold BN1 (scale into weights, shift into bias).  K = 432 -> 512.
    q["cw2"] = _prep_conv_weight(p["w2"], k_pad=512, in_scale=s1)      # (512, 128)
    cb2 = p["cb2"] + jnp.einsum("oihw,i->o", p["w2"], t1)
    q["cb2"] = _pad_lane(cb2).reshape(1, LANE).astype(jnp.float32)

    # conv3: fold BN2.  K = 324 -> 384.
    q["cw3"] = _prep_conv_weight(p["w3"], k_pad=384, in_scale=s2)      # (384, 128)
    cb3 = p["cb3"] + jnp.einsum("oihw,i->o", p["w3"], t2)
    q["cb3"] = _pad_lane(cb3).reshape(1, LANE).astype(jnp.float32)

    # fc1: fold BN3 and re-permute rows to the NHWC (C padded to 128) flatten
    # order of conv3's kernel output, so no transpose/slice is needed at runtime.
    w1 = p["fw1"].reshape(256, 12, 6, 6)                               # (o, c, h, w)
    fb1 = p["fb1"] + jnp.einsum("ochw,c->o", w1, t3)
    w1 = w1 * s3.reshape(1, 12, 1, 1)
    w1 = jnp.transpose(w1, (2, 3, 1, 0))                               # (h, w, c, o)
    w1 = jnp.pad(w1, ((0, 0), (0, 0), (0, LANE - 12), (0, 0)))         # (6,6,128,256)
    q["fw1"] = w1.reshape(6 * 6 * LANE, 256).astype(jnp.bfloat16)      # (4608, 256)
    q["fb1"] = fb1.reshape(1, 256).astype(jnp.float32)

    q["fw2"] = jnp.pad(p["fw2"].T, ((0, 0), (0, LANE - 84))).astype(jnp.bfloat16)           # (256,128)
    q["fb2"] = _pad_lane(p["fb2"]).reshape(1, LANE).astype(jnp.float32)
    q["fw3"] = jnp.pad(p["fw3"].T, ((0, LANE - 84), (0, LANE - NUM_CLASSES))).astype(jnp.bfloat16)  # (128,128)
    q["fb3"] = _pad_lane(p["fb3"]).reshape(1, LANE).astype(jnp.float32)
    return q


# ----------------------------------------------------------------------------
# Forward pass
# ----------------------------------------------------------------------------
def net_forward(x_nchw, q):
    x = jnp.transpose(x_nchw, (0, 2, 3, 1)).astype(jnp.bfloat16)     # NCHW->NHWC, bf16 early
    x = conv_pool(x, q["cw1"], q["cb1"], kh=5, kw=5, pk=3, tmax=256)  # (N,30,30,128)
    x = conv_pool(x[..., :48], q["cw2"], q["cb2"], kh=3, kw=3, pk=2)  # (N,14,14,128)
    x = conv_pool(x[..., :36], q["cw3"], q["cb3"], kh=3, kw=3, pk=2)  # (N, 6, 6,128)
    # Contiguous flatten (BN3 + PyTorch's channel-major view are folded into fw1).
    n = x.shape[0]
    logits = fc_head(x.reshape(n, 6 * 6 * LANE), q)
    return logits[:, :NUM_CLASSES]


# ----------------------------------------------------------------------------
# Pure-JAX reference (f32) for a correctness sanity check
# ----------------------------------------------------------------------------
def net_reference(x, p):
    def conv(x, w, b):
        y = jax.lax.conv_general_dilated(x, w, (1, 1), "VALID",
                                         dimension_numbers=("NCHW", "OIHW", "NCHW"))
        return y + b.reshape(1, -1, 1, 1)

    def pool(x, k):
        return jax.lax.reduce_window(x, -jnp.inf, jax.lax.max,
                                     (1, 1, k, k), (1, 1, k, k), "VALID")

    def bn(x, g, be, m, v, eps=1e-5):
        inv = g / jnp.sqrt(v + eps)
        return x * inv.reshape(1, -1, 1, 1) + (be - m * inv).reshape(1, -1, 1, 1)

    x = bn(pool(jax.nn.relu(conv(x, p["w1"], p["cb1"])), 3), p["g1"], p["be1"], p["m1"], p["v1"])
    x = bn(pool(jax.nn.relu(conv(x, p["w2"], p["cb2"])), 2), p["g2"], p["be2"], p["m2"], p["v2"])
    x = bn(pool(jax.nn.relu(conv(x, p["w3"], p["cb3"])), 2), p["g3"], p["be3"], p["m3"], p["v3"])
    x = x.reshape(x.shape[0], -1)
    x = jax.nn.relu(x @ p["fw1"].T + p["fb1"])
    x = jax.nn.relu(x @ p["fw2"].T + p["fb2"])
    return x @ p["fw3"].T + p["fb3"]


# ----------------------------------------------------------------------------
# Deterministic parameter init (PyTorch weight layouts)
# ----------------------------------------------------------------------------
def init_params(key):
    ks = jax.random.split(key, 24)
    it = iter(ks)
    n = lambda shape, s=0.05: jax.random.normal(next(it), shape, jnp.float32) * s
    p = {}
    p["w1"], p["cb1"] = n((48, 1, 5, 5)), n((48,))
    p["w2"], p["cb2"] = n((36, 48, 3, 3)), n((36,))
    p["w3"], p["cb3"] = n((12, 36, 3, 3)), n((12,))
    p["fw1"], p["fb1"] = n((256, 12 * 6 * 6)), n((256,))
    p["fw2"], p["fb2"] = n((84, 256)), n((84,))
    p["fw3"], p["fb3"] = n((NUM_CLASSES, 84)), n((NUM_CLASSES,))
    for i, c in zip((1, 2, 3), (48, 36, 12)):
        p[f"g{i}"] = 1.0 + n((c,), 0.1)
        p[f"be{i}"] = n((c,), 0.1)
        p[f"m{i}"] = n((c,), 0.1)
        p[f"v{i}"] = 1.0 + jnp.abs(n((c,), 0.1))
    return p


if __name__ == "__main__":
    key = jax.random.PRNGKey(0)
    pkey, xkey = jax.random.split(key)
    params = init_params(pkey)
    prepped = prepare_params(params)

    # 94x94 input makes fc1's 12*6*6 flatten line up:
    # 94 -conv5-> 90 -pool3-> 30 -conv3-> 28 -pool2-> 14 -conv3-> 12 -pool2-> 6
    x = jax.random.normal(xkey, (2, 1, 94, 94), jnp.float32)   # NCHW like PyTorch

    out = jax.block_until_ready(jax.jit(net_forward)(x, prepped))
    assert out.shape == (2, NUM_CLASSES), out.shape
    assert jnp.all(jnp.isfinite(out))

    ref = jax.block_until_ready(net_reference(x, params))
    rel_err = jnp.max(jnp.abs(out - ref)) / (jnp.max(jnp.abs(ref)) + 1e-6)
    assert rel_err < 0.12, float(rel_err)   # loose: bf16 MXU operands vs f32 ref

    print("KERNEL_OK")
</pallas_src>

<mosaic_0001>
module attributes {stable_mosaic.version = 11 : i64} {
  func.func @_conv_pool_kernel(%arg0: i32, %arg1: memref<9x256x32xbf16, #tpu.memory_space<vmem>>, %arg2: memref<32x128xbf16, #tpu.memory_space<vmem>>, %arg3: memref<1x128xf32, #tpu.memory_space<vmem>>, %arg4: memref<256x128xbf16, #tpu.memory_space<vmem>>) attributes {dimension_semantics = [#tpu.dimension_semantics<parallel>], iteration_bounds = array<i64: 8>, scalar_prefetch = 0 : i64, scratch_operands = 0 : i64, tpu.core_type = #tpu.core_type<tc>, window_params = [{transform_indices = @transform_0, window_bounds = array<i64: 9, 256, 32>}, {pipeline_mode = #tpu.pipeline_mode<synchronous>, transform_indices = @transform_1, window_bounds = array<i64: 32, 128>}, {pipeline_mode = #tpu.pipeline_mode<synchronous>, transform_indices = @transform_2, window_bounds = array<i64: 1, 128>}, {transform_indices = @transform_3, window_bounds = array<i64: 256, 128>}]} {
    %c0 = arith.constant 0 : index
    %c0_0 = arith.constant 0 : index
    %c0_1 = arith.constant 0 : index
    %0 = vector.load %arg1[%c0, %c0_0, %c0_1] : memref<9x256x32xbf16, #tpu.memory_space<vmem>>, vector<9x256x32xbf16>
    %1 = vector.shape_cast %0 : vector<9x256x32xbf16> to vector<2304x32xbf16>
    %c0_2 = arith.constant 0 : index
    %c0_3 = arith.constant 0 : index
    %2 = vector.load %arg2[%c0_2, %c0_3] : memref<32x128xbf16, #tpu.memory_space<vmem>>, vector<32x128xbf16>
    %cst = arith.constant dense<0.000000e+00> : vector<2304x128xf32>
    %3 = tpu.matmul %1, %2, %cst {dimension_numbers = #tpu.dot_dimension_numbers<[1], [0], [0], [1], [0, 0, 1, 1], [], []>} : vector<2304x32xbf16>, vector<32x128xbf16>, vector<2304x128xf32> -> vector<2304x128xf32>
    %4 = vector.shape_cast %3 : vector<2304x128xf32> to vector<9x256x128xf32>
    %cst_4 = arith.constant dense<0xFF800000> : vector<256x128xf32>
    %5 = vector.multi_reduction <maximumf>, %4, %cst_4 [0] : vector<9x256x128xf32> to vector<256x128xf32>
    %c0_5 = arith.constant 0 : index
    %c0_6 = arith.constant 0 : index
    %6 = vector.load %arg3[%c0_5, %c0_6] : memref<1x128xf32, #tpu.memory_space<vmem>>, vector<1x128xf32>
    %7 = vector.broadcast %6 : vector<1x128xf32> to vector<256x128xf32>
    %8 = arith.addf %5, %7 : vector<256x128xf32>
    %cst_7 = arith.constant 0.000000e+00 : f32
    %9 = vector.broadcast %cst_7 : f32 to vector<256x128xf32>
    %10 = arith.maximumf %8, %9 : vector<256x128xf32>
    %11 = arith.truncf %10 : vector<256x128xf32> to vector<256x128xbf16>
    %c0_8 = arith.constant 0 : index
    %c0_9 = arith.constant 0 : index
    %12 = vector.load %arg4[%c0_8, %c0_9] : memref<256x128xbf16, #tpu.memory_space<vmem>>, vector<256x128xbf16>
    tpu.vector_store %arg4[%c0_8, %c0_9], %11 {strides = array<i32>} : memref<256x128xbf16, #tpu.memory_space<vmem>>, vector<256x128xbf16>,
    return
  }
  func.func @transform_0(%arg0: i32) -> (i32, i32, i32) {
    %c0_i32 = arith.constant 0 : i32
    %c0_i32_0 = arith.constant 0 : i32
    %c0_i32_1 = arith.constant 0 : i32
    return %c0_i32, %arg0, %c0_i32_0 : i32, i32, i32
  }
  func.func @transform_1(%arg0: i32) -> (i32, i32) {
    %c0_i32 = arith.constant 0 : i32
    %c0_i32_0 = arith.constant 0 : i32
    %c0_i32_1 = arith.constant 0 : i32
    return %c0_i32, %c0_i32_0 : i32, i32
  }
  func.func @transform_2(%arg0: i32) -> (i32, i32) {
    %c0_i32 = arith.constant 0 : i32
    %c0_i32_0 = arith.constant 0 : i32
    %c0_i32_1 = arith.constant 0 : i32
    return %c0_i32, %c0_i32_0 : i32, i32
  }
  func.func @transform_3(%arg0: i32) -> (i32, i32) {
    %c0_i32 = arith.constant 0 : i32
    %c0_i32_0 = arith.constant 0 : i32
    return %arg0, %c0_i32 : i32, i32
  }
}

module attributes {stable_mosaic.version = 11 : i64} {
  func.func @_conv_pool_kernel(%arg0: i32, %arg1: memref<4x256x512xbf16, #tpu.memory_space<vmem>>, %arg2: memref<512x128xbf16, #tpu.memory_space<vmem>>, %arg3: memref<1x128xf32, #tpu.memory_space<vmem>>, %arg4: memref<256x128xbf16, #tpu.memory_space<vmem>>) attributes {dimension_semantics = [#tpu.dimension_semantics<parallel>], iteration_bounds = array<i64: 2>, scalar_prefetch = 0 : i64, scratch_operands = 0 : i64, tpu.core_type = #tpu.core_type<tc>, window_params = [{transform_indices = @transform_0, window_bounds = array<i64: 4, 256, 512>}, {pipeline_mode = #tpu.pipeline_mode<synchronous>, transform_indices = @transform_1, window_bounds = array<i64: 512, 128>}, {pipeline_mode = #tpu.pipeline_mode<synchronous>, transform_indices = @transform_2, window_bounds = array<i64: 1, 128>}, {transform_indices = @transform_3, window_bounds = array<i64: 256, 128>}]} {
    %c0 = arith.constant 0 : index
    %c0_0 = arith.constant 0 : index
    %c0_1 = arith.constant 0 : index
    %0 = vector.load %arg1[%c0, %c0_0, %c0_1] : memref<4x256x512xbf16, #tpu.memory_space<vmem>>, vector<4x256x512xbf16>
    %1 = vector.shape_cast %0 : vector<4x256x512xbf16> to vector<1024x512xbf16>
    %c0_2 = arith.constant 0 : index
    %c0_3 = arith.constant 0 : index
    %2 = vector.load %arg2[%c0_2, %c0_3] : memref<512x128xbf16, #tpu.memory_space<vmem>>, vector<512x128xbf16>
    %cst = arith.constant dense<0.000000e+00> : vector<1024x128xf32>
    %3 = tpu.matmul %1, %2, %cst {dimension_numbers = #tpu.dot_dimension_numbers<[1], [0], [0], [1], [0, 0, 1, 1], [], []>} : vector<1024x512xbf16>, vector<512x128xbf16>, vector<1024x128xf32> -> vector<1024x128xf32>
    %4 = vector.shape_cast %3 : vector<1024x128xf32> to vector<4x256x128xf32>
    %cst_4 = arith.constant dense<0xFF800000> : vector<256x128xf32>
    %5 = vector.multi_reduction <maximumf>, %4, %cst_4 [0] : vector<4x256x128xf32> to vector<256x128xf32>
    %c0_5 = arith.constant 0 : index
    %c0_6 = arith.constant 0 : index
    %6 = vector.load %arg3[%c0_5, %c0_6] : memref<1x128xf32, #tpu.memory_space<vmem>>, vector<1x128xf32>
    %7 = vector.broadcast %6 : vector<1x128xf32> to vector<256x128xf32>
    %8 = arith.addf %5, %7 : vector<256x128xf32>
    %cst_7 = arith.constant 0.000000e+00 : f32
    %9 = vector.broadcast %cst_7 : f32 to vector<256x128xf32>
    %10 = arith.maximumf %8, %9 : vector<256x128xf32>
    %11 = arith.truncf %10 : vector<256x128xf32> to vector<256x128xbf16>
    %c0_8 = arith.constant 0 : index
    %c0_9 = arith.constant 0 : index
    %12 = vector.load %arg4[%c0_8, %c0_9] : memref<256x128xbf16, #tpu.memory_space<vmem>>, vector<256x128xbf16>
    tpu.vector_store %arg4[%c0_8, %c0_9], %11 {strides = array<i32>} : memref<256x128xbf16, #tpu.memory_space<vmem>>, vector<256x128xbf16>,
    return
  }
  func.func @transform_0(%arg0: i32) -> (i32, i32, i32) {
    %c0_i32 = arith.constant 0 : i32
    %c0_i32_0 = arith.constant 0 : i32
    %c0_i32_1 = arith.constant 0 : i32
    return %c0_i32, %arg0, %c0_i32_0 : i32, i32, i32
  }
  func.func @transform_1(%arg0: i32) -> (i32, i32) {
    %c0_i32 = arith.constant 0 : i32
    %c0_i32_0 = arith.constant 0 : i32
    %c0_i32_1 = arith.constant 0 : i32
    return %c0_i32, %c0_i32_0 : i32, i32
  }
  func.func @transform_2(%arg0: i32) -> (i32, i32) {
    %c0_i32 = arith.constant 0 : i32
    %c0_i32_0 = arith.constant 0 : i32
    %c0_i32_1 = arith.constant 0 : i32
    return %c0_i32, %c0_i32_0 : i32, i32
  }
  func.func @transform_3(%arg0: i32) -> (i32, i32) {
    %c0_i32 = arith.constant 0 : i32
    %c0_i32_0 = arith.constant 0 : i32
    return %arg0, %c0_i32 : i32, i32
  }
}

module attributes {stable_mosaic.version = 11 : i64} {
  func.func @_conv_pool_kernel(%arg0: i32, %arg1: memref<4x64x384xbf16, #tpu.memory_space<vmem>>, %arg2: memref<384x128xbf16, #tpu.memory_space<vmem>>, %arg3: memref<1x128xf32, #tpu.memory_space<vmem>>, %arg4: memref<64x128xbf16, #tpu.memory_space<vmem>>) attributes {dimension_semantics = [#tpu.dimension_semantics<parallel>], iteration_bounds = array<i64: 2>, scalar_prefetch = 0 : i64, scratch_operands = 0 : i64, tpu.core_type = #tpu.core_type<tc>, window_params = [{transform_indices = @transform_0, window_bounds = array<i64: 4, 64, 384>}, {pipeline_mode = #tpu.pipeline_mode<synchronous>, transform_indices = @transform_1, window_bounds = array<i64: 384, 128>}, {pipeline_mode = #tpu.pipeline_mode<synchronous>, transform_indices = @transform_2, window_bounds = array<i64: 1, 128>}, {transform_indices = @transform_3, window_bounds = array<i64: 64, 128>}]} {
    %c0 = arith.constant 0 : index
    %c0_0 = arith.constant 0 : index
    %c0_1 = arith.constant 0 : index
    %0 = vector.load %arg1[%c0, %c0_0, %c0_1] : memref<4x64x384xbf16, #tpu.memory_space<vmem>>, vector<4x64x384xbf16>
    %1 = vector.shape_cast %0 : vector<4x64x384xbf16> to vector<256x384xbf16>
    %c0_2 = arith.constant 0 : index
    %c0_3 = arith.constant 0 : index
    %2 = vector.load %arg2[%c0_2, %c0_3] : memref<384x128xbf16, #tpu.memory_space<vmem>>, vector<384x128xbf16>
    %cst = arith.constant dense<0.000000e+00> : vector<256x128xf32>
    %3 = tpu.matmul %1, %2, %cst {dimension_numbers = #tpu.dot_dimension_numbers<[1], [0], [0], [1], [0, 0, 1, 1], [], []>} : vector<256x384xbf16>, vector<384x128xbf16>, vector<256x128xf32> -> vector<256x128xf32>
    %4 = vector.shape_cast %3 : vector<256x128xf32> to vector<4x64x128xf32>
    %cst_4 = arith.constant dense<0xFF800000> : vector<64x128xf32>
    %5 = vector.multi_reduction <maximumf>, %4, %cst_4 [0] : vector<4x64x128xf32> to vector<64x128xf32>
    %c0_5 = arith.constant 0 : index
    %c0_6 = arith.constant 0 : index
    %6 = vector.load %arg3[%c0_5, %c0_6] : memref<1x128xf32, #tpu.memory_space<vmem>>, vector<1x128xf32>
    %7 = vector.broadcast %6 : vector<1x128xf32> to vector<64x128xf32>
    %8 = arith.addf %5, %7 : vector<64x128xf32>
    %cst_7 = arith.constant 0.000000e+00 : f32
    %9 = vector.broadcast %cst_7 : f32 to vector<64x128xf32>
    %10 = arith.maximumf %8, %9 : vector<64x128xf32>
    %11 = arith.truncf %10 : vector<64x128xf32> to vector<64x128xbf16>
    %c0_8 = arith.constant 0 : index
    %c0_9 = arith.constant 0 : index
    %12 = vector.load %arg4[%c0_8, %c0_9] : memref<64x128xbf16, #tpu.memory_space<vmem>>, vector<64x128xbf16>
    tpu.vector_store %arg4[%c0_8, %c0_9], %11 {strides = array<i32>} : memref<64x128xbf16, #tpu.memory_space<vmem>>, vector<64x128xbf16>,
    return
  }
  func.func @transform_0(%arg0: i32) -> (i32, i32, i32) {
    %c0_i32 = arith.constant 0 : i32
    %c0_i32_0 = arith.constant 0 : i32
    %c0_i32_1 = arith.constant 0 : i32
    return %c0_i32, %arg0, %c0_i32_0 : i32, i32, i32
  }
  func.func @transform_1(%arg0: i32) -> (i32, i32) {
    %c0_i32 = arith.constant 0 : i32
    %c0_i32_0 = arith.constant 0 : i32
    %c0_i32_1 = arith.constant 0 : i32
    return %c0_i32, %c0_i32_0 : i32, i32
  }
  func.func @transform_2(%arg0: i32) -> (i32, i32) {
    %c0_i32 = arith.constant 0 : i32
    %c0_i32_0 = arith.constant 0 : i32
    %c0_i32_1 = arith.constant 0 : i32
    return %c0_i32, %c0_i32_0 : i32, i32
  }
  func.func @transform_3(%arg0: i32) -> (i32, i32) {
    %c0_i32 = arith.constant 0 : i32
    %c0_i32_0 = arith.constant 0 : i32
    return %arg0, %c0_i32 : i32, i32
  }
}

module attributes {stable_mosaic.version = 11 : i64} {
  func.func @_fc_fused_kernel(%arg0: i32, %arg1: memref<16x4608xbf16, #tpu.memory_space<vmem>>, %arg2: memref<4608x256xbf16, #tpu.memory_space<vmem>>, %arg3: memref<1x256xf32, #tpu.memory_space<vmem>>, %arg4: memref<256x128xbf16, #tpu.memory_space<vmem>>, %arg5: memref<1x128xf32, #tpu.memory_space<vmem>>, %arg6: memref<128x128xbf16, #tpu.memory_space<vmem>>, %arg7: memref<1x128xf32, #tpu.memory_space<vmem>>, %arg8: memref<16x128xf32, #tpu.memory_space<vmem>>) attributes {dimension_semantics = [#tpu.dimension_semantics<parallel>], iteration_bounds = array<i64: 1>, scalar_prefetch = 0 : i64, scratch_operands = 0 : i64, tpu.core_type = #tpu.core_type<tc>, window_params = [{transform_indices = @transform_0, window_bounds = array<i64: 16, 4608>}, {pipeline_mode = #tpu.pipeline_mode<synchronous>, transform_indices = @transform_1, window_bounds = array<i64: 4608, 256>}, {pipeline_mode = #tpu.pipeline_mode<synchronous>, transform_indices = @transform_2, window_bounds = array<i64: 1, 256>}, {pipeline_mode = #tpu.pipeline_mode<synchronous>, transform_indices = @transform_3, window_bounds = array<i64: 256, 128>}, {pipeline_mode = #tpu.pipeline_mode<synchronous>, transform_indices = @transform_4, window_bounds = array<i64: 1, 128>}, {pipeline_mode = #tpu.pipeline_mode<synchronous>, transform_indices = @transform_5, window_bounds = array<i64: 128, 128>}, {pipeline_mode = #tpu.pipeline_mode<synchronous>, transform_indices = @transform_6, window_bounds = array<i64: 1, 128>}, {transform_indices = @transform_7, window_bounds = array<i64: 16, 128>}]} {
    %c0 = arith.constant 0 : index
    %c0_0 = arith.constant 0 : index
    %0 = vector.load %arg1[%c0, %c0_0] : memref<16x4608xbf16, #tpu.memory_space<vmem>>, vector<16x4608xbf16>
    %c0_1 = arith.constant 0 : index
    %c0_2 = arith.constant 0 : index
    %1 = vector.load %arg2[%c0_1, %c0_2] : memref<4608x256xbf16, #tpu.memory_space<vmem>>, vector<4608x256xbf16>
    %cst = arith.constant dense<0.000000e+00> : vector<16x256xf32>
    %2 = tpu.matmul %0, %1, %cst {dimension_numbers = #tpu.dot_dimension_numbers<[1], [0], [0], [1], [0, 0, 1, 1], [], []>} : vector<16x4608xbf16>, vector<4608x256xbf16>, vector<16x256xf32> -> vector<16x256xf32>
    %c0_3 = arith.constant 0 : index
    %c0_4 = arith.constant 0 : index
    %3 = vector.load %arg3[%c0_3, %c0_4] : memref<1x256xf32, #tpu.memory_space<vmem>>, vector<1x256xf32>
    %4 = vector.broadcast %3 : vector<1x256xf32> to vector<16x256xf32>
    %5 = arith.addf %2, %4 : vector<16x256xf32>
    %cst_5 = arith.constant 0.000000e+00 : f32
    %6 = vector.broadcast %cst_5 : f32 to vector<16x256xf32>
    %7 = arith.maximumf %5, %6 : vector<16x256xf32>
    %8 = arith.truncf %7 : vector<16x256xf32> to vector<16x256xbf16>
    %c0_6 = arith.constant 0 : index
    %c0_7 = arith.constant 0 : index
    %9 = vector.load %arg4[%c0_6, %c0_7] : memref<256x128xbf16, #tpu.memory_space<vmem>>, vector<256x128xbf16>
    %cst_8 = arith.constant dense<0.000000e+00> : vector<16x128xf32>
    %10 = tpu.matmul %8, %9, %cst_8 {dimension_numbers = #tpu.dot_dimension_numbers<[1], [0], [0], [1], [0, 0, 1, 1], [], []>} : vector<16x256xbf16>, vector<256x128xbf16>, vector<16x128xf32> -> vector<16x128xf32>
    %c0_9 = arith.constant 0 : index
    %c0_10 = arith.constant 0 : index
    %11 = vector.load %arg5[%c0_9, %c0_10] : memref<1x128xf32, #tpu.memory_space<vmem>>, vector<1x128xf32>
    %12 = vector.broadcast %11 : vector<1x128xf32> to vector<16x128xf32>
    %13 = arith.addf %10, %12 : vector<16x128xf32>
    %cst_11 = arith.constant 0.000000e+00 : f32
    %14 = vector.broadcast %cst_11 : f32 to vector<16x128xf32>
    %15 = arith.maximumf %13, %14 : vector<16x128xf32>
    %16 = arith.truncf %15 : vector<16x128xf32> to vector<16x128xbf16>
    %c0_12 = arith.constant 0 : index
    %c0_13 = arith.constant 0 : index
    %17 = vector.load %arg6[%c0_12, %c0_13] : memref<128x128xbf16, #tpu.memory_space<vmem>>, vector<128x128xbf16>
    %cst_14 = arith.constant dense<0.000000e+00> : vector<16x128xf32>
    %18 = tpu.matmul %16, %17, %cst_14 {dimension_numbers = #tpu.dot_dimension_numbers<[1], [0], [0], [1], [0, 0, 1, 1], [], []>} : vector<16x128xbf16>, vector<128x128xbf16>, vector<16x128xf32> -> vector<16x128xf32>
    %c0_15 = arith.constant 0 : index
    %c0_16 = arith.constant 0 : index
    %19 = vector.load %arg7[%c0_15, %c0_16] : memref<1x128xf32, #tpu.memory_space<vmem>>, vector<1x128xf32>
    %20 = vector.broadcast %19 : vector<1x128xf32> to vector<16x128xf32>
    %21 = arith.addf %18, %20 : vector<16x128xf32>
    %c0_17 = arith.constant 0 : index
    %c0_18 = arith.constant 0 : index
    %22 = vector.load %arg8[%c0_17, %c0_18] : memref<16x128xf32, #tpu.memory_space<vmem>>, vector<16x128xf32>
    tpu.vector_store %arg8[%c0_17, %c0_18], %21 {strides = array<i32>} : memref<16x128xf32, #tpu.memory_space<vmem>>, vector<16x128xf32>,
    return
  }
  func.func @transform_0(%arg0: i32) -> (i32, i32) {
    %c0_i32 = arith.constant 0 : i32
    %c0_i32_0 = arith.constant 0 : i32
    return %arg0, %c0_i32 : i32, i32
  }
  func.func @transform_1(%arg0: i32) -> (i32, i32) {
    %c0_i32 = arith.constant 0 : i32
    %c0_i32_0 = arith.constant 0 : i32
    %c0_i32_1 = arith.constant 0 : i32
    return %c0_i32, %c0_i32_0 : i32, i32
  }
  func.func @transform_2(%arg0: i32) -> (i32, i32) {
    %c0_i32 = arith.constant 0 : i32
    %c0_i32_0 = arith.constant 0 : i32
    %c0_i32_1 = arith.constant 0 : i32
    return %c0_i32, %c0_i32_0 : i32, i32
  }
  func.func @transform_3(%arg0: i32) -> (i32, i32) {
    %c0_i32 = arith.constant 0 : i32
    %c0_i32_0 = arith.constant 0 : i32
    %c0_i32_1 = arith.constant 0 : i32
    return %c0_i32, %c0_i32_0 : i32, i32
  }
  func.func @transform_4(%arg0: i32) -> (i32, i32) {
    %c0_i32 = arith.constant 0 : i32
    %c0_i32_0 = arith.constant 0 : i32
    %c0_i32_1 = arith.constant 0 : i32
    return %c0_i32, %c0_i32_0 : i32, i32
  }
  func.func @transform_5(%arg0: i32) -> (i32, i32) {
    %c0_i32 = arith.constant 0 : i32
    %c0_i32_0 = arith.constant 0 : i32
    %c0_i32_1 = arith.constant 0 : i32
    return %c0_i32, %c0_i32_0 : i32, i32
  }
  func.func @transform_6(%arg0: i32) -> (i32, i32) {
    %c0_i32 = arith.constant 0 : i32
    %c0_i32_0 = arith.constant 0 : i32
    %c0_i32_1 = arith.constant 0 : i32
    return %c0_i32, %c0_i32_0 : i32, i32
  }
  func.func @transform_7(%arg0: i32) -> (i32, i32) {
    %c0_i32 = arith.constant 0 : i32
    %c0_i32_0 = arith.constant 0 : i32
    return %arg0, %c0_i32 : i32, i32
  }
}

</mosaic_0001>

<bundles_post_ra>
// kernel: net_forward.4
= control target key start
LH: loop header
LB: loop body
LE: loop exit
PB: predicated region body
PF: predicated region fallthrough
CT: control target
= control target key end

     0   :  { %s5675_s12 = smov 0   ;;  %s5677_s13 = smov 0   ;;  %s7238_s0 = inlined_call_operand.vmem [shape: bf16[9,2048,32], index: 0, kind: input, shape index: {}]   ;;  %s7239_s1 = inlined_call_operand.vmem [shape: bf16[32,128], index: 1, kind: input, shape index: {}]   ;;  %s7240_s2 = inlined_call_operand.vmem [shape: f32[1,128], index: 2, kind: input, shape index: {}]   ;;  %s7241_s3 = inlined_call_operand.vmem [shape: bf16[2048,128], index: 3, kind: output, shape index: {}]  }
   0x1   :  { %s5679_s14 = smov 0  }
   0x2 LB: > { %s4555_s15 = sadd.s32 4294967295, %s5653_s14   ;;  %s5692_s16 = sadd.s32 1, %s5653_s14   ;;  %s5653_s14 = sphi %s5679_s14, %s7444_s14   ;;  %s5649_s13 = sphi %s5677_s13, %s7443_s13   ;;  %s5645_s12 = sphi %s5675_s12, %s7442_s12  }
   0x3   : > { %s17_s17 = ssub.s32 %s5653_s14, %s5692_s16  ;;  %s20_s18 = sadd.s32 1, %s5649_s13 }
   0x4   : > { %p18_p0 = scmp.eq.s32.totalorder %s17_s17, 0  ;;  %p27_p1 = scmp.ne.s32.totalorder %s5649_s13, %s5645_s12 }
   0x5   : > { %p28_p2 = scmp.eq.s32.totalorder %s5653_s14, 0  ;;  %p4558_p4 = scmp.ge.s32.totalorder %s5653_s14, 8 }
   0x6   : > { %s5701_s19 = scalar_select %p18_p0, %s5649_s13, %s20_s18  }
   0x7   : > { %p29_p3 = por %p28_p2, %p27_p1  ;;  %127 = sbr.rel (%p4558_p4) target bundleno = 91 (0x5b), region = 24 }
   0xe   : > { %130 = sbr.rel (!%p29_p3) target bundleno = 91 (0x5b), region = 28  ;;  %s132_s20 = sand.u32 (%p29_p3), 1, %s5649_s13  }
   0xf   : > { %s4889_s21 = sshll.u32 (%p29_p3), %s5653_s14, 7  ;;  %s5459_s22 = smul.u32 (%p29_p3), 1152, %s132_s20 }
  0x10   : > { %s5709_s25 = scalar_lea.vmem (%p29_p3), %s7238_s0, %s4889_s21 }
  0x11   : > { %v153_v0 = vld [vmem:[%s5709_s25] sm:$0xff] (%p29_p3)   ;;  %v157_v1 = vld [vmem:[%s5709_s25 + $0x8] sm:$0xff] (%p29_p3)   ;;  %v161_v2 = vld [vmem:[%s5709_s25 + $0x10] sm:$0xff] (%p29_p3)   ;;  %s5717_s26 = scalar_lea.vmem (%p29_p3), [#allocation2], %s5459_s22 }
  0x12   : > { %v165_v3 = vld [vmem:[%s5709_s25 + $0x18] sm:$0xff] (%p29_p3)   ;;  %v169_v4 = vld [vmem:[%s5709_s25 + $0x20] sm:$0xff] (%p29_p3)   ;;  %v173_v5 = vld [vmem:[%s5709_s25 + $0x28] sm:$0xff] (%p29_p3)   ;;  %154 = vst [vmem:[%s5717_s26] sm:$0xff] (%p29_p3), %v153_v0  }
  0x13   : > { %158 = vst [vmem:[%s5717_s26 + $0x8] sm:$0xff] (%p29_p3), %v157_v1   ;;  %162 = vst [vmem:[%s5717_s26 + $0x10] sm:$0xff] (%p29_p3), %v161_v2   ;;  %v177_v6 = vld [vmem:[%s5709_s25 + $0x30] sm:$0xff] (%p29_p3)   ;;  %v181_v7 = vld [vmem:[%s5709_s25 + $0x38] sm:$0xff] (%p29_p3)  }
  0x14   : > { %166 = vst [vmem:[%s5717_s26 + $0x18] sm:$0xff] (%p29_p3), %v165_v3   ;;  %170 = vst [vmem:[%s5717_s26 + $0x20] sm:$0xff] (%p29_p3), %v169_v4   ;;  %v185_v8 = vld [vmem:[%s5709_s25 + $0x40] sm:$0xff] (%p29_p3)   ;;  %v189_v9 = vld [vmem:[%s5709_s25 + $0x48] sm:$0xff] (%p29_p3)  }
  0x15   : > { %174 = vst [vmem:[%s5717_s26 + $0x28] sm:$0xff] %v173_v5   ;;  %178 = vst [vmem:[%s5717_s26 + $0x30] sm:$0xff] %v177_v6   ;;  %v193_v10 = vld [vmem:[%s5709_s25 + $0x50] sm:$0xff]   ;;  %v197_v11 = vld [vmem:[%s5709_s25 + $0x58] sm:$0xff]  }
  0x16   : > { %182 = vst [vmem:[%s5717_s26 + $0x38] sm:$0xff] %v181_v7   ;;  %186 = vst [vmem:[%s5717_s26 + $0x40] sm:$0xff] %v185_v8   ;;  %v201_v12 = vld [vmem:[%s5709_s25 + $0x60] sm:$0xff]   ;;  %v205_v13 = vld [vmem:[%s5709_s25 + $0x68] sm:$0xff]  }
  0x17   : > { %190 = vst [vmem:[%s5717_s26 + $0x48] sm:$0xff] %v189_v9   ;;  %194 = vst [vmem:[%s5717_s26 + $0x50] sm:$0xff] %v193_v10   ;;  %v209_v14 = vld [vmem:[%s5709_s25 + $0x70] sm:$0xff]   ;;  %v213_v15 = vld [vmem:[%s5709_s25 + $0x78] sm:$0xff]  }
  0x18   : > { %198 = vst [vmem:[%s5717_s26 + $0x58] sm:$0xff] %v197_v11   ;;  %202 = vst [vmem:[%s5717_s26 + $0x60] sm:$0xff] %v201_v12   ;;  %v217_v16 = vld [vmem:[%s5709_s25 + $0x400] sm:$0xff]   ;;  %v221_v17 = vld [vmem:[%s5709_s25 + $0x408] sm:$0xff]  }
  0x19   : > { %206 = vst [vmem:[%s5717_s26 + $0x68] sm:$0xff] %v205_v13   ;;  %210 = vst [vmem:[%s5717_s26 + $0x70] sm:$0xff] %v209_v14   ;;  %v225_v18 = vld [vmem:[%s5709_s25 + $0x410] sm:$0xff]   ;;  %v229_v19 = vld [vmem:[%s5709_s25 + $0x418] sm:$0xff]  }
  0x1a   : > { %214 = vst [vmem:[%s5717_s26 + $0x78] sm:$0xff] %v213_v15   ;;  %218 = vst [vmem:[%s5717_s26 + $0x80] sm:$0xff] %v217_v16   ;;  %v233_v20 = vld [vmem:[%s5709_s25 + $0x420] sm:$0xff]   ;;  %v237_v21 = vld [vmem:[%s5709_s25 + $0x428] sm:$0xff]  }
  0x1b   : > { %222 = vst [vmem:[%s5717_s26 + $0x88] sm:$0xff] %v221_v17   ;;  %226 = vst [vmem:[%s5717_s26 + $0x90] sm:$0xff] %v225_v18   ;;  %v241_v22 = vld [vmem:[%s5709_s25 + $0x430] sm:$0xff]   ;;  %v245_v23 = vld [vmem:[%s5709_s25 + $0x438] sm:$0xff]  }
  0x1c   : > { %230 = vst [vmem:[%s5717_s26 + $0x98] sm:$0xff] %v229_v19   ;;  %234 = vst [vmem:[%s5717_s26 + $0xa0] sm:$0xff] %v233_v20   ;;  %v249_v24 = vld [vmem:[%s5709_s25 + $0x440] sm:$0xff]   ;;  %v253_v25 = vld [vmem:[%s5709_s25 + $0x448] sm:$0xff]  }
  0x1d   : > { %238 = vst [vmem:[%s5717_s26 + $0xa8] sm:$0xff] %v237_v21   ;;  %242 = vst [vmem:[%s5717_s26 + $0xb0] sm:$0xff] %v241_v22   ;;  %v257_v26 = vld [vmem:[%s5709_s25 + $0x450] sm:$0xff]   ;;  %v261_v27 = vld [vmem:[%s5709_s25 + $0x458] sm:$0xff]  }
  0x1e   : > { %246 = vst [vmem:[%s5717_s26 + $0xb8] sm:$0xff] %v245_v23   ;;  %250 = vst [vmem:[%s5717_s26 + $0xc0] sm:$0xff] %v249_v24   ;;  %v265_v28 = vld [vmem:[%s5709_s25 + $0x460] sm:$0xff]   ;;  %v269_v29 = vld [vmem:[%s5709_s25 + $0x468] sm:$0xff]  }
  0x1f   : > { %254 = vst [vmem:[%s5717_s26 + $0xc8] sm:$0xff] %v253_v25   ;;  %258 = vst [vmem:[%s5717_s26 + $0xd0] sm:$0xff] %v257_v26   ;;  %v273_v30 = vld [vmem:[%s5709_s25 + $0x470] sm:$0xff]   ;;  %v277_v31 = vld [vmem:[%s5709_s25 + $0x478] sm:$0xff]  }
  0x20   : > { %262 = vst [vmem:[%s5717_s26 + $0xd8] sm:$0xff] %v261_v27   ;;  %266 = vst [vmem:[%s5717_s26 + $0xe0] sm:$0xff] %v265_v28   ;;  %v281_v32 = vld [vmem:[%s5709_s25 + $0x800] sm:$0xff]   ;;  %v285_v33 = vld [vmem:[%s5709_s25 + $0x808] sm:$0xff]  }
  0x21   : > { %270 = vst [vmem:[%s5717_s26 + $0xe8] sm:$0xff] %v269_v29   ;;  %274 = vst [vmem:[%s5717_s26 + $0xf0] sm:$0xff] %v273_v30   ;;  %v289_v34 = vld [vmem:[%s5709_s25 + $0x810] sm:$0xff]   ;;  %v293_v35 = vld [vmem:[%s5709_s25 + $0x818] sm:$0xff]  }
  0x22   : > { %278 = vst [vmem:[%s5717_s26 + $0xf8] sm:$0xff] %v277_v31   ;;  %282 = vst [vmem:[%s5717_s26 + $0x100] sm:$0xff] %v281_v32   ;;  %v297_v36 = vld [vmem:[%s5709_s25 + $0x820] sm:$0xff]   ;;  %v301_v37 = vld [vmem:[%s5709_s25 + $0x828] sm:$0xff]  }
  0x23   : > { %286 = vst [vmem:[%s5717_s26 + $0x108] sm:$0xff] %v285_v33   ;;  %290 = vst [vmem:[%s5717_s26 + $0x110] sm:$0xff] %v289_v34   ;;  %v305_v38 = vld [vmem:[%s5709_s25 + $0x830] sm:$0xff]   ;;  %v309_v39 = vld [vmem:[%s5709_s25 + $0x838] sm:$0xff]  }
  0x24   : > { %294 = vst [vmem:[%s5717_s26 + $0x118] sm:$0xff] %v293_v35   ;;  %298 = vst [vmem:[%s5717_s26 + $0x120] sm:$0xff] %v297_v36   ;;  %v313_v40 = vld [vmem:[%s5709_s25 + $0x840] sm:$0xff]   ;;  %v317_v41 = vld [vmem:[%s5709_s25 + $0x848] sm:$0xff]  }
  0x25   : > { %302 = vst [vmem:[%s5717_s26 + $0x128] sm:$0xff] %v301_v37   ;;  %306 = vst [vmem:[%s5717_s26 + $0x130] sm:$0xff] %v305_v38   ;;  %v321_v42 = vld [vmem:[%s5709_s25 + $0x850] sm:$0xff]   ;;  %v325_v43 = vld [vmem:[%s5709_s25 + $0x858] sm:$0xff]  }
  0x26   : > { %310 = vst [vmem:[%s5717_s26 + $0x138] sm:$0xff] %v309_v39   ;;  %314 = vst [vmem:[%s5717_s26 + $0x140] sm:$0xff] %v313_v40   ;;  %v329_v44 = vld [vmem:[%s5709_s25 + $0x860] sm:$0xff]   ;;  %v333_v45 = vld [vmem:[%s5709_s25 + $0x868] sm:$0xff]  }
  0x27   : > { %318 = vst [vmem:[%s5717_s26 + $0x148] sm:$0xff] %v317_v41   ;;  %322 = vst [vmem:[%s5717_s26 + $0x150] sm:$0xff] %v321_v42   ;;  %v337_v46 = vld [vmem:[%s5709_s25 + $0x870] sm:$0xff]   ;;  %v341_v47 = vld [vmem:[%s5709_s25 + $0x878] sm:$0xff]  }
  0x28   : > { %326 = vst [vmem:[%s5717_s26 + $0x158] sm:$0xff] %v325_v43   ;;  %330 = vst [vmem:[%s5717_s26 + $0x160] sm:$0xff] %v329_v44   ;;  %v345_v48 = vld [vmem:[%s5709_s25 + $0xc00] sm:$0xff]   ;;  %v349_v49 = vld [vmem:[%s5709_s25 + $0xc08] sm:$0xff]  }
  0x29   : > { %334 = vst [vmem:[%s5717_s26 + $0x168] sm:$0xff] %v333_v45   ;;  %338 = vst [vmem:[%s5717_s26 + $0x170] sm:$0xff] %v337_v46   ;;  %v353_v50 = vld [vmem:[%s5709_s25 + $0xc10] sm:$0xff]   ;;  %v357_v51 = vld [vmem:[%s5709_s25 + $0xc18] sm:$0xff]  }
  0x2a   : > { %342 = vst [vmem:[%s5717_s26 + $0x178] sm:$0xff] %v341_v47   ;;  %346 = vst [vmem:[%s5717_s26 + $0x180] sm:$0xff] %v345_v48   ;;  %v361_v52 = vld [vmem:[%s5709_s25 + $0xc20] sm:$0xff]   ;;  %v365_v53 = vld [vmem:[%s5709_s25 + $0xc28] sm:$0xff]  }
  0x2b   : > { %350 = vst [vmem:[%s5717_s26 + $0x188] sm:$0xff] %v349_v49   ;;  %354 = vst [vmem:[%s5717_s26 + $0x190] sm:$0xff] %v353_v50   ;;  %v369_v54 = vld [vmem:[%s5709_s25 + $0xc30] sm:$0xff]   ;;  %v373_v55 = vld [vmem:[%s5709_s25 + $0xc38] sm:$0xff]  }
  0x2c   : > { %358 = vst [vmem:[%s5717_s26 + $0x198] sm:$0xff] %v357_v51   ;;  %362 = vst [vmem:[%s5717_s26 + $0x1a0] sm:$0xff] %v361_v52   ;;  %v377_v56 = vld [vmem:[%s5709_s25 + $0xc40] sm:$0xff]   ;;  %v381_v57 = vld [vmem:[%s5709_s25 + $0xc48] sm:$0xff]  }
  0x2d   : > { %366 = vst [vmem:[%s5717_s26 + $0x1a8] sm:$0xff] %v365_v53   ;;  %370 = vst [vmem:[%s5717_s26 + $0x1b0] sm:$0xff] %v369_v54   ;;  %v385_v58 = vld [vmem:[%s5709_s25 + $0xc50] sm:$0xff]   ;;  %v389_v59 = vld [vmem:[%s5709_s25 + $0xc58] sm:$0xff]  }
  0x2e   : > { %374 = vst [vmem:[%s5717_s26 + $0x1b8] sm:$0xff] %v373_v55   ;;  %378 = vst [vmem:[%s5717_s26 + $0x1c0] sm:$0xff] %v377_v56   ;;  %v393_v60 = vld [vmem:[%s5709_s25 + $0xc60] sm:$0xff]   ;;  %v397_v61 = vld [vmem:[%s5709_s25 + $0xc68] sm:$0xff]  }
  0x2f   : > { %382 = vst [vmem:[%s5717_s26 + $0x1c8] sm:$0xff] %v381_v57   ;;  %386 = vst [vmem:[%s5717_s26 + $0x1d0] sm:$0xff] %v385_v58   ;;  %v401_v62 = vld [vmem:[%s5709_s25 + $0xc70] sm:$0xff]   ;;  %v405_v63 = vld [vmem:[%s5709_s25 + $0xc78] sm:$0xff]  }
  0x30   : > { %390 = vst [vmem:[%s5717_s26 + $0x1d8] sm:$0xff] %v389_v59   ;;  %394 = vst [vmem:[%s5717_s26 + $0x1e0] sm:$0xff] %v393_v60   ;;  %v409_v0 = vld [vmem:[%s5709_s25 + $0x1000] sm:$0xff]   ;;  %v413_v1 = vld [vmem:[%s5709_s25 + $0x1008] sm:$0xff]  }
  0x31   : > { %398 = vst [vmem:[%s5717_s26 + $0x1e8] sm:$0xff] %v397_v61   ;;  %402 = vst [vmem:[%s5717_s26 + $0x1f0] sm:$0xff] %v401_v62   ;;  %v417_v2 = vld [vmem:[%s5709_s25 + $0x1010] sm:$0xff]   ;;  %v421_v3 = vld [vmem:[%s5709_s25 + $0x1018] sm:$0xff]  }
  0x32   : > { %406 = vst [vmem:[%s5717_s26 + $0x1f8] sm:$0xff] %v405_v63   ;;  %410 = vst [vmem:[%s5717_s26 + $0x200] sm:$0xff] %v409_v0   ;;  %v425_v4 = vld [vmem:[%s5709_s25 + $0x1020] sm:$0xff]   ;;  %v429_v5 = vld [vmem:[%s5709_s25 + $0x1028] sm:$0xff]  }
  0x33   : > { %414 = vst [vmem:[%s5717_s26 + $0x208] sm:$0xff] %v413_v1   ;;  %418 = vst [vmem:[%s5717_s26 + $0x210] sm:$0xff] %v417_v2   ;;  %v433_v6 = vld [vmem:[%s5709_s25 + $0x1030] sm:$0xff]   ;;  %v437_v7 = vld [vmem:[%s5709_s25 + $0x1038] sm:$0xff]  }
  0x34   : > { %422 = vst [vmem:[%s5717_s26 + $0x218] sm:$0xff] %v421_v3   ;;  %426 = vst [vmem:[%s5717_s26 + $0x220] sm:$0xff] %v425_v4   ;;  %v441_v8 = vld [vmem:[%s5709_s25 + $0x1040] sm:$0xff]   ;;  %v445_v9 = vld [vmem:[%s5709_s25 + $0x1048] sm:$0xff]  }
  0x35   : > { %430 = vst [vmem:[%s5717_s26 + $0x228] sm:$0xff] %v429_v5   ;;  %434 = vst [vmem:[%s5717_s26 + $0x230] sm:$0xff] %v433_v6   ;;  %v449_v10 = vld [vmem:[%s5709_s25 + $0x1050] sm:$0xff]   ;;  %v453_v11 = vld [vmem:[%s5709_s25 + $0x1058] sm:$0xff]  }
  0x36   : > { %438 = vst [vmem:[%s5717_s26 + $0x238] sm:$0xff] %v437_v7   ;;  %442 = vst [vmem:[%s5717_s26 + $0x240] sm:$0xff] %v441_v8   ;;  %v457_v12 = vld [vmem:[%s5709_s25 + $0x1060] sm:$0xff]   ;;  %v461_v13 = vld [vmem:[%s5709_s25 + $0x1068] sm:$0xff]  }
  0x37   : > { %446 = vst [vmem:[%s5717_s26 + $0x248] sm:$0xff] %v445_v9   ;;  %450 = vst [vmem:[%s5717_s26 + $0x250] sm:$0xff] %v449_v10   ;;  %v465_v14 = vld [vmem:[%s5709_s25 + $0x1070] sm:$0xff]   ;;  %v469_v15 = vld [vmem:[%s5709_s25 + $0x1078] sm:$0xff]  }
  0x38   : > { %454 = vst [vmem:[%s5717_s26 + $0x258] sm:$0xff] %v453_v11   ;;  %458 = vst [vmem:[%s5717_s26 + $0x260] sm:$0xff] %v457_v12   ;;  %v473_v16 = vld [vmem:[%s5709_s25 + $0x1400] sm:$0xff]   ;;  %v477_v17 = vld [vmem:[%s5709_s25 + $0x1408] sm:$0xff]  }
  0x39   : > { %462 = vst [vmem:[%s5717_s26 + $0x268] sm:$0xff] %v461_v13   ;;  %466 = vst [vmem:[%s5717_s26 + $0x270] sm:$0xff] %v465_v14   ;;  %v481_v18 = vld [vmem:[%s5709_s25 + $0x1410] sm:$0xff]   ;;  %v485_v19 = vld [vmem:[%s5709_s25 + $0x1418] sm:$0xff]  }
  0x3a   : > { %470 = vst [vmem:[%s5717_s26 + $0x278] sm:$0xff] %v469_v15   ;;  %474 = vst [vmem:[%s5717_s26 + $0x280] sm:$0xff] %v473_v16   ;;  %v489_v20 = vld [vmem:[%s5709_s25 + $0x1420] sm:$0xff]   ;;  %v493_v21 = vld [vmem:[%s5709_s25 + $0x1428] sm:$0xff]  }
  0x3b   : > { %478 = vst [vmem:[%s5717_s26 + $0x288] sm:$0xff] %v477_v17   ;;  %482 = vst [vmem:[%s5717_s26 + $0x290] sm:$0xff] %v481_v18   ;;  %v497_v22 = vld [vmem:[%s5709_s25 + $0x1430] sm:$0xff]   ;;  %v501_v23 = vld [vmem:[%s5709_s25 + $0x1438] sm:$0xff]  }
  0x3c   : > { %486 = vst [vmem:[%s5717_s26 + $0x298] sm:$0xff] %v485_v19   ;;  %490 = vst [vmem:[%s5717_s26 + $0x2a0] sm:$0xff] %v489_v20   ;;  %v505_v24 = vld [vmem:[%s5709_s25 + $0x1440] sm:$0xff]   ;;  %v509_v25 = vld [vmem:[%s5709_s25 + $0x1448] sm:$0xff]  }
  0x3d   : > { %494 = vst [vmem:[%s5717_s26 + $0x2a8] sm:$0xff] %v493_v21   ;;  %498 = vst [vmem:[%s5717_s26 + $0x2b0] sm:$0xff] %v497_v22   ;;  %v513_v26 = vld [vmem:[%s5709_s25 + $0x1450] sm:$0xff]   ;;  %v517_v27 = vld [vmem:[%s5709_s25 + $0x1458] sm:$0xff]  }
  0x3e   : > { %502 = vst [vmem:[%s5717_s26 + $0x2b8] sm:$0xff] %v501_v23   ;;  %506 = vst [vmem:[%s5717_s26 + $0x2c0] sm:$0xff] %v505_v24   ;;  %v521_v28 = vld [vmem:[%s5709_s25 + $0x1460] sm:$0xff]   ;;  %v525_v29 = vld [vmem:[%s5709_s25 + $0x1468] sm:$0xff]  }
  0x3f   : > { %510 = vst [vmem:[%s5717_s26 + $0x2c8] sm:$0xff] %v509_v25   ;;  %514 = vst [vmem:[%s5717_s26 + $0x2d0] sm:$0xff] %v513_v26   ;;  %v529_v30 = vld [vmem:[%s5709_s25 + $0x1470] sm:$0xff]   ;;  %v533_v31 = vld [vmem:[%s5709_s25 + $0x1478] sm:$0xff]  }
  0x40   : > { %518 = vst [vmem:[%s5717_s26 + $0x2d8] sm:$0xff] %v517_v27   ;;  %522 = vst [vmem:[%s5717_s26 + $0x2e0] sm:$0xff] %v521_v28   ;;  %v537_v32 = vld [vmem:[%s5709_s25 + $0x1800] sm:$0xff]   ;;  %v541_v33 = vld [vmem:[%s5709_s25 + $0x1808] sm:$0xff]  }
  0x41   : > { %526 = vst [vmem:[%s5717_s26 + $0x2e8] sm:$0xff] %v525_v29   ;;  %530 = vst [vmem:[%s5717_s26 + $0x2f0] sm:$0xff] %v529_v30   ;;  %v545_v34 = vld [vmem:[%s5709_s25 + $0x1810] sm:$0xff]   ;;  %v549_v35 = vld [vmem:[%s5709_s25 + $0x1818] sm:$0xff]  }
  0x42   : > { %534 = vst [vmem:[%s5717_s26 + $0x2f8] sm:$0xff] %v533_v31   ;;  %538 = vst [vmem:[%s5717_s26 + $0x300] sm:$0xff] %v537_v32   ;;  %v553_v36 = vld [vmem:[%s5709_s25 + $0x1820] sm:$0xff]   ;;  %v557_v37 = vld [vmem:[%s5709_s25 + $0x1828] sm:$0xff]  }
  0x43   : > { %542 = vst [vmem:[%s5717_s26 + $0x308] sm:$0xff] %v541_v33   ;;  %546 = vst [vmem:[%s5717_s26 + $0x310] sm:$0xff] %v545_v34   ;;  %v561_v38 = vld [vmem:[%s5709_s25 + $0x1830] sm:$0xff]   ;;  %v565_v39 = vld [vmem:[%s5709_s25 + $0x1838] sm:$0xff]  }
  0x44   : > { %550 = vst [vmem:[%s5717_s26 + $0x318] sm:$0xff] %v549_v35   ;;  %554 = vst [vmem:[%s5717_s26 + $0x320] sm:$0xff] %v553_v36   ;;  %v569_v40 = vld [vmem:[%s5709_s25 + $0x1840] sm:$0xff]   ;;  %v573_v41 = vld [vmem:[%s5709_s25 + $0x1848] sm:$0xff]  }
  0x45   : > { %558 = vst [vmem:[%s5717_s26 + $0x328] sm:$0xff] %v557_v37   ;;  %562 = vst [vmem:[%s5717_s26 + $0x330] sm:$0xff] %v561_v38   ;;  %v577_v42 = vld [vmem:[%s5709_s25 + $0x1850] sm:$0xff]   ;;  %v581_v43 = vld [vmem:[%s5709_s25 + $0x1858] sm:$0xff]  }
  0x46   : > { %566 = vst [vmem:[%s5717_s26 + $0x338] sm:$0xff] %v565_v39   ;;  %570 = vst [vmem:[%s5717_s26 + $0x340] sm:$0xff] %v569_v40   ;;  %v585_v44 = vld [vmem:[%s5709_s25 + $0x1860] sm:$0xff]   ;;  %v589_v45 = vld [vmem:[%s5709_s25 + $0x1868] sm:$0xff]  }
  0x47   : > { %574 = vst [vmem:[%s5717_s26 + $0x348] sm:$0xff] %v573_v41   ;;  %578 = vst [vmem:[%s5717_s26 + $0x350] sm:$0xff] %v577_v42   ;;  %v593_v46 = vld [vmem:[%s5709_s25 + $0x1870] sm:$0xff]   ;;  %v597_v47 = vld [vmem:[%s5709_s25 + $0x1878] sm:$0xff]  }
  0x48   : > { %582 = vst [vmem:[%s5717_s26 + $0x358] sm:$0xff] %v581_v43   ;;  %586 = vst [vmem:[%s5717_s26 + $0x360] sm:$0xff] %v585_v44   ;;  %v601_v48 = vld [vmem:[%s5709_s25 + $0x1c00] sm:$0xff]   ;;  %v605_v49 = vld [vmem:[%s5709_s25 + $0x1c08] sm:$0xff]  }
  0x49   : > { %590 = vst [vmem:[%s5717_s26 + $0x368] sm:$0xff] %v589_v45   ;;  %594 = vst [vmem:[%s5717_s26 + $0x370] sm:$0xff] %v593_v46   ;;  %v609_v50 = vld [vmem:[%s5709_s25 + $0x1c10] sm:$0xff]   ;;  %v613_v51 = vld [vmem:[%s5709_s25 + $0x1c18] sm:$0xff]  }
  0x4a   : > { %598 = vst [vmem:[%s5717_s26 + $0x378] sm:$0xff] %v597_v47   ;;  %602 = vst [vmem:[%s5717_s26 + $0x380] sm:$0xff] %v601_v48   ;;  %v617_v52 = vld [vmem:[%s5709_s25 + $0x1c20] sm:$0xff]   ;;  %v621_v53 = vld [vmem:[%s5709_s25 + $0x1c28] sm:$0xff]  }
  0x4b   : > { %606 = vst [vmem:[%s5717_s26 + $0x388] sm:$0xff] %v605_v49   ;;  %610 = vst [vmem:[%s5717_s26 + $0x390] sm:$0xff] %v609_v50   ;;  %v625_v54 = vld [vmem:[%s5709_s25 + $0x1c30] sm:$0xff]   ;;  %v629_v55 = vld [vmem:[%s5709_s25 + $0x1c38] sm:$0xff]  }
  0x4c   : > { %614 = vst [vmem:[%s5717_s26 + $0x398] sm:$0xff] %v613_v51   ;;  %618 = vst [vmem:[%s5717_s26 + $0x3a0] sm:$0xff] %v617_v52   ;;  %v633_v56 = vld [vmem:[%s5709_s25 + $0x1c40] sm:$0xff]   ;;  %v637_v57 = vld [vmem:[%s5709_s25 + $0x1c48] sm:$0xff]  }
  0x4d   : > { %622 = vst [vmem:[%s5717_s26 + $0x3a8] sm:$0xff] %v621_v53   ;;  %626 = vst [vmem:[%s5717_s26 + $0x3b0] sm:$0xff] %v625_v54   ;;  %v641_v58 = vld [vmem:[%s5709_s25 + $0x1c50] sm:$0xff]   ;;  %v645_v59 = vld [vmem:[%s5709_s25 + $0x1c58] sm:$0xff]  }
  0x4e   : > { %630 = vst [vmem:[%s5717_s26 + $0x3b8] sm:$0xff] %v629_v55   ;;  %634 = vst [vmem:[%s5717_s26 + $0x3c0] sm:$0xff] %v633_v56   ;;  %v649_v60 = vld [vmem:[%s5709_s25 + $0x1c60] sm:$0xff]   ;;  %v653_v61 = vld [vmem:[%s5709_s25 + $0x1c68] sm:$0xff]  }
  0x4f   : > { %638 = vst [vmem:[%s5717_s26 + $0x3c8] sm:$0xff] %v637_v57   ;;  %642 = vst [vmem:[%s5717_s26 + $0x3d0] sm:$0xff] %v641_v58   ;;  %v657_v62 = vld [vmem:[%s5709_s25 + $0x1c70] sm:$0xff]   ;;  %v661_v63 = vld [vmem:[%s5709_s25 + $0x1c78] sm:$0xff]  }
  0x50   : > { %646 = vst [vmem:[%s5717_s26 + $0x3d8] sm:$0xff] %v645_v59   ;;  %650 = vst [vmem:[%s5717_s26 + $0x3e0] sm:$0xff] %v649_v60   ;;  %v665_v0 = vld [vmem:[%s5709_s25 + $0x2000] sm:$0xff]   ;;  %v669_v1 = vld [vmem:[%s5709_s25 + $0x2008] sm:$0xff]  }
  0x51   : > { %654 = vst [vmem:[%s5717_s26 + $0x3e8] sm:$0xff] %v653_v61   ;;  %658 = vst [vmem:[%s5717_s26 + $0x3f0] sm:$0xff] %v657_v62   ;;  %v673_v2 = vld [vmem:[%s5709_s25 + $0x2010] sm:$0xff]   ;;  %v677_v3 = vld [vmem:[%s5709_s25 + $0x2018] sm:$0xff]  }
  0x52   : > { %662 = vst [vmem:[%s5717_s26 + $0x3f8] sm:$0xff] %v661_v63   ;;  %666 = vst [vmem:[%s5717_s26 + $0x400] sm:$0xff] %v665_v0   ;;  %v681_v4 = vld [vmem:[%s5709_s25 + $0x2020] sm:$0xff]   ;;  %v685_v5 = vld [vmem:[%s5709_s25 + $0x2028] sm:$0xff]  }
  0x53   : > { %670 = vst [vmem:[%s5717_s26 + $0x408] sm:$0xff] %v669_v1   ;;  %674 = vst [vmem:[%s5717_s26 + $0x410] sm:$0xff] %v673_v2   ;;  %v689_v6 = vld [vmem:[%s5709_s25 + $0x2030] sm:$0xff]   ;;  %v693_v7 = vld [vmem:[%s5709_s25 + $0x2038] sm:$0xff]  }
  0x54   : > { %678 = vst [vmem:[%s5717_s26 + $0x418] sm:$0xff] %v677_v3   ;;  %682 = vst [vmem:[%s5717_s26 + $0x420] sm:$0xff] %v681_v4   ;;  %v697_v8 = vld [vmem:[%s5709_s25 + $0x2040] sm:$0xff]   ;;  %v701_v9 = vld [vmem:[%s5709_s25 + $0x2048] sm:$0xff]  }
  0x55   : > { %686 = vst [vmem:[%s5717_s26 + $0x428] sm:$0xff] %v685_v5   ;;  %690 = vst [vmem:[%s5717_s26 + $0x430] sm:$0xff] %v689_v6   ;;  %v705_v10 = vld [vmem:[%s5709_s25 + $0x2050] sm:$0xff]   ;;  %v709_v11 = vld [vmem:[%s5709_s25 + $0x2058] sm:$0xff]  }
  0x56   : > { %694 = vst [vmem:[%s5717_s26 + $0x438] sm:$0xff] %v693_v7   ;;  %698 = vst [vmem:[%s5717_s26 + $0x440] sm:$0xff] %v697_v8   ;;  %v713_v12 = vld [vmem:[%s5709_s25 + $0x2060] sm:$0xff]   ;;  %v717_v13 = vld [vmem:[%s5709_s25 + $0x2068] sm:$0xff]  }
  0x57   : > { %702 = vst [vmem:[%s5717_s26 + $0x448] sm:$0xff] %v701_v9   ;;  %706 = vst [vmem:[%s5717_s26 + $0x450] sm:$0xff] %v705_v10   ;;  %v721_v14 = vld [vmem:[%s5709_s25 + $0x2070] sm:$0xff]   ;;  %v725_v15 = vld [vmem:[%s5709_s25 + $0x2078] sm:$0xff]  }
  0x58   : > { %710 = vst [vmem:[%s5717_s26 + $0x458] sm:$0xff] %v709_v11   ;;  %714 = vst [vmem:[%s5717_s26 + $0x460] sm:$0xff] %v713_v12  }
  0x59   : > { %718 = vst [vmem:[%s5717_s26 + $0x468] sm:$0xff] %v717_v13   ;;  %722 = vst [vmem:[%s5717_s26 + $0x470] sm:$0xff] %v721_v14  }
  0x5a   : > { %726 = vst [vmem:[%s5717_s26 + $0x478] sm:$0xff] %v725_v15  }
  0x5b PF: > { %p4561_p5 = scmp.ge.s32.totalorder %s5653_s14, 1  ;;  %p1326_p6 = scmp.lt.s32.totalorder %s5653_s14, 9 }
  0x5d   : > { %p1327_p7 = pnand %p4561_p5, %p1326_p6 }
  0x5f   : > { %1330 = sbr.rel (%p1327_p7) target bundleno = 620 (0x26c), region = 69 }
  0x66   : > { %v5485_v16 = vld [vmem:[%s7239_s1] sm:$0xff]   ;;  %s1333_s29 = sand.u32 1, %s5645_s12   ;;  %v5486_v17 = vld [vmem:[%s7239_s1 + $0x8] sm:$0xff]   ;;  %vm2388_vm0 = vcmask 261120   ;;  %s4562_s7 = sshll.u32 %s4555_s15, 5 }
  0x67   : > { %s5460_s5 = smul.u32 1152, %s1333_s29  ;;  %5163 = vmatprep.subr.bf16.mxu0 %v5485_v16  ;;  %5455 = vmatprep.subr.bf16.mxu1 %v5485_v16  ;;  %p1358_p8 = scmp.lt.s32.totalorder %s4562_s7, 255 }
  0x68   : > { %5164 = vmatpush3.bf16.msra.mxu0 %v5485_v16  ;;  %5457 = vmatpush3.bf16.msra.mxu1 %v5485_v16 }
  0x69   : > { %5165 = vmatprep.subr.bf16.mxu0 %v5486_v17  ;;  %5456 = vmatprep.subr.bf16.mxu1 %v5486_v17  ;;  %s6010_s6 = scalar_lea.vmem [#allocation2], %s5460_s5  ;;  %s7446_s7 = smov (!%p1358_p8, %s4562_s7), 255 }
  0x6a   : > { %v5487_v18 = vld [vmem:[%s6010_s6] sm:$0xff]   ;;  %v5489_v20 = vld [vmem:[%s6010_s6 + $0x8] sm:$0xff]   ;;  %v5491_v22 = vld [vmem:[%s6010_s6 + $0x10] sm:$0xff]   ;;  %s4563_s10 = sshll.u32 %s7446_s7, 2 }
  0x6b   : > { %v5488_v19 = vld [vmem:[%s6010_s6 + $0x240] sm:$0xff]   ;;  %5167 = vmatprep.mubr.msk.bf16.mxu0 %vm2388_vm0, %v5487_v18  ;;  %v5490_v21 = vld [vmem:[%s6010_s6 + $0x248] sm:$0xff]   ;;  %v5492_v23 = vld [vmem:[%s6010_s6 + $0x250] sm:$0xff]   ;;  %s7114_s14 = scalar_lea.vmem %s7241_s3, %s4563_s10 }
  0x6c   : > { %5166 = vmatpush3.bf16.msra.mxu0 %v5486_v17  ;;  %5458 = vmatpush3.bf16.msra.mxu1 %v5486_v17  ;;  %v5493_v24 = vld [vmem:[%s6010_s6 + $0x18] sm:$0xff]   ;;  %v5495_v26 = vld [vmem:[%s6010_s6 + $0x20] sm:$0xff]   ;;  %v5497_v28 = vld [vmem:[%s6010_s6 + $0x28] sm:$0xff]  }
  0x6d   : > { %5311 = vmatprep.mubr.msk.bf16.mxu1 %vm2388_vm0, %v5488_v19  ;;  %v5494_v25 = vld [vmem:[%s6010_s6 + $0x258] sm:$0xff]   ;;  %v5496_v27 = vld [vmem:[%s6010_s6 + $0x260] sm:$0xff]   ;;  %v5498_v29 = vld [vmem:[%s6010_s6 + $0x268] sm:$0xff]  }
  0x6e   : > { %v5499_v30 = vld [vmem:[%s6010_s6 + $0x30] sm:$0xff]   ;;  %v5501_v32 = vld [vmem:[%s6010_s6 + $0x38] sm:$0xff]   ;;  %v5503_v34 = vld [vmem:[%s6010_s6 + $0x40] sm:$0xff]  }
  0x6f   : > { %5168 = vmatmul.mubr.msk.bf16.vlgmr.msra.gmra.mrb[0].mxu0 %vm2388_vm0, %v5489_v20  ;;  %5312 = vmatmul.mubr.msk.bf16.vlgmr.msra.gmra.mrb[0].mxu1 %vm2388_vm0, %v5490_v21  ;;  %v5500_v31 = vld [vmem:[%s6010_s6 + $0x270] sm:$0xff]   ;;  %v5502_v33 = vld [vmem:[%s6010_s6 + $0x278] sm:$0xff]   ;;  %v5504_v35 = vld [vmem:[%s6010_s6 + $0x280] sm:$0xff]  }
  0x70   : > { %5171 = vmatprep.mubr.msk.bf16.mxu0 %vm2388_vm0, %v5491_v22  ;;  %5315 = vmatprep.mubr.msk.bf16.mxu1 %vm2388_vm0, %v5492_v23  ;;  %v5505_v36 = vld [vmem:[%s6010_s6 + $0x48] sm:$0xff]   ;;  %v5507_v38 = vld [vmem:[%s6010_s6 + $0x50] sm:$0xff]   ;;  %v5509_v40 = vld [vmem:[%s6010_s6 + $0x58] sm:$0xff]  }
  0x71   : > { %v5506_v37 = vld [vmem:[%s6010_s6 + $0x288] sm:$0xff]   ;;  %v5508_v39 = vld [vmem:[%s6010_s6 + $0x290] sm:$0xff]   ;;  %v5510_v41 = vld [vmem:[%s6010_s6 + $0x298] sm:$0xff]  }
  0x72   : > { %v5511_v42 = vld [vmem:[%s6010_s6 + $0x60] sm:$0xff]   ;;  %v5513_v44 = vld [vmem:[%s6010_s6 + $0x68] sm:$0xff]   ;;  %v5515_v46 = vld [vmem:[%s6010_s6 + $0x70] sm:$0xff]  }
  0x73   : > { %v5512_v43 = vld [vmem:[%s6010_s6 + $0x2a0] sm:$0xff]   ;;  %v5514_v45 = vld [vmem:[%s6010_s6 + $0x2a8] sm:$0xff]   ;;  %v5516_v47 = vld [vmem:[%s6010_s6 + $0x2b0] sm:$0xff]  }
  0x74   : > { %v5517_v48 = vld [vmem:[%s6010_s6 + $0x78] sm:$0xff]   ;;  %v5519_v50 = vld [vmem:[%s6010_s6 + $0x80] sm:$0xff]   ;;  %v5521_v52 = vld [vmem:[%s6010_s6 + $0x88] sm:$0xff]  }
  0x75   : > { %v5518_v49 = vld [vmem:[%s6010_s6 + $0x2b8] sm:$0xff]   ;;  %v5520_v51 = vld [vmem:[%s6010_s6 + $0x2c0] sm:$0xff]   ;;  %v5522_v53 = vld [vmem:[%s6010_s6 + $0x2c8] sm:$0xff]  }
  0x76   : > { %v5523_v54 = vld [vmem:[%s6010_s6 + $0x90] sm:$0xff]   ;;  %v5525_v56 = vld [vmem:[%s6010_s6 + $0x98] sm:$0xff]   ;;  %v5527_v58 = vld [vmem:[%s6010_s6 + $0xa0] sm:$0xff]  }
  0x77   : > { %5172 = vmatmul.mubr.msk.bf16.gmra.mrb[4].mxu0 %vm2388_vm0, %v5493_v24  ;;  %5316 = vmatmul.mubr.msk.bf16.gmra.mrb[4].mxu1 %vm2388_vm0, %v5494_v25  ;;  %v5524_v55 = vld [vmem:[%s6010_s6 + $0x2d0] sm:$0xff]   ;;  %v5526_v57 = vld [vmem:[%s6010_s6 + $0x2d8] sm:$0xff]   ;;  %v5528_v59 = vld [vmem:[%s6010_s6 + $0x2e0] sm:$0xff]  }
  0x78   : > { %5175 = vmatprep.mubr.msk.bf16.mxu0 %vm2388_vm0, %v5495_v26  ;;  %5319 = vmatprep.mubr.msk.bf16.mxu1 %vm2388_vm0, %v5496_v27  ;;  %v5529_v60 = vld [vmem:[%s6010_s6 + $0xa8] sm:$0xff]   ;;  %v5531_v62 = vld [vmem:[%s6010_s6 + $0xb0] sm:$0xff]   ;;  %v5533_v0 = vld [vmem:[%s6010_s6 + $0xb8] sm:$0xff]  }
  0x79   : > { %v5530_v61 = vld [vmem:[%s6010_s6 + $0x2e8] sm:$0xff]   ;;  %v5532_v63 = vld [vmem:[%s6010_s6 + $0x2f0] sm:$0xff]   ;;  %v5534_v1 = vld [vmem:[%s6010_s6 + $0x2f8] sm:$0xff]  }
  0x7a   : > { %v5535_v2 = vld [vmem:[%s6010_s6 + $0xc0] sm:$0xff]   ;;  %v5537_v4 = vld [vmem:[%s6010_s6 + $0xc8] sm:$0xff]   ;;  %v5539_v6 = vld [vmem:[%s6010_s6 + $0xd0] sm:$0xff]  }
  0x7b   : > { %v5536_v3 = vld [vmem:[%s6010_s6 + $0x300] sm:$0xff]   ;;  %v5538_v5 = vld [vmem:[%s6010_s6 + $0x308] sm:$0xff]   ;;  %v5540_v7 = vld [vmem:[%s6010_s6 + $0x310] sm:$0xff]  }
  0x7c   : > { %v5541_v8 = vld [vmem:[%s6010_s6 + $0xd8] sm:$0xff]   ;;  %v5543_v10 = vld [vmem:[%s6010_s6 + $0xe0] sm:$0xff]   ;;  %v5545_v12 = vld [vmem:[%s6010_s6 + $0xe8] sm:$0xff]  }
  0x7d   : > { %v5542_v9 = vld [vmem:[%s6010_s6 + $0x318] sm:$0xff]   ;;  %v5544_v11 = vld [vmem:[%s6010_s6 + $0x320] sm:$0xff]   ;;  %v5546_v13 = vld [vmem:[%s6010_s6 + $0x328] sm:$0xff]  }
  0x7e   : > { %v5547_v14 = vld [vmem:[%s6010_s6 + $0xf0] sm:$0xff]   ;;  %v5549_v16 = vld [vmem:[%s6010_s6 + $0xf8] sm:$0xff]   ;;  %v5551_v18 = vld [vmem:[%s6010_s6 + $0x100] sm:$0xff]  }
  0x7f   : > { %5176 = vmatmul.mubr.msk.bf16.gmra.mrb[8].mxu0 %vm2388_vm0, %v5497_v28  ;;  %5320 = vmatmul.mubr.msk.bf16.gmra.mrb[8].mxu1 %vm2388_vm0, %v5498_v29  ;;  %v5548_v15 = vld [vmem:[%s6010_s6 + $0x330] sm:$0xff]   ;;  %v5550_v17 = vld [vmem:[%s6010_s6 + $0x338] sm:$0xff]   ;;  %v5552_v19 = vld [vmem:[%s6010_s6 + $0x340] sm:$0xff]  }
  0x80   : > { %5179 = vmatprep.mubr.msk.bf16.mxu0 %vm2388_vm0, %v5499_v30  ;;  %5323 = vmatprep.mubr.msk.bf16.mxu1 %vm2388_vm0, %v5500_v31  ;;  %v5553_v20 = vld [vmem:[%s6010_s6 + $0x108] sm:$0xff]   ;;  %v5555_v22 = vld [vmem:[%s6010_s6 + $0x110] sm:$0xff]   ;;  %v5557_v24 = vld [vmem:[%s6010_s6 + $0x118] sm:$0xff]  }
  0x81   : > { %v5554_v21 = vld [vmem:[%s6010_s6 + $0x348] sm:$0xff]   ;;  %v5556_v23 = vld [vmem:[%s6010_s6 + $0x350] sm:$0xff]   ;;  %v5558_v25 = vld [vmem:[%s6010_s6 + $0x358] sm:$0xff]  }
  0x82   : > { %v5559_v26 = vld [vmem:[%s6010_s6 + $0x120] sm:$0xff]   ;;  %v5561_v28 = vld [vmem:[%s6010_s6 + $0x128] sm:$0xff]   ;;  %v5563_v30 = vld [vmem:[%s6010_s6 + $0x130] sm:$0xff]  }
  0x83   : > { %v5560_v27 = vld [vmem:[%s6010_s6 + $0x360] sm:$0xff]   ;;  %v5562_v29 = vld [vmem:[%s6010_s6 + $0x368] sm:$0xff]   ;;  %v5564_v31 = vld [vmem:[%s6010_s6 + $0x370] sm:$0xff]  }
  0x87   : > { %5180 = vmatmul.mubr.msk.bf16.gmra.mrb[12].mxu0 %vm2388_vm0, %v5501_v32  ;;  %5324 = vmatmul.mubr.msk.bf16.gmra.mrb[12].mxu1 %vm2388_vm0, %v5502_v33  ;;  %v5565_v32 = vld [vmem:[%s6010_s6 + $0x138] sm:$0xff]  }
  0x88   : > { %5183 = vmatprep.mubr.msk.bf16.mxu0 %vm2388_vm0, %v5503_v34  ;;  %5327 = vmatprep.mubr.msk.bf16.mxu1 %vm2388_vm0, %v5504_v35  ;;  %v5566_v33 = vld [vmem:[%s6010_s6 + $0x378] sm:$0xff]   ;;  %v5567_v34 = vld [vmem:[%s6010_s6 + $0x140] sm:$0xff]  }
  0x89   : > { %v5568_v35 = vld [vmem:[%s6010_s6 + $0x380] sm:$0xff]  }
  0x8f   : > { %5184 = vmatmul.mubr.msk.bf16.gmra.mrb[16].mxu0 %vm2388_vm0, %v5505_v36  ;;  %5328 = vmatmul.mubr.msk.bf16.gmra.mrb[16].mxu1 %vm2388_vm0, %v5506_v37  ;;  %v5569_v36 = vld [vmem:[%s6010_s6 + $0x148] sm:$0xff]  }
  0x90   : > { %5187 = vmatprep.mubr.msk.bf16.mxu0 %vm2388_vm0, %v5507_v38  ;;  %5331 = vmatprep.mubr.msk.bf16.mxu1 %vm2388_vm0, %v5508_v39  ;;  %v5570_v37 = vld [vmem:[%s6010_s6 + $0x388] sm:$0xff]   ;;  %v5571_v38 = vld [vmem:[%s6010_s6 + $0x150] sm:$0xff]  }
  0x91   : > { %v5572_v39 = vld [vmem:[%s6010_s6 + $0x390] sm:$0xff]  }
  0x97   : > { %5188 = vmatmul.mubr.msk.bf16.gmra.mrb[20].mxu0 %vm2388_vm0, %v5509_v40  ;;  %5332 = vmatmul.mubr.msk.bf16.gmra.mrb[20].mxu1 %vm2388_vm0, %v5510_v41  ;;  %v5573_v40 = vld [vmem:[%s6010_s6 + $0x158] sm:$0xff]  }
  0x98   : > { %5191 = vmatprep.mubr.msk.bf16.mxu0 %vm2388_vm0, %v5511_v42  ;;  %5335 = vmatprep.mubr.msk.bf16.mxu1 %vm2388_vm0, %v5512_v43  ;;  %v5574_v41 = vld [vmem:[%s6010_s6 + $0x398] sm:$0xff]   ;;  %v5575_v42 = vld [vmem:[%s6010_s6 + $0x160] sm:$0xff]  }
  0x99   : > { %v5576_v43 = vld [vmem:[%s6010_s6 + $0x3a0] sm:$0xff]  }
  0x9f   : > { %5192 = vmatmul.mubr.msk.bf16.gmra.mrb[24].mxu0 %vm2388_vm0, %v5513_v44  ;;  %5336 = vmatmul.mubr.msk.bf16.gmra.mrb[24].mxu1 %vm2388_vm0, %v5514_v45  ;;  %v5577_v44 = vld [vmem:[%s6010_s6 + $0x168] sm:$0xff]  }
  0xa0   : > { %5195 = vmatprep.mubr.msk.bf16.mxu0 %vm2388_vm0, %v5515_v46  ;;  %5339 = vmatprep.mubr.msk.bf16.mxu1 %vm2388_vm0, %v5516_v47  ;;  %v5578_v45 = vld [vmem:[%s6010_s6 + $0x3a8] sm:$0xff]   ;;  %v5579_v46 = vld [vmem:[%s6010_s6 + $0x170] sm:$0xff]  }
  0xa1   : > { %v5580_v47 = vld [vmem:[%s6010_s6 + $0x3b0] sm:$0xff]  }
  0xa7   : > { %5196 = vmatmul.mubr.msk.bf16.gmra.mrb[28].mxu0 %vm2388_vm0, %v5517_v48  ;;  %5340 = vmatmul.mubr.msk.bf16.gmra.mrb[28].mxu1 %vm2388_vm0, %v5518_v49  ;;  %v5581_v48 = vld [vmem:[%s6010_s6 + $0x178] sm:$0xff]  }
  0xa8   : > { %5199 = vmatprep.mubr.msk.bf16.mxu0 %vm2388_vm0, %v5519_v50  ;;  %5343 = vmatprep.mubr.msk.bf16.mxu1 %vm2388_vm0, %v5520_v51  ;;  %v5582_v49 = vld [vmem:[%s6010_s6 + $0x3b8] sm:$0xff]   ;;  %v5583_v50 = vld [vmem:[%s6010_s6 + $0x180] sm:$0xff]  }
  0xa9   : > { %v5584_v51 = vld [vmem:[%s6010_s6 + $0x3c0] sm:$0xff]  }
  0xaf   : > { %5200 = vmatmul.mubr.msk.bf16.gmra.mrb[32].mxu0 %vm2388_vm0, %v5521_v52  ;;  %5344 = vmatmul.mubr.msk.bf16.gmra.mrb[32].mxu1 %vm2388_vm0, %v5522_v53  ;;  %v5585_v52 = vld [vmem:[%s6010_s6 + $0x188] sm:$0xff]  }
  0xb0   : > { %5203 = vmatprep.mubr.msk.bf16.mxu0 %vm2388_vm0, %v5523_v54  ;;  %5347 = vmatprep.mubr.msk.bf16.mxu1 %vm2388_vm0, %v5524_v55  ;;  %v5586_v53 = vld [vmem:[%s6010_s6 + $0x3c8] sm:$0xff]   ;;  %v5587_v54 = vld [vmem:[%s6010_s6 + $0x190] sm:$0xff]  }
  0xb1   : > { %v5588_v55 = vld [vmem:[%s6010_s6 + $0x3d0] sm:$0xff]  }
  0xb7   : > { %5204 = vmatmul.mubr.msk.bf16.gmra.mrb[36].mxu0 %vm2388_vm0, %v5525_v56  ;;  %5348 = vmatmul.mubr.msk.bf16.gmra.mrb[36].mxu1 %vm2388_vm0, %v5526_v57  ;;  %v5589_v56 = vld [vmem:[%s6010_s6 + $0x198] sm:$0xff]  }
  0xb8   : > { %5207 = vmatprep.mubr.msk.bf16.mxu0 %vm2388_vm0, %v5527_v58  ;;  %5351 = vmatprep.mubr.msk.bf16.mxu1 %vm2388_vm0, %v5528_v59  ;;  %v5590_v57 = vld [vmem:[%s6010_s6 + $0x3d8] sm:$0xff]   ;;  %v5591_v58 = vld [vmem:[%s6010_s6 + $0x1a0] sm:$0xff]  }
  0xb9   : > { %v5592_v59 = vld [vmem:[%s6010_s6 + $0x3e0] sm:$0xff]  }
  0xbf   : > { %5208 = vmatmul.mubr.msk.bf16.gmra.mrb[40].mxu0 %vm2388_vm0, %v5529_v60  ;;  %5352 = vmatmul.mubr.msk.bf16.gmra.mrb[40].mxu1 %vm2388_vm0, %v5530_v61  ;;  %v5593_v60 = vld [vmem:[%s6010_s6 + $0x1a8] sm:$0xff]  }
  0xc0   : > { %5211 = vmatprep.mubr.msk.bf16.mxu0 %vm2388_vm0, %v5531_v62  ;;  %5355 = vmatprep.mubr.msk.bf16.mxu1 %vm2388_vm0, %v5532_v63  ;;  %v5594_v61 = vld [vmem:[%s6010_s6 + $0x3e8] sm:$0xff]   ;;  %v5595_v62 = vld [vmem:[%s6010_s6 + $0x1b0] sm:$0xff]  }
  0xc1   : > { %v5596_v63 = vld [vmem:[%s6010_s6 + $0x3f0] sm:$0xff]  }
  0xc7   : > { %5212 = vmatmul.mubr.msk.bf16.gmra.mrb[44].mxu0 %vm2388_vm0, %v5533_v0  ;;  %5356 = vmatmul.mubr.msk.bf16.gmra.mrb[44].mxu1 %vm2388_vm0, %v5534_v1 }
  0xc8   : > { %5215 = vmatprep.mubr.msk.bf16.mxu0 %vm2388_vm0, %v5535_v2  ;;  %5359 = vmatprep.mubr.msk.bf16.mxu1 %vm2388_vm0, %v5536_v3  ;;  %v5597_v3 = vld [vmem:[%s6010_s6 + $0x1b8] sm:$0xff]  }
  0xcf   : > { %5216 = vmatmul.mubr.msk.bf16.gmra.mrb[48].mxu0 %vm2388_vm0, %v5537_v4  ;;  %5360 = vmatmul.mubr.msk.bf16.gmra.mrb[48].mxu1 %vm2388_vm0, %v5538_v5  ;;  %v5598_v4 = vld [vmem:[%s6010_s6 + $0x3f8] sm:$0xff]  }
  0xd0   : > { %5219 = vmatprep.mubr.msk.bf16.mxu0 %vm2388_vm0, %v5539_v6  ;;  %5363 = vmatprep.mubr.msk.bf16.mxu1 %vm2388_vm0, %v5540_v7 }
  0xd7   : > { %5220 = vmatmul.mubr.msk.bf16.gmra.mrb[52].mxu0 %vm2388_vm0, %v5541_v8  ;;  %5364 = vmatmul.mubr.msk.bf16.gmra.mrb[52].mxu1 %vm2388_vm0, %v5542_v9  ;;  %v5599_v8 = vld [vmem:[%s6010_s6 + $0x1c0] sm:$0xff]  }
  0xd8   : > { %5223 = vmatprep.mubr.msk.bf16.mxu0 %vm2388_vm0, %v5543_v10  ;;  %5367 = vmatprep.mubr.msk.bf16.mxu1 %vm2388_vm0, %v5544_v11  ;;  %v5600_v9 = vld [vmem:[%s6010_s6 + $0x400] sm:$0xff]  }
  0xdf   : > { %5224 = vmatmul.mubr.msk.bf16.gmra.mrb[56].mxu0 %vm2388_vm0, %v5545_v12  ;;  %5368 = vmatmul.mubr.msk.bf16.gmra.mrb[56].mxu1 %vm2388_vm0, %v5546_v13 }
  0xe0   : > { %5227 = vmatprep.mubr.msk.bf16.mxu0 %vm2388_vm0, %v5547_v14  ;;  %5371 = vmatprep.mubr.msk.bf16.mxu1 %vm2388_vm0, %v5548_v15  ;;  %v5601_v15 = vld [vmem:[%s6010_s6 + $0x1c8] sm:$0xff]  }
  0xe7   : > { %5228 = vmatmul.mubr.msk.bf16.gmra.mrb[60].mxu0 %vm2388_vm0, %v5549_v16  ;;  %5372 = vmatmul.mubr.msk.bf16.gmra.mrb[60].mxu1 %vm2388_vm0, %v5550_v17  ;;  %v5602_v16 = vld [vmem:[%s6010_s6 + $0x408] sm:$0xff]  }
  0xe8   : > { %5231 = vmatprep.mubr.msk.bf16.mxu0 %vm2388_vm0, %v5551_v18  ;;  %5375 = vmatprep.mubr.msk.bf16.mxu1 %vm2388_vm0, %v5552_v19 }
  0xef   : > { %5232 = vmatmul.mubr.msk.bf16.gmra.mrb[64].mxu0 %vm2388_vm0, %v5553_v20  ;;  %5376 = vmatmul.mubr.msk.bf16.gmra.mrb[64].mxu1 %vm2388_vm0, %v5554_v21  ;;  %v5603_v20 = vld [vmem:[%s6010_s6 + $0x1d0] sm:$0xff]  }
  0xf0   : > { %5235 = vmatprep.mubr.msk.bf16.mxu0 %vm2388_vm0, %v5555_v22  ;;  %5379 = vmatprep.mubr.msk.bf16.mxu1 %vm2388_vm0, %v5556_v23  ;;  %v5604_v21 = vld [vmem:[%s6010_s6 + $0x410] sm:$0xff]  }
  0xf7   : > { %5236 = vmatmul.mubr.msk.bf16.gmra.mrb[68].mxu0 %vm2388_vm0, %v5557_v24  ;;  %5380 = vmatmul.mubr.msk.bf16.gmra.mrb[68].mxu1 %vm2388_vm0, %v5558_v25 }
  0xf8   : > { %5239 = vmatprep.mubr.msk.bf16.mxu0 %vm2388_vm0, %v5559_v26  ;;  %5383 = vmatprep.mubr.msk.bf16.mxu1 %vm2388_vm0, %v5560_v27  ;;  %v5605_v27 = vld [vmem:[%s6010_s6 + $0x1d8] sm:$0xff]  }
  0xff   : > { %5240 = vmatmul.mubr.msk.bf16.gmra.mrb[72].mxu0 %vm2388_vm0, %v5561_v28  ;;  %5384 = vmatmul.mubr.msk.bf16.gmra.mrb[72].mxu1 %vm2388_vm0, %v5562_v29  ;;  %v5606_v28 = vld [vmem:[%s6010_s6 + $0x418] sm:$0xff]  }
 0x100   : > { %5243 = vmatprep.mubr.msk.bf16.mxu0 %vm2388_vm0, %v5563_v30  ;;  %5387 = vmatprep.mubr.msk.bf16.mxu1 %vm2388_vm0, %v5564_v31 }
 0x107   : > { %5244 = vmatmul.mubr.msk.bf16.gmra.mrb[76].mxu0 %vm2388_vm0, %v5565_v32  ;;  %5388 = vmatmul.mubr.msk.bf16.gmra.mrb[76].mxu1 %vm2388_vm0, %v5566_v33  ;;  %v5607_v32 = vld [vmem:[%s6010_s6 + $0x1e0] sm:$0xff]  }
 0x108   : > { %5247 = vmatprep.mubr.msk.bf16.mxu0 %vm2388_vm0, %v5567_v34  ;;  %5391 = vmatprep.mubr.msk.bf16.mxu1 %vm2388_vm0, %v5568_v35  ;;  %v5608_v33 = vld [vmem:[%s6010_s6 + $0x420] sm:$0xff]  }
 0x10f   : > { %5248 = vmatmul.mubr.msk.bf16.gmra.mrb[80].mxu0 %vm2388_vm0, %v5569_v36  ;;  %5392 = vmatmul.mubr.msk.bf16.gmra.mrb[80].mxu1 %vm2388_vm0, %v5570_v37 }
 0x110   : > { %5251 = vmatprep.mubr.msk.bf16.mxu0 %vm2388_vm0, %v5571_v38  ;;  %5395 = vmatprep.mubr.msk.bf16.mxu1 %vm2388_vm0, %v5572_v39  ;;  %v5609_v39 = vld [vmem:[%s6010_s6 + $0x1e8] sm:$0xff]  }
 0x117   : > { %5252 = vmatmul.mubr.msk.bf16.gmra.mrb[84].mxu0 %vm2388_vm0, %v5573_v40  ;;  %5396 = vmatmul.mubr.msk.bf16.gmra.mrb[84].mxu1 %vm2388_vm0, %v5574_v41  ;;  %v5610_v40 = vld [vmem:[%s6010_s6 + $0x428] sm:$0xff]  }
 0x118   : > { %5255 = vmatprep.mubr.msk.bf16.mxu0 %vm2388_vm0, %v5575_v42  ;;  %5399 = vmatprep.mubr.msk.bf16.mxu1 %vm2388_vm0, %v5576_v43 }
 0x11f   : > { %5256 = vmatmul.mubr.msk.bf16.gmra.mrb[88].mxu0 %vm2388_vm0, %v5577_v44  ;;  %5400 = vmatmul.mubr.msk.bf16.gmra.mrb[88].mxu1 %vm2388_vm0, %v5578_v45  ;;  %v5611_v44 = vld [vmem:[%s6010_s6 + $0x1f0] sm:$0xff]  }
 0x120   : > { %5259 = vmatprep.mubr.msk.bf16.mxu0 %vm2388_vm0, %v5579_v46  ;;  %5403 = vmatprep.mubr.msk.bf16.mxu1 %vm2388_vm0, %v5580_v47  ;;  %v5612_v45 = vld [vmem:[%s6010_s6 + $0x430] sm:$0xff]  }
 0x127   : > { %5260 = vmatmul.mubr.msk.bf16.gmra.mrb[92].mxu0 %vm2388_vm0, %v5581_v48  ;;  %5404 = vmatmul.mubr.msk.bf16.gmra.mrb[92].mxu1 %vm2388_vm0, %v5582_v49 }
 0x128   : > { %5263 = vmatprep.mubr.msk.bf16.mxu0 %vm2388_vm0, %v5583_v50  ;;  %5407 = vmatprep.mubr.msk.bf16.mxu1 %vm2388_vm0, %v5584_v51  ;;  %v5613_v51 = vld [vmem:[%s6010_s6 + $0x1f8] sm:$0xff]  }
 0x12f   : > { %5264 = vmatmul.mubr.msk.bf16.gmra.mrb[96].mxu0 %vm2388_vm0, %v5585_v52  ;;  %5408 = vmatmul.mubr.msk.bf16.gmra.mrb[96].mxu1 %vm2388_vm0, %v5586_v53  ;;  %v5614_v53 = vld [vmem:[%s6010_s6 + $0x438] sm:$0xff]  }
 0x130   : > { %5267 = vmatprep.mubr.msk.bf16.mxu0 %vm2388_vm0, %v5587_v54  ;;  %5411 = vmatprep.mubr.msk.bf16.mxu1 %vm2388_vm0, %v5588_v55 }
 0x137   : > { %5268 = vmatmul.mubr.msk.bf16.gmra.mrb[100].mxu0 %vm2388_vm0, %v5589_v56  ;;  %5412 = vmatmul.mubr.msk.bf16.gmra.mrb[100].mxu1 %vm2388_vm0, %v5590_v57 }
 0x138   : > { %5271 = vmatprep.mubr.msk.bf16.mxu0 %vm2388_vm0, %v5591_v58  ;;  %5415 = vmatprep.mubr.msk.bf16.mxu1 %vm2388_vm0, %v5592_v59  ;;  %v5615_v58 = vld [vmem:[%s6010_s6 + $0x200] sm:$0xff]  }
 0x139   : > { %v5616_v59 = vld [vmem:[%s6010_s6 + $0x440] sm:$0xff]  }
 0x13f   : > { %5272 = vmatmul.mubr.msk.bf16.gmra.mrb[104].mxu0 %vm2388_vm0, %v5593_v60  ;;  %5416 = vmatmul.mubr.msk.bf16.gmra.mrb[104].mxu1 %vm2388_vm0, %v5594_v61  ;;  %v5625_v61 = vld [vmem:[%s6010_s6 + $0x228] sm:$0xff]  }
 0x140   : > { %5275 = vmatprep.mubr.msk.bf16.mxu0 %vm2388_vm0, %v5595_v62  ;;  %5419 = vmatprep.mubr.msk.bf16.mxu1 %vm2388_vm0, %v5596_v63 }
 0x142   : > { %v6232_v0 = vpop.f32.mrb[0].mxu0  ;;  %v6234_v1 = vpop.f32.mrb[0].mxu1 }
 0x143   : > { %v6236_v2 = vpop.f32.mrb[1].mxu0  ;;  %v6240_v5 = vpop.f32.mrb[1].mxu1 }
 0x144   : > { %v6242_v6 = vpop.f32.mrb[2].mxu0  ;;  %v6244_v7 = vpop.f32.mrb[2].mxu1 }
 0x145   : > { %7260 = vst [vmem:[#allocation3_spill] sm:$0xff] %v6244_v7  ;;  %v6248_v10 = vpop.f32.mrb[3].mxu0  ;;  %v6250_v11 = vpop.f32.mrb[3].mxu1 }
 0x146   : > { %7261 = vst [vmem:[#allocation4_spill] sm:$0xff] %v6250_v11 }
 0x147   : > { %5276 = vmatmul.mubr.msk.bf16.gmra.mrb[108].mxu0 %vm2388_vm0, %v5597_v3  ;;  %5420 = vmatmul.mubr.msk.bf16.gmra.mrb[108].mxu1 %vm2388_vm0, %v5598_v4 }
 0x148   : > { %5279 = vmatprep.mubr.msk.bf16.mxu0 %vm2388_vm0, %v5599_v8  ;;  %5423 = vmatprep.mubr.msk.bf16.mxu1 %vm2388_vm0, %v5600_v9  ;;  %v5617_v9 = vld [vmem:[%s6010_s6 + $0x208] sm:$0xff]  }
 0x14a   : > { %v6256_v12 = vpop.f32.mrb[4].mxu0  ;;  %v6258_v13 = vpop.f32.mrb[4].mxu1 }
 0x14b   : > { %7262 = vst [vmem:[#allocation5_spill] sm:$0xff] %v6258_v13  ;;  %v6260_v14 = vpop.f32.mrb[5].mxu0  ;;  %v6264_v17 = vpop.f32.mrb[5].mxu1 }
 0x14c   : > { %7263 = vst [vmem:[#allocation6_spill] sm:$0xff] %v6264_v17  ;;  %v6266_v18 = vpop.f32.mrb[6].mxu0  ;;  %v6268_v19 = vpop.f32.mrb[6].mxu1 }
 0x14d   : > { %7264 = vst [vmem:[#allocation7_spill] sm:$0xff] %v6268_v19  ;;  %v6272_v22 = vpop.f32.mrb[7].mxu0  ;;  %v6274_v23 = vpop.f32.mrb[7].mxu1 }
 0x14e   : > { %7265 = vst [vmem:[#allocation8_spill] sm:$0xff] %v6274_v23  ;;  %v5630_v23 = vld [vmem:[%s6010_s6 + $0x478] sm:$0xff]  }
 0x14f   : > { %5280 = vmatmul.mubr.msk.bf16.gmra.mrb[112].mxu0 %vm2388_vm0, %v5601_v15  ;;  %5424 = vmatmul.mubr.msk.bf16.gmra.mrb[112].mxu1 %vm2388_vm0, %v5602_v16  ;;  %v5618_v16 = vld [vmem:[%s6010_s6 + $0x448] sm:$0xff]   ;;  %v5624_v15 = vld [vmem:[%s6010_s6 + $0x460] sm:$0xff]  }
 0x150   : > { %5283 = vmatprep.mubr.msk.bf16.mxu0 %vm2388_vm0, %v5603_v20  ;;  %5427 = vmatprep.mubr.msk.bf16.mxu1 %vm2388_vm0, %v5604_v21 }
 0x152   : > { %v6280_v24 = vpop.f32.mrb[8].mxu0  ;;  %v6282_v25 = vpop.f32.mrb[8].mxu1 }
 0x153   : > { %7266 = vst [vmem:[#allocation9_spill] sm:$0xff] %v6282_v25  ;;  %v6284_v26 = vpop.f32.mrb[9].mxu0  ;;  %v6288_v29 = vpop.f32.mrb[9].mxu1 }
 0x154   : > { %7267 = vst [vmem:[#allocation10_spill] sm:$0xff] %v6288_v29  ;;  %v6290_v30 = vpop.f32.mrb[10].mxu0  ;;  %v6292_v31 = vpop.f32.mrb[10].mxu1 }
 0x155   : > { %7268 = vst [vmem:[#allocation11_spill] sm:$0xff] %v6292_v31  ;;  %v6296_v34 = vpop.f32.mrb[11].mxu0  ;;  %v6298_v35 = vpop.f32.mrb[11].mxu1 }
 0x156   : > { %7269 = vst [vmem:[#allocation12_spill] sm:$0xff] %v6298_v35  ;;  %v5628_v35 = vld [vmem:[%s6010_s6 + $0x470] sm:$0xff]  }
 0x157   : > { %5284 = vmatmul.mubr.msk.bf16.gmra.mrb[116].mxu0 %vm2388_vm0, %v5605_v27  ;;  %5428 = vmatmul.mubr.msk.bf16.gmra.mrb[116].mxu1 %vm2388_vm0, %v5606_v28 }
 0x158   : > { %5287 = vmatprep.mubr.msk.bf16.mxu0 %vm2388_vm0, %v5607_v32  ;;  %5431 = vmatprep.mubr.msk.bf16.mxu1 %vm2388_vm0, %v5608_v33  ;;  %v5619_v32 = vld [vmem:[%s6010_s6 + $0x210] sm:$0xff]  }
 0x159   : > { %v5620_v33 = vld [vmem:[%s6010_s6 + $0x450] sm:$0xff]  }
 0x15a   : > { %v6304_v36 = vpop.f32.mrb[12].mxu0  ;;  %v6306_v37 = vpop.f32.mrb[12].mxu1 }
 0x15b   : > { %7270 = vst [vmem:[#allocation13_spill] sm:$0xff] %v6306_v37  ;;  %v6308_v38 = vpop.f32.mrb[13].mxu0  ;;  %v6312_v41 = vpop.f32.mrb[13].mxu1 }
 0x15c   : > { %7271 = vst [vmem:[#allocation14_spill] sm:$0xff] %v6312_v41  ;;  %v6314_v42 = vpop.f32.mrb[14].mxu0  ;;  %v6316_v43 = vpop.f32.mrb[14].mxu1  ;;  %v5626_v41 = vld [vmem:[%s6010_s6 + $0x468] sm:$0xff]  }
 0x15d   : > { %7272 = vst [vmem:[#allocation15_spill] sm:$0xff] %v6316_v43  ;;  %v6320_v46 = vpop.f32.mrb[15].mxu0  ;;  %v6322_v47 = vpop.f32.mrb[15].mxu1 }
 0x15e   : > { %7273 = vst [vmem:[#allocation16_spill] sm:$0xff] %v6322_v47 }
 0x15f   : > { %5288 = vmatmul.mubr.msk.bf16.gmra.mrb[120].mxu0 %vm2388_vm0, %v5609_v39  ;;  %5432 = vmatmul.mubr.msk.bf16.gmra.mrb[120].mxu1 %vm2388_vm0, %v5610_v40 }
 0x160   : > { %5291 = vmatprep.mubr.msk.bf16.mxu0 %vm2388_vm0, %v5611_v44  ;;  %5435 = vmatprep.mubr.msk.bf16.mxu1 %vm2388_vm0, %v5612_v45  ;;  %v5622_v45 = vld [vmem:[%s6010_s6 + $0x458] sm:$0xff]  }
 0x162   : > { %v6328_v48 = vpop.f32.mrb[16].mxu0  ;;  %v6330_v49 = vpop.f32.mrb[16].mxu1 }
 0x163   : > { %v6332_v50 = vpop.f32.mrb[17].mxu0  ;;  %v6338_v54 = vpop.f32.mrb[17].mxu1 }
 0x164   : > { %v6340_v55 = vpop.f32.mrb[18].mxu0  ;;  %v6344_v57 = vpop.f32.mrb[18].mxu1 }
 0x165   : > { %v6348_v60 = vpop.f32.mrb[19].mxu0  ;;  %v6352_v62 = vpop.f32.mrb[19].mxu1 }
 0x167   : > { %5292 = vmatmul.mubr.msk.bf16.gmra.mrb[124].mxu0 %vm2388_vm0, %v5613_v51  ;;  %5436 = vmatmul.mubr.msk.bf16.gmra.mrb[124].mxu1 %vm2388_vm0, %v5614_v53 }
 0x168   : > { %5295 = vmatprep.mubr.msk.bf16.mxu0 %vm2388_vm0, %v5615_v58  ;;  %5439 = vmatprep.mubr.msk.bf16.mxu1 %vm2388_vm0, %v5616_v59  ;;  %v5621_v59 = vld [vmem:[%s6010_s6 + $0x218] sm:$0xff]  }
 0x16a   : > { %v6360_v3 = vpop.f32.mrb[20].mxu0  ;;  %v6362_v4 = vpop.f32.mrb[20].mxu1 }
 0x16b   : > { %v6364_v8 = vpop.f32.mrb[21].mxu0  ;;  %v6370_v20 = vpop.f32.mrb[21].mxu1 }
 0x16c   : > { %v6372_v21 = vpop.f32.mrb[22].mxu0  ;;  %v6376_v28 = vpop.f32.mrb[22].mxu1 }
 0x16d   : > { %v6380_v39 = vpop.f32.mrb[23].mxu0  ;;  %v6384_v44 = vpop.f32.mrb[23].mxu1 }
 0x16f   : > { %5296 = vmatmul.mubr.msk.bf16.gmra.mrb[128].mxu0 %vm2388_vm0, %v5617_v9  ;;  %5440 = vmatmul.mubr.msk.bf16.gmra.mrb[128].mxu1 %vm2388_vm0, %v5618_v16 }
 0x170   : > { %5299 = vmatprep.mubr.msk.bf16.mxu0 %vm2388_vm0, %v5619_v32  ;;  %5443 = vmatprep.mubr.msk.bf16.mxu1 %vm2388_vm0, %v5620_v33  ;;  %v5623_v33 = vld [vmem:[%s6010_s6 + $0x220] sm:$0xff]  }
 0x172   : > { %v6392_v51 = vpop.f32.mrb[24].mxu0  ;;  %v6394_v53 = vpop.f32.mrb[24].mxu1 }
 0x173   : > { %v6396_v58 = vpop.f32.mrb[25].mxu0  ;;  %v6402_v27 = vpop.f32.mrb[25].mxu1 }
 0x174   : > { %v6404_v9 = vpop.f32.mrb[26].mxu0  ;;  %v6408_v32 = vpop.f32.mrb[26].mxu1 }
 0x175   : > { %v6412_v63 = vpop.f32.mrb[27].mxu0  ;;  %v6416_v40 = vpop.f32.mrb[27].mxu1 }
 0x177   : > { %5300 = vmatmul.mubr.msk.bf16.gmra.mrb[132].mxu0 %vm2388_vm0, %v5621_v59  ;;  %5444 = vmatmul.mubr.msk.bf16.gmra.mrb[132].mxu1 %vm2388_vm0, %v5622_v45 }
 0x178   : > { %5303 = vmatprep.mubr.msk.bf16.mxu0 %vm2388_vm0, %v5623_v33  ;;  %5447 = vmatprep.mubr.msk.bf16.mxu1 %vm2388_vm0, %v5624_v15  ;;  %v5627_v33 = vld [vmem:[%s6010_s6 + $0x230] sm:$0xff]  }
 0x17a   : > { %v6424_v16 = vpop.f32.mrb[28].mxu0  ;;  %v5341_v52 = vpop.f32.mrb[28].mxu1 }
 0x17b   : > { %v6426_v47 = vpop.f32.mrb[29].mxu0  ;;  %v4118_v43 = vmax.f32 %v6304_v36, %v5341_v52  ;;  %v3543_v37 = vpop.f32.mrb[29].mxu1 }
 0x17c   : > { %v6431_v56 = vpop.f32.mrb[30].mxu0  ;;  %v4102_v59 = vmax.f32 %v6308_v38, %v3543_v37  ;;  %v5342_v45 = vpop.f32.mrb[30].mxu1  ;;  %v7275_v38 = vmax.f32 %v6232_v0, %v6330_v49 }
 0x17d   : > { %v6436_v15 = vpop.f32.mrb[31].mxu0  ;;  %v4126_v31 = vmax.f32 %v6314_v42, %v5342_v45  ;;  %v3546_v29 = vpop.f32.mrb[31].mxu1  ;;  %v5629_v45 = vld [vmem:[%s6010_s6 + $0x238] sm:$0xff]  }
 0x17e   : > { %v4110_v25 = vmax.f32 %v6320_v46, %v3546_v29 }
 0x17f   : > { %5304 = vmatmul.mubr.msk.bf16.gmra.mrb[136].mxu0 %vm2388_vm0, %v5625_v61  ;;  %5448 = vmatmul.mubr.msk.bf16.gmra.mrb[136].mxu1 %vm2388_vm0, %v5626_v41  ;;  %v7277_v41 = vmax.f32 %v6236_v2, %v6338_v54 }
 0x180   : > { %5307 = vmatprep.mubr.msk.bf16.mxu0 %vm2388_vm0, %v5627_v33  ;;  %5451 = vmatprep.mubr.msk.bf16.mxu1 %vm2388_vm0, %v5628_v35  ;;  %v7279_v33 = vmax.f32 %v6242_v6, %v6344_v57  ;;  %v7283_v6 = vmax.f32 %v6256_v12, %v6362_v4  ;;  %v7289_v4 = vmax.f32 %v6272_v22, %v6384_v44 }
 0x181   : > { %v7295_v44 = vmax.f32 %v6290_v30, %v6408_v32 }
 0x182   : > { %v5201_v36 = vpop.f32.mrb[32].mxu0  ;;  %v6444_v37 = vpop.f32.mrb[32].mxu1 }
 0x183   : > { %7274 = vst [vmem:[#allocation17_spill] sm:$0xff] %v6444_v37  ;;  %v6449_v52 = vmax.f32 %v7275_v38, %v5201_v36  ;;  %v2983_v42 = vpop.f32.mrb[33].mxu0  ;;  %v6453_v29 = vpop.f32.mrb[33].mxu1  ;;  %v7281_v36 = vmax.f32 %v6248_v10, %v6352_v62  ;;  %v7285_v10 = vmax.f32 %v6260_v14, %v6370_v20  ;;  %v7291_v20 = vmax.f32 %v6280_v24, %v6394_v53 }
 0x184   : > { %7276 = vst [vmem:[#allocation18_spill] sm:$0xff] %v6453_v29  ;;  %v6458_v46 = vmax.f32 %v7277_v41, %v2983_v42  ;;  %v5202_v61 = vpop.f32.mrb[34].mxu0  ;;  %v6460_v35 = vpop.f32.mrb[34].mxu1  ;;  %v7297_v53 = vmax.f32 %v6296_v34, %v6416_v40 }
 0x185   : > { %7278 = vst [vmem:[#allocation19_spill] sm:$0xff] %v6460_v35  ;;  %v6465_v19 = vmax.f32 %v7279_v33, %v5202_v61  ;;  %v2986_v0 = vpop.f32.mrb[35].mxu0  ;;  %v6467_v49 = vpop.f32.mrb[35].mxu1 }
 0x186   : > { %7280 = vst [vmem:[#allocation20_spill] sm:$0xff] %v6467_v49  ;;  %v6472_v38 = vmax.f32 %v7281_v36, %v2986_v0 }
 0x187   : > { %5308 = vmatmul.mubr.msk.bf16.gmra.mrb[140].mxu0 %vm2388_vm0, %v5629_v45  ;;  %5452 = vmatmul.mubr.msk.bf16.gmra.mrb[140].mxu1 %vm2388_vm0, %v5630_v23  ;;  %v7287_v23 = vmax.f32 %v6266_v18, %v6376_v28  ;;  %v7293_v28 = vmax.f32 %v6284_v26, %v6402_v27 }
 0x18a   : > { %v5205_v2 = vpop.f32.mrb[36].mxu0  ;;  %v6476_v54 = vpop.f32.mrb[36].mxu1 }
 0x18b   : > { %7282 = vst [vmem:[#allocation21_spill] sm:$0xff] %v6476_v54  ;;  %v6481_v57 = vmax.f32 %v7283_v6, %v5205_v2  ;;  %v2999_v42 = vpop.f32.mrb[37].mxu0  ;;  %v6483_v41 = vpop.f32.mrb[37].mxu1 }
 0x18c   : > { %7284 = vst [vmem:[#allocation22_spill] sm:$0xff] %v6483_v41  ;;  %v6488_v62 = vmax.f32 %v7285_v10, %v2999_v42  ;;  %v5206_v61 = vpop.f32.mrb[38].mxu0  ;;  %v6490_v45 = vpop.f32.mrb[38].mxu1 }
 0x18d   : > { %7286 = vst [vmem:[#allocation23_spill] sm:$0xff] %v6490_v45  ;;  %v6495_v33 = vmax.f32 %v7287_v23, %v5206_v61  ;;  %v3002_v0 = vpop.f32.mrb[39].mxu0  ;;  %v6497_v12 = vpop.f32.mrb[39].mxu1 }
 0x18e   : > { %7288 = vst [vmem:[#allocation24_spill] sm:$0xff] %v6497_v12  ;;  %v6502_v36 = vmax.f32 %v7289_v4, %v3002_v0 }
 0x192   : > { %v5209_v2 = vpop.f32.mrb[40].mxu0  ;;  %v6504_v14 = vpop.f32.mrb[40].mxu1 }
 0x193   : > { %7290 = vst [vmem:[#allocation25_spill] sm:$0xff] %v6504_v14  ;;  %v6509_v6 = vmax.f32 %v7291_v20, %v5209_v2  ;;  %v3015_v42 = vpop.f32.mrb[41].mxu0  ;;  %v6511_v18 = vpop.f32.mrb[41].mxu1 }
 0x194   : > { %7292 = vst [vmem:[#allocation26_spill] sm:$0xff] %v6511_v18  ;;  %v6516_v10 = vmax.f32 %v7293_v28, %v3015_v42  ;;  %v5210_v61 = vpop.f32.mrb[42].mxu0  ;;  %v6518_v22 = vpop.f32.mrb[42].mxu1 }
 0x195   : > { %7294 = vst [vmem:[#allocation27_spill] sm:$0xff] %v6518_v22  ;;  %v6523_v23 = vmax.f32 %v7295_v44, %v5210_v61  ;;  %v3018_v0 = vpop.f32.mrb[43].mxu0  ;;  %v6525_v24 = vpop.f32.mrb[43].mxu1 }
 0x196   : > { %7296 = vst [vmem:[#allocation28_spill] sm:$0xff] %v6525_v24  ;;  %v6530_v4 = vmax.f32 %v7297_v53, %v3018_v0 }
 0x19a   : > { %v5213_v2 = vpop.f32.mrb[44].mxu0  ;;  %v6532_v26 = vpop.f32.mrb[44].mxu1 }
 0x19b   : > { %7298 = vst [vmem:[#allocation29_spill] sm:$0xff] %v6532_v26  ;;  %v6534_v27 = vmax.f32 %v4118_v43, %v5213_v2  ;;  %v3031_v20 = vpop.f32.mrb[45].mxu0  ;;  %v6536_v42 = vpop.f32.mrb[45].mxu1 }
 0x19c   : > { %7299 = vst [vmem:[#allocation30_spill] sm:$0xff] %v6536_v42  ;;  %v6538_v28 = vmax.f32 %v4102_v59, %v3031_v20  ;;  %v5214_v30 = vpop.f32.mrb[46].mxu0  ;;  %v6540_v32 = vpop.f32.mrb[46].mxu1 }
 0x19d   : > { %7300 = vst [vmem:[#allocation31_spill] sm:$0xff] %v6540_v32  ;;  %v6542_v61 = vmax.f32 %v4126_v31, %v5214_v30  ;;  %v3034_v44 = vpop.f32.mrb[47].mxu0  ;;  %v6544_v24 = vpop.f32.mrb[47].mxu1 }
 0x19e   : > { %7301 = vst [vmem:[#allocation32_spill] sm:$0xff] %v6544_v24  ;;  %v6546_v34 = vmax.f32 %v4110_v25, %v3034_v44 }
 0x1a2   : > { %v6548_v40 = vpop.f32.mrb[48].mxu0  ;;  %v6550_v0 = vpop.f32.mrb[48].mxu1 }
 0x1a3   : > { %v6554_v53 = vpop.f32.mrb[49].mxu0  ;;  %v4024_v59 = vmax.f32 %v6449_v52, %v6550_v0  ;;  %v6558_v2 = vpop.f32.mrb[49].mxu1 }
 0x1a4   : > { %v6562_v20 = vpop.f32.mrb[50].mxu0  ;;  %v4008_v25 = vmax.f32 %v6458_v46, %v6558_v2  ;;  %v6566_v30 = vpop.f32.mrb[50].mxu1 }
 0x1a5   : > { %v6570_v43 = vpop.f32.mrb[51].mxu0  ;;  %v4032_v52 = vmax.f32 %v6465_v19, %v6566_v30  ;;  %v6574_v0 = vpop.f32.mrb[51].mxu1 }
 0x1a6   : > { %v4016_v24 = vmax.f32 %v6472_v38, %v6574_v0 }
 0x1aa   : > { %v6580_v32 = vpop.f32.mrb[52].mxu0  ;;  %v5365_v46 = vpop.f32.mrb[52].mxu1 }
 0x1ab   : > { %v6584_v44 = vpop.f32.mrb[53].mxu0  ;;  %v4056_v42 = vmax.f32 %v6481_v57, %v5365_v46  ;;  %v3639_v26 = vpop.f32.mrb[53].mxu1 }
 0x1ac   : > { %v6589_v30 = vpop.f32.mrb[54].mxu0  ;;  %v4040_v31 = vmax.f32 %v6488_v62, %v3639_v26  ;;  %v5366_v22 = vpop.f32.mrb[54].mxu1 }
 0x1ad   : > { %v6594_v0 = vpop.f32.mrb[55].mxu0  ;;  %v4064_v2 = vmax.f32 %v6495_v33, %v5366_v22  ;;  %v3642_v18 = vpop.f32.mrb[55].mxu1 }
 0x1ae   : > { %v4048_v46 = vmax.f32 %v6502_v36, %v3642_v18 }
 0x1b2   : > { %v6600_v14 = vpop.f32.mrb[56].mxu0  ;;  %v5369_v19 = vpop.f32.mrb[56].mxu1 }
 0x1b3   : > { %v6604_v26 = vpop.f32.mrb[57].mxu0  ;;  %v4088_v38 = vmax.f32 %v6509_v6, %v5369_v19  ;;  %v3655_v12 = vpop.f32.mrb[57].mxu1 }
 0x1b4   : > { %v6609_v22 = vpop.f32.mrb[58].mxu0  ;;  %v4072_v57 = vmax.f32 %v6516_v10, %v3655_v12  ;;  %v5370_v45 = vpop.f32.mrb[58].mxu1 }
 0x1b5   : > { %v6614_v18 = vpop.f32.mrb[59].mxu0  ;;  %v4096_v62 = vmax.f32 %v6523_v23, %v5370_v45  ;;  %v3658_v41 = vpop.f32.mrb[59].mxu1 }
 0x1b6   : > { %v4080_v19 = vmax.f32 %v6530_v4, %v3658_v41 }
 0x1ba   : > { %v6620_v54 = vpop.f32.mrb[60].mxu0  ;;  %v5373_v33 = vpop.f32.mrb[60].mxu1 }
 0x1bb   : > { %v6624_v10 = vpop.f32.mrb[61].mxu0  ;;  %v4120_v36 = vmax.f32 %v6534_v27, %v5373_v33  ;;  %v3671_v17 = vpop.f32.mrb[61].mxu1 }
 0x1bc   : > { %v6629_v23 = vpop.f32.mrb[62].mxu0  ;;  %v4104_v6 = vmax.f32 %v6538_v28, %v3671_v17  ;;  %v5374_v13 = vpop.f32.mrb[62].mxu1 }
 0x1bd   : > { %v6634_v4 = vpop.f32.mrb[63].mxu0  ;;  %v4128_v12 = vmax.f32 %v6542_v61, %v5374_v13  ;;  %v3674_v49 = vpop.f32.mrb[63].mxu1 }
 0x1be   : > { %v4112_v33 = vmax.f32 %v6546_v34, %v3674_v49 }
 0x1c2   : > { %v5233_v35 = vpop.f32.mrb[64].mxu0  ;;  %v6640_v45 = vpop.f32.mrb[64].mxu1 }
 0x1c3   : > { %7302 = vst [vmem:[#allocation33_spill] sm:$0xff] %v6640_v45  ;;  %v6642_v11 = vmax.f32 %v4024_v59, %v5233_v35  ;;  %v3111_v17 = vpop.f32.mrb[65].mxu0  ;;  %v6644_v28 = vpop.f32.mrb[65].mxu1 }
 0x1c4   : > { %7303 = vst [vmem:[#allocation34_spill] sm:$0xff] %v6644_v28  ;;  %v6646_v29 = vmax.f32 %v4008_v25, %v3111_v17  ;;  %v5234_v41 = vpop.f32.mrb[66].mxu0  ;;  %v6648_v7 = vpop.f32.mrb[66].mxu1 }
 0x1c5   : > { %7304 = vst [vmem:[#allocation35_spill] sm:$0xff] %v6648_v7  ;;  %v6650_v13 = vmax.f32 %v4032_v52, %v5234_v41  ;;  %v3114_v61 = vpop.f32.mrb[67].mxu0  ;;  %v6652_v37 = vpop.f32.mrb[67].mxu1 }
 0x1c6   : > { %7305 = vst [vmem:[#allocation36_spill] sm:$0xff] %v6652_v37  ;;  %v6654_v27 = vmax.f32 %v4016_v24, %v3114_v61 }
 0x1ca   : > { %v5237_v49 = vpop.f32.mrb[68].mxu0  ;;  %v6656_v34 = vpop.f32.mrb[68].mxu1 }
 0x1cb   : > { %7306 = vst [vmem:[#allocation37_spill] sm:$0xff] %v6656_v34  ;;  %v6658_v35 = vmax.f32 %v4056_v42, %v5237_v49  ;;  %v3127_v59 = vpop.f32.mrb[69].mxu0  ;;  %v6660_v45 = vpop.f32.mrb[69].mxu1 }
 0x1cc   : > { %7307 = vst [vmem:[#allocation38_spill] sm:$0xff] %v6660_v45  ;;  %v6662_v25 = vmax.f32 %v4040_v31, %v3127_v59  ;;  %v5238_v17 = vpop.f32.mrb[70].mxu0  ;;  %v6664_v28 = vpop.f32.mrb[70].mxu1 }
 0x1cd   : > { %7308 = vst [vmem:[#allocation39_spill] sm:$0xff] %v6664_v28  ;;  %v6666_v52 = vmax.f32 %v4064_v2, %v5238_v17  ;;  %v3130_v41 = vpop.f32.mrb[71].mxu0  ;;  %v6668_v7 = vpop.f32.mrb[71].mxu1 }
 0x1ce   : > { %7309 = vst [vmem:[#allocation40_spill] sm:$0xff] %v6668_v7  ;;  %v6670_v24 = vmax.f32 %v4048_v46, %v3130_v41 }
 0x1d2   : > { %v5241_v61 = vpop.f32.mrb[72].mxu0  ;;  %v6672_v37 = vpop.f32.mrb[72].mxu1 }
 0x1d3   : > { %7310 = vst [vmem:[#allocation41_spill] sm:$0xff] %v6672_v37  ;;  %v6674_v42 = vmax.f32 %v4088_v38, %v5241_v61  ;;  %v3143_v49 = vpop.f32.mrb[73].mxu0  ;;  %v6676_v34 = vpop.f32.mrb[73].mxu1 }
 0x1d4   : > { %7311 = vst [vmem:[#allocation42_spill] sm:$0xff] %v6676_v34  ;;  %v6678_v31 = vmax.f32 %v4072_v57, %v3143_v49  ;;  %v5242_v59 = vpop.f32.mrb[74].mxu0  ;;  %v6680_v45 = vpop.f32.mrb[74].mxu1 }
 0x1d5   : > { %7312 = vst [vmem:[#allocation43_spill] sm:$0xff] %v6680_v45  ;;  %v6682_v2 = vmax.f32 %v4096_v62, %v5242_v59  ;;  %v3146_v17 = vpop.f32.mrb[75].mxu0  ;;  %v6684_v28 = vpop.f32.mrb[75].mxu1 }
 0x1d6   : > { %7313 = vst [vmem:[#allocation44_spill] sm:$0xff] %v6684_v28  ;;  %v6686_v46 = vmax.f32 %v4080_v19, %v3146_v17 }
 0x1da   : > { %v5245_v41 = vpop.f32.mrb[76].mxu0  ;;  %v6688_v7 = vpop.f32.mrb[76].mxu1 }
 0x1db   : > { %v6690_v38 = vmax.f32 %v4120_v36, %v5245_v41  ;;  %v3159_v61 = vpop.f32.mrb[77].mxu0  ;;  %v6692_v37 = vpop.f32.mrb[77].mxu1  ;;  %v7316_v36 = vmax.f32 %v6328_v48, %v6548_v40  ;;  %v7318_v48 = vmax.f32 %v6340_v55, %v6562_v20  ;;  %v7320_v55 = vmax.f32 %v6360_v3, %v6580_v32 }
 0x1dc   : > { %v6694_v57 = vmax.f32 %v4104_v6, %v3159_v61  ;;  %v5246_v49 = vpop.f32.mrb[78].mxu0  ;;  %v6696_v34 = vpop.f32.mrb[78].mxu1 }
 0x1dd   : > { %7314 = vst [vmem:[#allocation45_spill] sm:$0xff] %v6696_v34  ;;  %v6698_v62 = vmax.f32 %v4128_v12, %v5246_v49  ;;  %v3162_v59 = vpop.f32.mrb[79].mxu0  ;;  %v6700_v45 = vpop.f32.mrb[79].mxu1  ;;  %v7317_v12 = vmax.f32 %v6332_v50, %v6554_v53  ;;  %v7319_v50 = vmax.f32 %v6348_v60, %v6570_v43 }
 0x1de   : > { %7315 = vst [vmem:[#allocation46_spill] sm:$0xff] %v6700_v45  ;;  %v6702_v19 = vmax.f32 %v4112_v33, %v3162_v59 }
 0x1e2   : > { %v5249_v17 = vpop.f32.mrb[80].mxu0  ;;  %v6704_v28 = vpop.f32.mrb[80].mxu1 }
 0x1e3   : > { %v6709_v41 = vmax.f32 %v7316_v36, %v5249_v17  ;;  %v3175_v6 = vpop.f32.mrb[81].mxu0  ;;  %v4026_v61 = vmax.f32 %v6642_v11, %v6704_v28  ;;  %v6713_v34 = vpop.f32.mrb[81].mxu1 }
 0x1e4   : > { %v6718_v49 = vmax.f32 %v7317_v12, %v3175_v6  ;;  %v5250_v33 = vpop.f32.mrb[82].mxu0  ;;  %v4010_v59 = vmax.f32 %v6646_v29, %v6713_v34  ;;  %v6722_v45 = vpop.f32.mrb[82].mxu1  ;;  %v7321_v12 = vmax.f32 %v6364_v8, %v6584_v44 }
 0x1e5   : > { %v6727_v40 = vmax.f32 %v7318_v48, %v5250_v33  ;;  %v3178_v17 = vpop.f32.mrb[83].mxu0  ;;  %v4034_v11 = vmax.f32 %v6650_v13, %v6722_v45  ;;  %v6731_v28 = vpop.f32.mrb[83].mxu1  ;;  %v7322_v48 = vmax.f32 %v6372_v21, %v6589_v30 }
 0x1e6   : > { %v6736_v53 = vmax.f32 %v7319_v50, %v3178_v17  ;;  %v4018_v29 = vmax.f32 %v6654_v27, %v6731_v28 }
 0x1ea   : > { %v5253_v34 = vpop.f32.mrb[84].mxu0  ;;  %v5397_v36 = vpop.f32.mrb[84].mxu1 }
 0x1eb   : > { %v6743_v20 = vmax.f32 %v7320_v55, %v5253_v34  ;;  %v3191_v6 = vpop.f32.mrb[85].mxu0  ;;  %v4058_v45 = vmax.f32 %v6658_v35, %v5397_v36  ;;  %v3767_v13 = vpop.f32.mrb[85].mxu1  ;;  %v7323_v35 = vmax.f32 %v6380_v39, %v6594_v0 }
 0x1ec   : > { %v6749_v60 = vmax.f32 %v7321_v12, %v3191_v6  ;;  %v5254_v43 = vpop.f32.mrb[86].mxu0  ;;  %v4042_v33 = vmax.f32 %v6662_v25, %v3767_v13  ;;  %v5398_v27 = vpop.f32.mrb[86].mxu1  ;;  %v7324_v25 = vmax.f32 %v6392_v51, %v6600_v14  ;;  %v7326_v13 = vmax.f32 %v6404_v9, %v6609_v22 }
 0x1ed   : > { %v6755_v17 = vmax.f32 %v7322_v48, %v5254_v43  ;;  %v3194_v3 = vpop.f32.mrb[87].mxu0  ;;  %v4066_v32 = vmax.f32 %v6666_v52, %v5398_v27  ;;  %v3770_v28 = vpop.f32.mrb[87].mxu1  ;;  %v7325_v52 = vmax.f32 %v6396_v58, %v6604_v26 }
 0x1ee   : > { %v6761_v50 = vmax.f32 %v7323_v35, %v3194_v3  ;;  %v4050_v8 = vmax.f32 %v6670_v24, %v3770_v28 }
 0x1f2   : > { %v5257_v44 = vpop.f32.mrb[88].mxu0  ;;  %v5401_v34 = vpop.f32.mrb[88].mxu1 }
 0x1f3   : > { %v6767_v36 = vmax.f32 %v7324_v25, %v5257_v44  ;;  %v3207_v21 = vpop.f32.mrb[89].mxu0  ;;  %v4090_v30 = vmax.f32 %v6674_v42, %v5401_v34  ;;  %v3783_v55 = vpop.f32.mrb[89].mxu1  ;;  %v7327_v42 = vmax.f32 %v6412_v63, %v6614_v18  ;;  %v7330_v44 = vmax.f32 %v6431_v56, %v6629_v23 }
 0x1f4   : > { %v6773_v6 = vmax.f32 %v7325_v52, %v3207_v21  ;;  %v5258_v39 = vpop.f32.mrb[90].mxu0  ;;  %v4074_v0 = vmax.f32 %v6678_v31, %v3783_v55  ;;  %v5402_v24 = vpop.f32.mrb[90].mxu1  ;;  %v7328_v31 = vmax.f32 %v6424_v16, %v6620_v54 }
 0x1f5   : > { %v6779_v12 = vmax.f32 %v7326_v13, %v5258_v39  ;;  %v3210_v51 = vpop.f32.mrb[91].mxu0  ;;  %v4098_v14 = vmax.f32 %v6682_v2, %v5402_v24  ;;  %v3786_v43 = vpop.f32.mrb[91].mxu1  ;;  %v7329_v2 = vmax.f32 %v6426_v47, %v6624_v10 }
 0x1f6   : > { %v6785_v27 = vmax.f32 %v7327_v42, %v3210_v51  ;;  %v4082_v58 = vmax.f32 %v6686_v46, %v3786_v43 }
 0x1fa   : > { %v5261_v26 = vpop.f32.mrb[92].mxu0  ;;  %v5405_v48 = vpop.f32.mrb[92].mxu1 }
 0x1fb   : > { %v6791_v3 = vmax.f32 %v7328_v31, %v5261_v26  ;;  %v3223_v9 = vpop.f32.mrb[93].mxu0  ;;  %v4122_v22 = vmax.f32 %v6690_v38, %v5405_v48  ;;  %v3799_v28 = vpop.f32.mrb[93].mxu1  ;;  %v7331_v38 = vmax.f32 %v6436_v15, %v6634_v4 }
 0x1fc   : > { %v6797_v35 = vmax.f32 %v7329_v2, %v3223_v9  ;;  %v5262_v63 = vpop.f32.mrb[94].mxu0  ;;  %v4106_v18 = vmax.f32 %v6694_v57, %v3799_v28  ;;  %v5406_v46 = vpop.f32.mrb[94].mxu1 }
 0x1fd   : > { %v6803_v34 = vmax.f32 %v7330_v44, %v5262_v63  ;;  %v3226_v16 = vpop.f32.mrb[95].mxu0  ;;  %v4130_v54 = vmax.f32 %v6698_v62, %v5406_v46  ;;  %v3802_v25 = vpop.f32.mrb[95].mxu1 }
 0x1fe   : > { %v6809_v21 = vmax.f32 %v7331_v38, %v3226_v16  ;;  %v4114_v47 = vmax.f32 %v6702_v19, %v3802_v25 }
 0x202   : > { %v5265_v10 = vpop.f32.mrb[96].mxu0  ;;  %v6812_v55 = vpop.f32.mrb[96].mxu1 }
 0x203   : > { %v6814_v57 = vmax.f32 %v4026_v61, %v5265_v10  ;;  %v3239_v52 = vpop.f32.mrb[97].mxu0  ;;  %v6816_v56 = vpop.f32.mrb[97].mxu1 }
 0x204   : > { %v6818_v23 = vmax.f32 %v4010_v59, %v3239_v52  ;;  %v5266_v39 = vpop.f32.mrb[98].mxu0  ;;  %v6820_v62 = vpop.f32.mrb[98].mxu1 }
 0x205   : > { %v6822_v24 = vmax.f32 %v4034_v11, %v5266_v39  ;;  %v3242_v15 = vpop.f32.mrb[99].mxu0  ;;  %v6824_v4 = vpop.f32.mrb[99].mxu1 }
 0x206   : > { %7332 = vst [vmem:[#allocation47_spill] sm:$0xff] %v6818_v23  ;;  %v6826_v13 = vmax.f32 %v4018_v29, %v3242_v15  ;;  %v7347_v23 = vld [vmem:[#allocation19_spill] sm:$0xff] }
 0x207   : > { %7333 = vst [vmem:[#allocation48_spill] sm:$0xff] %v6822_v24  ;;  %v7349_v24 = vld [vmem:[#allocation20_spill] sm:$0xff] }
 0x20a   : > { %v5269_v19 = vpop.f32.mrb[100].mxu0  ;;  %v6828_v51 = vpop.f32.mrb[100].mxu1 }
 0x20b   : > { %v6830_v61 = vmax.f32 %v4058_v45, %v5269_v19  ;;  %v3255_v43 = vpop.f32.mrb[101].mxu0  ;;  %v6832_v42 = vpop.f32.mrb[101].mxu1 }
 0x20c   : > { %v6834_v59 = vmax.f32 %v4042_v33, %v3255_v43  ;;  %v5270_v26 = vpop.f32.mrb[102].mxu0  ;;  %v6836_v48 = vpop.f32.mrb[102].mxu1 }
 0x20d   : > { %v6838_v11 = vmax.f32 %v4066_v32, %v5270_v26  ;;  %v3258_v31 = vpop.f32.mrb[103].mxu0  ;;  %v6840_v9 = vpop.f32.mrb[103].mxu1 }
 0x20e   : > { %v6842_v29 = vmax.f32 %v4050_v8, %v3258_v31 }
 0x20f   : > { %7334 = vst [vmem:[#allocation49_spill] sm:$0xff] %v6838_v11  ;;  %v7362_v11 = vld [vmem:[#allocation23_spill] sm:$0xff] }
 0x212   : > { %v5273_v28 = vpop.f32.mrb[104].mxu0  ;;  %v6844_v2 = vpop.f32.mrb[104].mxu1 }
 0x213   : > { %v6846_v45 = vmax.f32 %v4090_v30, %v5273_v28  ;;  %v3271_v63 = vpop.f32.mrb[105].mxu0  ;;  %v6848_v46 = vpop.f32.mrb[105].mxu1 }
 0x214   : > { %v6850_v33 = vmax.f32 %v4074_v0, %v3271_v63  ;;  %v5274_v44 = vpop.f32.mrb[106].mxu0  ;;  %v6852_v16 = vpop.f32.mrb[106].mxu1 }
 0x215   : > { %v6854_v32 = vmax.f32 %v4098_v14, %v5274_v44  ;;  %v3274_v25 = vpop.f32.mrb[107].mxu0  ;;  %v6856_v38 = vpop.f32.mrb[107].mxu1 }
 0x216   : > { %v6858_v8 = vmax.f32 %v4082_v58, %v3274_v25 }
 0x217   : > { %7335 = vst [vmem:[#allocation50_spill] sm:$0xff] %v6854_v32  ;;  %v7377_v32 = vld [vmem:[#allocation27_spill] sm:$0xff] }
 0x21a   : > { %v5277_v10 = vpop.f32.mrb[108].mxu0  ;;  %v6860_v52 = vpop.f32.mrb[108].mxu1 }
 0x21b   : > { %7336 = vst [vmem:[#allocation51_spill] sm:$0xff] %v6860_v52  ;;  %v6862_v30 = vmax.f32 %v4122_v22, %v5277_v10  ;;  %v3287_v39 = vpop.f32.mrb[109].mxu0  ;;  %v6864_v15 = vpop.f32.mrb[109].mxu1 }
 0x21c   : > { %7337 = vst [vmem:[#allocation52_spill] sm:$0xff] %v6864_v15  ;;  %v6866_v0 = vmax.f32 %v4106_v18, %v3287_v39  ;;  %v5278_v19 = vpop.f32.mrb[110].mxu0  ;;  %v6868_v43 = vpop.f32.mrb[110].mxu1  ;;  %v7343_v39 = vld [vmem:[#allocation17_spill] sm:$0xff]  ;;  %v7344_v15 = vld [vmem:[#allocation3_spill] sm:$0xff] }
 0x21d   : > { %7338 = vst [vmem:[#allocation53_spill] sm:$0xff] %v6868_v43  ;;  %v6870_v14 = vmax.f32 %v4130_v54, %v5278_v19  ;;  %v3290_v26 = vpop.f32.mrb[111].mxu0  ;;  %v6872_v31 = vpop.f32.mrb[111].mxu1 }
 0x21e   : > { %7340 = vst [vmem:[#allocation55_spill] sm:$0xff] %v6872_v31  ;;  %v6874_v58 = vmax.f32 %v4114_v47, %v3290_v26 }
 0x21f   : > { %7339 = vst [vmem:[#allocation54_spill] sm:$0xff] %v6870_v14 }
 0x222   : > { %v5281_v28 = vpop.f32.mrb[112].mxu0  ;;  %v6876_v63 = vpop.f32.mrb[112].mxu1 }
 0x223   : > { %v4152_v22 = vmax.f32 %v6709_v41, %v5281_v28  ;;  %v3303_v44 = vpop.f32.mrb[113].mxu0  ;;  %v6881_v25 = vpop.f32.mrb[113].mxu1  ;;  %v7348_v41 = vld [vmem:[#allocation33_spill] sm:$0xff] }
 0x224   : > { %7341 = vst [vmem:[#allocation56_spill] sm:$0xff] %v6881_v25  ;;  %v4136_v10 = vmax.f32 %v6718_v49, %v3303_v44  ;;  %v5282_v54 = vpop.f32.mrb[114].mxu0  ;;  %v6886_v19 = vpop.f32.mrb[114].mxu1 }
 0x225   : > { %7342 = vst [vmem:[#allocation57_spill] sm:$0xff] %v6886_v19  ;;  %v4153_v47 = vmax.f32 %v4152_v22, %v6234_v1  ;;  %v4160_v26 = vmax.f32 %v6727_v40, %v5282_v54  ;;  %v3306_v31 = vpop.f32.mrb[115].mxu0  ;;  %v6892_v28 = vpop.f32.mrb[115].mxu1  ;;  %v7345_v1 = vld [vmem:[#allocation18_spill] sm:$0xff]  ;;  %v7346_v40 = vld [vmem:[#allocation4_spill] sm:$0xff] }
 0x226   : > { %v4137_v18 = vmax.f32 %v4136_v10, %v6240_v5  ;;  %v4144_v49 = vmax.f32 %v6736_v53, %v3306_v31  ;;  %v7350_v31 = vld [vmem:[#allocation34_spill] sm:$0xff] }
 0x227   : > { %v4154_v43 = vmax.f32 %v4153_v47, %v7343_v39  ;;  %v4161_v25 = vmax.f32 %v4160_v26, %v7344_v15 }
 0x228   : > { %v4138_v22 = vmax.f32 %v4137_v18, %v7345_v1  ;;  %v4145_v54 = vmax.f32 %v4144_v49, %v7346_v40  ;;  %v7354_v1 = vld [vmem:[#allocation36_spill] sm:$0xff]  ;;  %v7355_v40 = vld [vmem:[#allocation5_spill] sm:$0xff] }
 0x229   : > { %v4162_v52 = vmax.f32 %v4161_v25, %v7347_v23  ;;  %v6904_v19 = vmax.f32 %v4154_v43, %v7348_v41  ;;  %v7352_v43 = vld [vmem:[#allocation35_spill] sm:$0xff]  ;;  %v7361_v23 = vld [vmem:[#allocation8_spill] sm:$0xff] }
 0x22a   : > { %v4146_v5 = vmax.f32 %v4145_v54, %v7349_v24  ;;  %v5285_v10 = vpop.f32.mrb[116].mxu0  ;;  %v6907_v53 = vpop.f32.mrb[116].mxu1  ;;  %v6910_v44 = vmax.f32 %v4138_v22, %v7350_v31 }
 0x22b   : > { %v4184_v39 = vmax.f32 %v6743_v20, %v5285_v10  ;;  %v3319_v15 = vpop.f32.mrb[117].mxu0  ;;  %v6915_v47 = vpop.f32.mrb[117].mxu1  ;;  %v6920_v25 = vmax.f32 %v4162_v52, %v7352_v43  ;;  %v7357_v43 = vld [vmem:[#allocation6_spill] sm:$0xff] }
 0x22c   : > { %7351 = vst [vmem:[#allocation17_spill] sm:$0xff] %v6915_v47  ;;  %v4168_v24 = vmax.f32 %v6749_v60, %v3319_v15  ;;  %v5286_v26 = vpop.f32.mrb[118].mxu0  ;;  %v6925_v49 = vpop.f32.mrb[118].mxu1  ;;  %v6930_v22 = vmax.f32 %v4146_v5, %v7354_v1  ;;  %v7359_v1 = vld [vmem:[#allocation7_spill] sm:$0xff]  ;;  %v7360_v60 = vld [vmem:[#allocation22_spill] sm:$0xff]  ;;  %v7363_v47 = vld [vmem:[#allocation37_spill] sm:$0xff] }
 0x22d   : > { %7353 = vst [vmem:[#allocation3_spill] sm:$0xff] %v6925_v49  ;;  %v4185_v54 = vmax.f32 %v4184_v39, %v7355_v40  ;;  %v4192_v10 = vmax.f32 %v6755_v17, %v5286_v26  ;;  %v3322_v52 = vpop.f32.mrb[119].mxu0  ;;  %v6936_v31 = vpop.f32.mrb[119].mxu1  ;;  %v7358_v17 = vld [vmem:[#allocation21_spill] sm:$0xff] }
 0x22e   : > { %7356 = vst [vmem:[#allocation18_spill] sm:$0xff] %v6936_v31  ;;  %v4169_v41 = vmax.f32 %v4168_v24, %v7357_v43  ;;  %v4176_v18 = vmax.f32 %v6761_v50, %v3322_v52  ;;  %v7364_v50 = vld [vmem:[#allocation24_spill] sm:$0xff]  ;;  %v7365_v31 = vld [vmem:[#allocation38_spill] sm:$0xff] }
 0x22f   : > { %v4186_v26 = vmax.f32 %v4185_v54, %v7358_v17  ;;  %v4193_v40 = vmax.f32 %v4192_v10, %v7359_v1  ;;  %v7369_v17 = vld [vmem:[#allocation40_spill] sm:$0xff]  ;;  %v7370_v1 = vld [vmem:[#allocation9_spill] sm:$0xff] }
 0x230   : > { %v4170_v20 = vmax.f32 %v4169_v41, %v7360_v60  ;;  %v4177_v49 = vmax.f32 %v4176_v18, %v7361_v23 }
 0x231   : > { %v4194_v15 = vmax.f32 %v4193_v40, %v7362_v11  ;;  %v6952_v24 = vmax.f32 %v4186_v26, %v7363_v47  ;;  %v7367_v47 = vld [vmem:[#allocation39_spill] sm:$0xff]  ;;  %v7376_v11 = vld [vmem:[#allocation12_spill] sm:$0xff] }
 0x232   : > { %v4178_v52 = vmax.f32 %v4177_v49, %v7364_v50  ;;  %v5289_v43 = vpop.f32.mrb[120].mxu0  ;;  %v6955_v5 = vpop.f32.mrb[120].mxu1  ;;  %v6958_v39 = vmax.f32 %v4170_v20, %v7365_v31 }
 0x233   : > { %v4216_v54 = vmax.f32 %v6767_v36, %v5289_v43  ;;  %v3335_v10 = vpop.f32.mrb[121].mxu0  ;;  %v6963_v18 = vpop.f32.mrb[121].mxu1  ;;  %v6968_v23 = vmax.f32 %v4194_v15, %v7367_v47  ;;  %v7372_v47 = vld [vmem:[#allocation10_spill] sm:$0xff] }
 0x234   : > { %7366 = vst [vmem:[#allocation4_spill] sm:$0xff] %v6963_v18  ;;  %v4200_v49 = vmax.f32 %v6773_v6, %v3335_v10  ;;  %v5290_v60 = vpop.f32.mrb[122].mxu0  ;;  %v6973_v31 = vpop.f32.mrb[122].mxu1  ;;  %v6978_v26 = vmax.f32 %v4178_v52, %v7369_v17  ;;  %v7374_v17 = vld [vmem:[#allocation11_spill] sm:$0xff]  ;;  %v7375_v6 = vld [vmem:[#allocation26_spill] sm:$0xff]  ;;  %v7378_v18 = vld [vmem:[#allocation41_spill] sm:$0xff] }
 0x235   : > { %7368 = vst [vmem:[#allocation19_spill] sm:$0xff] %v6973_v31  ;;  %v4217_v40 = vmax.f32 %v4216_v54, %v7370_v1  ;;  %v4224_v50 = vmax.f32 %v6779_v12, %v5290_v60  ;;  %v3338_v15 = vpop.f32.mrb[123].mxu0  ;;  %v6984_v43 = vpop.f32.mrb[123].mxu1  ;;  %v7373_v12 = vld [vmem:[#allocation25_spill] sm:$0xff]  ;;  %v7380_v54 = vld [vmem:[#allocation42_spill] sm:$0xff] }
 0x236   : > { %7371 = vst [vmem:[#allocation33_spill] sm:$0xff] %v6984_v43  ;;  %v4201_v20 = vmax.f32 %v4200_v49, %v7372_v47  ;;  %v4208_v41 = vmax.f32 %v6785_v27, %v3338_v15  ;;  %v7379_v27 = vld [vmem:[#allocation28_spill] sm:$0xff] }
 0x237   : > { %v4218_v60 = vmax.f32 %v4217_v40, %v7373_v12  ;;  %v4225_v1 = vmax.f32 %v4224_v50, %v7374_v17  ;;  %v7383_v12 = vld [vmem:[#allocation44_spill] sm:$0xff]  ;;  %v7384_v17 = vld [vmem:[#allocation13_spill] sm:$0xff] }
 0x238   : > { %v4202_v36 = vmax.f32 %v4201_v20, %v7375_v6  ;;  %v4209_v31 = vmax.f32 %v4208_v41, %v7376_v11 }
 0x239   : > { %v4226_v10 = vmax.f32 %v4225_v1, %v7377_v32  ;;  %v7000_v49 = vmax.f32 %v4218_v60, %v7378_v18  ;;  %v7381_v18 = vld [vmem:[#allocation43_spill] sm:$0xff]  ;;  %v7389_v32 = vld [vmem:[#allocation16_spill] sm:$0xff] }
 0x23a   : > { %v4210_v15 = vmax.f32 %v4209_v31, %v7379_v27  ;;  %v5293_v47 = vpop.f32.mrb[124].mxu0  ;;  %v7003_v52 = vpop.f32.mrb[124].mxu1  ;;  %v7006_v43 = vmax.f32 %v4202_v36, %v7380_v54 }
 0x23b   : > { %v4248_v40 = vmax.f32 %v6791_v3, %v5293_v47  ;;  %v3351_v50 = vpop.f32.mrb[125].mxu0  ;;  %v7011_v11 = vpop.f32.mrb[125].mxu1  ;;  %v7016_v20 = vmax.f32 %v4226_v10, %v7381_v18  ;;  %v7385_v18 = vld [vmem:[#allocation14_spill] sm:$0xff] }
 0x23c   : > { %v4232_v31 = vmax.f32 %v6797_v35, %v3351_v50  ;;  %v5294_v6 = vpop.f32.mrb[126].mxu0  ;;  %v7021_v54 = vpop.f32.mrb[126].mxu1  ;;  %v7028_v60 = vmax.f32 %v4210_v15, %v7383_v12  ;;  %v7387_v12 = vld [vmem:[#allocation15_spill] sm:$0xff]  ;;  %v7388_v35 = vld [vmem:[#allocation30_spill] sm:$0xff] }
 0x23d   : > { %7382 = vst [vmem:[#allocation20_spill] sm:$0xff] %v7021_v54  ;;  %v4249_v1 = vmax.f32 %v4248_v40, %v7384_v17  ;;  %v4256_v10 = vmax.f32 %v6803_v34, %v5294_v6  ;;  %v3354_v27 = vpop.f32.mrb[127].mxu0  ;;  %v7034_v47 = vpop.f32.mrb[127].mxu1  ;;  %v7386_v34 = vld [vmem:[#allocation29_spill] sm:$0xff]  ;;  %v7390_v50 = vld [vmem:[#allocation31_spill] sm:$0xff] }
 0x23e   : > { %v4233_v36 = vmax.f32 %v4232_v31, %v7385_v18  ;;  %v4240_v41 = vmax.f32 %v6809_v21, %v3354_v27  ;;  %v4212_v40 = vmax.f32 %v7028_v60, %v6856_v38  ;;  %v7391_v21 = vld [vmem:[#allocation32_spill] sm:$0xff]  ;;  %v7056_v15 = vld [vmem:[%s7240_s2] ss:$0 sm:$0xff] }
 0x23f   : > { %v4250_v6 = vmax.f32 %v4249_v1, %v7386_v34  ;;  %v4257_v17 = vmax.f32 %v4256_v10, %v7387_v12  ;;  %v7402_v34 = vld [vmem:[#allocation48_spill] sm:$0xff] }
 0x240   : > { %v4234_v3 = vmax.f32 %v4233_v36, %v7388_v35  ;;  %v4241_v54 = vmax.f32 %v4240_v41, %v7389_v32  ;;  %v7392_v41 = vmax.f32 %v6814_v57, %v6876_v63  ;;  %v7399_v63 = vmax.f32 %v6910_v44, %v6816_v56 }
 0x241   : > { %v4258_v14 = vmax.f32 %v4257_v17, %v7390_v50  ;;  %v7050_v31 = vmax.f32 %v4250_v6, %v6688_v7  ;;  %v7393_v7 = vmax.f32 %v6904_v19, %v6812_v55  ;;  %v7394_v50 = vld [vmem:[#allocation51_spill] sm:$0xff]  ;;  %v7395_v6 = vld [vmem:[#allocation45_spill] sm:$0xff]  ;;  %v7405_v56 = vmax.f32 %v6920_v25, %v6820_v62 }
 0x242   : > { %v4242_v27 = vmax.f32 %v4241_v54, %v7391_v21  ;;  %v5297_v18 = vpop.f32.mrb[128].mxu0  ;;  %v5441_v1 = vpop.f32.mrb[128].mxu1  ;;  %v7059_v10 = vmax.f32 %v4234_v3, %v6692_v37  ;;  %v7396_v37 = vld [vmem:[#allocation47_spill] sm:$0xff]  ;;  %v7397_v3 = vld [vmem:[#allocation56_spill] sm:$0xff] }
 0x243   : > { %v4029_v32 = vmax.f32 %v7392_v41, %v5297_v18  ;;  %v4157_v36 = vmax.f32 %v7393_v7, %v5441_v1  ;;  %v3367_v35 = vpop.f32.mrb[129].mxu0  ;;  %v3943_v54 = vpop.f32.mrb[129].mxu1  ;;  %v7073_v12 = vmax.f32 %v4258_v14, %v7395_v6  ;;  %v7398_v17 = vmax.f32 %v7396_v37, %v7397_v3  ;;  %v7400_v18 = vld [vmem:[#allocation52_spill] sm:$0xff]  ;;  %v7401_v41 = vld [vmem:[#allocation46_spill] sm:$0xff]  ;;  %v7403_v37 = vld [vmem:[#allocation57_spill] sm:$0xff] }
 0x244   : > { %v4141_v55 = vmax.f32 %v7399_v63, %v3943_v54  ;;  %v5298_v19 = vpop.f32.mrb[130].mxu0  ;;  %v5442_v21 = vpop.f32.mrb[130].mxu1  ;;  %v7084_v7 = vmax.f32 %v4242_v27, %v7401_v41  ;;  %v7406_v27 = vmax.f32 %v6826_v13, %v6892_v28  ;;  %v7409_v28 = vld [vmem:[#allocation55_spill] sm:$0xff] }
 0x245   : > { %v4013_v57 = vmax.f32 %v7398_v17, %v3367_v35  ;;  %v4271_v14 = vadd.f32 %v7056_v15, %v4029_v32  ;;  %v4287_v6 = vadd.f32 %v7056_v15, %v4157_v36  ;;  %v7404_v35 = vmax.f32 %v7402_v34, %v7403_v37  ;;  %v3370_v54 = vpop.f32.mrb[131].mxu0  ;;  %v3946_v17 = vpop.f32.mrb[131].mxu1 }
 0x246   : > { %v4165_v44 = vmax.f32 %v7405_v56, %v5442_v21  ;;  %v4285_v1 = vadd.f32 %v7056_v15, %v4141_v55  ;;  %v4021_v32 = vmax.f32 %v7406_v27, %v3370_v54  ;;  %v7407_v36 = vmax.f32 %v6930_v22, %v6824_v4 }
 0x247   : > { %v4037_v3 = vmax.f32 %v7404_v35, %v5298_v19  ;;  %v4269_v63 = vadd.f32 %v7056_v15, %v4013_v57  ;;  %v4303_v25 = vmax.f32 %v4271_v14, 0.0  ;;  %v4319_v19 = vmax.f32 %v4287_v6, 0.0  ;;  %v7408_v35 = vld [vmem:[#allocation53_spill] sm:$0xff] }
 0x248   : > { %v4149_v41 = vmax.f32 %v7407_v36, %v3946_v17  ;;  %v4288_v62 = vadd.f32 %v7056_v15, %v4165_v44  ;;  %v4270_v21 = vadd.f32 %v7056_v15, %v4021_v32  ;;  %v4260_v13 = vmax.f32 %v7073_v12, %v7408_v35 }
 0x249   : > { %v4272_v34 = vadd.f32 %v7056_v15, %v4037_v3  ;;  %v4301_v22 = vmax.f32 %v4269_v63, 0.0  ;;  %v4317_v56 = vmax.f32 %v4285_v1, 0.0  ;;  %v7410_v27 = vmax.f32 %v6830_v61, %v6907_v53 }
 0x24a   : > { %v4286_v57 = vadd.f32 %v7056_v15, %v4149_v41  ;;  %v4320_v37 = vmax.f32 %v4288_v62, 0.0  ;;  %v4302_v14 = vmax.f32 %v4270_v21, 0.0  ;;  %v5301_v3 = vpop.f32.mrb[132].mxu0  ;;  %v5445_v44 = vpop.f32.mrb[132].mxu1  ;;  %v7411_v1 = vmax.f32 %v6952_v24, %v6828_v51  ;;  %v7412_v21 = vld [vmem:[#allocation17_spill] sm:$0xff] }
 0x24b   : > { %v4304_v55 = vmax.f32 %v4272_v34, 0.0  ;;  %v4061_v32 = vmax.f32 %v7410_v27, %v5301_v3  ;;  %v3383_v36 = vpop.f32.mrb[133].mxu0  ;;  %v3959_v41 = vpop.f32.mrb[133].mxu1  ;;  %v7421_v27 = vmax.f32 %v6978_v26, %v6840_v9 }
 0x24c   : > { %v4318_v6 = vmax.f32 %v4286_v57, 0.0  ;;  %v4970_v17 = vpack.c.bf16 %v4320_v37, %v4319_v19  ;;  %v4189_v63 = vmax.f32 %v7411_v1, %v5445_v44  ;;  %v4925_v34 = vpack.c.bf16 %v4302_v14, %v4301_v22  ;;  %v5302_v61 = vpop.f32.mrb[134].mxu0  ;;  %v5446_v53 = vpop.f32.mrb[134].mxu1  ;;  %v7416_v37 = vld [vmem:[#allocation3_spill] sm:$0xff]  ;;  %v7419_v44 = vld [vmem:[#allocation18_spill] sm:$0xff] }
 0x24d   : > { %v4930_v54 = vpack.c.bf16 %v4304_v55, %v4303_v25  ;;  %v7413_v57 = vmax.f32 %v6834_v59, %v7412_v21  ;;  %v7414_v25 = vmax.f32 %v6958_v39, %v6832_v42  ;;  %v4275_v51 = vadd.f32 %v7056_v15, %v4061_v32  ;;  %v7415_v55 = vld [vmem:[#allocation49_spill] sm:$0xff]  ;;  %v3962_v3 = vpop.f32.mrb[135].mxu1 }
 0x24e   : > { %v4965_v62 = vpack.c.bf16 %v4318_v6, %v4317_v56  ;;  %5010 = vst [vmem:[%s7114_s14 + $0x48] sm:$0xff] %v4970_v17   ;;  %v4291_v24 = vadd.f32 %v7056_v15, %v4189_v63  ;;  %v7417_v22 = vmax.f32 %v7415_v55, %v7416_v37  ;;  %v7418_v59 = vmax.f32 %v6968_v23, %v6836_v48  ;;  %v3386_v6 = vpop.f32.mrb[135].mxu0 }
 0x24f   : > { %v4045_v4 = vmax.f32 %v7413_v57, %v3383_v36  ;;  %v4173_v19 = vmax.f32 %v7414_v25, %v3959_v41  ;;  %5002 = vst [vmem:[%s7114_s14 + $0x8] sm:$0xff] %v4930_v54   ;;  %4926 = vst [vmem:[%s7114_s14] sm:$0xff] %v4925_v34   ;;  %v7420_v54 = vmax.f32 %v6842_v29, %v7419_v44  ;;  %v4307_v36 = vmax.f32 %v4275_v51, 0.0  ;;  %v7428_v44 = vld [vmem:[#allocation19_spill] sm:$0xff] }
 0x250   : > { %v4069_v56 = vmax.f32 %v7417_v22, %v5302_v61  ;;  %v4197_v14 = vmax.f32 %v7418_v59, %v5446_v53  ;;  %5009 = vst [vmem:[%s7114_s14 + $0x40] sm:$0xff] %v4965_v62   ;;  %v4181_v32 = vmax.f32 %v7421_v27, %v3962_v3  ;;  %v7422_v61 = vmax.f32 %v6846_v45, %v6955_v5  ;;  %v7424_v59 = vld [vmem:[#allocation4_spill] sm:$0xff] }
 0x251   : > { %v4273_v42 = vadd.f32 %v7056_v15, %v4045_v4  ;;  %v4289_v39 = vadd.f32 %v7056_v15, %v4173_v19  ;;  %v4053_v17 = vmax.f32 %v7420_v54, %v3386_v6  ;;  %v4323_v4 = vmax.f32 %v4291_v24, 0.0 }
 0x252   : > { %v4276_v1 = vadd.f32 %v7056_v15, %v4069_v56  ;;  %v4292_v48 = vadd.f32 %v7056_v15, %v4197_v14  ;;  %v4290_v63 = vadd.f32 %v7056_v15, %v4181_v32  ;;  %v5305_v9 = vpop.f32.mrb[136].mxu0  ;;  %v5449_v26 = vpop.f32.mrb[136].mxu1  ;;  %v7423_v51 = vmax.f32 %v7000_v49, %v6844_v2 }
 0x253   : > { %v4274_v23 = vadd.f32 %v7056_v15, %v4053_v17  ;;  %v4305_v62 = vmax.f32 %v4273_v42, 0.0  ;;  %v4321_v21 = vmax.f32 %v4289_v39, 0.0  ;;  %v4093_v53 = vmax.f32 %v7422_v61, %v5305_v9  ;;  %v3399_v55 = vpop.f32.mrb[137].mxu0  ;;  %v3975_v37 = vpop.f32.mrb[137].mxu1  ;;  %v7427_v39 = vld [vmem:[#allocation50_spill] sm:$0xff] }
 0x254   : > { %v4308_v41 = vmax.f32 %v4276_v1, 0.0  ;;  %v4324_v34 = vmax.f32 %v4292_v48, 0.0  ;;  %v4322_v57 = vmax.f32 %v4290_v63, 0.0  ;;  %v4221_v24 = vmax.f32 %v7423_v51, %v5449_v26  ;;  %v5306_v45 = vpop.f32.mrb[138].mxu0  ;;  %v5450_v5 = vpop.f32.mrb[138].mxu1  ;;  %v7431_v48 = vld [vmem:[#allocation33_spill] sm:$0xff] }
 0x255   : > { %v4306_v29 = vmax.f32 %v4274_v23, 0.0  ;;  %v7425_v14 = vmax.f32 %v6850_v33, %v7424_v59  ;;  %v7426_v3 = vmax.f32 %v7006_v43, %v6848_v46  ;;  %v4279_v2 = vadd.f32 %v7056_v15, %v4093_v53  ;;  %v3402_v32 = vpop.f32.mrb[139].mxu0  ;;  %v3978_v1 = vpop.f32.mrb[139].mxu1 }
 0x256   : > { %v4940_v25 = vpack.c.bf16 %v4308_v41, %v4307_v36  ;;  %v4980_v19 = vpack.c.bf16 %v4324_v34, %v4323_v4  ;;  %v4975_v56 = vpack.c.bf16 %v4322_v57, %v4321_v21  ;;  %v4295_v49 = vadd.f32 %v7056_v15, %v4221_v24 }
 0x257   : > { %v4935_v22 = vpack.c.bf16 %v4306_v29, %v4305_v62  ;;  %v4077_v6 = vmax.f32 %v7425_v14, %v3399_v55  ;;  %v4205_v42 = vmax.f32 %v7426_v3, %v3975_v37  ;;  %v7429_v54 = vmax.f32 %v7427_v39, %v7428_v44  ;;  %v7437_v3 = vld [vmem:[#allocation54_spill] sm:$0xff] }
 0x258   : > { %5004 = vst [vmem:[%s7114_s14 + $0x18] sm:$0xff] %v4940_v25   ;;  %5012 = vst [vmem:[%s7114_s14 + $0x58] sm:$0xff] %v4980_v19   ;;  %v7430_v33 = vmax.f32 %v7016_v20, %v6852_v16  ;;  %v7432_v23 = vmax.f32 %v6858_v8, %v7431_v48  ;;  %v4213_v36 = vmax.f32 %v4212_v40, %v3978_v1  ;;  %v4311_v34 = vmax.f32 %v4279_v2, 0.0 }
 0x259   : > { %v4101_v17 = vmax.f32 %v7429_v54, %v5306_v45  ;;  %5003 = vst [vmem:[%s7114_s14 + $0x10] sm:$0xff] %v4935_v22   ;;  %5011 = vst [vmem:[%s7114_s14 + $0x50] sm:$0xff] %v4975_v56   ;;  %v4277_v46 = vadd.f32 %v7056_v15, %v4077_v6  ;;  %v4293_v43 = vadd.f32 %v7056_v15, %v4205_v42  ;;  %v4327_v62 = vmax.f32 %v4295_v49, 0.0  ;;  %v7438_v42 = vld [vmem:[#allocation20_spill] sm:$0xff] }
 0x25a   : > { %v4229_v27 = vmax.f32 %v7430_v33, %v5450_v5  ;;  %v4085_v63 = vmax.f32 %v7432_v23, %v3402_v32  ;;  %v4294_v41 = vadd.f32 %v7056_v15, %v4213_v36  ;;  %v5309_v38 = vpop.f32.mrb[140].mxu0  ;;  %v5453_v60 = vpop.f32.mrb[140].mxu1  ;;  %v7433_v19 = vmax.f32 %v6862_v30, %v7003_v52 }
 0x25b   : > { %v4280_v4 = vadd.f32 %v7056_v15, %v4101_v17  ;;  %v4309_v57 = vmax.f32 %v4277_v46, 0.0  ;;  %v4325_v9 = vmax.f32 %v4293_v43, 0.0  ;;  %v7434_v53 = vmax.f32 %v7050_v31, %v7394_v50  ;;  %v3415_v24 = vpop.f32.mrb[141].mxu0  ;;  %v3991_v55 = vpop.f32.mrb[141].mxu1 }
 0x25c   : > { %v4296_v16 = vadd.f32 %v7056_v15, %v4229_v27  ;;  %v4278_v20 = vadd.f32 %v7056_v15, %v4085_v63  ;;  %v4326_v26 = vmax.f32 %v4294_v41, 0.0  ;;  %v4125_v61 = vmax.f32 %v7433_v19, %v5309_v38  ;;  %v5310_v30 = vpop.f32.mrb[142].mxu0  ;;  %v5454_v52 = vpop.f32.mrb[142].mxu1 }
 0x25d   : > { %v4312_v21 = vmax.f32 %v4280_v4, 0.0  ;;  %v4253_v51 = vmax.f32 %v7434_v53, %v5453_v60  ;;  %v7435_v56 = vmax.f32 %v6866_v0, %v7011_v11  ;;  %v7436_v14 = vmax.f32 %v7059_v10, %v7400_v18  ;;  %v3418_v11 = vpop.f32.mrb[143].mxu0  ;;  %v3994_v2 = vpop.f32.mrb[143].mxu1 }
 0x25e   : > { %v4328_v29 = vmax.f32 %v4296_v16, 0.0  ;;  %v4310_v8 = vmax.f32 %v4278_v20, 0.0  ;;  %v4985_v22 = vpack.c.bf16 %v4326_v26, %v4325_v9  ;;  %v4283_v31 = vadd.f32 %v7056_v15, %v4125_v61 }
 0x25f   : > { %v4950_v40 = vpack.c.bf16 %v4312_v21, %v4311_v34  ;;  %v4109_v59 = vmax.f32 %v7435_v56, %v3415_v24  ;;  %v4237_v6 = vmax.f32 %v7436_v14, %v3991_v55  ;;  %v4299_v50 = vadd.f32 %v7056_v15, %v4253_v51 }
 0x260   : > { %v4990_v25 = vpack.c.bf16 %v4328_v29, %v4327_v62  ;;  %v4945_v37 = vpack.c.bf16 %v4310_v8, %v4309_v57  ;;  %v7439_v45 = vmax.f32 %v7437_v3, %v7438_v42  ;;  %v4261_v0 = vmax.f32 %v4260_v13, %v5454_v52  ;;  %5013 = vst [vmem:[%s7114_s14 + $0x60] sm:$0xff] %v4985_v22  }
 0x261   : > { %5006 = vst [vmem:[%s7114_s14 + $0x28] sm:$0xff] %v4950_v40   ;;  %v4281_v10 = vadd.f32 %v7056_v15, %v4109_v59  ;;  %v4297_v18 = vadd.f32 %v7056_v15, %v4237_v6  ;;  %v7440_v49 = vmax.f32 %v6874_v58, %v7034_v47  ;;  %v7441_v44 = vmax.f32 %v7084_v7, %v7409_v28 }
 0x262   : > { %5014 = vst [vmem:[%s7114_s14 + $0x68] sm:$0xff] %v4990_v25   ;;  %v4133_v5 = vmax.f32 %v7439_v45, %v5310_v30  ;;  %5005 = vst [vmem:[%s7114_s14 + $0x20] sm:$0xff] %v4945_v37   ;;  %v4300_v12 = vadd.f32 %v7056_v15, %v4261_v0  ;;  %v4315_v33 = vmax.f32 %v4283_v31, 0.0  ;;  %v4331_v27 = vmax.f32 %v4299_v50, 0.0 }
 0x263   : > { %v4117_v39 = vmax.f32 %v7440_v49, %v3418_v11  ;;  %v4245_v54 = vmax.f32 %v7441_v44, %v3994_v2  ;;  %v4313_v32 = vmax.f32 %v4281_v10, 0.0  ;;  %v4329_v1 = vmax.f32 %v4297_v18, 0.0 }
 0x264   : > { %v4284_v17 = vadd.f32 %v7056_v15, %v4133_v5  ;;  %v4332_v47 = vmax.f32 %v4300_v12, 0.0 }
 0x265   : > { %v4282_v35 = vadd.f32 %v7056_v15, %v4117_v39  ;;  %v4298_v13 = vadd.f32 %v7056_v15, %v4245_v54 }
 0x266   : > { %v4316_v58 = vmax.f32 %v4284_v17, 0.0  ;;  %v5000_v43 = vpack.c.bf16 %v4332_v47, %v4331_v27 }
 0x267   : > { %v4314_v7 = vmax.f32 %v4282_v35, 0.0  ;;  %v4330_v28 = vmax.f32 %v4298_v13, 0.0 }
 0x268   : > { %v4960_v46 = vpack.c.bf16 %v4316_v58, %v4315_v33  ;;  %5016 = vst [vmem:[%s7114_s14 + $0x78] sm:$0xff] %v5000_v43  }
 0x269   : > { %v4955_v48 = vpack.c.bf16 %v4314_v7, %v4313_v32  ;;  %v4995_v23 = vpack.c.bf16 %v4330_v28, %v4329_v1 }
 0x26a   : > { %5008 = vst [vmem:[%s7114_s14 + $0x38] sm:$0xff] %v4960_v46  }
 0x26b   : > { %5007 = vst [vmem:[%s7114_s14 + $0x30] sm:$0xff] %v4955_v48   ;;  %5015 = vst [vmem:[%s7114_s14 + $0x70] sm:$0xff] %v4995_v23  }
 0x26c PF: > { %p10_p9 = scmp.ge.s32.totalorder %s5692_s16, 10   ;;  %s7442_s12 = smov %s5649_s13 }
 0x26d   : > { %s7443_s13 = smov %s5701_s19  ;;  %s7444_s14 = smov %s5692_s16 }
 0x26e   :  { %12 = sbr.rel (!%p10_p9) target bundleno = 2 (0x2), region = 108 }

// kernel: net_forward.5
= control target key start
LH: loop header
LB: loop body
LE: loop exit
PB: predicated region body
PF: predicated region fallthrough
CT: control target
= control target key end

     0   :  { %s5054_s12 = smov 0   ;;  %s5056_s13 = smov 0   ;;  %s6447_s0 = inlined_call_operand.vmem [shape: bf16[4,512,512], index: 0, kind: input, shape index: {}]   ;;  %s6448_s1 = inlined_call_operand.vmem [shape: bf16[512,128], index: 1, kind: input, shape index: {}]   ;;  %s6449_s2 = inlined_call_operand.vmem [shape: f32[1,128], index: 2, kind: input, shape index: {}]   ;;  %s6450_s3 = inlined_call_operand.vmem [shape: bf16[512,128], index: 3, kind: output, shape index: {}]  }
   0x1   :  { %s5058_s14 = smov 0  }
   0x2 LB: > { %s3976_s15 = sadd.s32 4294967295, %s5031_s14   ;;  %s5071_s16 = sadd.s32 1, %s5031_s14   ;;  %s5031_s14 = sphi %s5058_s14, %s6536_s14   ;;  %s5027_s13 = sphi %s5056_s13, %s6535_s13   ;;  %s5023_s12 = sphi %s5054_s12, %s6534_s12  }
   0x3   : > { %s17_s17 = ssub.s32 %s5031_s14, %s5071_s16  ;;  %s20_s18 = sadd.s32 1, %s5027_s13 }
   0x4   : > { %p18_p0 = scmp.eq.s32.totalorder %s17_s17, 0  ;;  %p27_p1 = scmp.ne.s32.totalorder %s5027_s13, %s5023_s12 }
   0x5   : > { %p28_p2 = scmp.eq.s32.totalorder %s5031_s14, 0  ;;  %p3979_p4 = scmp.ge.s32.totalorder %s5031_s14, 2 }
   0x6   : > { %s5080_s19 = scalar_select %p18_p0, %s5027_s13, %s20_s18  }
   0x7   : > { %p29_p3 = por %p28_p2, %p27_p1  ;;  %127 = sbr.rel (%p3979_p4) target bundleno = 146 (0x92), region = 24 }
   0xe   : > { %130 = sbr.rel (!%p29_p3) target bundleno = 146 (0x92), region = 28  ;;  %s132_s20 = sand.u32 (%p29_p3), 1, %s5027_s13  }
   0xf   : > { %s4312_s21 = sshll.u32 (%p29_p3), %s5031_s14, 9  ;;  %s3980_s22 = sshll.u32 (%p29_p3), %s132_s20, 11 }
  0x10   : > { %s5088_s25 = scalar_lea.vmem (%p29_p3), %s6447_s0, %s4312_s21  ;;  %s5093_s26 = scalar_lea.vmem (%p29_p3), [#allocation2], %s3980_s22 }
  0x11   : > { %v151_v0 = vld [vmem:[%s5088_s25] sm:$0xff] (%p29_p3)  ;;  %v153_v1 = vld [vmem:[%s5088_s25 + $0x8] sm:$0xff] (%p29_p3)  ;;  %v155_v2 = vld [vmem:[%s5088_s25 + $0x10] sm:$0xff] (%p29_p3) }
  0x12   : > { %152 = vst [vmem:[%s5093_s26] sm:$0xff] (%p29_p3), %v151_v0  ;;  %154 = vst [vmem:[%s5093_s26 + $0x8] sm:$0xff] (%p29_p3), %v153_v1  ;;  %v157_v3 = vld [vmem:[%s5088_s25 + $0x18] sm:$0xff] (%p29_p3)  ;;  %v159_v4 = vld [vmem:[%s5088_s25 + $0x20] sm:$0xff] (%p29_p3) }
  0x13   : > { %156 = vst [vmem:[%s5093_s26 + $0x10] sm:$0xff] (%p29_p3), %v155_v2  ;;  %v161_v5 = vld [vmem:[%s5088_s25 + $0x28] sm:$0xff] (%p29_p3)  ;;  %158 = vst [vmem:[%s5093_s26 + $0x18] sm:$0xff] (%p29_p3), %v157_v3  ;;  %v163_v6 = vld [vmem:[%s5088_s25 + $0x30] sm:$0xff] (%p29_p3) }
  0x14   : > { %160 = vst [vmem:[%s5093_s26 + $0x20] sm:$0xff] (%p29_p3), %v159_v4  ;;  %162 = vst [vmem:[%s5093_s26 + $0x28] sm:$0xff] (%p29_p3), %v161_v5  ;;  %v165_v7 = vld [vmem:[%s5088_s25 + $0x38] sm:$0xff] (%p29_p3)  ;;  %v167_v8 = vld [vmem:[%s5088_s25 + $0x40] sm:$0xff] (%p29_p3) }
  0x15   : > { %164 = vst [vmem:[%s5093_s26 + $0x30] sm:$0xff] %v163_v6  ;;  %166 = vst [vmem:[%s5093_s26 + $0x38] sm:$0xff] %v165_v7  ;;  %v169_v9 = vld [vmem:[%s5088_s25 + $0x48] sm:$0xff]  ;;  %v171_v10 = vld [vmem:[%s5088_s25 + $0x50] sm:$0xff] }
  0x16   : > { %168 = vst [vmem:[%s5093_s26 + $0x40] sm:$0xff] %v167_v8  ;;  %v173_v11 = vld [vmem:[%s5088_s25 + $0x58] sm:$0xff]  ;;  %170 = vst [vmem:[%s5093_s26 + $0x48] sm:$0xff] %v169_v9  ;;  %v175_v12 = vld [vmem:[%s5088_s25 + $0x60] sm:$0xff] }
  0x17   : > { %172 = vst [vmem:[%s5093_s26 + $0x50] sm:$0xff] %v171_v10  ;;  %174 = vst [vmem:[%s5093_s26 + $0x58] sm:$0xff] %v173_v11  ;;  %v177_v13 = vld [vmem:[%s5088_s25 + $0x68] sm:$0xff]  ;;  %v179_v14 = vld [vmem:[%s5088_s25 + $0x70] sm:$0xff] }
  0x18   : > { %176 = vst [vmem:[%s5093_s26 + $0x60] sm:$0xff] %v175_v12  ;;  %178 = vst [vmem:[%s5093_s26 + $0x68] sm:$0xff] %v177_v13  ;;  %v181_v15 = vld [vmem:[%s5088_s25 + $0x78] sm:$0xff]  ;;  %v183_v16 = vld [vmem:[%s5088_s25 + $0x80] sm:$0xff] }
  0x19   : > { %180 = vst [vmem:[%s5093_s26 + $0x70] sm:$0xff] %v179_v14  ;;  %v185_v17 = vld [vmem:[%s5088_s25 + $0x88] sm:$0xff]  ;;  %182 = vst [vmem:[%s5093_s26 + $0x78] sm:$0xff] %v181_v15  ;;  %v187_v18 = vld [vmem:[%s5088_s25 + $0x90] sm:$0xff] }
  0x1a   : > { %184 = vst [vmem:[%s5093_s26 + $0x80] sm:$0xff] %v183_v16  ;;  %186 = vst [vmem:[%s5093_s26 + $0x88] sm:$0xff] %v185_v17  ;;  %v189_v19 = vld [vmem:[%s5088_s25 + $0x98] sm:$0xff]  ;;  %v191_v20 = vld [vmem:[%s5088_s25 + $0xa0] sm:$0xff] }
  0x1b   : > { %188 = vst [vmem:[%s5093_s26 + $0x90] sm:$0xff] %v187_v18  ;;  %190 = vst [vmem:[%s5093_s26 + $0x98] sm:$0xff] %v189_v19  ;;  %v193_v21 = vld [vmem:[%s5088_s25 + $0xa8] sm:$0xff]  ;;  %v195_v22 = vld [vmem:[%s5088_s25 + $0xb0] sm:$0xff] }
  0x1c   : > { %192 = vst [vmem:[%s5093_s26 + $0xa0] sm:$0xff] %v191_v20  ;;  %v197_v23 = vld [vmem:[%s5088_s25 + $0xb8] sm:$0xff]  ;;  %194 = vst [vmem:[%s5093_s26 + $0xa8] sm:$0xff] %v193_v21  ;;  %v199_v24 = vld [vmem:[%s5088_s25 + $0xc0] sm:$0xff] }
  0x1d   : > { %196 = vst [vmem:[%s5093_s26 + $0xb0] sm:$0xff] %v195_v22  ;;  %198 = vst [vmem:[%s5093_s26 + $0xb8] sm:$0xff] %v197_v23  ;;  %v201_v25 = vld [vmem:[%s5088_s25 + $0xc8] sm:$0xff]  ;;  %v203_v26 = vld [vmem:[%s5088_s25 + $0xd0] sm:$0xff] }
  0x1e   : > { %200 = vst [vmem:[%s5093_s26 + $0xc0] sm:$0xff] %v199_v24  ;;  %202 = vst [vmem:[%s5093_s26 + $0xc8] sm:$0xff] %v201_v25  ;;  %v205_v27 = vld [vmem:[%s5088_s25 + $0xd8] sm:$0xff]  ;;  %v207_v28 = vld [vmem:[%s5088_s25 + $0xe0] sm:$0xff] }
  0x1f   : > { %204 = vst [vmem:[%s5093_s26 + $0xd0] sm:$0xff] %v203_v26  ;;  %v209_v29 = vld [vmem:[%s5088_s25 + $0xe8] sm:$0xff]  ;;  %206 = vst [vmem:[%s5093_s26 + $0xd8] sm:$0xff] %v205_v27  ;;  %v211_v30 = vld [vmem:[%s5088_s25 + $0xf0] sm:$0xff] }
  0x20   : > { %208 = vst [vmem:[%s5093_s26 + $0xe0] sm:$0xff] %v207_v28  ;;  %210 = vst [vmem:[%s5093_s26 + $0xe8] sm:$0xff] %v209_v29  ;;  %v213_v31 = vld [vmem:[%s5088_s25 + $0xf8] sm:$0xff]  ;;  %v215_v32 = vld [vmem:[%s5088_s25 + $0x100] sm:$0xff] }
  0x21   : > { %212 = vst [vmem:[%s5093_s26 + $0xf0] sm:$0xff] %v211_v30  ;;  %214 = vst [vmem:[%s5093_s26 + $0xf8] sm:$0xff] %v213_v31  ;;  %v217_v33 = vld [vmem:[%s5088_s25 + $0x108] sm:$0xff]  ;;  %v219_v34 = vld [vmem:[%s5088_s25 + $0x110] sm:$0xff] }
  0x22   : > { %216 = vst [vmem:[%s5093_s26 + $0x100] sm:$0xff] %v215_v32  ;;  %v221_v35 = vld [vmem:[%s5088_s25 + $0x118] sm:$0xff]  ;;  %218 = vst [vmem:[%s5093_s26 + $0x108] sm:$0xff] %v217_v33  ;;  %v223_v36 = vld [vmem:[%s5088_s25 + $0x120] sm:$0xff] }
  0x23   : > { %220 = vst [vmem:[%s5093_s26 + $0x110] sm:$0xff] %v219_v34  ;;  %222 = vst [vmem:[%s5093_s26 + $0x118] sm:$0xff] %v221_v35  ;;  %v225_v37 = vld [vmem:[%s5088_s25 + $0x128] sm:$0xff]  ;;  %v227_v38 = vld [vmem:[%s5088_s25 + $0x130] sm:$0xff] }
  0x24   : > { %224 = vst [vmem:[%s5093_s26 + $0x120] sm:$0xff] %v223_v36  ;;  %226 = vst [vmem:[%s5093_s26 + $0x128] sm:$0xff] %v225_v37  ;;  %v229_v39 = vld [vmem:[%s5088_s25 + $0x138] sm:$0xff]  ;;  %v231_v40 = vld [vmem:[%s5088_s25 + $0x140] sm:$0xff] }
  0x25   : > { %228 = vst [vmem:[%s5093_s26 + $0x130] sm:$0xff] %v227_v38  ;;  %v233_v41 = vld [vmem:[%s5088_s25 + $0x148] sm:$0xff]  ;;  %230 = vst [vmem:[%s5093_s26 + $0x138] sm:$0xff] %v229_v39  ;;  %v235_v42 = vld [vmem:[%s5088_s25 + $0x150] sm:$0xff] }
  0x26   : > { %232 = vst [vmem:[%s5093_s26 + $0x140] sm:$0xff] %v231_v40  ;;  %234 = vst [vmem:[%s5093_s26 + $0x148] sm:$0xff] %v233_v41  ;;  %v237_v43 = vld [vmem:[%s5088_s25 + $0x158] sm:$0xff]  ;;  %v239_v44 = vld [vmem:[%s5088_s25 + $0x160] sm:$0xff] }
  0x27   : > { %236 = vst [vmem:[%s5093_s26 + $0x150] sm:$0xff] %v235_v42  ;;  %238 = vst [vmem:[%s5093_s26 + $0x158] sm:$0xff] %v237_v43  ;;  %v241_v45 = vld [vmem:[%s5088_s25 + $0x168] sm:$0xff]  ;;  %v243_v46 = vld [vmem:[%s5088_s25 + $0x170] sm:$0xff] }
  0x28   : > { %240 = vst [vmem:[%s5093_s26 + $0x160] sm:$0xff] %v239_v44  ;;  %v245_v47 = vld [vmem:[%s5088_s25 + $0x178] sm:$0xff]  ;;  %242 = vst [vmem:[%s5093_s26 + $0x168] sm:$0xff] %v241_v45  ;;  %v247_v48 = vld [vmem:[%s5088_s25 + $0x180] sm:$0xff] }
  0x29   : > { %244 = vst [vmem:[%s5093_s26 + $0x170] sm:$0xff] %v243_v46  ;;  %246 = vst [vmem:[%s5093_s26 + $0x178] sm:$0xff] %v245_v47  ;;  %v249_v49 = vld [vmem:[%s5088_s25 + $0x188] sm:$0xff]  ;;  %v251_v50 = vld [vmem:[%s5088_s25 + $0x190] sm:$0xff] }
  0x2a   : > { %248 = vst [vmem:[%s5093_s26 + $0x180] sm:$0xff] %v247_v48  ;;  %250 = vst [vmem:[%s5093_s26 + $0x188] sm:$0xff] %v249_v49  ;;  %v253_v51 = vld [vmem:[%s5088_s25 + $0x198] sm:$0xff]  ;;  %v255_v52 = vld [vmem:[%s5088_s25 + $0x1a0] sm:$0xff] }
  0x2b   : > { %252 = vst [vmem:[%s5093_s26 + $0x190] sm:$0xff] %v251_v50  ;;  %v257_v53 = vld [vmem:[%s5088_s25 + $0x1a8] sm:$0xff]  ;;  %254 = vst [vmem:[%s5093_s26 + $0x198] sm:$0xff] %v253_v51  ;;  %v259_v54 = vld [vmem:[%s5088_s25 + $0x1b0] sm:$0xff] }
  0x2c   : > { %256 = vst [vmem:[%s5093_s26 + $0x1a0] sm:$0xff] %v255_v52  ;;  %258 = vst [vmem:[%s5093_s26 + $0x1a8] sm:$0xff] %v257_v53  ;;  %v261_v55 = vld [vmem:[%s5088_s25 + $0x1b8] sm:$0xff]  ;;  %v263_v56 = vld [vmem:[%s5088_s25 + $0x1c0] sm:$0xff] }
  0x2d   : > { %260 = vst [vmem:[%s5093_s26 + $0x1b0] sm:$0xff] %v259_v54  ;;  %262 = vst [vmem:[%s5093_s26 + $0x1b8] sm:$0xff] %v261_v55  ;;  %v265_v57 = vld [vmem:[%s5088_s25 + $0x1c8] sm:$0xff]  ;;  %v267_v58 = vld [vmem:[%s5088_s25 + $0x1d0] sm:$0xff] }
  0x2e   : > { %264 = vst [vmem:[%s5093_s26 + $0x1c0] sm:$0xff] %v263_v56  ;;  %v269_v59 = vld [vmem:[%s5088_s25 + $0x1d8] sm:$0xff]  ;;  %266 = vst [vmem:[%s5093_s26 + $0x1c8] sm:$0xff] %v265_v57  ;;  %v271_v60 = vld [vmem:[%s5088_s25 + $0x1e0] sm:$0xff] }
  0x2f   : > { %268 = vst [vmem:[%s5093_s26 + $0x1d0] sm:$0xff] %v267_v58  ;;  %270 = vst [vmem:[%s5093_s26 + $0x1d8] sm:$0xff] %v269_v59  ;;  %v273_v61 = vld [vmem:[%s5088_s25 + $0x1e8] sm:$0xff]  ;;  %v275_v62 = vld [vmem:[%s5088_s25 + $0x1f0] sm:$0xff] }
  0x30   : > { %272 = vst [vmem:[%s5093_s26 + $0x1e0] sm:$0xff] %v271_v60  ;;  %274 = vst [vmem:[%s5093_s26 + $0x1e8] sm:$0xff] %v273_v61  ;;  %v277_v63 = vld [vmem:[%s5088_s25 + $0x1f8] sm:$0xff]  ;;  %v279_v0 = vld [vmem:[%s5088_s25 + $0x400] sm:$0xff] }
  0x31   : > { %276 = vst [vmem:[%s5093_s26 + $0x1f0] sm:$0xff] %v275_v62  ;;  %v281_v1 = vld [vmem:[%s5088_s25 + $0x408] sm:$0xff]  ;;  %278 = vst [vmem:[%s5093_s26 + $0x1f8] sm:$0xff] %v277_v63  ;;  %v283_v2 = vld [vmem:[%s5088_s25 + $0x410] sm:$0xff] }
  0x32   : > { %280 = vst [vmem:[%s5093_s26 + $0x200] sm:$0xff] %v279_v0  ;;  %282 = vst [vmem:[%s5093_s26 + $0x208] sm:$0xff] %v281_v1  ;;  %v285_v3 = vld [vmem:[%s5088_s25 + $0x418] sm:$0xff]  ;;  %v287_v4 = vld [vmem:[%s5088_s25 + $0x420] sm:$0xff] }
  0x33   : > { %284 = vst [vmem:[%s5093_s26 + $0x210] sm:$0xff] %v283_v2  ;;  %286 = vst [vmem:[%s5093_s26 + $0x218] sm:$0xff] %v285_v3  ;;  %v289_v5 = vld [vmem:[%s5088_s25 + $0x428] sm:$0xff]  ;;  %v291_v6 = vld [vmem:[%s5088_s25 + $0x430] sm:$0xff] }
  0x34   : > { %288 = vst [vmem:[%s5093_s26 + $0x220] sm:$0xff] %v287_v4  ;;  %v293_v7 = vld [vmem:[%s5088_s25 + $0x438] sm:$0xff]  ;;  %290 = vst [vmem:[%s5093_s26 + $0x228] sm:$0xff] %v289_v5  ;;  %v295_v8 = vld [vmem:[%s5088_s25 + $0x440] sm:$0xff] }
  0x35   : > { %292 = vst [vmem:[%s5093_s26 + $0x230] sm:$0xff] %v291_v6  ;;  %294 = vst [vmem:[%s5093_s26 + $0x238] sm:$0xff] %v293_v7  ;;  %v297_v9 = vld [vmem:[%s5088_s25 + $0x448] sm:$0xff]  ;;  %v299_v10 = vld [vmem:[%s5088_s25 + $0x450] sm:$0xff] }
  0x36   : > { %296 = vst [vmem:[%s5093_s26 + $0x240] sm:$0xff] %v295_v8  ;;  %298 = vst [vmem:[%s5093_s26 + $0x248] sm:$0xff] %v297_v9  ;;  %v301_v11 = vld [vmem:[%s5088_s25 + $0x458] sm:$0xff]  ;;  %v303_v12 = vld [vmem:[%s5088_s25 + $0x460] sm:$0xff] }
  0x37   : > { %300 = vst [vmem:[%s5093_s26 + $0x250] sm:$0xff] %v299_v10  ;;  %v305_v13 = vld [vmem:[%s5088_s25 + $0x468] sm:$0xff]  ;;  %302 = vst [vmem:[%s5093_s26 + $0x258] sm:$0xff] %v301_v11  ;;  %v307_v14 = vld [vmem:[%s5088_s25 + $0x470] sm:$0xff] }
  0x38   : > { %304 = vst [vmem:[%s5093_s26 + $0x260] sm:$0xff] %v303_v12  ;;  %306 = vst [vmem:[%s5093_s26 + $0x268] sm:$0xff] %v305_v13  ;;  %v309_v15 = vld [vmem:[%s5088_s25 + $0x478] sm:$0xff]  ;;  %v311_v16 = vld [vmem:[%s5088_s25 + $0x480] sm:$0xff] }
  0x39   : > { %308 = vst [vmem:[%s5093_s26 + $0x270] sm:$0xff] %v307_v14  ;;  %310 = vst [vmem:[%s5093_s26 + $0x278] sm:$0xff] %v309_v15  ;;  %v313_v17 = vld [vmem:[%s5088_s25 + $0x488] sm:$0xff]  ;;  %v315_v18 = vld [vmem:[%s5088_s25 + $0x490] sm:$0xff] }
  0x3a   : > { %312 = vst [vmem:[%s5093_s26 + $0x280] sm:$0xff] %v311_v16  ;;  %v317_v19 = vld [vmem:[%s5088_s25 + $0x498] sm:$0xff]  ;;  %314 = vst [vmem:[%s5093_s26 + $0x288] sm:$0xff] %v313_v17  ;;  %v319_v20 = vld [vmem:[%s5088_s25 + $0x4a0] sm:$0xff] }
  0x3b   : > { %316 = vst [vmem:[%s5093_s26 + $0x290] sm:$0xff] %v315_v18  ;;  %318 = vst [vmem:[%s5093_s26 + $0x298] sm:$0xff] %v317_v19  ;;  %v321_v21 = vld [vmem:[%s5088_s25 + $0x4a8] sm:$0xff]  ;;  %v323_v22 = vld [vmem:[%s5088_s25 + $0x4b0] sm:$0xff] }
  0x3c   : > { %320 = vst [vmem:[%s5093_s26 + $0x2a0] sm:$0xff] %v319_v20  ;;  %322 = vst [vmem:[%s5093_s26 + $0x2a8] sm:$0xff] %v321_v21  ;;  %v325_v23 = vld [vmem:[%s5088_s25 + $0x4b8] sm:$0xff]  ;;  %v327_v24 = vld [vmem:[%s5088_s25 + $0x4c0] sm:$0xff] }
  0x3d   : > { %324 = vst [vmem:[%s5093_s26 + $0x2b0] sm:$0xff] %v323_v22  ;;  %v329_v25 = vld [vmem:[%s5088_s25 + $0x4c8] sm:$0xff]  ;;  %326 = vst [vmem:[%s5093_s26 + $0x2b8] sm:$0xff] %v325_v23  ;;  %v331_v26 = vld [vmem:[%s5088_s25 + $0x4d0] sm:$0xff] }
  0x3e   : > { %328 = vst [vmem:[%s5093_s26 + $0x2c0] sm:$0xff] %v327_v24  ;;  %330 = vst [vmem:[%s5093_s26 + $0x2c8] sm:$0xff] %v329_v25  ;;  %v333_v27 = vld [vmem:[%s5088_s25 + $0x4d8] sm:$0xff]  ;;  %v335_v28 = vld [vmem:[%s5088_s25 + $0x4e0] sm:$0xff] }
  0x3f   : > { %332 = vst [vmem:[%s5093_s26 + $0x2d0] sm:$0xff] %v331_v26  ;;  %334 = vst [vmem:[%s5093_s26 + $0x2d8] sm:$0xff] %v333_v27  ;;  %v337_v29 = vld [vmem:[%s5088_s25 + $0x4e8] sm:$0xff]  ;;  %v339_v30 = vld [vmem:[%s5088_s25 + $0x4f0] sm:$0xff] }
  0x40   : > { %336 = vst [vmem:[%s5093_s26 + $0x2e0] sm:$0xff] %v335_v28  ;;  %v341_v31 = vld [vmem:[%s5088_s25 + $0x4f8] sm:$0xff]  ;;  %338 = vst [vmem:[%s5093_s26 + $0x2e8] sm:$0xff] %v337_v29  ;;  %v343_v32 = vld [vmem:[%s5088_s25 + $0x500] sm:$0xff] }
  0x41   : > { %340 = vst [vmem:[%s5093_s26 + $0x2f0] sm:$0xff] %v339_v30  ;;  %342 = vst [vmem:[%s5093_s26 + $0x2f8] sm:$0xff] %v341_v31  ;;  %v345_v33 = vld [vmem:[%s5088_s25 + $0x508] sm:$0xff]  ;;  %v347_v34 = vld [vmem:[%s5088_s25 + $0x510] sm:$0xff] }
  0x42   : > { %344 = vst [vmem:[%s5093_s26 + $0x300] sm:$0xff] %v343_v32  ;;  %346 = vst [vmem:[%s5093_s26 + $0x308] sm:$0xff] %v345_v33  ;;  %v349_v35 = vld [vmem:[%s5088_s25 + $0x518] sm:$0xff]  ;;  %v351_v36 = vld [vmem:[%s5088_s25 + $0x520] sm:$0xff] }
  0x43   : > { %348 = vst [vmem:[%s5093_s26 + $0x310] sm:$0xff] %v347_v34  ;;  %v353_v37 = vld [vmem:[%s5088_s25 + $0x528] sm:$0xff]  ;;  %350 = vst [vmem:[%s5093_s26 + $0x318] sm:$0xff] %v349_v35  ;;  %v355_v38 = vld [vmem:[%s5088_s25 + $0x530] sm:$0xff] }
  0x44   : > { %352 = vst [vmem:[%s5093_s26 + $0x320] sm:$0xff] %v351_v36  ;;  %354 = vst [vmem:[%s5093_s26 + $0x328] sm:$0xff] %v353_v37  ;;  %v357_v39 = vld [vmem:[%s5088_s25 + $0x538] sm:$0xff]  ;;  %v359_v40 = vld [vmem:[%s5088_s25 + $0x540] sm:$0xff] }
  0x45   : > { %356 = vst [vmem:[%s5093_s26 + $0x330] sm:$0xff] %v355_v38  ;;  %358 = vst [vmem:[%s5093_s26 + $0x338] sm:$0xff] %v357_v39  ;;  %v361_v41 = vld [vmem:[%s5088_s25 + $0x548] sm:$0xff]  ;;  %v363_v42 = vld [vmem:[%s5088_s25 + $0x550] sm:$0xff] }
  0x46   : > { %360 = vst [vmem:[%s5093_s26 + $0x340] sm:$0xff] %v359_v40  ;;  %v365_v43 = vld [vmem:[%s5088_s25 + $0x558] sm:$0xff]  ;;  %362 = vst [vmem:[%s5093_s26 + $0x348] sm:$0xff] %v361_v41  ;;  %v367_v44 = vld [vmem:[%s5088_s25 + $0x560] sm:$0xff] }
  0x47   : > { %364 = vst [vmem:[%s5093_s26 + $0x350] sm:$0xff] %v363_v42  ;;  %366 = vst [vmem:[%s5093_s26 + $0x358] sm:$0xff] %v365_v43  ;;  %v369_v45 = vld [vmem:[%s5088_s25 + $0x568] sm:$0xff]  ;;  %v371_v46 = vld [vmem:[%s5088_s25 + $0x570] sm:$0xff] }
  0x48   : > { %368 = vst [vmem:[%s5093_s26 + $0x360] sm:$0xff] %v367_v44  ;;  %370 = vst [vmem:[%s5093_s26 + $0x368] sm:$0xff] %v369_v45  ;;  %v373_v47 = vld [vmem:[%s5088_s25 + $0x578] sm:$0xff]  ;;  %v375_v48 = vld [vmem:[%s5088_s25 + $0x580] sm:$0xff] }
  0x49   : > { %372 = vst [vmem:[%s5093_s26 + $0x370] sm:$0xff] %v371_v46  ;;  %v377_v49 = vld [vmem:[%s5088_s25 + $0x588] sm:$0xff]  ;;  %374 = vst [vmem:[%s5093_s26 + $0x378] sm:$0xff] %v373_v47  ;;  %v379_v50 = vld [vmem:[%s5088_s25 + $0x590] sm:$0xff] }
  0x4a   : > { %376 = vst [vmem:[%s5093_s26 + $0x380] sm:$0xff] %v375_v48  ;;  %378 = vst [vmem:[%s5093_s26 + $0x388] sm:$0xff] %v377_v49  ;;  %v381_v51 = vld [vmem:[%s5088_s25 + $0x598] sm:$0xff]  ;;  %v383_v52 = vld [vmem:[%s5088_s25 + $0x5a0] sm:$0xff] }
  0x4b   : > { %380 = vst [vmem:[%s5093_s26 + $0x390] sm:$0xff] %v379_v50  ;;  %382 = vst [vmem:[%s5093_s26 + $0x398] sm:$0xff] %v381_v51  ;;  %v385_v53 = vld [vmem:[%s5088_s25 + $0x5a8] sm:$0xff]  ;;  %v387_v54 = vld [vmem:[%s5088_s25 + $0x5b0] sm:$0xff] }
  0x4c   : > { %384 = vst [vmem:[%s5093_s26 + $0x3a0] sm:$0xff] %v383_v52  ;;  %v389_v55 = vld [vmem:[%s5088_s25 + $0x5b8] sm:$0xff]  ;;  %386 = vst [vmem:[%s5093_s26 + $0x3a8] sm:$0xff] %v385_v53  ;;  %v391_v56 = vld [vmem:[%s5088_s25 + $0x5c0] sm:$0xff] }
  0x4d   : > { %388 = vst [vmem:[%s5093_s26 + $0x3b0] sm:$0xff] %v387_v54  ;;  %390 = vst [vmem:[%s5093_s26 + $0x3b8] sm:$0xff] %v389_v55  ;;  %v393_v57 = vld [vmem:[%s5088_s25 + $0x5c8] sm:$0xff]  ;;  %v395_v58 = vld [vmem:[%s5088_s25 + $0x5d0] sm:$0xff] }
  0x4e   : > { %392 = vst [vmem:[%s5093_s26 + $0x3c0] sm:$0xff] %v391_v56  ;;  %394 = vst [vmem:[%s5093_s26 + $0x3c8] sm:$0xff] %v393_v57  ;;  %v397_v59 = vld [vmem:[%s5088_s25 + $0x5d8] sm:$0xff]  ;;  %v399_v60 = vld [vmem:[%s5088_s25 + $0x5e0] sm:$0xff] }
  0x4f   : > { %396 = vst [vmem:[%s5093_s26 + $0x3d0] sm:$0xff] %v395_v58  ;;  %v401_v61 = vld [vmem:[%s5088_s25 + $0x5e8] sm:$0xff]  ;;  %398 = vst [vmem:[%s5093_s26 + $0x3d8] sm:$0xff] %v397_v59  ;;  %v403_v62 = vld [vmem:[%s5088_s25 + $0x5f0] sm:$0xff] }
  0x50   : > { %400 = vst [vmem:[%s5093_s26 + $0x3e0] sm:$0xff] %v399_v60  ;;  %402 = vst [vmem:[%s5093_s26 + $0x3e8] sm:$0xff] %v401_v61  ;;  %v405_v63 = vld [vmem:[%s5088_s25 + $0x5f8] sm:$0xff]  ;;  %v407_v0 = vld [vmem:[%s5088_s25 + $0x800] sm:$0xff] }
  0x51   : > { %404 = vst [vmem:[%s5093_s26 + $0x3f0] sm:$0xff] %v403_v62  ;;  %406 = vst [vmem:[%s5093_s26 + $0x3f8] sm:$0xff] %v405_v63  ;;  %v409_v1 = vld [vmem:[%s5088_s25 + $0x808] sm:$0xff]  ;;  %v411_v2 = vld [vmem:[%s5088_s25 + $0x810] sm:$0xff] }
  0x52   : > { %408 = vst [vmem:[%s5093_s26 + $0x400] sm:$0xff] %v407_v0  ;;  %v413_v3 = vld [vmem:[%s5088_s25 + $0x818] sm:$0xff]  ;;  %410 = vst [vmem:[%s5093_s26 + $0x408] sm:$0xff] %v409_v1  ;;  %v415_v4 = vld [vmem:[%s5088_s25 + $0x820] sm:$0xff] }
  0x53   : > { %412 = vst [vmem:[%s5093_s26 + $0x410] sm:$0xff] %v411_v2  ;;  %414 = vst [vmem:[%s5093_s26 + $0x418] sm:$0xff] %v413_v3  ;;  %v417_v5 = vld [vmem:[%s5088_s25 + $0x828] sm:$0xff]  ;;  %v419_v6 = vld [vmem:[%s5088_s25 + $0x830] sm:$0xff] }
  0x54   : > { %416 = vst [vmem:[%s5093_s26 + $0x420] sm:$0xff] %v415_v4  ;;  %418 = vst [vmem:[%s5093_s26 + $0x428] sm:$0xff] %v417_v5  ;;  %v421_v7 = vld [vmem:[%s5088_s25 + $0x838] sm:$0xff]  ;;  %v423_v8 = vld [vmem:[%s5088_s25 + $0x840] sm:$0xff] }
  0x55   : > { %420 = vst [vmem:[%s5093_s26 + $0x430] sm:$0xff] %v419_v6  ;;  %v425_v9 = vld [vmem:[%s5088_s25 + $0x848] sm:$0xff]  ;;  %422 = vst [vmem:[%s5093_s26 + $0x438] sm:$0xff] %v421_v7  ;;  %v427_v10 = vld [vmem:[%s5088_s25 + $0x850] sm:$0xff] }
  0x56   : > { %424 = vst [vmem:[%s5093_s26 + $0x440] sm:$0xff] %v423_v8  ;;  %426 = vst [vmem:[%s5093_s26 + $0x448] sm:$0xff] %v425_v9  ;;  %v429_v11 = vld [vmem:[%s5088_s25 + $0x858] sm:$0xff]  ;;  %v431_v12 = vld [vmem:[%s5088_s25 + $0x860] sm:$0xff] }
  0x57   : > { %428 = vst [vmem:[%s5093_s26 + $0x450] sm:$0xff] %v427_v10  ;;  %430 = vst [vmem:[%s5093_s26 + $0x458] sm:$0xff] %v429_v11  ;;  %v433_v13 = vld [vmem:[%s5088_s25 + $0x868] sm:$0xff]  ;;  %v435_v14 = vld [vmem:[%s5088_s25 + $0x870] sm:$0xff] }
  0x58   : > { %432 = vst [vmem:[%s5093_s26 + $0x460] sm:$0xff] %v431_v12  ;;  %v437_v15 = vld [vmem:[%s5088_s25 + $0x878] sm:$0xff]  ;;  %434 = vst [vmem:[%s5093_s26 + $0x468] sm:$0xff] %v433_v13  ;;  %v439_v16 = vld [vmem:[%s5088_s25 + $0x880] sm:$0xff] }
  0x59   : > { %436 = vst [vmem:[%s5093_s26 + $0x470] sm:$0xff] %v435_v14  ;;  %438 = vst [vmem:[%s5093_s26 + $0x478] sm:$0xff] %v437_v15  ;;  %v441_v17 = vld [vmem:[%s5088_s25 + $0x888] sm:$0xff]  ;;  %v443_v18 = vld [vmem:[%s5088_s25 + $0x890] sm:$0xff] }
  0x5a   : > { %440 = vst [vmem:[%s5093_s26 + $0x480] sm:$0xff] %v439_v16  ;;  %442 = vst [vmem:[%s5093_s26 + $0x488] sm:$0xff] %v441_v17  ;;  %v445_v19 = vld [vmem:[%s5088_s25 + $0x898] sm:$0xff]  ;;  %v447_v20 = vld [vmem:[%s5088_s25 + $0x8a0] sm:$0xff] }
  0x5b   : > { %444 = vst [vmem:[%s5093_s26 + $0x490] sm:$0xff] %v443_v18  ;;  %v449_v21 = vld [vmem:[%s5088_s25 + $0x8a8] sm:$0xff]  ;;  %446 = vst [vmem:[%s5093_s26 + $0x498] sm:$0xff] %v445_v19  ;;  %v451_v22 = vld [vmem:[%s5088_s25 + $0x8b0] sm:$0xff] }
  0x5c   : > { %448 = vst [vmem:[%s5093_s26 + $0x4a0] sm:$0xff] %v447_v20  ;;  %450 = vst [vmem:[%s5093_s26 + $0x4a8] sm:$0xff] %v449_v21  ;;  %v453_v23 = vld [vmem:[%s5088_s25 + $0x8b8] sm:$0xff]  ;;  %v455_v24 = vld [vmem:[%s5088_s25 + $0x8c0] sm:$0xff] }
  0x5d   : > { %452 = vst [vmem:[%s5093_s26 + $0x4b0] sm:$0xff] %v451_v22  ;;  %454 = vst [vmem:[%s5093_s26 + $0x4b8] sm:$0xff] %v453_v23  ;;  %v457_v25 = vld [vmem:[%s5088_s25 + $0x8c8] sm:$0xff]  ;;  %v459_v26 = vld [vmem:[%s5088_s25 + $0x8d0] sm:$0xff] }
  0x5e   : > { %456 = vst [vmem:[%s5093_s26 + $0x4c0] sm:$0xff] %v455_v24  ;;  %v461_v27 = vld [vmem:[%s5088_s25 + $0x8d8] sm:$0xff]  ;;  %458 = vst [vmem:[%s5093_s26 + $0x4c8] sm:$0xff] %v457_v25  ;;  %v463_v28 = vld [vmem:[%s5088_s25 + $0x8e0] sm:$0xff] }
  0x5f   : > { %460 = vst [vmem:[%s5093_s26 + $0x4d0] sm:$0xff] %v459_v26  ;;  %462 = vst [vmem:[%s5093_s26 + $0x4d8] sm:$0xff] %v461_v27  ;;  %v465_v29 = vld [vmem:[%s5088_s25 + $0x8e8] sm:$0xff]  ;;  %v467_v30 = vld [vmem:[%s5088_s25 + $0x8f0] sm:$0xff] }
  0x60   : > { %464 = vst [vmem:[%s5093_s26 + $0x4e0] sm:$0xff] %v463_v28  ;;  %466 = vst [vmem:[%s5093_s26 + $0x4e8] sm:$0xff] %v465_v29  ;;  %v469_v31 = vld [vmem:[%s5088_s25 + $0x8f8] sm:$0xff]  ;;  %v471_v32 = vld [vmem:[%s5088_s25 + $0x900] sm:$0xff] }
  0x61   : > { %468 = vst [vmem:[%s5093_s26 + $0x4f0] sm:$0xff] %v467_v30  ;;  %v473_v33 = vld [vmem:[%s5088_s25 + $0x908] sm:$0xff]  ;;  %470 = vst [vmem:[%s5093_s26 + $0x4f8] sm:$0xff] %v469_v31  ;;  %v475_v34 = vld [vmem:[%s5088_s25 + $0x910] sm:$0xff] }
  0x62   : > { %472 = vst [vmem:[%s5093_s26 + $0x500] sm:$0xff] %v471_v32  ;;  %474 = vst [vmem:[%s5093_s26 + $0x508] sm:$0xff] %v473_v33  ;;  %v477_v35 = vld [vmem:[%s5088_s25 + $0x918] sm:$0xff]  ;;  %v479_v36 = vld [vmem:[%s5088_s25 + $0x920] sm:$0xff] }
  0x63   : > { %476 = vst [vmem:[%s5093_s26 + $0x510] sm:$0xff] %v475_v34  ;;  %478 = vst [vmem:[%s5093_s26 + $0x518] sm:$0xff] %v477_v35  ;;  %v481_v37 = vld [vmem:[%s5088_s25 + $0x928] sm:$0xff]  ;;  %v483_v38 = vld [vmem:[%s5088_s25 + $0x930] sm:$0xff] }
  0x64   : > { %480 = vst [vmem:[%s5093_s26 + $0x520] sm:$0xff] %v479_v36  ;;  %v485_v39 = vld [vmem:[%s5088_s25 + $0x938] sm:$0xff]  ;;  %482 = vst [vmem:[%s5093_s26 + $0x528] sm:$0xff] %v481_v37  ;;  %v487_v40 = vld [vmem:[%s5088_s25 + $0x940] sm:$0xff] }
  0x65   : > { %484 = vst [vmem:[%s5093_s26 + $0x530] sm:$0xff] %v483_v38  ;;  %486 = vst [vmem:[%s5093_s26 + $0x538] sm:$0xff] %v485_v39  ;;  %v489_v41 = vld [vmem:[%s5088_s25 + $0x948] sm:$0xff]  ;;  %v491_v42 = vld [vmem:[%s5088_s25 + $0x950] sm:$0xff] }
  0x66   : > { %488 = vst [vmem:[%s5093_s26 + $0x540] sm:$0xff] %v487_v40  ;;  %490 = vst [vmem:[%s5093_s26 + $0x548] sm:$0xff] %v489_v41  ;;  %v493_v43 = vld [vmem:[%s5088_s25 + $0x958] sm:$0xff]  ;;  %v495_v44 = vld [vmem:[%s5088_s25 + $0x960] sm:$0xff] }
  0x67   : > { %492 = vst [vmem:[%s5093_s26 + $0x550] sm:$0xff] %v491_v42  ;;  %v497_v45 = vld [vmem:[%s5088_s25 + $0x968] sm:$0xff]  ;;  %494 = vst [vmem:[%s5093_s26 + $0x558] sm:$0xff] %v493_v43  ;;  %v499_v46 = vld [vmem:[%s5088_s25 + $0x970] sm:$0xff] }
  0x68   : > { %496 = vst [vmem:[%s5093_s26 + $0x560] sm:$0xff] %v495_v44  ;;  %498 = vst [vmem:[%s5093_s26 + $0x568] sm:$0xff] %v497_v45  ;;  %v501_v47 = vld [vmem:[%s5088_s25 + $0x978] sm:$0xff]  ;;  %v503_v48 = vld [vmem:[%s5088_s25 + $0x980] sm:$0xff] }
  0x69   : > { %500 = vst [vmem:[%s5093_s26 + $0x570] sm:$0xff] %v499_v46  ;;  %502 = vst [vmem:[%s5093_s26 + $0x578] sm:$0xff] %v501_v47  ;;  %v505_v49 = vld [vmem:[%s5088_s25 + $0x988] sm:$0xff]  ;;  %v507_v50 = vld [vmem:[%s5088_s25 + $0x990] sm:$0xff] }
  0x6a   : > { %504 = vst [vmem:[%s5093_s26 + $0x580] sm:$0xff] %v503_v48  ;;  %v509_v51 = vld [vmem:[%s5088_s25 + $0x998] sm:$0xff]  ;;  %506 = vst [vmem:[%s5093_s26 + $0x588] sm:$0xff] %v505_v49  ;;  %v511_v52 = vld [vmem:[%s5088_s25 + $0x9a0] sm:$0xff] }
  0x6b   : > { %508 = vst [vmem:[%s5093_s26 + $0x590] sm:$0xff] %v507_v50  ;;  %510 = vst [vmem:[%s5093_s26 + $0x598] sm:$0xff] %v509_v51  ;;  %v513_v53 = vld [vmem:[%s5088_s25 + $0x9a8] sm:$0xff]  ;;  %v515_v54 = vld [vmem:[%s5088_s25 + $0x9b0] sm:$0xff] }
  0x6c   : > { %512 = vst [vmem:[%s5093_s26 + $0x5a0] sm:$0xff] %v511_v52  ;;  %514 = vst [vmem:[%s5093_s26 + $0x5a8] sm:$0xff] %v513_v53  ;;  %v517_v55 = vld [vmem:[%s5088_s25 + $0x9b8] sm:$0xff]  ;;  %v519_v56 = vld [vmem:[%s5088_s25 + $0x9c0] sm:$0xff] }
  0x6d   : > { %516 = vst [vmem:[%s5093_s26 + $0x5b0] sm:$0xff] %v515_v54  ;;  %v521_v57 = vld [vmem:[%s5088_s25 + $0x9c8] sm:$0xff]  ;;  %518 = vst [vmem:[%s5093_s26 + $0x5b8] sm:$0xff] %v517_v55  ;;  %v523_v58 = vld [vmem:[%s5088_s25 + $0x9d0] sm:$0xff] }
  0x6e   : > { %520 = vst [vmem:[%s5093_s26 + $0x5c0] sm:$0xff] %v519_v56  ;;  %522 = vst [vmem:[%s5093_s26 + $0x5c8] sm:$0xff] %v521_v57  ;;  %v525_v59 = vld [vmem:[%s5088_s25 + $0x9d8] sm:$0xff]  ;;  %v527_v60 = vld [vmem:[%s5088_s25 + $0x9e0] sm:$0xff] }
  0x6f   : > { %524 = vst [vmem:[%s5093_s26 + $0x5d0] sm:$0xff] %v523_v58  ;;  %526 = vst [vmem:[%s5093_s26 + $0x5d8] sm:$0xff] %v525_v59  ;;  %v529_v61 = vld [vmem:[%s5088_s25 + $0x9e8] sm:$0xff]  ;;  %v531_v62 = vld [vmem:[%s5088_s25 + $0x9f0] sm:$0xff] }
  0x70   : > { %528 = vst [vmem:[%s5093_s26 + $0x5e0] sm:$0xff] %v527_v60  ;;  %v533_v63 = vld [vmem:[%s5088_s25 + $0x9f8] sm:$0xff]  ;;  %530 = vst [vmem:[%s5093_s26 + $0x5e8] sm:$0xff] %v529_v61  ;;  %v535_v0 = vld [vmem:[%s5088_s25 + $0xc00] sm:$0xff] }
  0x71   : > { %532 = vst [vmem:[%s5093_s26 + $0x5f0] sm:$0xff] %v531_v62  ;;  %534 = vst [vmem:[%s5093_s26 + $0x5f8] sm:$0xff] %v533_v63  ;;  %v537_v1 = vld [vmem:[%s5088_s25 + $0xc08] sm:$0xff]  ;;  %v539_v2 = vld [vmem:[%s5088_s25 + $0xc10] sm:$0xff] }
  0x72   : > { %536 = vst [vmem:[%s5093_s26 + $0x600] sm:$0xff] %v535_v0  ;;  %538 = vst [vmem:[%s5093_s26 + $0x608] sm:$0xff] %v537_v1  ;;  %v541_v3 = vld [vmem:[%s5088_s25 + $0xc18] sm:$0xff]  ;;  %v543_v4 = vld [vmem:[%s5088_s25 + $0xc20] sm:$0xff] }
  0x73   : > { %540 = vst [vmem:[%s5093_s26 + $0x610] sm:$0xff] %v539_v2  ;;  %v545_v5 = vld [vmem:[%s5088_s25 + $0xc28] sm:$0xff]  ;;  %542 = vst [vmem:[%s5093_s26 + $0x618] sm:$0xff] %v541_v3  ;;  %v547_v6 = vld [vmem:[%s5088_s25 + $0xc30] sm:$0xff] }
  0x74   : > { %544 = vst [vmem:[%s5093_s26 + $0x620] sm:$0xff] %v543_v4  ;;  %546 = vst [vmem:[%s5093_s26 + $0x628] sm:$0xff] %v545_v5  ;;  %v549_v7 = vld [vmem:[%s5088_s25 + $0xc38] sm:$0xff]  ;;  %v551_v8 = vld [vmem:[%s5088_s25 + $0xc40] sm:$0xff] }
  0x75   : > { %548 = vst [vmem:[%s5093_s26 + $0x630] sm:$0xff] %v547_v6  ;;  %550 = vst [vmem:[%s5093_s26 + $0x638] sm:$0xff] %v549_v7  ;;  %v553_v9 = vld [vmem:[%s5088_s25 + $0xc48] sm:$0xff]  ;;  %v555_v10 = vld [vmem:[%s5088_s25 + $0xc50] sm:$0xff] }
  0x76   : > { %552 = vst [vmem:[%s5093_s26 + $0x640] sm:$0xff] %v551_v8  ;;  %v557_v11 = vld [vmem:[%s5088_s25 + $0xc58] sm:$0xff]  ;;  %554 = vst [vmem:[%s5093_s26 + $0x648] sm:$0xff] %v553_v9  ;;  %v559_v12 = vld [vmem:[%s5088_s25 + $0xc60] sm:$0xff] }
  0x77   : > { %556 = vst [vmem:[%s5093_s26 + $0x650] sm:$0xff] %v555_v10  ;;  %558 = vst [vmem:[%s5093_s26 + $0x658] sm:$0xff] %v557_v11  ;;  %v561_v13 = vld [vmem:[%s5088_s25 + $0xc68] sm:$0xff]  ;;  %v563_v14 = vld [vmem:[%s5088_s25 + $0xc70] sm:$0xff] }
  0x78   : > { %560 = vst [vmem:[%s5093_s26 + $0x660] sm:$0xff] %v559_v12  ;;  %562 = vst [vmem:[%s5093_s26 + $0x668] sm:$0xff] %v561_v13  ;;  %v565_v15 = vld [vmem:[%s5088_s25 + $0xc78] sm:$0xff]  ;;  %v567_v16 = vld [vmem:[%s5088_s25 + $0xc80] sm:$0xff] }
  0x79   : > { %564 = vst [vmem:[%s5093_s26 + $0x670] sm:$0xff] %v563_v14  ;;  %v569_v17 = vld [vmem:[%s5088_s25 + $0xc88] sm:$0xff]  ;;  %566 = vst [vmem:[%s5093_s26 + $0x678] sm:$0xff] %v565_v15  ;;  %v571_v18 = vld [vmem:[%s5088_s25 + $0xc90] sm:$0xff] }
  0x7a   : > { %568 = vst [vmem:[%s5093_s26 + $0x680] sm:$0xff] %v567_v16  ;;  %570 = vst [vmem:[%s5093_s26 + $0x688] sm:$0xff] %v569_v17  ;;  %v573_v19 = vld [vmem:[%s5088_s25 + $0xc98] sm:$0xff]  ;;  %v575_v20 = vld [vmem:[%s5088_s25 + $0xca0] sm:$0xff] }
  0x7b   : > { %572 = vst [vmem:[%s5093_s26 + $0x690] sm:$0xff] %v571_v18  ;;  %574 = vst [vmem:[%s5093_s26 + $0x698] sm:$0xff] %v573_v19  ;;  %v577_v21 = vld [vmem:[%s5088_s25 + $0xca8] sm:$0xff]  ;;  %v579_v22 = vld [vmem:[%s5088_s25 + $0xcb0] sm:$0xff] }
  0x7c   : > { %576 = vst [vmem:[%s5093_s26 + $0x6a0] sm:$0xff] %v575_v20  ;;  %v581_v23 = vld [vmem:[%s5088_s25 + $0xcb8] sm:$0xff]  ;;  %578 = vst [vmem:[%s5093_s26 + $0x6a8] sm:$0xff] %v577_v21  ;;  %v583_v24 = vld [vmem:[%s5088_s25 + $0xcc0] sm:$0xff] }
  0x7d   : > { %580 = vst [vmem:[%s5093_s26 + $0x6b0] sm:$0xff] %v579_v22  ;;  %582 = vst [vmem:[%s5093_s26 + $0x6b8] sm:$0xff] %v581_v23  ;;  %v585_v25 = vld [vmem:[%s5088_s25 + $0xcc8] sm:$0xff]  ;;  %v587_v26 = vld [vmem:[%s5088_s25 + $0xcd0] sm:$0xff] }
  0x7e   : > { %584 = vst [vmem:[%s5093_s26 + $0x6c0] sm:$0xff] %v583_v24  ;;  %586 = vst [vmem:[%s5093_s26 + $0x6c8] sm:$0xff] %v585_v25  ;;  %v589_v27 = vld [vmem:[%s5088_s25 + $0xcd8] sm:$0xff]  ;;  %v591_v28 = vld [vmem:[%s5088_s25 + $0xce0] sm:$0xff] }
  0x7f   : > { %588 = vst [vmem:[%s5093_s26 + $0x6d0] sm:$0xff] %v587_v26  ;;  %v593_v29 = vld [vmem:[%s5088_s25 + $0xce8] sm:$0xff]  ;;  %590 = vst [vmem:[%s5093_s26 + $0x6d8] sm:$0xff] %v589_v27  ;;  %v595_v30 = vld [vmem:[%s5088_s25 + $0xcf0] sm:$0xff] }
  0x80   : > { %592 = vst [vmem:[%s5093_s26 + $0x6e0] sm:$0xff] %v591_v28  ;;  %594 = vst [vmem:[%s5093_s26 + $0x6e8] sm:$0xff] %v593_v29  ;;  %v597_v31 = vld [vmem:[%s5088_s25 + $0xcf8] sm:$0xff]  ;;  %v599_v32 = vld [vmem:[%s5088_s25 + $0xd00] sm:$0xff] }
  0x81   : > { %596 = vst [vmem:[%s5093_s26 + $0x6f0] sm:$0xff] %v595_v30  ;;  %598 = vst [vmem:[%s5093_s26 + $0x6f8] sm:$0xff] %v597_v31  ;;  %v601_v33 = vld [vmem:[%s5088_s25 + $0xd08] sm:$0xff]  ;;  %v603_v34 = vld [vmem:[%s5088_s25 + $0xd10] sm:$0xff] }
  0x82   : > { %600 = vst [vmem:[%s5093_s26 + $0x700] sm:$0xff] %v599_v32  ;;  %v605_v35 = vld [vmem:[%s5088_s25 + $0xd18] sm:$0xff]  ;;  %602 = vst [vmem:[%s5093_s26 + $0x708] sm:$0xff] %v601_v33  ;;  %v607_v36 = vld [vmem:[%s5088_s25 + $0xd20] sm:$0xff] }
  0x83   : > { %604 = vst [vmem:[%s5093_s26 + $0x710] sm:$0xff] %v603_v34  ;;  %606 = vst [vmem:[%s5093_s26 + $0x718] sm:$0xff] %v605_v35  ;;  %v609_v37 = vld [vmem:[%s5088_s25 + $0xd28] sm:$0xff]  ;;  %v611_v38 = vld [vmem:[%s5088_s25 + $0xd30] sm:$0xff] }
  0x84   : > { %608 = vst [vmem:[%s5093_s26 + $0x720] sm:$0xff] %v607_v36  ;;  %610 = vst [vmem:[%s5093_s26 + $0x728] sm:$0xff] %v609_v37  ;;  %v613_v39 = vld [vmem:[%s5088_s25 + $0xd38] sm:$0xff]  ;;  %v615_v40 = vld [vmem:[%s5088_s25 + $0xd40] sm:$0xff] }
  0x85   : > { %612 = vst [vmem:[%s5093_s26 + $0x730] sm:$0xff] %v611_v38  ;;  %v617_v41 = vld [vmem:[%s5088_s25 + $0xd48] sm:$0xff]  ;;  %614 = vst [vmem:[%s5093_s26 + $0x738] sm:$0xff] %v613_v39  ;;  %v619_v42 = vld [vmem:[%s5088_s25 + $0xd50] sm:$0xff] }
  0x86   : > { %616 = vst [vmem:[%s5093_s26 + $0x740] sm:$0xff] %v615_v40  ;;  %618 = vst [vmem:[%s5093_s26 + $0x748] sm:$0xff] %v617_v41  ;;  %v621_v43 = vld [vmem:[%s5088_s25 + $0xd58] sm:$0xff]  ;;  %v623_v44 = vld [vmem:[%s5088_s25 + $0xd60] sm:$0xff] }
  0x87   : > { %620 = vst [vmem:[%s5093_s26 + $0x750] sm:$0xff] %v619_v42  ;;  %622 = vst [vmem:[%s5093_s26 + $0x758] sm:$0xff] %v621_v43  ;;  %v625_v45 = vld [vmem:[%s5088_s25 + $0xd68] sm:$0xff]  ;;  %v627_v46 = vld [vmem:[%s5088_s25 + $0xd70] sm:$0xff] }
  0x88   : > { %624 = vst [vmem:[%s5093_s26 + $0x760] sm:$0xff] %v623_v44  ;;  %v629_v47 = vld [vmem:[%s5088_s25 + $0xd78] sm:$0xff]  ;;  %626 = vst [vmem:[%s5093_s26 + $0x768] sm:$0xff] %v625_v45  ;;  %v631_v48 = vld [vmem:[%s5088_s25 + $0xd80] sm:$0xff] }
  0x89   : > { %628 = vst [vmem:[%s5093_s26 + $0x770] sm:$0xff] %v627_v46  ;;  %630 = vst [vmem:[%s5093_s26 + $0x778] sm:$0xff] %v629_v47  ;;  %v633_v49 = vld [vmem:[%s5088_s25 + $0xd88] sm:$0xff]  ;;  %v635_v50 = vld [vmem:[%s5088_s25 + $0xd90] sm:$0xff] }
  0x8a   : > { %632 = vst [vmem:[%s5093_s26 + $0x780] sm:$0xff] %v631_v48  ;;  %634 = vst [vmem:[%s5093_s26 + $0x788] sm:$0xff] %v633_v49  ;;  %v637_v51 = vld [vmem:[%s5088_s25 + $0xd98] sm:$0xff]  ;;  %v639_v52 = vld [vmem:[%s5088_s25 + $0xda0] sm:$0xff] }
  0x8b   : > { %636 = vst [vmem:[%s5093_s26 + $0x790] sm:$0xff] %v635_v50  ;;  %v641_v53 = vld [vmem:[%s5088_s25 + $0xda8] sm:$0xff]  ;;  %638 = vst [vmem:[%s5093_s26 + $0x798] sm:$0xff] %v637_v51  ;;  %v643_v54 = vld [vmem:[%s5088_s25 + $0xdb0] sm:$0xff] }
  0x8c   : > { %640 = vst [vmem:[%s5093_s26 + $0x7a0] sm:$0xff] %v639_v52  ;;  %642 = vst [vmem:[%s5093_s26 + $0x7a8] sm:$0xff] %v641_v53  ;;  %v645_v55 = vld [vmem:[%s5088_s25 + $0xdb8] sm:$0xff]  ;;  %v647_v56 = vld [vmem:[%s5088_s25 + $0xdc0] sm:$0xff] }
  0x8d   : > { %644 = vst [vmem:[%s5093_s26 + $0x7b0] sm:$0xff] %v643_v54  ;;  %646 = vst [vmem:[%s5093_s26 + $0x7b8] sm:$0xff] %v645_v55  ;;  %v649_v57 = vld [vmem:[%s5088_s25 + $0xdc8] sm:$0xff]  ;;  %v651_v58 = vld [vmem:[%s5088_s25 + $0xdd0] sm:$0xff] }
  0x8e   : > { %648 = vst [vmem:[%s5093_s26 + $0x7c0] sm:$0xff] %v647_v56  ;;  %v653_v59 = vld [vmem:[%s5088_s25 + $0xdd8] sm:$0xff]  ;;  %650 = vst [vmem:[%s5093_s26 + $0x7c8] sm:$0xff] %v649_v57  ;;  %v655_v60 = vld [vmem:[%s5088_s25 + $0xde0] sm:$0xff] }
  0x8f   : > { %652 = vst [vmem:[%s5093_s26 + $0x7d0] sm:$0xff] %v651_v58  ;;  %654 = vst [vmem:[%s5093_s26 + $0x7d8] sm:$0xff] %v653_v59  ;;  %v657_v61 = vld [vmem:[%s5088_s25 + $0xde8] sm:$0xff]  ;;  %v659_v62 = vld [vmem:[%s5088_s25 + $0xdf0] sm:$0xff] }
  0x90   : > { %656 = vst [vmem:[%s5093_s26 + $0x7e0] sm:$0xff] %v655_v60  ;;  %658 = vst [vmem:[%s5093_s26 + $0x7e8] sm:$0xff] %v657_v61  ;;  %v661_v63 = vld [vmem:[%s5088_s25 + $0xdf8] sm:$0xff] }
  0x91   : > { %660 = vst [vmem:[%s5093_s26 + $0x7f0] sm:$0xff] %v659_v62  ;;  %662 = vst [vmem:[%s5093_s26 + $0x7f8] sm:$0xff] %v661_v63 }
  0x92 PF: > { %p3984_p5 = scmp.ge.s32.totalorder %s5031_s14, 1  ;;  %p667_p6 = scmp.lt.s32.totalorder %s5031_s14, 3 }
  0x94   : > { %p668_p7 = pnand %p3984_p5, %p667_p6 }
  0x96   : > { %671 = sbr.rel (%p668_p7) target bundleno = 951 (0x3b7), region = 51 }
  0x9d   : > { %v4593_v0 = vld [vmem:[%s6448_s1] sm:$0xff]   ;;  %v5033_v1 = vmov 0   ;;  %v4595_v3 = vld [vmem:[%s6448_s1 + $0x8] sm:$0xff]   ;;  %v4597_v5 = vld [vmem:[%s6448_s1 + $0x10] sm:$0xff]   ;;  %s674_s7 = sand.u32 1, %s5023_s12  }
  0x9e   : > { %2497 = vmatprep.subr.bf16.mxu1 %v5033_v1  ;;  %3042 = vmatprep.subr.bf16.mxu0 %v5033_v1  ;;  %v4594_v2 = vld [vmem:[%s6448_s1 + $0x80] sm:$0xff]   ;;  %v4596_v4 = vld [vmem:[%s6448_s1 + $0x88] sm:$0xff]   ;;  %v4598_v6 = vld [vmem:[%s6448_s1 + $0x90] sm:$0xff]   ;;  %s3985_s17 = sshll.u32 %s674_s7, 11 }
  0x9f   : > { %2498 = vmatpush1.bf16.msra.mxu1 %v4593_v0  ;;  %3043 = vmatpush1.bf16.msra.mxu0 %v4594_v2  ;;  %v4599_v7 = vld [vmem:[%s6448_s1 + $0x18] sm:$0xff]   ;;  %v4601_v9 = vld [vmem:[%s6448_s1 + $0x20] sm:$0xff]   ;;  %v4603_v11 = vld [vmem:[%s6448_s1 + $0x28] sm:$0xff]   ;;  %s5679_s22 = scalar_lea.vmem [#allocation2], %s3985_s17 }
  0xa0   : > { %2499 = vmatprep.subr.bf16.mxu1 %v5033_v1  ;;  %3044 = vmatprep.subr.bf16.mxu0 %v5033_v1  ;;  %v4600_v8 = vld [vmem:[%s6448_s1 + $0x98] sm:$0xff]   ;;  %v4602_v10 = vld [vmem:[%s6448_s1 + $0xa0] sm:$0xff]   ;;  %v4604_v12 = vld [vmem:[%s6448_s1 + $0xa8] sm:$0xff]  }
  0xa1   : > { %v4605_v13 = vld [vmem:[%s6448_s1 + $0x30] sm:$0xff]   ;;  %v4607_v15 = vld [vmem:[%s6448_s1 + $0x38] sm:$0xff]   ;;  %v4609_v17 = vld [vmem:[%s6448_s1 + $0x40] sm:$0xff]  }
  0xa2   : > { %v4606_v14 = vld [vmem:[%s6448_s1 + $0xb0] sm:$0xff]   ;;  %v4608_v16 = vld [vmem:[%s6448_s1 + $0xb8] sm:$0xff]   ;;  %v4610_v18 = vld [vmem:[%s6448_s1 + $0xc0] sm:$0xff]  }
  0xa3   : > { %2500 = vmatpush1.bf16.msra.mxu1 %v4595_v3  ;;  %3045 = vmatpush1.bf16.msra.mxu0 %v4596_v4  ;;  %v4627_v19 = vld [vmem:[%s5679_s22 + $0x4] ss:$16 sps:$4 sm:$0xff]   ;;  %v4611_v20 = vld [vmem:[%s6448_s1 + $0x48] sm:$0xff]   ;;  %v4615_v25 = vld [vmem:[%s6448_s1 + $0x58] sm:$0xff]  }
  0xa4   : > { %2501 = vmatprep.subr.bf16.mxu1 %v5033_v1  ;;  %3046 = vmatprep.subr.bf16.mxu0 %v5033_v1  ;;  %v4630_v21 = vld [vmem:[%s5679_s22 + $0xc] ss:$16 sps:$4 sm:$0xff]   ;;  %v4613_v23 = vld [vmem:[%s6448_s1 + $0x50] sm:$0xff]   ;;  %v4617_v27 = vld [vmem:[%s6448_s1 + $0x60] sm:$0xff]  }
  0xa5   : > { %v4612_v22 = vld [vmem:[%s6448_s1 + $0xc8] sm:$0xff]   ;;  %2529 = vmatprep.mubr.bf16.mxu1 %v4627_v19  ;;  %3074 = vmatprep.mubr.bf16.mxu0 %v4630_v21  ;;  %v4614_v24 = vld [vmem:[%s6448_s1 + $0xd0] sm:$0xff]   ;;  %v4616_v26 = vld [vmem:[%s6448_s1 + $0xd8] sm:$0xff]  }
  0xa6   : > { %v4618_v28 = vld [vmem:[%s6448_s1 + $0xe0] sm:$0xff]   ;;  %v4619_v29 = vld [vmem:[%s6448_s1 + $0x68] sm:$0xff]   ;;  %v4621_v31 = vld [vmem:[%s6448_s1 + $0x70] sm:$0xff]  }
  0xa7   : > { %2502 = vmatpush1.bf16.msra.mxu1 %v4597_v5  ;;  %3047 = vmatpush1.bf16.msra.mxu0 %v4598_v6  ;;  %v4620_v30 = vld [vmem:[%s6448_s1 + $0xe8] sm:$0xff]   ;;  %v4622_v32 = vld [vmem:[%s6448_s1 + $0xf0] sm:$0xff]   ;;  %v4623_v33 = vld [vmem:[%s6448_s1 + $0x78] sm:$0xff]  }
  0xa8   : > { %2503 = vmatprep.subr.bf16.mxu1 %v5033_v1  ;;  %3048 = vmatprep.subr.bf16.mxu0 %v5033_v1  ;;  %v4624_v34 = vld [vmem:[%s6448_s1 + $0xf8] sm:$0xff]   ;;  %v4625_v35 = vld [vmem:[%s5679_s22] ss:$16 sps:$4 sm:$0xff]   ;;  %v4631_v37 = vld [vmem:[%s5679_s22 + $0x24] ss:$16 sps:$4 sm:$0xff]  }
  0xa9   : > { %v4628_v36 = vld [vmem:[%s5679_s22 + $0x8] ss:$16 sps:$4 sm:$0xff]   ;;  %v4633_v38 = vld [vmem:[%s5679_s22 + $0x2c] ss:$16 sps:$4 sm:$0xff]   ;;  %v4635_v39 = vld [vmem:[%s5679_s22 + $0x20] ss:$16 sps:$4 sm:$0xff]  }
  0xaa   : > { %v4636_v40 = vld [vmem:[%s5679_s22 + $0x28] ss:$16 sps:$4 sm:$0xff]   ;;  %v4637_v41 = vld [vmem:[%s5679_s22 + $0x44] ss:$16 sps:$4 sm:$0xff]   ;;  %v4639_v42 = vld [vmem:[%s5679_s22 + $0x4c] ss:$16 sps:$4 sm:$0xff]  }
  0xab   : > { %2504 = vmatpush1.bf16.msra.mxu1 %v4599_v7  ;;  %3049 = vmatpush1.bf16.msra.mxu0 %v4600_v8  ;;  %v4641_v43 = vld [vmem:[%s5679_s22 + $0x40] ss:$16 sps:$4 sm:$0xff]   ;;  %v4642_v44 = vld [vmem:[%s5679_s22 + $0x48] ss:$16 sps:$4 sm:$0xff]   ;;  %v4643_v45 = vld [vmem:[%s5679_s22 + $0x64] ss:$16 sps:$4 sm:$0xff]  }
  0xac   : > { %2505 = vmatprep.subr.bf16.mxu1 %v5033_v1  ;;  %3050 = vmatprep.subr.bf16.mxu0 %v5033_v1  ;;  %v4645_v46 = vld [vmem:[%s5679_s22 + $0x6c] ss:$16 sps:$4 sm:$0xff]   ;;  %v4647_v47 = vld [vmem:[%s5679_s22 + $0x60] ss:$16 sps:$4 sm:$0xff]   ;;  %v4648_v48 = vld [vmem:[%s5679_s22 + $0x68] ss:$16 sps:$4 sm:$0xff]  }
  0xad   : > { %v4649_v49 = vld [vmem:[%s5679_s22 + $0x84] ss:$16 sps:$4 sm:$0xff]   ;;  %v4651_v50 = vld [vmem:[%s5679_s22 + $0x8c] ss:$16 sps:$4 sm:$0xff]   ;;  %v4653_v51 = vld [vmem:[%s5679_s22 + $0x80] ss:$16 sps:$4 sm:$0xff]  }
  0xae   : > { %v4654_v52 = vld [vmem:[%s5679_s22 + $0x88] ss:$16 sps:$4 sm:$0xff]   ;;  %v4655_v53 = vld [vmem:[%s5679_s22 + $0xa4] ss:$16 sps:$4 sm:$0xff]   ;;  %v4657_v54 = vld [vmem:[%s5679_s22 + $0xac] ss:$16 sps:$4 sm:$0xff]  }
  0xaf   : > { %2506 = vmatpush1.bf16.msra.mxu1 %v4601_v9  ;;  %3051 = vmatpush1.bf16.msra.mxu0 %v4602_v10  ;;  %v4659_v55 = vld [vmem:[%s5679_s22 + $0xa0] ss:$16 sps:$4 sm:$0xff]   ;;  %v4660_v56 = vld [vmem:[%s5679_s22 + $0xa8] ss:$16 sps:$4 sm:$0xff]   ;;  %v4661_v57 = vld [vmem:[%s5679_s22 + $0xc4] ss:$16 sps:$4 sm:$0xff]  }
  0xb0   : > { %2507 = vmatprep.subr.bf16.mxu1 %v5033_v1  ;;  %3052 = vmatprep.subr.bf16.mxu0 %v5033_v1  ;;  %v4663_v58 = vld [vmem:[%s5679_s22 + $0xcc] ss:$16 sps:$4 sm:$0xff]   ;;  %v4665_v59 = vld [vmem:[%s5679_s22 + $0xc0] ss:$16 sps:$4 sm:$0xff]   ;;  %v4666_v60 = vld [vmem:[%s5679_s22 + $0xc8] ss:$16 sps:$4 sm:$0xff]  }
  0xb1   : > { %v4667_v61 = vld [vmem:[%s5679_s22 + $0xe4] ss:$16 sps:$4 sm:$0xff]   ;;  %v4669_v62 = vld [vmem:[%s5679_s22 + $0xec] ss:$16 sps:$4 sm:$0xff]   ;;  %v4671_v63 = vld [vmem:[%s5679_s22 + $0xe0] ss:$16 sps:$4 sm:$0xff]  }
  0xb2   : > { %v4672_v0 = vld [vmem:[%s5679_s22 + $0xe8] ss:$16 sps:$4 sm:$0xff]   ;;  %v4675_v2 = vld [vmem:[%s5679_s22 + $0x10c] ss:$16 sps:$4 sm:$0xff]   ;;  %v4677_v3 = vld [vmem:[%s5679_s22 + $0x100] ss:$16 sps:$4 sm:$0xff]  }
  0xb3   : > { %2508 = vmatpush1.bf16.msra.mxu1 %v4603_v11  ;;  %3053 = vmatpush1.bf16.msra.mxu0 %v4604_v12  ;;  %v4678_v4 = vld [vmem:[%s5679_s22 + $0x108] ss:$16 sps:$4 sm:$0xff]   ;;  %v4679_v5 = vld [vmem:[%s5679_s22 + $0x124] ss:$16 sps:$4 sm:$0xff]   ;;  %v4681_v6 = vld [vmem:[%s5679_s22 + $0x12c] ss:$16 sps:$4 sm:$0xff]  }
  0xb4   : > { %2509 = vmatprep.subr.bf16.mxu1 %v5033_v1  ;;  %3054 = vmatprep.subr.bf16.mxu0 %v5033_v1  ;;  %v4683_v7 = vld [vmem:[%s5679_s22 + $0x120] ss:$16 sps:$4 sm:$0xff]   ;;  %v4684_v8 = vld [vmem:[%s5679_s22 + $0x128] ss:$16 sps:$4 sm:$0xff]   ;;  %v4685_v9 = vld [vmem:[%s5679_s22 + $0x144] ss:$16 sps:$4 sm:$0xff]  }
  0xb5   : > { %v4687_v10 = vld [vmem:[%s5679_s22 + $0x14c] ss:$16 sps:$4 sm:$0xff]   ;;  %v4689_v11 = vld [vmem:[%s5679_s22 + $0x140] ss:$16 sps:$4 sm:$0xff]   ;;  %v4690_v12 = vld [vmem:[%s5679_s22 + $0x148] ss:$16 sps:$4 sm:$0xff]  }
  0xb6   : > { %v4701_v19 = vld [vmem:[%s5679_s22 + $0x180] ss:$16 sps:$4 sm:$0xff]   ;;  %v4703_v21 = vld [vmem:[%s5679_s22 + $0x1a4] ss:$16 sps:$4 sm:$0xff]  }
  0xb7   : > { %2510 = vmatpush1.bf16.msra.mxu1 %v4605_v13  ;;  %3055 = vmatpush1.bf16.msra.mxu0 %v4606_v14  ;;  %v4691_v13 = vld [vmem:[%s5679_s22 + $0x164] ss:$16 sps:$4 sm:$0xff]   ;;  %v4693_v14 = vld [vmem:[%s5679_s22 + $0x16c] ss:$16 sps:$4 sm:$0xff]  }
  0xb8   : > { %2511 = vmatprep.subr.bf16.mxu1 %v5033_v1  ;;  %3056 = vmatprep.subr.bf16.mxu0 %v5033_v1 }
  0xbb   : > { %2512 = vmatpush1.bf16.msra.mxu1 %v4607_v15  ;;  %3057 = vmatpush1.bf16.msra.mxu0 %v4608_v16  ;;  %v4695_v15 = vld [vmem:[%s5679_s22 + $0x160] ss:$16 sps:$4 sm:$0xff]   ;;  %v4696_v16 = vld [vmem:[%s5679_s22 + $0x168] ss:$16 sps:$4 sm:$0xff]  }
  0xbc   : > { %2513 = vmatprep.subr.bf16.mxu1 %v5033_v1  ;;  %3058 = vmatprep.subr.bf16.mxu0 %v5033_v1 }
  0xbf   : > { %2514 = vmatpush1.bf16.msra.mxu1 %v4609_v17  ;;  %3059 = vmatpush1.bf16.msra.mxu0 %v4610_v18  ;;  %v4697_v17 = vld [vmem:[%s5679_s22 + $0x184] ss:$16 sps:$4 sm:$0xff]   ;;  %v4699_v18 = vld [vmem:[%s5679_s22 + $0x18c] ss:$16 sps:$4 sm:$0xff]  }
  0xc0   : > { %2515 = vmatprep.subr.bf16.mxu1 %v5033_v1  ;;  %3060 = vmatprep.subr.bf16.mxu0 %v5033_v1 }
  0xc3   : > { %2516 = vmatpush1.bf16.msra.mxu1 %v4611_v20  ;;  %3061 = vmatpush1.bf16.msra.mxu0 %v4612_v22  ;;  %v4702_v20 = vld [vmem:[%s5679_s22 + $0x188] ss:$16 sps:$4 sm:$0xff]   ;;  %v4705_v22 = vld [vmem:[%s5679_s22 + $0x1ac] ss:$16 sps:$4 sm:$0xff]  }
  0xc4   : > { %2517 = vmatprep.subr.bf16.mxu1 %v5033_v1  ;;  %3062 = vmatprep.subr.bf16.mxu0 %v5033_v1 }
  0xc7   : > { %2518 = vmatpush1.bf16.msra.mxu1 %v4613_v23  ;;  %3063 = vmatpush1.bf16.msra.mxu0 %v4614_v24  ;;  %v4707_v23 = vld [vmem:[%s5679_s22 + $0x1a0] ss:$16 sps:$4 sm:$0xff]   ;;  %v4708_v24 = vld [vmem:[%s5679_s22 + $0x1a8] ss:$16 sps:$4 sm:$0xff]  }
  0xc8   : > { %2519 = vmatprep.subr.bf16.mxu1 %v5033_v1  ;;  %3064 = vmatprep.subr.bf16.mxu0 %v5033_v1 }
  0xcb   : > { %2520 = vmatpush1.bf16.msra.mxu1 %v4615_v25  ;;  %3065 = vmatpush1.bf16.msra.mxu0 %v4616_v26  ;;  %v4709_v25 = vld [vmem:[%s5679_s22 + $0x1c4] ss:$16 sps:$4 sm:$0xff]   ;;  %v4711_v26 = vld [vmem:[%s5679_s22 + $0x1cc] ss:$16 sps:$4 sm:$0xff]  }
  0xcc   : > { %2521 = vmatprep.subr.bf16.mxu1 %v5033_v1  ;;  %3066 = vmatprep.subr.bf16.mxu0 %v5033_v1 }
  0xcf   : > { %2522 = vmatpush1.bf16.msra.mxu1 %v4617_v27  ;;  %3067 = vmatpush1.bf16.msra.mxu0 %v4618_v28  ;;  %v4713_v27 = vld [vmem:[%s5679_s22 + $0x1c0] ss:$16 sps:$4 sm:$0xff]   ;;  %v4714_v28 = vld [vmem:[%s5679_s22 + $0x1c8] ss:$16 sps:$4 sm:$0xff]  }
  0xd0   : > { %2523 = vmatprep.subr.bf16.mxu1 %v5033_v1  ;;  %3068 = vmatprep.subr.bf16.mxu0 %v5033_v1 }
  0xd3   : > { %2524 = vmatpush1.bf16.msra.mxu1 %v4619_v29  ;;  %3069 = vmatpush1.bf16.msra.mxu0 %v4620_v30  ;;  %v4715_v29 = vld [vmem:[%s5679_s22 + $0x1e4] ss:$16 sps:$4 sm:$0xff]   ;;  %v4717_v30 = vld [vmem:[%s5679_s22 + $0x1ec] ss:$16 sps:$4 sm:$0xff]  }
  0xd4   : > { %2525 = vmatprep.subr.bf16.mxu1 %v5033_v1  ;;  %3070 = vmatprep.subr.bf16.mxu0 %v5033_v1 }
  0xd7   : > { %2526 = vmatpush1.bf16.msra.mxu1 %v4621_v31  ;;  %3071 = vmatpush1.bf16.msra.mxu0 %v4622_v32  ;;  %v4719_v31 = vld [vmem:[%s5679_s22 + $0x1e0] ss:$16 sps:$4 sm:$0xff]   ;;  %v4720_v32 = vld [vmem:[%s5679_s22 + $0x1e8] ss:$16 sps:$4 sm:$0xff]  }
  0xd8   : > { %2527 = vmatprep.subr.bf16.mxu1 %v5033_v1  ;;  %3072 = vmatprep.subr.bf16.mxu0 %v5033_v1  ;;  %v4673_v1 = vld [vmem:[%s5679_s22 + $0x104] ss:$16 sps:$4 sm:$0xff]  }
  0xdb   : > { %2528 = vmatpush1.bf16.msra.mxu1 %v4623_v33  ;;  %3073 = vmatpush1.bf16.msra.mxu0 %v4624_v34  ;;  %v4721_v33 = vld [vmem:[%s5679_s22 + $0x204] ss:$16 sps:$4 sm:$0xff]   ;;  %v4723_v34 = vld [vmem:[%s5679_s22 + $0x20c] ss:$16 sps:$4 sm:$0xff]  }
  0xde   : > { %2530 = vmatmul.mubr.bf16.vlgmr.msra.gmra.mrb[0].mxu1 %v4625_v35  ;;  %3075 = vmatmul.mubr.bf16.vlgmr.msra.gmra.mrb[0].mxu0 %v4628_v36  ;;  %v4725_v35 = vld [vmem:[%s5679_s22 + $0x200] ss:$16 sps:$4 sm:$0xff]   ;;  %v4726_v36 = vld [vmem:[%s5679_s22 + $0x208] ss:$16 sps:$4 sm:$0xff]  }
  0xdf   : > { %2537 = vmatprep.mubr.bf16.mxu1 %v4631_v37  ;;  %3082 = vmatprep.mubr.bf16.mxu0 %v4633_v38  ;;  %v4727_v37 = vld [vmem:[%s5679_s22 + $0x224] ss:$16 sps:$4 sm:$0xff]   ;;  %v4729_v38 = vld [vmem:[%s5679_s22 + $0x22c] ss:$16 sps:$4 sm:$0xff]  }
  0xe6   : > { %2538 = vmatmul.mubr.bf16.gmra.mrb[4].mxu1 %v4635_v39  ;;  %3083 = vmatmul.mubr.bf16.gmra.mrb[4].mxu0 %v4636_v40  ;;  %v4731_v39 = vld [vmem:[%s5679_s22 + $0x220] ss:$16 sps:$4 sm:$0xff]   ;;  %v4732_v40 = vld [vmem:[%s5679_s22 + $0x228] ss:$16 sps:$4 sm:$0xff]  }
  0xe7   : > { %2545 = vmatprep.mubr.bf16.mxu1 %v4637_v41  ;;  %3090 = vmatprep.mubr.bf16.mxu0 %v4639_v42  ;;  %v4733_v41 = vld [vmem:[%s5679_s22 + $0x244] ss:$16 sps:$4 sm:$0xff]   ;;  %v4735_v42 = vld [vmem:[%s5679_s22 + $0x24c] ss:$16 sps:$4 sm:$0xff]  }
  0xee   : > { %2546 = vmatmul.mubr.bf16.gmra.mrb[8].mxu1 %v4641_v43  ;;  %3091 = vmatmul.mubr.bf16.gmra.mrb[8].mxu0 %v4642_v44  ;;  %v4737_v43 = vld [vmem:[%s5679_s22 + $0x240] ss:$16 sps:$4 sm:$0xff]   ;;  %v4738_v44 = vld [vmem:[%s5679_s22 + $0x248] ss:$16 sps:$4 sm:$0xff]  }
  0xef   : > { %2553 = vmatprep.mubr.bf16.mxu1 %v4643_v45  ;;  %3098 = vmatprep.mubr.bf16.mxu0 %v4645_v46  ;;  %v4739_v45 = vld [vmem:[%s5679_s22 + $0x264] ss:$16 sps:$4 sm:$0xff]   ;;  %v4741_v46 = vld [vmem:[%s5679_s22 + $0x26c] ss:$16 sps:$4 sm:$0xff]  }
  0xf6   : > { %2554 = vmatmul.mubr.bf16.gmra.mrb[12].mxu1 %v4647_v47  ;;  %3099 = vmatmul.mubr.bf16.gmra.mrb[12].mxu0 %v4648_v48  ;;  %v4743_v47 = vld [vmem:[%s5679_s22 + $0x260] ss:$16 sps:$4 sm:$0xff]   ;;  %v4744_v48 = vld [vmem:[%s5679_s22 + $0x268] ss:$16 sps:$4 sm:$0xff]  }
  0xf7   : > { %2561 = vmatprep.mubr.bf16.mxu1 %v4649_v49  ;;  %3106 = vmatprep.mubr.bf16.mxu0 %v4651_v50  ;;  %v4745_v49 = vld [vmem:[%s5679_s22 + $0x284] ss:$16 sps:$4 sm:$0xff]   ;;  %v4747_v50 = vld [vmem:[%s5679_s22 + $0x28c] ss:$16 sps:$4 sm:$0xff]  }
  0xfe   : > { %2562 = vmatmul.mubr.bf16.gmra.mrb[16].mxu1 %v4653_v51  ;;  %3107 = vmatmul.mubr.bf16.gmra.mrb[16].mxu0 %v4654_v52  ;;  %v4749_v51 = vld [vmem:[%s5679_s22 + $0x280] ss:$16 sps:$4 sm:$0xff]   ;;  %v4750_v52 = vld [vmem:[%s5679_s22 + $0x288] ss:$16 sps:$4 sm:$0xff]  }
  0xff   : > { %2569 = vmatprep.mubr.bf16.mxu1 %v4655_v53  ;;  %3114 = vmatprep.mubr.bf16.mxu0 %v4657_v54  ;;  %v4751_v53 = vld [vmem:[%s5679_s22 + $0x2a4] ss:$16 sps:$4 sm:$0xff]   ;;  %v4753_v54 = vld [vmem:[%s5679_s22 + $0x2ac] ss:$16 sps:$4 sm:$0xff]  }
 0x106   : > { %2570 = vmatmul.mubr.bf16.gmra.mrb[20].mxu1 %v4659_v55  ;;  %3115 = vmatmul.mubr.bf16.gmra.mrb[20].mxu0 %v4660_v56  ;;  %v4755_v55 = vld [vmem:[%s5679_s22 + $0x2a0] ss:$16 sps:$4 sm:$0xff]   ;;  %v4756_v56 = vld [vmem:[%s5679_s22 + $0x2a8] ss:$16 sps:$4 sm:$0xff]  }
 0x107   : > { %2577 = vmatprep.mubr.bf16.mxu1 %v4661_v57  ;;  %3122 = vmatprep.mubr.bf16.mxu0 %v4663_v58  ;;  %v4757_v57 = vld [vmem:[%s5679_s22 + $0x2c4] ss:$16 sps:$4 sm:$0xff]   ;;  %v4759_v58 = vld [vmem:[%s5679_s22 + $0x2cc] ss:$16 sps:$4 sm:$0xff]  }
 0x10e   : > { %2578 = vmatmul.mubr.bf16.gmra.mrb[24].mxu1 %v4665_v59  ;;  %3123 = vmatmul.mubr.bf16.gmra.mrb[24].mxu0 %v4666_v60  ;;  %v4761_v59 = vld [vmem:[%s5679_s22 + $0x2c0] ss:$16 sps:$4 sm:$0xff]   ;;  %v4762_v60 = vld [vmem:[%s5679_s22 + $0x2c8] ss:$16 sps:$4 sm:$0xff]  }
 0x10f   : > { %2585 = vmatprep.mubr.bf16.mxu1 %v4667_v61  ;;  %3130 = vmatprep.mubr.bf16.mxu0 %v4669_v62  ;;  %v4763_v61 = vld [vmem:[%s5679_s22 + $0x2e4] ss:$16 sps:$4 sm:$0xff]   ;;  %v4765_v62 = vld [vmem:[%s5679_s22 + $0x2ec] ss:$16 sps:$4 sm:$0xff]  }
 0x116   : > { %2586 = vmatmul.mubr.bf16.gmra.mrb[28].mxu1 %v4671_v63  ;;  %3131 = vmatmul.mubr.bf16.gmra.mrb[28].mxu0 %v4672_v0  ;;  %v4767_v63 = vld [vmem:[%s5679_s22 + $0x2e0] ss:$16 sps:$4 sm:$0xff]   ;;  %v4768_v0 = vld [vmem:[%s5679_s22 + $0x2e8] ss:$16 sps:$4 sm:$0xff]  }
 0x117   : > { %2593 = vmatprep.mubr.bf16.mxu1 %v4673_v1  ;;  %3138 = vmatprep.mubr.bf16.mxu0 %v4675_v2  ;;  %v4769_v1 = vld [vmem:[%s5679_s22 + $0x304] ss:$16 sps:$4 sm:$0xff]   ;;  %v4771_v2 = vld [vmem:[%s5679_s22 + $0x30c] ss:$16 sps:$4 sm:$0xff]  }
 0x11e   : > { %2594 = vmatmul.mubr.bf16.gmra.mrb[32].mxu1 %v4677_v3  ;;  %3139 = vmatmul.mubr.bf16.gmra.mrb[32].mxu0 %v4678_v4  ;;  %v4773_v3 = vld [vmem:[%s5679_s22 + $0x300] ss:$16 sps:$4 sm:$0xff]   ;;  %v4774_v4 = vld [vmem:[%s5679_s22 + $0x308] ss:$16 sps:$4 sm:$0xff]  }
 0x11f   : > { %2601 = vmatprep.mubr.bf16.mxu1 %v4679_v5  ;;  %3146 = vmatprep.mubr.bf16.mxu0 %v4681_v6  ;;  %v4775_v5 = vld [vmem:[%s5679_s22 + $0x324] ss:$16 sps:$4 sm:$0xff]   ;;  %v4777_v6 = vld [vmem:[%s5679_s22 + $0x32c] ss:$16 sps:$4 sm:$0xff]  }
 0x126   : > { %2602 = vmatmul.mubr.bf16.gmra.mrb[36].mxu1 %v4683_v7  ;;  %3147 = vmatmul.mubr.bf16.gmra.mrb[36].mxu0 %v4684_v8  ;;  %v4779_v7 = vld [vmem:[%s5679_s22 + $0x320] ss:$16 sps:$4 sm:$0xff]   ;;  %v4780_v8 = vld [vmem:[%s5679_s22 + $0x328] ss:$16 sps:$4 sm:$0xff]  }
 0x127   : > { %2609 = vmatprep.mubr.bf16.mxu1 %v4685_v9  ;;  %3154 = vmatprep.mubr.bf16.mxu0 %v4687_v10  ;;  %v4781_v9 = vld [vmem:[%s5679_s22 + $0x344] ss:$16 sps:$4 sm:$0xff]   ;;  %v4783_v10 = vld [vmem:[%s5679_s22 + $0x34c] ss:$16 sps:$4 sm:$0xff]  }
 0x12e   : > { %2610 = vmatmul.mubr.bf16.gmra.mrb[40].mxu1 %v4689_v11  ;;  %3155 = vmatmul.mubr.bf16.gmra.mrb[40].mxu0 %v4690_v12  ;;  %v4785_v11 = vld [vmem:[%s5679_s22 + $0x340] ss:$16 sps:$4 sm:$0xff]   ;;  %v4786_v12 = vld [vmem:[%s5679_s22 + $0x348] ss:$16 sps:$4 sm:$0xff]  }
 0x12f   : > { %2617 = vmatprep.mubr.bf16.mxu1 %v4691_v13  ;;  %3162 = vmatprep.mubr.bf16.mxu0 %v4693_v14  ;;  %v4787_v13 = vld [vmem:[%s5679_s22 + $0x364] ss:$16 sps:$4 sm:$0xff]   ;;  %v4789_v14 = vld [vmem:[%s5679_s22 + $0x36c] ss:$16 sps:$4 sm:$0xff]  }
 0x136   : > { %2618 = vmatmul.mubr.bf16.gmra.mrb[44].mxu1 %v4695_v15  ;;  %3163 = vmatmul.mubr.bf16.gmra.mrb[44].mxu0 %v4696_v16 }
 0x137   : > { %2625 = vmatprep.mubr.bf16.mxu1 %v4697_v17  ;;  %3170 = vmatprep.mubr.bf16.mxu0 %v4699_v18  ;;  %v4791_v18 = vld [vmem:[%s5679_s22 + $0x360] ss:$16 sps:$4 sm:$0xff]  }
 0x13e   : > { %2626 = vmatmul.mubr.bf16.gmra.mrb[48].mxu1 %v4701_v19  ;;  %3171 = vmatmul.mubr.bf16.gmra.mrb[48].mxu0 %v4702_v20 }
 0x13f   : > { %2633 = vmatprep.mubr.bf16.mxu1 %v4703_v21  ;;  %3178 = vmatprep.mubr.bf16.mxu0 %v4705_v22  ;;  %v4792_v22 = vld [vmem:[%s5679_s22 + $0x368] ss:$16 sps:$4 sm:$0xff]  }
 0x146   : > { %2634 = vmatmul.mubr.bf16.gmra.mrb[52].mxu1 %v4707_v23  ;;  %3179 = vmatmul.mubr.bf16.gmra.mrb[52].mxu0 %v4708_v24  ;;  %v4793_v23 = vld [vmem:[%s5679_s22 + $0x384] ss:$16 sps:$4 sm:$0xff]  }
 0x147   : > { %2641 = vmatprep.mubr.bf16.mxu1 %v4709_v25  ;;  %3186 = vmatprep.mubr.bf16.mxu0 %v4711_v26  ;;  %v4795_v26 = vld [vmem:[%s5679_s22 + $0x38c] ss:$16 sps:$4 sm:$0xff]  }
 0x14e   : > { %2642 = vmatmul.mubr.bf16.gmra.mrb[56].mxu1 %v4713_v27  ;;  %3187 = vmatmul.mubr.bf16.gmra.mrb[56].mxu0 %v4714_v28 }
 0x14f   : > { %2649 = vmatprep.mubr.bf16.mxu1 %v4715_v29  ;;  %3194 = vmatprep.mubr.bf16.mxu0 %v4717_v30 }
 0x156   : > { %2650 = vmatmul.mubr.bf16.gmra.mrb[60].mxu1 %v4719_v31  ;;  %3195 = vmatmul.mubr.bf16.gmra.mrb[60].mxu0 %v4720_v32  ;;  %v4797_v32 = vld [vmem:[%s5679_s22 + $0x380] ss:$16 sps:$4 sm:$0xff]  }
 0x157   : > { %2657 = vmatprep.mubr.bf16.mxu1 %v4721_v33  ;;  %3202 = vmatprep.mubr.bf16.mxu0 %v4723_v34 }
 0x15e   : > { %2658 = vmatmul.mubr.bf16.gmra.mrb[64].mxu1 %v4725_v35  ;;  %3203 = vmatmul.mubr.bf16.gmra.mrb[64].mxu0 %v4726_v36  ;;  %v4798_v36 = vld [vmem:[%s5679_s22 + $0x388] ss:$16 sps:$4 sm:$0xff]  }
 0x15f   : > { %2665 = vmatprep.mubr.bf16.mxu1 %v4727_v37  ;;  %3210 = vmatprep.mubr.bf16.mxu0 %v4729_v38  ;;  %v4799_v37 = vld [vmem:[%s5679_s22 + $0x3a4] ss:$16 sps:$4 sm:$0xff]  }
 0x166   : > { %2666 = vmatmul.mubr.bf16.gmra.mrb[68].mxu1 %v4731_v39  ;;  %3211 = vmatmul.mubr.bf16.gmra.mrb[68].mxu0 %v4732_v40  ;;  %v4801_v40 = vld [vmem:[%s5679_s22 + $0x3ac] ss:$16 sps:$4 sm:$0xff]  }
 0x167   : > { %2673 = vmatprep.mubr.bf16.mxu1 %v4733_v41  ;;  %3218 = vmatprep.mubr.bf16.mxu0 %v4735_v42 }
 0x16e   : > { %2674 = vmatmul.mubr.bf16.gmra.mrb[72].mxu1 %v4737_v43  ;;  %3219 = vmatmul.mubr.bf16.gmra.mrb[72].mxu0 %v4738_v44 }
 0x16f   : > { %2681 = vmatprep.mubr.bf16.mxu1 %v4739_v45  ;;  %3226 = vmatprep.mubr.bf16.mxu0 %v4741_v46  ;;  %v4803_v46 = vld [vmem:[%s5679_s22 + $0x3a0] ss:$16 sps:$4 sm:$0xff]  }
 0x176   : > { %2682 = vmatmul.mubr.bf16.gmra.mrb[76].mxu1 %v4743_v47  ;;  %3227 = vmatmul.mubr.bf16.gmra.mrb[76].mxu0 %v4744_v48 }
 0x177   : > { %2689 = vmatprep.mubr.bf16.mxu1 %v4745_v49  ;;  %3234 = vmatprep.mubr.bf16.mxu0 %v4747_v50  ;;  %v4804_v50 = vld [vmem:[%s5679_s22 + $0x3a8] ss:$16 sps:$4 sm:$0xff]  }
 0x17e   : > { %2690 = vmatmul.mubr.bf16.gmra.mrb[80].mxu1 %v4749_v51  ;;  %3235 = vmatmul.mubr.bf16.gmra.mrb[80].mxu0 %v4750_v52  ;;  %v4805_v51 = vld [vmem:[%s5679_s22 + $0x3c4] ss:$16 sps:$4 sm:$0xff]  }
 0x17f   : > { %2697 = vmatprep.mubr.bf16.mxu1 %v4751_v53  ;;  %3242 = vmatprep.mubr.bf16.mxu0 %v4753_v54  ;;  %v4807_v54 = vld [vmem:[%s5679_s22 + $0x3cc] ss:$16 sps:$4 sm:$0xff]  }
 0x186   : > { %2698 = vmatmul.mubr.bf16.gmra.mrb[84].mxu1 %v4755_v55  ;;  %3243 = vmatmul.mubr.bf16.gmra.mrb[84].mxu0 %v4756_v56 }
 0x187   : > { %2705 = vmatprep.mubr.bf16.mxu1 %v4757_v57  ;;  %3250 = vmatprep.mubr.bf16.mxu0 %v4759_v58 }
 0x18e   : > { %2706 = vmatmul.mubr.bf16.gmra.mrb[88].mxu1 %v4761_v59  ;;  %3251 = vmatmul.mubr.bf16.gmra.mrb[88].mxu0 %v4762_v60  ;;  %v4809_v60 = vld [vmem:[%s5679_s22 + $0x3c0] ss:$16 sps:$4 sm:$0xff]  }
 0x18f   : > { %2713 = vmatprep.mubr.bf16.mxu1 %v4763_v61  ;;  %3258 = vmatprep.mubr.bf16.mxu0 %v4765_v62 }
 0x196   : > { %2714 = vmatmul.mubr.bf16.gmra.mrb[92].mxu1 %v4767_v63  ;;  %3259 = vmatmul.mubr.bf16.gmra.mrb[92].mxu0 %v4768_v0  ;;  %v4810_v0 = vld [vmem:[%s5679_s22 + $0x3c8] ss:$16 sps:$4 sm:$0xff]  }
 0x197   : > { %2721 = vmatprep.mubr.bf16.mxu1 %v4769_v1  ;;  %3266 = vmatprep.mubr.bf16.mxu0 %v4771_v2  ;;  %v4811_v1 = vld [vmem:[%s5679_s22 + $0x3e4] ss:$16 sps:$4 sm:$0xff]  }
 0x19e   : > { %2722 = vmatmul.mubr.bf16.gmra.mrb[96].mxu1 %v4773_v3  ;;  %3267 = vmatmul.mubr.bf16.gmra.mrb[96].mxu0 %v4774_v4  ;;  %v4813_v4 = vld [vmem:[%s5679_s22 + $0x3ec] ss:$16 sps:$4 sm:$0xff]  }
 0x19f   : > { %2729 = vmatprep.mubr.bf16.mxu1 %v4775_v5  ;;  %3274 = vmatprep.mubr.bf16.mxu0 %v4777_v6 }
 0x1a6   : > { %2730 = vmatmul.mubr.bf16.gmra.mrb[100].mxu1 %v4779_v7  ;;  %3275 = vmatmul.mubr.bf16.gmra.mrb[100].mxu0 %v4780_v8 }
 0x1a7   : > { %2737 = vmatprep.mubr.bf16.mxu1 %v4781_v9  ;;  %3282 = vmatprep.mubr.bf16.mxu0 %v4783_v10  ;;  %v4815_v10 = vld [vmem:[%s5679_s22 + $0x3e0] ss:$16 sps:$4 sm:$0xff]  }
 0x1ae   : > { %2738 = vmatmul.mubr.bf16.gmra.mrb[104].mxu1 %v4785_v11  ;;  %3283 = vmatmul.mubr.bf16.gmra.mrb[104].mxu0 %v4786_v12 }
 0x1af   : > { %2745 = vmatprep.mubr.bf16.mxu1 %v4787_v13  ;;  %3290 = vmatprep.mubr.bf16.mxu0 %v4789_v14  ;;  %v4816_v14 = vld [vmem:[%s5679_s22 + $0x3e8] ss:$16 sps:$4 sm:$0xff]  }
 0x1b1   : > { %v2531_v15 = vpop.f32.mrb[0].mxu1  ;;  %v3076_v16 = vpop.f32.mrb[0].mxu0 }
 0x1b2   : > { %v2533_v17 = vpop.f32.mrb[1].mxu1  ;;  %v5848_v19 = vadd.f32 %v3076_v16, %v2531_v15  ;;  %v3078_v20 = vpop.f32.mrb[1].mxu0  ;;  %v4817_v15 = vld [vmem:[%s5679_s22 + $0x404] ss:$16 sps:$4 sm:$0xff]  }
 0x1b3   : > { %v2534_v21 = vpop.f32.mrb[2].mxu1  ;;  %v3079_v24 = vpop.f32.mrb[2].mxu0 }
 0x1b4   : > { %v2536_v25 = vpop.f32.mrb[3].mxu1  ;;  %v5853_v27 = vadd.f32 %v3079_v24, %v2534_v21  ;;  %v3081_v28 = vpop.f32.mrb[3].mxu0 }
 0x1b5   : > { %v4821_v25 = vld [vmem:[%s5679_s22 + $0x400] ss:$16 sps:$4 sm:$0xff]  }
 0x1b6   : > { %2746 = vmatmul.mubr.bf16.gmra.mrb[108].mxu1 %v4791_v18  ;;  %3291 = vmatmul.mubr.bf16.gmra.mrb[108].mxu0 %v4792_v22  ;;  %v4819_v18 = vld [vmem:[%s5679_s22 + $0x40c] ss:$16 sps:$4 sm:$0xff]  }
 0x1b7   : > { %2753 = vmatprep.mubr.bf16.mxu1 %v4793_v23  ;;  %3298 = vmatprep.mubr.bf16.mxu0 %v4795_v26 }
 0x1b9   : > { %v2539_v29 = vpop.f32.mrb[4].mxu1  ;;  %v3084_v30 = vpop.f32.mrb[4].mxu0 }
 0x1ba   : > { %v2541_v31 = vpop.f32.mrb[5].mxu1  ;;  %v5856_v33 = vadd.f32 %v3084_v30, %v2539_v29  ;;  %v3086_v34 = vpop.f32.mrb[5].mxu0  ;;  %v4822_v30 = vld [vmem:[%s5679_s22 + $0x408] ss:$16 sps:$4 sm:$0xff]  }
 0x1bb   : > { %v2542_v35 = vpop.f32.mrb[6].mxu1  ;;  %v3087_v38 = vpop.f32.mrb[6].mxu0  ;;  %v4823_v31 = vld [vmem:[%s5679_s22 + $0x424] ss:$16 sps:$4 sm:$0xff]  }
 0x1bc   : > { %v2544_v39 = vpop.f32.mrb[7].mxu1  ;;  %v5861_v41 = vadd.f32 %v3087_v38, %v2542_v35  ;;  %v3089_v42 = vpop.f32.mrb[7].mxu0  ;;  %v4825_v35 = vld [vmem:[%s5679_s22 + $0x42c] ss:$16 sps:$4 sm:$0xff]  }
 0x1bd   : > { %v4827_v42 = vld [vmem:[%s5679_s22 + $0x420] ss:$16 sps:$4 sm:$0xff]  }
 0x1be   : > { %2754 = vmatmul.mubr.bf16.gmra.mrb[112].mxu1 %v4797_v32  ;;  %3299 = vmatmul.mubr.bf16.gmra.mrb[112].mxu0 %v4798_v36 }
 0x1bf   : > { %2761 = vmatprep.mubr.bf16.mxu1 %v4799_v37  ;;  %3306 = vmatprep.mubr.bf16.mxu0 %v4801_v40 }
 0x1c1   : > { %v2547_v43 = vpop.f32.mrb[8].mxu1  ;;  %v3092_v44 = vpop.f32.mrb[8].mxu0 }
 0x1c2   : > { %v2549_v45 = vpop.f32.mrb[9].mxu1  ;;  %v5864_v47 = vadd.f32 %v3092_v44, %v2547_v43  ;;  %v3094_v48 = vpop.f32.mrb[9].mxu0 }
 0x1c3   : > { %v2550_v49 = vpop.f32.mrb[10].mxu1  ;;  %v3095_v52 = vpop.f32.mrb[10].mxu0  ;;  %v4829_v48 = vld [vmem:[%s5679_s22 + $0x444] ss:$16 sps:$4 sm:$0xff]  }
 0x1c4   : > { %v2552_v53 = vpop.f32.mrb[11].mxu1  ;;  %v5869_v55 = vadd.f32 %v3095_v52, %v2550_v49  ;;  %v3097_v56 = vpop.f32.mrb[11].mxu0 }
 0x1c6   : > { %2762 = vmatmul.mubr.bf16.gmra.mrb[116].mxu1 %v4803_v46  ;;  %3307 = vmatmul.mubr.bf16.gmra.mrb[116].mxu0 %v4804_v50  ;;  %v4828_v46 = vld [vmem:[%s5679_s22 + $0x428] ss:$16 sps:$4 sm:$0xff]  }
 0x1c7   : > { %2769 = vmatprep.mubr.bf16.mxu1 %v4805_v51  ;;  %3314 = vmatprep.mubr.bf16.mxu0 %v4807_v54  ;;  %v4831_v51 = vld [vmem:[%s5679_s22 + $0x44c] ss:$16 sps:$4 sm:$0xff]  }
 0x1c9   : > { %v2555_v57 = vpop.f32.mrb[12].mxu1  ;;  %v3100_v58 = vpop.f32.mrb[12].mxu0 }
 0x1ca   : > { %v2557_v59 = vpop.f32.mrb[13].mxu1  ;;  %v5872_v61 = vadd.f32 %v3100_v58, %v2555_v57  ;;  %v3102_v62 = vpop.f32.mrb[13].mxu0  ;;  %v4833_v58 = vld [vmem:[%s5679_s22 + $0x440] ss:$16 sps:$4 sm:$0xff]  }
 0x1cb   : > { %v2558_v63 = vpop.f32.mrb[14].mxu1  ;;  %v3103_v2 = vpop.f32.mrb[14].mxu0 }
 0x1cc   : > { %v2560_v3 = vpop.f32.mrb[15].mxu1  ;;  %v5877_v5 = vadd.f32 %v3103_v2, %v2558_v63  ;;  %v3105_v6 = vpop.f32.mrb[15].mxu0  ;;  %v4834_v63 = vld [vmem:[%s5679_s22 + $0x448] ss:$16 sps:$4 sm:$0xff]  }
 0x1cd   : > { %v4837_v3 = vld [vmem:[%s5679_s22 + $0x46c] ss:$16 sps:$4 sm:$0xff]  }
 0x1ce   : > { %2770 = vmatmul.mubr.bf16.gmra.mrb[120].mxu1 %v4809_v60  ;;  %3315 = vmatmul.mubr.bf16.gmra.mrb[120].mxu0 %v4810_v0  ;;  %v4835_v0 = vld [vmem:[%s5679_s22 + $0x464] ss:$16 sps:$4 sm:$0xff]  }
 0x1cf   : > { %2777 = vmatprep.mubr.bf16.mxu1 %v4811_v1  ;;  %3322 = vmatprep.mubr.bf16.mxu0 %v4813_v4 }
 0x1d1   : > { %v2563_v7 = vpop.f32.mrb[16].mxu1  ;;  %v3108_v8 = vpop.f32.mrb[16].mxu0 }
 0x1d2   : > { %v2565_v9 = vpop.f32.mrb[17].mxu1  ;;  %v5880_v11 = vadd.f32 %v3108_v8, %v2563_v7  ;;  %v3110_v12 = vpop.f32.mrb[17].mxu0 }
 0x1d3   : > { %v2566_v13 = vpop.f32.mrb[18].mxu1  ;;  %v3111_v16 = vpop.f32.mrb[18].mxu0 }
 0x1d4   : > { %v2568_v17 = vpop.f32.mrb[19].mxu1  ;;  %v5885_v20 = vadd.f32 %v3111_v16, %v2566_v13  ;;  %v3113_v21 = vpop.f32.mrb[19].mxu0  ;;  %v4841_v16 = vld [vmem:[%s5679_s22 + $0x484] ss:$16 sps:$4 sm:$0xff]  }
 0x1d5   : > { %v4843_v21 = vld [vmem:[%s5679_s22 + $0x48c] ss:$16 sps:$4 sm:$0xff]  }
 0x1d6   : > { %2778 = vmatmul.mubr.bf16.gmra.mrb[124].mxu1 %v4815_v10  ;;  %3323 = vmatmul.mubr.bf16.gmra.mrb[124].mxu0 %v4816_v14  ;;  %v4839_v10 = vld [vmem:[%s5679_s22 + $0x460] ss:$16 sps:$4 sm:$0xff]  }
 0x1d7   : > { %2785 = vmatprep.mubr.bf16.mxu1 %v4817_v15  ;;  %3330 = vmatprep.mubr.bf16.mxu0 %v4819_v18  ;;  %v4840_v15 = vld [vmem:[%s5679_s22 + $0x468] ss:$16 sps:$4 sm:$0xff]  }
 0x1d9   : > { %v2571_v22 = vpop.f32.mrb[20].mxu1  ;;  %v3116_v23 = vpop.f32.mrb[20].mxu0 }
 0x1da   : > { %v2573_v24 = vpop.f32.mrb[21].mxu1  ;;  %v5888_v26 = vadd.f32 %v3116_v23, %v2571_v22  ;;  %v3118_v28 = vpop.f32.mrb[21].mxu0 }
 0x1db   : > { %v2574_v29 = vpop.f32.mrb[22].mxu1  ;;  %v3119_v32 = vpop.f32.mrb[22].mxu0 }
 0x1dc   : > { %v2576_v34 = vpop.f32.mrb[23].mxu1  ;;  %v5893_v36 = vadd.f32 %v3119_v32, %v2574_v29  ;;  %v3121_v37 = vpop.f32.mrb[23].mxu0  ;;  %v4845_v29 = vld [vmem:[%s5679_s22 + $0x480] ss:$16 sps:$4 sm:$0xff]  }
 0x1dd   : > { %v4846_v34 = vld [vmem:[%s5679_s22 + $0x488] ss:$16 sps:$4 sm:$0xff]  }
 0x1de   : > { %2786 = vmatmul.mubr.bf16.gmra.mrb[128].mxu1 %v4821_v25  ;;  %3331 = vmatmul.mubr.bf16.gmra.mrb[128].mxu0 %v4822_v30 }
 0x1df   : > { %2793 = vmatprep.mubr.bf16.mxu1 %v4823_v31  ;;  %3338 = vmatprep.mubr.bf16.mxu0 %v4825_v35  ;;  %v4847_v35 = vld [vmem:[%s5679_s22 + $0x4a4] ss:$16 sps:$4 sm:$0xff]  }
 0x1e1   : > { %v2579_v38 = vpop.f32.mrb[24].mxu1  ;;  %v3124_v39 = vpop.f32.mrb[24].mxu0 }
 0x1e2   : > { %v2581_v40 = vpop.f32.mrb[25].mxu1  ;;  %v5896_v43 = vadd.f32 %v3124_v39, %v2579_v38  ;;  %v3126_v44 = vpop.f32.mrb[25].mxu0  ;;  %v4849_v39 = vld [vmem:[%s5679_s22 + $0x4ac] ss:$16 sps:$4 sm:$0xff]  }
 0x1e3   : > { %v2582_v45 = vpop.f32.mrb[26].mxu1  ;;  %v3127_v49 = vpop.f32.mrb[26].mxu0 }
 0x1e4   : > { %v2584_v50 = vpop.f32.mrb[27].mxu1  ;;  %v5901_v52 = vadd.f32 %v3127_v49, %v2582_v45  ;;  %v3129_v53 = vpop.f32.mrb[27].mxu0 }
 0x1e5   : > { %v4852_v53 = vld [vmem:[%s5679_s22 + $0x4a8] ss:$16 sps:$4 sm:$0xff]  }
 0x1e6   : > { %2794 = vmatmul.mubr.bf16.gmra.mrb[132].mxu1 %v4827_v42  ;;  %3339 = vmatmul.mubr.bf16.gmra.mrb[132].mxu0 %v4828_v46 }
 0x1e7   : > { %2801 = vmatprep.mubr.bf16.mxu1 %v4829_v48  ;;  %3346 = vmatprep.mubr.bf16.mxu0 %v4831_v51  ;;  %v4851_v48 = vld [vmem:[%s5679_s22 + $0x4a0] ss:$16 sps:$4 sm:$0xff]  }
 0x1e9   : > { %v2587_v54 = vpop.f32.mrb[28].mxu1  ;;  %v3132_v56 = vpop.f32.mrb[28].mxu0 }
 0x1ea   : > { %v2589_v57 = vpop.f32.mrb[29].mxu1  ;;  %v5904_v59 = vadd.f32 %v3132_v56, %v2587_v54  ;;  %v3134_v60 = vpop.f32.mrb[29].mxu0  ;;  %v4853_v54 = vld [vmem:[%s5679_s22 + $0x4c4] ss:$16 sps:$4 sm:$0xff]  }
 0x1eb   : > { %v2590_v62 = vpop.f32.mrb[30].mxu1  ;;  %v3135_v1 = vpop.f32.mrb[30].mxu0 }
 0x1ec   : > { %v2592_v2 = vpop.f32.mrb[31].mxu1  ;;  %v5909_v4 = vadd.f32 %v3135_v1, %v2590_v62  ;;  %v3137_v6 = vpop.f32.mrb[31].mxu0 }
 0x1ed   : > { %v4857_v2 = vld [vmem:[%s5679_s22 + $0x4c0] ss:$16 sps:$4 sm:$0xff]  }
 0x1ee   : > { %2802 = vmatmul.mubr.bf16.gmra.mrb[136].mxu1 %v4833_v58  ;;  %3347 = vmatmul.mubr.bf16.gmra.mrb[136].mxu0 %v4834_v63  ;;  %v4855_v58 = vld [vmem:[%s5679_s22 + $0x4cc] ss:$16 sps:$4 sm:$0xff]  }
 0x1ef   : > { %2809 = vmatprep.mubr.bf16.mxu1 %v4835_v0  ;;  %3354 = vmatprep.mubr.bf16.mxu0 %v4837_v3 }
 0x1f1   : > { %v2595_v7 = vpop.f32.mrb[32].mxu1  ;;  %v3140_v8 = vpop.f32.mrb[32].mxu0 }
 0x1f2   : > { %v2597_v9 = vpop.f32.mrb[33].mxu1  ;;  %v5912_v12 = vadd.f32 %v3140_v8, %v2595_v7  ;;  %v3142_v13 = vpop.f32.mrb[33].mxu0  ;;  %v4858_v8 = vld [vmem:[%s5679_s22 + $0x4c8] ss:$16 sps:$4 sm:$0xff]  }
 0x1f3   : > { %v2598_v14 = vpop.f32.mrb[34].mxu1  ;;  %v3143_v17 = vpop.f32.mrb[34].mxu0  ;;  %v4859_v9 = vld [vmem:[%s5679_s22 + $0x4e4] ss:$16 sps:$4 sm:$0xff]  }
 0x1f4   : > { %v2600_v18 = vpop.f32.mrb[35].mxu1  ;;  %v5917_v22 = vadd.f32 %v3143_v17, %v2598_v14  ;;  %v3145_v23 = vpop.f32.mrb[35].mxu0  ;;  %v4861_v14 = vld [vmem:[%s5679_s22 + $0x4ec] ss:$16 sps:$4 sm:$0xff]  }
 0x1f5   : > { %v4863_v23 = vld [vmem:[%s5679_s22 + $0x4e0] ss:$16 sps:$4 sm:$0xff]  }
 0x1f6   : > { %2810 = vmatmul.mubr.bf16.gmra.mrb[140].mxu1 %v4839_v10  ;;  %3355 = vmatmul.mubr.bf16.gmra.mrb[140].mxu0 %v4840_v15 }
 0x1f7   : > { %2817 = vmatprep.mubr.bf16.mxu1 %v4841_v16  ;;  %3362 = vmatprep.mubr.bf16.mxu0 %v4843_v21 }
 0x1f9   : > { %v2603_v24 = vpop.f32.mrb[36].mxu1  ;;  %v3148_v25 = vpop.f32.mrb[36].mxu0 }
 0x1fa   : > { %v2605_v28 = vpop.f32.mrb[37].mxu1  ;;  %v5920_v30 = vadd.f32 %v3148_v25, %v2603_v24  ;;  %v3150_v31 = vpop.f32.mrb[37].mxu0 }
 0x1fb   : > { %v2606_v32 = vpop.f32.mrb[38].mxu1  ;;  %v3151_v37 = vpop.f32.mrb[38].mxu0  ;;  %v4865_v31 = vld [vmem:[%s5679_s22 + $0x504] ss:$16 sps:$4 sm:$0xff]  }
 0x1fc   : > { %v2608_v38 = vpop.f32.mrb[39].mxu1  ;;  %v5925_v40 = vadd.f32 %v3151_v37, %v2606_v32  ;;  %v3153_v42 = vpop.f32.mrb[39].mxu0 }
 0x1fe   : > { %2818 = vmatmul.mubr.bf16.gmra.mrb[144].mxu1 %v4845_v29  ;;  %3363 = vmatmul.mubr.bf16.gmra.mrb[144].mxu0 %v4846_v34  ;;  %v4864_v29 = vld [vmem:[%s5679_s22 + $0x4e8] ss:$16 sps:$4 sm:$0xff]  }
 0x1ff   : > { %2825 = vmatprep.mubr.bf16.mxu1 %v4847_v35  ;;  %3370 = vmatprep.mubr.bf16.mxu0 %v4849_v39  ;;  %v4867_v35 = vld [vmem:[%s5679_s22 + $0x50c] ss:$16 sps:$4 sm:$0xff]  }
 0x201   : > { %v2611_v44 = vpop.f32.mrb[40].mxu1  ;;  %v3156_v45 = vpop.f32.mrb[40].mxu0 }
 0x202   : > { %v2613_v46 = vpop.f32.mrb[41].mxu1  ;;  %v5928_v49 = vadd.f32 %v3156_v45, %v2611_v44  ;;  %v3158_v50 = vpop.f32.mrb[41].mxu0  ;;  %v4869_v45 = vld [vmem:[%s5679_s22 + $0x500] ss:$16 sps:$4 sm:$0xff]  }
 0x203   : > { %v2614_v51 = vpop.f32.mrb[42].mxu1  ;;  %v3159_v56 = vpop.f32.mrb[42].mxu0 }
 0x204   : > { %v2616_v57 = vpop.f32.mrb[43].mxu1  ;;  %v5933_v60 = vadd.f32 %v3159_v56, %v2614_v51  ;;  %v3161_v62 = vpop.f32.mrb[43].mxu0  ;;  %v4870_v51 = vld [vmem:[%s5679_s22 + $0x508] ss:$16 sps:$4 sm:$0xff]  }
 0x205   : > { %v4873_v57 = vld [vmem:[%s5679_s22 + $0x52c] ss:$16 sps:$4 sm:$0xff]  }
 0x206   : > { %2826 = vmatmul.mubr.bf16.gmra.mrb[148].mxu1 %v4851_v48  ;;  %3371 = vmatmul.mubr.bf16.gmra.mrb[148].mxu0 %v4852_v53  ;;  %v4871_v53 = vld [vmem:[%s5679_s22 + $0x524] ss:$16 sps:$4 sm:$0xff]  }
 0x207   : > { %2833 = vmatprep.mubr.bf16.mxu1 %v4853_v54  ;;  %3378 = vmatprep.mubr.bf16.mxu0 %v4855_v58 }
 0x209   : > { %v2619_v63 = vpop.f32.mrb[44].mxu1  ;;  %v3164_v0 = vpop.f32.mrb[44].mxu0 }
 0x20a   : > { %v2621_v1 = vpop.f32.mrb[45].mxu1  ;;  %v5936_v3 = vadd.f32 %v3164_v0, %v2619_v63  ;;  %v3166_v6 = vpop.f32.mrb[45].mxu0 }
 0x20b   : > { %v2622_v7 = vpop.f32.mrb[46].mxu1  ;;  %v3167_v10 = vpop.f32.mrb[46].mxu0 }
 0x20c   : > { %v2624_v13 = vpop.f32.mrb[47].mxu1  ;;  %v5941_v15 = vadd.f32 %v3167_v10, %v2622_v7  ;;  %v3169_v16 = vpop.f32.mrb[47].mxu0  ;;  %v4877_v10 = vld [vmem:[%s5679_s22 + $0x544] ss:$16 sps:$4 sm:$0xff]  }
 0x20d   : > { %v4879_v16 = vld [vmem:[%s5679_s22 + $0x54c] ss:$16 sps:$4 sm:$0xff]  }
 0x20e   : > { %2834 = vmatmul.mubr.bf16.gmra.mrb[152].mxu1 %v4857_v2  ;;  %3379 = vmatmul.mubr.bf16.gmra.mrb[152].mxu0 %v4858_v8  ;;  %v4875_v2 = vld [vmem:[%s5679_s22 + $0x520] ss:$16 sps:$4 sm:$0xff]  }
 0x20f   : > { %2841 = vmatprep.mubr.bf16.mxu1 %v4859_v9  ;;  %3386 = vmatprep.mubr.bf16.mxu0 %v4861_v14  ;;  %v4876_v9 = vld [vmem:[%s5679_s22 + $0x528] ss:$16 sps:$4 sm:$0xff]  }
 0x211   : > { %v2627_v17 = vpop.f32.mrb[48].mxu1  ;;  %v3172_v18 = vpop.f32.mrb[48].mxu0 }
 0x212   : > { %v2629_v21 = vpop.f32.mrb[49].mxu1  ;;  %v5944_v24 = vadd.f32 %v3172_v18, %v2627_v17  ;;  %v3174_v25 = vpop.f32.mrb[49].mxu0 }
 0x213   : > { %v2630_v28 = vpop.f32.mrb[50].mxu1  ;;  %v3175_v32 = vpop.f32.mrb[50].mxu0 }
 0x214   : > { %v2632_v34 = vpop.f32.mrb[51].mxu1  ;;  %v5949_v37 = vadd.f32 %v3175_v32, %v2630_v28  ;;  %v3177_v38 = vpop.f32.mrb[51].mxu0  ;;  %v4881_v28 = vld [vmem:[%s5679_s22 + $0x540] ss:$16 sps:$4 sm:$0xff]  }
 0x215   : > { %v4882_v34 = vld [vmem:[%s5679_s22 + $0x548] ss:$16 sps:$4 sm:$0xff]  }
 0x216   : > { %2842 = vmatmul.mubr.bf16.gmra.mrb[156].mxu1 %v4863_v23  ;;  %3387 = vmatmul.mubr.bf16.gmra.mrb[156].mxu0 %v4864_v29 }
 0x217   : > { %2849 = vmatprep.mubr.bf16.mxu1 %v4865_v31  ;;  %3394 = vmatprep.mubr.bf16.mxu0 %v4867_v35  ;;  %v4883_v35 = vld [vmem:[%s5679_s22 + $0x564] ss:$16 sps:$4 sm:$0xff]  }
 0x219   : > { %v2635_v39 = vpop.f32.mrb[52].mxu1  ;;  %v3180_v42 = vpop.f32.mrb[52].mxu0 }
 0x21a   : > { %v2637_v44 = vpop.f32.mrb[53].mxu1  ;;  %v5952_v46 = vadd.f32 %v3180_v42, %v2635_v39  ;;  %v3182_v48 = vpop.f32.mrb[53].mxu0  ;;  %v4885_v42 = vld [vmem:[%s5679_s22 + $0x56c] ss:$16 sps:$4 sm:$0xff]  }
 0x21b   : > { %v2638_v50 = vpop.f32.mrb[54].mxu1  ;;  %v3183_v54 = vpop.f32.mrb[54].mxu0 }
 0x21c   : > { %v2640_v56 = vpop.f32.mrb[55].mxu1  ;;  %v5957_v58 = vadd.f32 %v3183_v54, %v2638_v50  ;;  %v3185_v62 = vpop.f32.mrb[55].mxu0 }
 0x21d   : > { %v4888_v62 = vld [vmem:[%s5679_s22 + $0x568] ss:$16 sps:$4 sm:$0xff]  }
 0x21e   : > { %2850 = vmatmul.mubr.bf16.gmra.mrb[160].mxu1 %v4869_v45  ;;  %3395 = vmatmul.mubr.bf16.gmra.mrb[160].mxu0 %v4870_v51 }
 0x21f   : > { %2857 = vmatprep.mubr.bf16.mxu1 %v4871_v53  ;;  %3402 = vmatprep.mubr.bf16.mxu0 %v4873_v57  ;;  %v4887_v53 = vld [vmem:[%s5679_s22 + $0x560] ss:$16 sps:$4 sm:$0xff]  }
 0x221   : > { %v2643_v63 = vpop.f32.mrb[56].mxu1  ;;  %v3188_v0 = vpop.f32.mrb[56].mxu0 }
 0x222   : > { %v2645_v1 = vpop.f32.mrb[57].mxu1  ;;  %v5960_v6 = vadd.f32 %v3188_v0, %v2643_v63  ;;  %v3190_v7 = vpop.f32.mrb[57].mxu0  ;;  %v4889_v63 = vld [vmem:[%s5679_s22 + $0x584] ss:$16 sps:$4 sm:$0xff]  }
 0x223   : > { %v2646_v8 = vpop.f32.mrb[58].mxu1  ;;  %v3191_v13 = vpop.f32.mrb[58].mxu0  ;;  %v4936_v7 = vld [vmem:[%s5679_s22 + $0x668] ss:$16 sps:$4 sm:$0xff]  }
 0x224   : > { %v2648_v14 = vpop.f32.mrb[59].mxu1  ;;  %v5965_v17 = vadd.f32 %v3191_v13, %v2646_v8  ;;  %v3193_v18 = vpop.f32.mrb[59].mxu0 }
 0x225   : > { %v4893_v18 = vld [vmem:[%s5679_s22 + $0x580] ss:$16 sps:$4 sm:$0xff]  }
 0x226   : > { %6468 = vst [vmem:[#allocation3_spill] sm:$0xff] %v5965_v17  ;;  %2858 = vmatmul.mubr.bf16.gmra.mrb[164].mxu1 %v4875_v2  ;;  %3403 = vmatmul.mubr.bf16.gmra.mrb[164].mxu0 %v4876_v9  ;;  %v4891_v2 = vld [vmem:[%s5679_s22 + $0x58c] ss:$16 sps:$4 sm:$0xff]  }
 0x227   : > { %2865 = vmatprep.mubr.bf16.mxu1 %v4877_v10  ;;  %3410 = vmatprep.mubr.bf16.mxu0 %v4879_v16 }
 0x229   : > { %v2651_v21 = vpop.f32.mrb[60].mxu1  ;;  %v3196_v23 = vpop.f32.mrb[60].mxu0 }
 0x22a   : > { %v2653_v25 = vpop.f32.mrb[61].mxu1  ;;  %v5968_v29 = vadd.f32 %v3196_v23, %v2651_v21  ;;  %v3198_v31 = vpop.f32.mrb[61].mxu0 }
 0x22b   : > { %v2654_v32 = vpop.f32.mrb[62].mxu1  ;;  %v3199_v38 = vpop.f32.mrb[62].mxu0  ;;  %v4895_v31 = vld [vmem:[%s5679_s22 + $0x5a4] ss:$16 sps:$4 sm:$0xff]  }
 0x22c   : > { %v2656_v39 = vpop.f32.mrb[63].mxu1  ;;  %v5973_v44 = vadd.f32 %v3199_v38, %v2654_v32  ;;  %v3201_v45 = vpop.f32.mrb[63].mxu0  ;;  %v4930_v38 = vld [vmem:[%s5679_s22 + $0x648] ss:$16 sps:$4 sm:$0xff]  }
 0x22e   : > { %2866 = vmatmul.mubr.bf16.gmra.mrb[168].mxu1 %v4881_v28  ;;  %3411 = vmatmul.mubr.bf16.gmra.mrb[168].mxu0 %v4882_v34  ;;  %v4894_v28 = vld [vmem:[%s5679_s22 + $0x588] ss:$16 sps:$4 sm:$0xff]  }
 0x22f   : > { %2873 = vmatprep.mubr.bf16.mxu1 %v4883_v35  ;;  %3418 = vmatprep.mubr.bf16.mxu0 %v4885_v42  ;;  %v4897_v35 = vld [vmem:[%s5679_s22 + $0x5ac] ss:$16 sps:$4 sm:$0xff]  }
 0x231   : > { %v2659_v48 = vpop.f32.mrb[64].mxu1  ;;  %v3204_v50 = vpop.f32.mrb[64].mxu0 }
 0x232   : > { %v2661_v51 = vpop.f32.mrb[65].mxu1  ;;  %v5976_v54 = vadd.f32 %v3204_v50, %v2659_v48  ;;  %v3206_v56 = vpop.f32.mrb[65].mxu0 }
 0x233   : > { %v2662_v57 = vpop.f32.mrb[66].mxu1  ;;  %v3207_v0 = vpop.f32.mrb[66].mxu0 }
 0x234   : > { %v2664_v1 = vpop.f32.mrb[67].mxu1  ;;  %v5983_v8 = vadd.f32 %v3207_v0, %v2662_v57  ;;  %v3209_v9 = vpop.f32.mrb[67].mxu0  ;;  %v4901_v0 = vld [vmem:[%s5679_s22 + $0x5c4] ss:$16 sps:$4 sm:$0xff]  }
 0x235   : > { %v4903_v9 = vld [vmem:[%s5679_s22 + $0x5cc] ss:$16 sps:$4 sm:$0xff]  }
 0x236   : > { %2874 = vmatmul.mubr.bf16.gmra.mrb[172].mxu1 %v4887_v53  ;;  %3419 = vmatmul.mubr.bf16.gmra.mrb[172].mxu0 %v4888_v62  ;;  %v4899_v53 = vld [vmem:[%s5679_s22 + $0x5a0] ss:$16 sps:$4 sm:$0xff]  }
 0x237   : > { %2881 = vmatprep.mubr.bf16.mxu1 %v4889_v63  ;;  %3426 = vmatprep.mubr.bf16.mxu0 %v4891_v2  ;;  %v4900_v63 = vld [vmem:[%s5679_s22 + $0x5a8] ss:$16 sps:$4 sm:$0xff]  }
 0x239   : > { %v2667_v13 = vpop.f32.mrb[68].mxu1  ;;  %v3212_v14 = vpop.f32.mrb[68].mxu0 }
 0x23a   : > { %v2669_v16 = vpop.f32.mrb[69].mxu1  ;;  %v5988_v21 = vadd.f32 %v3212_v14, %v2667_v13  ;;  %v3214_v23 = vpop.f32.mrb[69].mxu0  ;;  %v4924_v13 = vld [vmem:[%s5679_s22 + $0x628] ss:$16 sps:$4 sm:$0xff]  }
 0x23b   : > { %v2670_v25 = vpop.f32.mrb[70].mxu1  ;;  %v3215_v32 = vpop.f32.mrb[70].mxu0 }
 0x23c   : > { %v2672_v34 = vpop.f32.mrb[71].mxu1  ;;  %v5995_v39 = vadd.f32 %v3215_v32, %v2670_v25  ;;  %v3217_v42 = vpop.f32.mrb[71].mxu0 }
 0x23d   : > { %v4906_v42 = vld [vmem:[%s5679_s22 + $0x5c8] ss:$16 sps:$4 sm:$0xff]  }
 0x23e   : > { %2882 = vmatmul.mubr.bf16.gmra.mrb[176].mxu1 %v4893_v18  ;;  %3427 = vmatmul.mubr.bf16.gmra.mrb[176].mxu0 %v4894_v28 }
 0x23f   : > { %2889 = vmatprep.mubr.bf16.mxu1 %v4895_v31  ;;  %3434 = vmatprep.mubr.bf16.mxu0 %v4897_v35  ;;  %v4905_v31 = vld [vmem:[%s5679_s22 + $0x5c0] ss:$16 sps:$4 sm:$0xff]  }
 0x241   : > { %v2675_v48 = vpop.f32.mrb[72].mxu1  ;;  %v3220_v50 = vpop.f32.mrb[72].mxu0 }
 0x242   : > { %v2677_v51 = vpop.f32.mrb[73].mxu1  ;;  %v6000_v56 = vadd.f32 %v3220_v50, %v2675_v48  ;;  %v3222_v57 = vpop.f32.mrb[73].mxu0  ;;  %v4907_v48 = vld [vmem:[%s5679_s22 + $0x5e4] ss:$16 sps:$4 sm:$0xff]  }
 0x243   : > { %v2678_v62 = vpop.f32.mrb[74].mxu1  ;;  %v3223_v1 = vpop.f32.mrb[74].mxu0  ;;  %v4918_v57 = vld [vmem:[%s5679_s22 + $0x608] ss:$16 sps:$4 sm:$0xff]  }
 0x244   : > { %v2680_v2 = vpop.f32.mrb[75].mxu1  ;;  %v6007_v14 = vadd.f32 %v3223_v1, %v2678_v62  ;;  %v3225_v16 = vpop.f32.mrb[75].mxu0 }
 0x245   : > { %v4911_v16 = vld [vmem:[%s5679_s22 + $0x5e0] ss:$16 sps:$4 sm:$0xff]  }
 0x246   : > { %2890 = vmatmul.mubr.bf16.gmra.mrb[180].mxu1 %v4899_v53  ;;  %3435 = vmatmul.mubr.bf16.gmra.mrb[180].mxu0 %v4900_v63  ;;  %v4909_v53 = vld [vmem:[%s5679_s22 + $0x5ec] ss:$16 sps:$4 sm:$0xff]  }
 0x247   : > { %2897 = vmatprep.mubr.bf16.mxu1 %v4901_v0  ;;  %3442 = vmatprep.mubr.bf16.mxu0 %v4903_v9 }
 0x249   : > { %v2683_v23 = vpop.f32.mrb[76].mxu1  ;;  %v3228_v25 = vpop.f32.mrb[76].mxu0 }
 0x24a   : > { %v2685_v28 = vpop.f32.mrb[77].mxu1  ;;  %v6012_v32 = vadd.f32 %v3228_v25, %v2683_v23  ;;  %v3230_v34 = vpop.f32.mrb[77].mxu0 }
 0x24b   : > { %v2686_v35 = vpop.f32.mrb[78].mxu1  ;;  %v3231_v50 = vpop.f32.mrb[78].mxu0  ;;  %v4912_v34 = vld [vmem:[%s5679_s22 + $0x5e8] ss:$16 sps:$4 sm:$0xff]  }
 0x24c   : > { %v2688_v51 = vpop.f32.mrb[79].mxu1  ;;  %v6019_v62 = vadd.f32 %v3231_v50, %v2686_v35  ;;  %v3233_v63 = vpop.f32.mrb[79].mxu0  ;;  %v4913_v35 = vld [vmem:[%s5679_s22 + $0x604] ss:$16 sps:$4 sm:$0xff]  }
 0x24d   : > { %v4915_v51 = vld [vmem:[%s5679_s22 + $0x60c] ss:$16 sps:$4 sm:$0xff]  }
 0x24e   : > { %2898 = vmatmul.mubr.bf16.gmra.mrb[184].mxu1 %v4905_v31  ;;  %3443 = vmatmul.mubr.bf16.gmra.mrb[184].mxu0 %v4906_v42 }
 0x24f   : > { %2905 = vmatprep.mubr.bf16.mxu1 %v4907_v48  ;;  %3450 = vmatprep.mubr.bf16.mxu0 %v4909_v53 }
 0x251   : > { %v2691_v1 = vpop.f32.mrb[80].mxu1  ;;  %v3236_v2 = vpop.f32.mrb[80].mxu0 }
 0x252   : > { %v2693_v9 = vpop.f32.mrb[81].mxu1  ;;  %v6024_v23 = vadd.f32 %v3236_v2, %v2691_v1  ;;  %v3238_v25 = vpop.f32.mrb[81].mxu0 }
 0x253   : > { %v2694_v28 = vpop.f32.mrb[82].mxu1  ;;  %v3239_v50 = vpop.f32.mrb[82].mxu0  ;;  %v4917_v25 = vld [vmem:[%s5679_s22 + $0x600] ss:$16 sps:$4 sm:$0xff]  }
 0x254   : > { %v2696_v31 = vpop.f32.mrb[83].mxu1  ;;  %v6031_v48 = vadd.f32 %v3239_v50, %v2694_v28  ;;  %v3241_v53 = vpop.f32.mrb[83].mxu0  ;;  %v4919_v28 = vld [vmem:[%s5679_s22 + $0x624] ss:$16 sps:$4 sm:$0xff]  }
 0x255   : > { %v4921_v53 = vld [vmem:[%s5679_s22 + $0x62c] ss:$16 sps:$4 sm:$0xff]  }
 0x256   : > { %2906 = vmatmul.mubr.bf16.gmra.mrb[188].mxu1 %v4911_v16  ;;  %3451 = vmatmul.mubr.bf16.gmra.mrb[188].mxu0 %v4912_v34 }
 0x257   : > { %2913 = vmatprep.mubr.bf16.mxu1 %v4913_v35  ;;  %3458 = vmatprep.mubr.bf16.mxu0 %v4915_v51 }
 0x259   : > { %v2699_v1 = vpop.f32.mrb[84].mxu1  ;;  %v3244_v2 = vpop.f32.mrb[84].mxu0 }
 0x25a   : > { %v2701_v9 = vpop.f32.mrb[85].mxu1  ;;  %v6036_v31 = vadd.f32 %v3244_v2, %v2699_v1  ;;  %v3246_v0 = vpop.f32.mrb[85].mxu0 }
 0x25b   : > { %v2702_v42 = vpop.f32.mrb[86].mxu1  ;;  %v3247_v50 = vpop.f32.mrb[86].mxu0 }
 0x25c   : > { %v2704_v16 = vpop.f32.mrb[87].mxu1  ;;  %v6043_v35 = vadd.f32 %v3247_v50, %v2702_v42  ;;  %v3249_v51 = vpop.f32.mrb[87].mxu0  ;;  %v4925_v42 = vld [vmem:[%s5679_s22 + $0x644] ss:$16 sps:$4 sm:$0xff]  }
 0x25d   : > { %v4923_v16 = vld [vmem:[%s5679_s22 + $0x620] ss:$16 sps:$4 sm:$0xff]   ;;  %v4927_v51 = vld [vmem:[%s5679_s22 + $0x64c] ss:$16 sps:$4 sm:$0xff]  }
 0x25e   : > { %2914 = vmatmul.mubr.bf16.gmra.mrb[192].mxu1 %v4917_v25  ;;  %3459 = vmatmul.mubr.bf16.gmra.mrb[192].mxu0 %v4918_v57 }
 0x25f   : > { %2921 = vmatprep.mubr.bf16.mxu1 %v4919_v28  ;;  %3466 = vmatprep.mubr.bf16.mxu0 %v4921_v53 }
 0x261   : > { %v2707_v1 = vpop.f32.mrb[88].mxu1  ;;  %v3252_v2 = vpop.f32.mrb[88].mxu0 }
 0x262   : > { %v2709_v9 = vpop.f32.mrb[89].mxu1  ;;  %v6048_v63 = vadd.f32 %v3252_v2, %v2707_v1  ;;  %v3254_v18 = vpop.f32.mrb[89].mxu0 }
 0x263   : > { %v2710_v34 = vpop.f32.mrb[90].mxu1  ;;  %v3255_v50 = vpop.f32.mrb[90].mxu0 }
 0x264   : > { %v2712_v25 = vpop.f32.mrb[91].mxu1  ;;  %v6055_v28 = vadd.f32 %v3255_v50, %v2710_v34  ;;  %v3257_v53 = vpop.f32.mrb[91].mxu0  ;;  %v4931_v34 = vld [vmem:[%s5679_s22 + $0x664] ss:$16 sps:$4 sm:$0xff]  }
 0x265   : > { %v4929_v25 = vld [vmem:[%s5679_s22 + $0x640] ss:$16 sps:$4 sm:$0xff]   ;;  %v4933_v53 = vld [vmem:[%s5679_s22 + $0x66c] ss:$16 sps:$4 sm:$0xff]  }
 0x266   : > { %2922 = vmatmul.mubr.bf16.gmra.mrb[196].mxu1 %v4923_v16  ;;  %3467 = vmatmul.mubr.bf16.gmra.mrb[196].mxu0 %v4924_v13 }
 0x267   : > { %2929 = vmatprep.mubr.bf16.mxu1 %v4925_v42  ;;  %3474 = vmatprep.mubr.bf16.mxu0 %v4927_v51 }
 0x269   : > { %v2715_v1 = vpop.f32.mrb[92].mxu1  ;;  %v3260_v2 = vpop.f32.mrb[92].mxu0 }
 0x26a   : > { %v2717_v9 = vpop.f32.mrb[93].mxu1  ;;  %v6060_v0 = vadd.f32 %v3260_v2, %v2715_v1  ;;  %v3262_v45 = vpop.f32.mrb[93].mxu0 }
 0x26b   : > { %v2718_v57 = vpop.f32.mrb[94].mxu1  ;;  %v3263_v50 = vpop.f32.mrb[94].mxu0 }
 0x26c   : > { %v2720_v16 = vpop.f32.mrb[95].mxu1  ;;  %v6067_v42 = vadd.f32 %v3263_v50, %v2718_v57  ;;  %v3265_v51 = vpop.f32.mrb[95].mxu0  ;;  %v4937_v57 = vld [vmem:[%s5679_s22 + $0x684] ss:$16 sps:$4 sm:$0xff]  }
 0x26d   : > { %v4935_v16 = vld [vmem:[%s5679_s22 + $0x660] ss:$16 sps:$4 sm:$0xff]   ;;  %v4939_v51 = vld [vmem:[%s5679_s22 + $0x68c] ss:$16 sps:$4 sm:$0xff]  }
 0x26e   : > { %6469 = vst [vmem:[#allocation4_spill] sm:$0xff] %v6067_v42  ;;  %2930 = vmatmul.mubr.bf16.gmra.mrb[200].mxu1 %v4929_v25  ;;  %3475 = vmatmul.mubr.bf16.gmra.mrb[200].mxu0 %v4930_v38 }
 0x26f   : > { %2937 = vmatprep.mubr.bf16.mxu1 %v4931_v34  ;;  %3482 = vmatprep.mubr.bf16.mxu0 %v4933_v53 }
 0x271   : > { %v2723_v1 = vpop.f32.mrb[96].mxu1  ;;  %v3268_v2 = vpop.f32.mrb[96].mxu0 }
 0x272   : > { %v2725_v9 = vpop.f32.mrb[97].mxu1  ;;  %v6072_v18 = vadd.f32 %v3268_v2, %v2723_v1  ;;  %v3270_v10 = vpop.f32.mrb[97].mxu0 }
 0x273   : > { %v2726_v13 = vpop.f32.mrb[98].mxu1  ;;  %v3271_v50 = vpop.f32.mrb[98].mxu0 }
 0x274   : > { %6470 = vst [vmem:[#allocation5_spill] sm:$0xff] %v6072_v18  ;;  %v2728_v25 = vpop.f32.mrb[99].mxu1  ;;  %v6079_v34 = vadd.f32 %v3271_v50, %v2726_v13  ;;  %v3273_v53 = vpop.f32.mrb[99].mxu0  ;;  %v4942_v18 = vld [vmem:[%s5679_s22 + $0x688] ss:$16 sps:$4 sm:$0xff]  }
 0x275   : > { %v4941_v25 = vld [vmem:[%s5679_s22 + $0x680] ss:$16 sps:$4 sm:$0xff]   ;;  %v4943_v13 = vld [vmem:[%s5679_s22 + $0x6a4] ss:$16 sps:$4 sm:$0xff]   ;;  %v4945_v53 = vld [vmem:[%s5679_s22 + $0x6ac] ss:$16 sps:$4 sm:$0xff]  }
 0x276   : > { %6471 = vst [vmem:[#allocation6_spill] sm:$0xff] %v6079_v34  ;;  %2938 = vmatmul.mubr.bf16.gmra.mrb[204].mxu1 %v4935_v16  ;;  %3483 = vmatmul.mubr.bf16.gmra.mrb[204].mxu0 %v4936_v7 }
 0x277   : > { %2945 = vmatprep.mubr.bf16.mxu1 %v4937_v57  ;;  %3490 = vmatprep.mubr.bf16.mxu0 %v4939_v51 }
 0x279   : > { %v2731_v1 = vpop.f32.mrb[100].mxu1  ;;  %v3276_v2 = vpop.f32.mrb[100].mxu0 }
 0x27a   : > { %v2733_v9 = vpop.f32.mrb[101].mxu1  ;;  %v6084_v45 = vadd.f32 %v3276_v2, %v2731_v1  ;;  %v3278_v42 = vpop.f32.mrb[101].mxu0 }
 0x27b   : > { %v2734_v38 = vpop.f32.mrb[102].mxu1  ;;  %v3279_v50 = vpop.f32.mrb[102].mxu0 }
 0x27c   : > { %6472 = vst [vmem:[#allocation7_spill] sm:$0xff] %v6084_v45  ;;  %v2736_v16 = vpop.f32.mrb[103].mxu1  ;;  %v6091_v57 = vadd.f32 %v3279_v50, %v2734_v38  ;;  %v3281_v51 = vpop.f32.mrb[103].mxu0  ;;  %v4948_v45 = vld [vmem:[%s5679_s22 + $0x6a8] ss:$16 sps:$4 sm:$0xff]  }
 0x27d   : > { %v4947_v16 = vld [vmem:[%s5679_s22 + $0x6a0] ss:$16 sps:$4 sm:$0xff]   ;;  %v4949_v38 = vld [vmem:[%s5679_s22 + $0x6c4] ss:$16 sps:$4 sm:$0xff]   ;;  %v4951_v51 = vld [vmem:[%s5679_s22 + $0x6cc] ss:$16 sps:$4 sm:$0xff]  }
 0x27e   : > { %6473 = vst [vmem:[#allocation8_spill] sm:$0xff] %v6091_v57  ;;  %2946 = vmatmul.mubr.bf16.gmra.mrb[208].mxu1 %v4941_v25  ;;  %3491 = vmatmul.mubr.bf16.gmra.mrb[208].mxu0 %v4942_v18 }
 0x27f   : > { %2953 = vmatprep.mubr.bf16.mxu1 %v4943_v13  ;;  %3498 = vmatprep.mubr.bf16.mxu0 %v4945_v53 }
 0x281   : > { %v2739_v1 = vpop.f32.mrb[104].mxu1  ;;  %v3284_v2 = vpop.f32.mrb[104].mxu0 }
 0x282   : > { %v2741_v9 = vpop.f32.mrb[105].mxu1  ;;  %v6096_v10 = vadd.f32 %v3284_v2, %v2739_v1  ;;  %v3286_v34 = vpop.f32.mrb[105].mxu0 }
 0x283   : > { %v2742_v7 = vpop.f32.mrb[106].mxu1  ;;  %v3287_v50 = vpop.f32.mrb[106].mxu0 }
 0x284   : > { %6474 = vst [vmem:[#allocation9_spill] sm:$0xff] %v6096_v10  ;;  %v2744_v25 = vpop.f32.mrb[107].mxu1  ;;  %v6103_v13 = vadd.f32 %v3287_v50, %v2742_v7  ;;  %v3289_v53 = vpop.f32.mrb[107].mxu0  ;;  %v4954_v10 = vld [vmem:[%s5679_s22 + $0x6c8] ss:$16 sps:$4 sm:$0xff]  }
 0x285   : > { %v4953_v25 = vld [vmem:[%s5679_s22 + $0x6c0] ss:$16 sps:$4 sm:$0xff]   ;;  %v4955_v7 = vld [vmem:[%s5679_s22 + $0x6e4] ss:$16 sps:$4 sm:$0xff]   ;;  %v4957_v53 = vld [vmem:[%s5679_s22 + $0x6ec] ss:$16 sps:$4 sm:$0xff]  }
 0x286   : > { %6475 = vst [vmem:[#allocation10_spill] sm:$0xff] %v6103_v13  ;;  %2954 = vmatmul.mubr.bf16.gmra.mrb[212].mxu1 %v4947_v16  ;;  %3499 = vmatmul.mubr.bf16.gmra.mrb[212].mxu0 %v4948_v45 }
 0x287   : > { %2961 = vmatprep.mubr.bf16.mxu1 %v4949_v38  ;;  %3506 = vmatprep.mubr.bf16.mxu0 %v4951_v51 }
 0x289   : > { %v2747_v1 = vpop.f32.mrb[108].mxu1  ;;  %v3292_v2 = vpop.f32.mrb[108].mxu0 }
 0x28a   : > { %v2749_v9 = vpop.f32.mrb[109].mxu1  ;;  %v6108_v42 = vadd.f32 %v3292_v2, %v2747_v1  ;;  %v3294_v57 = vpop.f32.mrb[109].mxu0 }
 0x28b   : > { %v2750_v18 = vpop.f32.mrb[110].mxu1  ;;  %v3295_v50 = vpop.f32.mrb[110].mxu0 }
 0x28c   : > { %6476 = vst [vmem:[#allocation11_spill] sm:$0xff] %v6108_v42  ;;  %v2752_v16 = vpop.f32.mrb[111].mxu1  ;;  %v6115_v38 = vadd.f32 %v3295_v50, %v2750_v18  ;;  %v3297_v51 = vpop.f32.mrb[111].mxu0  ;;  %v4960_v42 = vld [vmem:[%s5679_s22 + $0x6e8] ss:$16 sps:$4 sm:$0xff]  }
 0x28d   : > { %v4959_v16 = vld [vmem:[%s5679_s22 + $0x6e0] ss:$16 sps:$4 sm:$0xff]   ;;  %v4961_v18 = vld [vmem:[%s5679_s22 + $0x704] ss:$16 sps:$4 sm:$0xff]   ;;  %v4963_v51 = vld [vmem:[%s5679_s22 + $0x70c] ss:$16 sps:$4 sm:$0xff]  }
 0x28e   : > { %6477 = vst [vmem:[#allocation12_spill] sm:$0xff] %v6115_v38  ;;  %2962 = vmatmul.mubr.bf16.gmra.mrb[216].mxu1 %v4953_v25  ;;  %3507 = vmatmul.mubr.bf16.gmra.mrb[216].mxu0 %v4954_v10 }
 0x28f   : > { %2969 = vmatprep.mubr.bf16.mxu1 %v4955_v7  ;;  %3514 = vmatprep.mubr.bf16.mxu0 %v4957_v53 }
 0x291   : > { %v2755_v1 = vpop.f32.mrb[112].mxu1  ;;  %v3300_v2 = vpop.f32.mrb[112].mxu0 }
 0x292   : > { %v2757_v9 = vpop.f32.mrb[113].mxu1  ;;  %v6120_v34 = vadd.f32 %v3300_v2, %v2755_v1  ;;  %v3302_v13 = vpop.f32.mrb[113].mxu0 }
 0x293   : > { %v2758_v45 = vpop.f32.mrb[114].mxu1  ;;  %v3303_v50 = vpop.f32.mrb[114].mxu0 }
 0x294   : > { %6478 = vst [vmem:[#allocation13_spill] sm:$0xff] %v6120_v34  ;;  %v2760_v25 = vpop.f32.mrb[115].mxu1  ;;  %v6127_v7 = vadd.f32 %v3303_v50, %v2758_v45  ;;  %v3305_v53 = vpop.f32.mrb[115].mxu0  ;;  %v4966_v34 = vld [vmem:[%s5679_s22 + $0x708] ss:$16 sps:$4 sm:$0xff]  }
 0x295   : > { %v4965_v25 = vld [vmem:[%s5679_s22 + $0x700] ss:$16 sps:$4 sm:$0xff]   ;;  %v4967_v45 = vld [vmem:[%s5679_s22 + $0x724] ss:$16 sps:$4 sm:$0xff]   ;;  %v4969_v53 = vld [vmem:[%s5679_s22 + $0x72c] ss:$16 sps:$4 sm:$0xff]  }
 0x296   : > { %6479 = vst [vmem:[#allocation14_spill] sm:$0xff] %v6127_v7  ;;  %2970 = vmatmul.mubr.bf16.gmra.mrb[220].mxu1 %v4959_v16  ;;  %3515 = vmatmul.mubr.bf16.gmra.mrb[220].mxu0 %v4960_v42 }
 0x297   : > { %2977 = vmatprep.mubr.bf16.mxu1 %v4961_v18  ;;  %3522 = vmatprep.mubr.bf16.mxu0 %v4963_v51 }
 0x299   : > { %v2763_v1 = vpop.f32.mrb[116].mxu1  ;;  %v3308_v2 = vpop.f32.mrb[116].mxu0 }
 0x29a   : > { %v2765_v9 = vpop.f32.mrb[117].mxu1  ;;  %v6132_v57 = vadd.f32 %v3308_v2, %v2763_v1  ;;  %v3310_v38 = vpop.f32.mrb[117].mxu0 }
 0x29b   : > { %v2766_v10 = vpop.f32.mrb[118].mxu1  ;;  %v3311_v50 = vpop.f32.mrb[118].mxu0 }
 0x29c   : > { %6480 = vst [vmem:[#allocation15_spill] sm:$0xff] %v6132_v57  ;;  %v2768_v16 = vpop.f32.mrb[119].mxu1  ;;  %v6139_v18 = vadd.f32 %v3311_v50, %v2766_v10  ;;  %v3313_v51 = vpop.f32.mrb[119].mxu0  ;;  %v4972_v57 = vld [vmem:[%s5679_s22 + $0x728] ss:$16 sps:$4 sm:$0xff]  }
 0x29d   : > { %v4971_v16 = vld [vmem:[%s5679_s22 + $0x720] ss:$16 sps:$4 sm:$0xff]   ;;  %v4973_v10 = vld [vmem:[%s5679_s22 + $0x744] ss:$16 sps:$4 sm:$0xff]   ;;  %v4975_v51 = vld [vmem:[%s5679_s22 + $0x74c] ss:$16 sps:$4 sm:$0xff]  }
 0x29e   : > { %6481 = vst [vmem:[#allocation16_spill] sm:$0xff] %v6139_v18  ;;  %2978 = vmatmul.mubr.bf16.gmra.mrb[224].mxu1 %v4965_v25  ;;  %3523 = vmatmul.mubr.bf16.gmra.mrb[224].mxu0 %v4966_v34 }
 0x29f   : > { %2985 = vmatprep.mubr.bf16.mxu1 %v4967_v45  ;;  %3530 = vmatprep.mubr.bf16.mxu0 %v4969_v53 }
 0x2a1   : > { %v2771_v1 = vpop.f32.mrb[120].mxu1  ;;  %v3316_v2 = vpop.f32.mrb[120].mxu0 }
 0x2a2   : > { %v2773_v9 = vpop.f32.mrb[121].mxu1  ;;  %v6144_v13 = vadd.f32 %v3316_v2, %v2771_v1  ;;  %v3318_v7 = vpop.f32.mrb[121].mxu0 }
 0x2a3   : > { %v2774_v42 = vpop.f32.mrb[122].mxu1  ;;  %v3319_v50 = vpop.f32.mrb[122].mxu0 }
 0x2a4   : > { %6482 = vst [vmem:[#allocation17_spill] sm:$0xff] %v6144_v13  ;;  %v2776_v25 = vpop.f32.mrb[123].mxu1  ;;  %v6151_v45 = vadd.f32 %v3319_v50, %v2774_v42  ;;  %v3321_v53 = vpop.f32.mrb[123].mxu0  ;;  %v4978_v13 = vld [vmem:[%s5679_s22 + $0x748] ss:$16 sps:$4 sm:$0xff]  }
 0x2a5   : > { %v4977_v25 = vld [vmem:[%s5679_s22 + $0x740] ss:$16 sps:$4 sm:$0xff]   ;;  %v4979_v42 = vld [vmem:[%s5679_s22 + $0x764] ss:$16 sps:$4 sm:$0xff]   ;;  %v4981_v53 = vld [vmem:[%s5679_s22 + $0x76c] ss:$16 sps:$4 sm:$0xff]  }
 0x2a6   : > { %6483 = vst [vmem:[#allocation18_spill] sm:$0xff] %v6151_v45  ;;  %2986 = vmatmul.mubr.bf16.gmra.mrb[228].mxu1 %v4971_v16  ;;  %3531 = vmatmul.mubr.bf16.gmra.mrb[228].mxu0 %v4972_v57  ;;  %v4984_v57 = vld [vmem:[%s5679_s22 + $0x768] ss:$16 sps:$4 sm:$0xff]  }
 0x2a7   : > { %2993 = vmatprep.mubr.bf16.mxu1 %v4973_v10  ;;  %3538 = vmatprep.mubr.bf16.mxu0 %v4975_v51 }
 0x2a9   : > { %v2779_v1 = vpop.f32.mrb[124].mxu1  ;;  %v3324_v2 = vpop.f32.mrb[124].mxu0 }
 0x2aa   : > { %v2781_v9 = vpop.f32.mrb[125].mxu1  ;;  %v6156_v38 = vadd.f32 %v3324_v2, %v2779_v1  ;;  %v3326_v18 = vpop.f32.mrb[125].mxu0 }
 0x2ab   : > { %v2782_v34 = vpop.f32.mrb[126].mxu1  ;;  %v3327_v50 = vpop.f32.mrb[126].mxu0  ;;  %v4990_v18 = vld [vmem:[%s5679_s22 + $0x788] ss:$16 sps:$4 sm:$0xff]  }
 0x2ac   : > { %6484 = vst [vmem:[#allocation19_spill] sm:$0xff] %v6156_v38  ;;  %v2784_v16 = vpop.f32.mrb[127].mxu1  ;;  %v6163_v10 = vadd.f32 %v3327_v50, %v2782_v34  ;;  %v3329_v51 = vpop.f32.mrb[127].mxu0  ;;  %v4985_v34 = vld [vmem:[%s5679_s22 + $0x784] ss:$16 sps:$4 sm:$0xff]   ;;  %v6485_v38 = vmax.f32 %v5848_v19, %v5976_v54 }
 0x2ad   : > { %v4983_v16 = vld [vmem:[%s5679_s22 + $0x760] ss:$16 sps:$4 sm:$0xff]  }
 0x2ae   : > { %2994 = vmatmul.mubr.bf16.gmra.mrb[232].mxu1 %v4977_v25  ;;  %3539 = vmatmul.mubr.bf16.gmra.mrb[232].mxu0 %v4978_v13  ;;  %v4987_v25 = vld [vmem:[%s5679_s22 + $0x78c] ss:$16 sps:$4 sm:$0xff]   ;;  %v4989_v19 = vld [vmem:[%s5679_s22 + $0x780] ss:$16 sps:$4 sm:$0xff]  }
 0x2af   : > { %3001 = vmatprep.mubr.bf16.mxu1 %v4979_v42  ;;  %3546 = vmatprep.mubr.bf16.mxu0 %v4981_v53 }
 0x2b1   : > { %v2787_v1 = vpop.f32.mrb[128].mxu1  ;;  %v3332_v2 = vpop.f32.mrb[128].mxu0 }
 0x2b2   : > { %v2789_v9 = vpop.f32.mrb[129].mxu1  ;;  %v3333_v7 = vadd.f32 %v3332_v2, %v2787_v1  ;;  %v3334_v45 = vpop.f32.mrb[129].mxu0 }
 0x2b3   : > { %v2790_v17 = vpop.f32.mrb[130].mxu1  ;;  %v3335_v50 = vpop.f32.mrb[130].mxu0  ;;  %v6486_v45 = vmax.f32 %v5853_v27, %v5983_v8  ;;  %v6487_v27 = vmax.f32 %v5856_v33, %v5988_v21  ;;  %v4995_v33 = vld [vmem:[%s5679_s22 + $0x7a0] ss:$16 sps:$4 sm:$0xff]  }
 0x2b4   : > { %v2792_v51 = vpop.f32.mrb[131].mxu1  ;;  %v6174_v13 = vmax.f32 %v6485_v38, %v3333_v7  ;;  %v3336_v42 = vadd.f32 %v3335_v50, %v2790_v17  ;;  %v3337_v53 = vpop.f32.mrb[131].mxu0  ;;  %v4991_v17 = vld [vmem:[%s5679_s22 + $0x7a4] ss:$16 sps:$4 sm:$0xff]  }
 0x2b5   : > { %v4993_v53 = vld [vmem:[%s5679_s22 + $0x7ac] ss:$16 sps:$4 sm:$0xff]  }
 0x2b6   : > { %3002 = vmatmul.mubr.bf16.gmra.mrb[236].mxu1 %v4983_v16  ;;  %v6179_v1 = vmax.f32 %v6486_v45, %v3336_v42  ;;  %3547 = vmatmul.mubr.bf16.gmra.mrb[236].mxu0 %v4984_v57 }
 0x2b7   : > { %3009 = vmatprep.mubr.bf16.mxu1 %v4985_v34  ;;  %3554 = vmatprep.mubr.bf16.mxu0 %v4987_v25  ;;  %v6488_v25 = vmax.f32 %v5861_v41, %v5995_v39  ;;  %v6489_v41 = vmax.f32 %v5864_v47, %v6000_v56  ;;  %v5001_v47 = vld [vmem:[%s5679_s22 + $0x7c0] ss:$16 sps:$4 sm:$0xff]  }
 0x2b9   : > { %v2795_v2 = vpop.f32.mrb[132].mxu1  ;;  %v3340_v9 = vpop.f32.mrb[132].mxu0 }
 0x2ba   : > { %v2797_v51 = vpop.f32.mrb[133].mxu1  ;;  %v3341_v54 = vadd.f32 %v3340_v9, %v2795_v2  ;;  %v3342_v38 = vpop.f32.mrb[133].mxu0 }
 0x2bb   : > { %v2798_v7 = vpop.f32.mrb[134].mxu1  ;;  %v3343_v16 = vpop.f32.mrb[134].mxu0  ;;  %v4996_v38 = vld [vmem:[%s5679_s22 + $0x7a8] ss:$16 sps:$4 sm:$0xff]  }
 0x2bc   : > { %v2800_v50 = vpop.f32.mrb[135].mxu1  ;;  %v6188_v8 = vmax.f32 %v6487_v27, %v3341_v54  ;;  %v3344_v57 = vadd.f32 %v3343_v16, %v2798_v7  ;;  %v3345_v34 = vpop.f32.mrb[135].mxu0  ;;  %v4997_v7 = vld [vmem:[%s5679_s22 + $0x7c4] ss:$16 sps:$4 sm:$0xff]  }
 0x2bd   : > { %v4999_v50 = vld [vmem:[%s5679_s22 + $0x7cc] ss:$16 sps:$4 sm:$0xff]  }
 0x2be   : > { %3010 = vmatmul.mubr.bf16.gmra.mrb[240].mxu1 %v4989_v19  ;;  %v6193_v42 = vmax.f32 %v6488_v25, %v3344_v57  ;;  %3555 = vmatmul.mubr.bf16.gmra.mrb[240].mxu0 %v4990_v18 }
 0x2bf   : > { %3017 = vmatprep.mubr.bf16.mxu1 %v4991_v17  ;;  %3562 = vmatprep.mubr.bf16.mxu0 %v4993_v53  ;;  %v6490_v53 = vmax.f32 %v5869_v55, %v6007_v14  ;;  %v6491_v55 = vmax.f32 %v5872_v61, %v6012_v32 }
 0x2c1   : > { %v2803_v45 = vpop.f32.mrb[136].mxu1  ;;  %v3348_v2 = vpop.f32.mrb[136].mxu0 }
 0x2c2   : > { %v2805_v9 = vpop.f32.mrb[137].mxu1  ;;  %v3349_v21 = vadd.f32 %v3348_v2, %v2803_v45  ;;  %v3350_v51 = vpop.f32.mrb[137].mxu0 }
 0x2c3   : > { %v2806_v54 = vpop.f32.mrb[138].mxu1  ;;  %v3351_v19 = vpop.f32.mrb[138].mxu0  ;;  %v5002_v9 = vld [vmem:[%s5679_s22 + $0x7c8] ss:$16 sps:$4 sm:$0xff]  }
 0x2c4   : > { %v2808_v16 = vpop.f32.mrb[139].mxu1  ;;  %v6202_v39 = vmax.f32 %v6489_v41, %v3349_v21  ;;  %v3352_v18 = vadd.f32 %v3351_v19, %v2806_v54  ;;  %v3353_v17 = vpop.f32.mrb[139].mxu0  ;;  %v5003_v21 = vld [vmem:[%s5679_s22 + $0x7e4] ss:$16 sps:$4 sm:$0xff]   ;;  %v5005_v54 = vld [vmem:[%s5679_s22 + $0x7ec] ss:$16 sps:$4 sm:$0xff]   ;;  %v6492_v19 = vmax.f32 %v5877_v5, %v6019_v62 }
 0x2c5   : > { %v5007_v17 = vld [vmem:[%s5679_s22 + $0x7e0] ss:$16 sps:$4 sm:$0xff]  }
 0x2c6   : > { %3018 = vmatmul.mubr.bf16.gmra.mrb[244].mxu1 %v4995_v33  ;;  %v6207_v27 = vmax.f32 %v6490_v53, %v3352_v18  ;;  %3563 = vmatmul.mubr.bf16.gmra.mrb[244].mxu0 %v4996_v38 }
 0x2c7   : > { %3025 = vmatprep.mubr.bf16.mxu1 %v4997_v7  ;;  %3570 = vmatprep.mubr.bf16.mxu0 %v4999_v50 }
 0x2c9   : > { %v2811_v57 = vpop.f32.mrb[140].mxu1  ;;  %v3356_v34 = vpop.f32.mrb[140].mxu0 }
 0x2ca   : > { %v2813_v25 = vpop.f32.mrb[141].mxu1  ;;  %v3357_v56 = vadd.f32 %v3356_v34, %v2811_v57  ;;  %v3358_v45 = vpop.f32.mrb[141].mxu0  ;;  %v5008_v57 = vld [vmem:[%s5679_s22 + $0x7e8] ss:$16 sps:$4 sm:$0xff]   ;;  %s3986_s22 = sshll.u32 %s3976_s15, 5 }
 0x2cb   : > { %v2814_v2 = vpop.f32.mrb[142].mxu1  ;;  %v3359_v33 = vpop.f32.mrb[142].mxu0  ;;  %v6494_v45 = vmax.f32 %v5885_v20, %v6031_v48  ;;  %v6496_v20 = vmax.f32 %v5893_v36, %v6043_v35  ;;  %v6498_v36 = vmax.f32 %v5901_v52, %v6055_v28  ;;  %p699_p8 = scmp.lt.s32.totalorder %s3986_s22, 63 }
 0x2cc   : > { %v2816_v51 = vpop.f32.mrb[143].mxu1  ;;  %v6216_v14 = vmax.f32 %v6491_v55, %v3357_v56  ;;  %v3360_v38 = vadd.f32 %v3359_v33, %v2814_v2  ;;  %v3361_v7 = vpop.f32.mrb[143].mxu0 }
 0x2cd   : > { %s6538_s22 = smov (!%p699_p8, %s3986_s22), 63 }
 0x2ce   : > { %3026 = vmatmul.mubr.bf16.gmra.mrb[248].mxu1 %v5001_v47  ;;  %v6221_v16 = vmax.f32 %v6492_v19, %v3360_v38  ;;  %3571 = vmatmul.mubr.bf16.gmra.mrb[248].mxu0 %v5002_v9  ;;  %v6493_v47 = vmax.f32 %v5880_v11, %v6024_v23  ;;  %v6495_v11 = vmax.f32 %v5888_v26, %v6036_v31  ;;  %s3987_s14 = sshll.u32 %s6538_s22, 2 }
 0x2cf   : > { %3033 = vmatprep.mubr.bf16.mxu1 %v5003_v21  ;;  %3578 = vmatprep.mubr.bf16.mxu0 %v5005_v54  ;;  %v6497_v26 = vmax.f32 %v5896_v43, %v6048_v63  ;;  %v6499_v43 = vmax.f32 %v5904_v59, %v6060_v0  ;;  %s6359_s6 = scalar_lea.vmem %s6450_s3, %s3987_s14 }
 0x2d1   : > { %v2819_v50 = vpop.f32.mrb[144].mxu1  ;;  %v3364_v41 = vpop.f32.mrb[144].mxu0 }
 0x2d2   : > { %v2821_v18 = vpop.f32.mrb[145].mxu1  ;;  %v3365_v53 = vadd.f32 %v3364_v41, %v2819_v50  ;;  %v3366_v61 = vpop.f32.mrb[145].mxu0 }
 0x2d3   : > { %v2822_v32 = vpop.f32.mrb[146].mxu1  ;;  %v3367_v34 = vpop.f32.mrb[146].mxu0 }
 0x2d4   : > { %v2824_v25 = vpop.f32.mrb[147].mxu1  ;;  %v6228_v56 = vmax.f32 %v6493_v47, %v3365_v53  ;;  %v3368_v5 = vadd.f32 %v3367_v34, %v2822_v32  ;;  %v3369_v62 = vpop.f32.mrb[147].mxu0 }
 0x2d6   : > { %3034 = vmatmul.mubr.bf16.gmra.mrb[252].mxu1 %v5007_v17  ;;  %v6233_v2 = vmax.f32 %v6494_v45, %v3368_v5  ;;  %3579 = vmatmul.mubr.bf16.gmra.mrb[252].mxu0 %v5008_v57 }
 0x2d9   : > { %v2827_v9 = vpop.f32.mrb[148].mxu1  ;;  %v3372_v21 = vpop.f32.mrb[148].mxu0 }
 0x2da   : > { %v2829_v33 = vpop.f32.mrb[149].mxu1  ;;  %v3373_v51 = vadd.f32 %v3372_v21, %v2827_v9  ;;  %v3374_v54 = vpop.f32.mrb[149].mxu0 }
 0x2db   : > { %v2830_v55 = vpop.f32.mrb[150].mxu1  ;;  %v3375_v38 = vpop.f32.mrb[150].mxu0 }
 0x2dc   : > { %v2832_v7 = vpop.f32.mrb[151].mxu1  ;;  %v6238_v23 = vmax.f32 %v6495_v11, %v3373_v51  ;;  %v3376_v19 = vadd.f32 %v3375_v38, %v2830_v55  ;;  %v3377_v50 = vpop.f32.mrb[151].mxu0 }
 0x2dd   : > { %v6500_v7 = vld [vmem:[#allocation4_spill] sm:$0xff] }
 0x2de   : > { %v6243_v48 = vmax.f32 %v6496_v20, %v3376_v19  ;;  %v6501_v52 = vmax.f32 %v5909_v4, %v6500_v7 }
 0x2e1   : > { %v2835_v41 = vpop.f32.mrb[152].mxu1  ;;  %v3380_v18 = vpop.f32.mrb[152].mxu0 }
 0x2e2   : > { %v2837_v17 = vpop.f32.mrb[153].mxu1  ;;  %v3381_v53 = vadd.f32 %v3380_v18, %v2835_v41  ;;  %v3382_v61 = vpop.f32.mrb[153].mxu0 }
 0x2e3   : > { %v2838_v32 = vpop.f32.mrb[154].mxu1  ;;  %v3383_v57 = vpop.f32.mrb[154].mxu0  ;;  %v6502_v61 = vld [vmem:[#allocation5_spill] sm:$0xff] }
 0x2e4   : > { %v2840_v34 = vpop.f32.mrb[155].mxu1  ;;  %v6248_v31 = vmax.f32 %v6497_v26, %v3381_v53  ;;  %v3384_v25 = vadd.f32 %v3383_v57, %v2838_v32  ;;  %v3385_v47 = vpop.f32.mrb[155].mxu0  ;;  %v6503_v59 = vmax.f32 %v5912_v12, %v6502_v61 }
 0x2e5   : > { %v6504_v34 = vld [vmem:[#allocation6_spill] sm:$0xff] }
 0x2e6   : > { %v6253_v35 = vmax.f32 %v6498_v36, %v3384_v25  ;;  %v6505_v4 = vmax.f32 %v5917_v22, %v6504_v34 }
 0x2e9   : > { %v2843_v5 = vpop.f32.mrb[156].mxu1  ;;  %v3388_v62 = vpop.f32.mrb[156].mxu0 }
 0x2ea   : > { %v2845_v45 = vpop.f32.mrb[157].mxu1  ;;  %v3389_v9 = vadd.f32 %v3388_v62, %v2843_v5  ;;  %v3390_v21 = vpop.f32.mrb[157].mxu0 }
 0x2eb   : > { %v2846_v33 = vpop.f32.mrb[158].mxu1  ;;  %v3391_v51 = vpop.f32.mrb[158].mxu0 }
 0x2ec   : > { %v2848_v54 = vpop.f32.mrb[159].mxu1  ;;  %v6258_v63 = vmax.f32 %v6499_v43, %v3389_v9  ;;  %v3392_v55 = vadd.f32 %v3391_v51, %v2846_v33  ;;  %v3393_v38 = vpop.f32.mrb[159].mxu0  ;;  %v6506_v33 = vld [vmem:[#allocation7_spill] sm:$0xff] }
 0x2ed   : > { %v6507_v12 = vmax.f32 %v5920_v30, %v6506_v33 }
 0x2ee   : > { %v6263_v28 = vmax.f32 %v6501_v52, %v3392_v55  ;;  %v6508_v55 = vld [vmem:[#allocation8_spill] sm:$0xff] }
 0x2ef   : > { %v6509_v22 = vmax.f32 %v5925_v40, %v6508_v55 }
 0x2f1   : > { %v2851_v11 = vpop.f32.mrb[160].mxu1  ;;  %v3396_v19 = vpop.f32.mrb[160].mxu0 }
 0x2f2   : > { %v2853_v50 = vpop.f32.mrb[161].mxu1  ;;  %v3397_v20 = vadd.f32 %v3396_v19, %v2851_v11  ;;  %v3398_v41 = vpop.f32.mrb[161].mxu0 }
 0x2f3   : > { %v2854_v18 = vpop.f32.mrb[162].mxu1  ;;  %v3399_v17 = vpop.f32.mrb[162].mxu0 }
 0x2f4   : > { %v2856_v53 = vpop.f32.mrb[163].mxu1  ;;  %v6268_v0 = vmax.f32 %v6503_v59, %v3397_v20  ;;  %v3400_v32 = vadd.f32 %v3399_v17, %v2854_v18  ;;  %v3401_v57 = vpop.f32.mrb[163].mxu0  ;;  %v6510_v17 = vld [vmem:[#allocation9_spill] sm:$0xff] }
 0x2f5   : > { %v6511_v30 = vmax.f32 %v5928_v49, %v6510_v17 }
 0x2f6   : > { %v6273_v26 = vmax.f32 %v6505_v4, %v3400_v32  ;;  %v6512_v32 = vld [vmem:[#allocation10_spill] sm:$0xff] }
 0x2f7   : > { %v6513_v40 = vmax.f32 %v5933_v60, %v6512_v32 }
 0x2f9   : > { %v2859_v25 = vpop.f32.mrb[164].mxu1  ;;  %v3404_v47 = vpop.f32.mrb[164].mxu0 }
 0x2fa   : > { %v2861_v36 = vpop.f32.mrb[165].mxu1  ;;  %v3405_v5 = vadd.f32 %v3404_v47, %v2859_v25  ;;  %v3406_v62 = vpop.f32.mrb[165].mxu0 }
 0x2fb   : > { %v2862_v45 = vpop.f32.mrb[166].mxu1  ;;  %v3407_v9 = vpop.f32.mrb[166].mxu0 }
 0x2fc   : > { %v2864_v21 = vpop.f32.mrb[167].mxu1  ;;  %v6278_v51 = vmax.f32 %v6507_v12, %v3405_v5  ;;  %v3408_v54 = vadd.f32 %v3407_v9, %v2862_v45  ;;  %v3409_v43 = vpop.f32.mrb[167].mxu0  ;;  %v6514_v9 = vld [vmem:[#allocation11_spill] sm:$0xff] }
 0x2fd   : > { %v6515_v49 = vmax.f32 %v5936_v3, %v6514_v9 }
 0x2fe   : > { %v6283_v38 = vmax.f32 %v6509_v22, %v3408_v54  ;;  %v6516_v54 = vld [vmem:[#allocation12_spill] sm:$0xff] }
 0x2ff   : > { %v6517_v60 = vmax.f32 %v5941_v15, %v6516_v54 }
 0x301   : > { %v2867_v7 = vpop.f32.mrb[168].mxu1  ;;  %v3412_v52 = vpop.f32.mrb[168].mxu0 }
 0x302   : > { %v2869_v11 = vpop.f32.mrb[169].mxu1  ;;  %v3413_v19 = vadd.f32 %v3412_v52, %v2867_v7  ;;  %v3414_v50 = vpop.f32.mrb[169].mxu0 }
 0x303   : > { %v2870_v20 = vpop.f32.mrb[170].mxu1  ;;  %v3415_v41 = vpop.f32.mrb[170].mxu0 }
 0x304   : > { %v2872_v18 = vpop.f32.mrb[171].mxu1  ;;  %v6288_v53 = vmax.f32 %v6511_v30, %v3413_v19  ;;  %v3416_v61 = vadd.f32 %v3415_v41, %v2870_v20  ;;  %v3417_v59 = vpop.f32.mrb[171].mxu0  ;;  %v6518_v41 = vld [vmem:[#allocation13_spill] sm:$0xff] }
 0x305   : > { %v6519_v3 = vmax.f32 %v5944_v24, %v6518_v41 }
 0x306   : > { %v6293_v57 = vmax.f32 %v6513_v40, %v3416_v61  ;;  %v6520_v61 = vld [vmem:[#allocation14_spill] sm:$0xff] }
 0x307   : > { %v6521_v15 = vmax.f32 %v5949_v37, %v6520_v61 }
 0x309   : > { %v2875_v34 = vpop.f32.mrb[172].mxu1  ;;  %v3420_v4 = vpop.f32.mrb[172].mxu0 }
 0x30a   : > { %v2877_v25 = vpop.f32.mrb[173].mxu1  ;;  %v3421_v47 = vadd.f32 %v3420_v4, %v2875_v34  ;;  %v3422_v36 = vpop.f32.mrb[173].mxu0 }
 0x30b   : > { %v2878_v5 = vpop.f32.mrb[174].mxu1  ;;  %v3423_v62 = vpop.f32.mrb[174].mxu0 }
 0x30c   : > { %v2880_v45 = vpop.f32.mrb[175].mxu1  ;;  %v6298_v21 = vmax.f32 %v6515_v49, %v3421_v47  ;;  %v3424_v33 = vadd.f32 %v3423_v62, %v2878_v5  ;;  %v3425_v12 = vpop.f32.mrb[175].mxu0  ;;  %v6522_v62 = vld [vmem:[#allocation15_spill] sm:$0xff] }
 0x30d   : > { %v6523_v24 = vmax.f32 %v5952_v46, %v6522_v62 }
 0x30e   : > { %v6303_v43 = vmax.f32 %v6517_v60, %v3424_v33  ;;  %v6524_v33 = vld [vmem:[#allocation16_spill] sm:$0xff] }
 0x30f   : > { %v6525_v37 = vmax.f32 %v5957_v58, %v6524_v33  ;;  %v6529_v58 = vld [vmem:[#allocation18_spill] sm:$0xff] }
 0x311   : > { %v2883_v55 = vpop.f32.mrb[176].mxu1  ;;  %v3428_v22 = vpop.f32.mrb[176].mxu0 }
 0x312   : > { %v2885_v7 = vpop.f32.mrb[177].mxu1  ;;  %v3429_v52 = vadd.f32 %v3428_v22, %v2883_v55  ;;  %v3430_v11 = vpop.f32.mrb[177].mxu0 }
 0x313   : > { %v2886_v19 = vpop.f32.mrb[178].mxu1  ;;  %v3431_v50 = vpop.f32.mrb[178].mxu0 }
 0x314   : > { %v2888_v20 = vpop.f32.mrb[179].mxu1  ;;  %v6308_v18 = vmax.f32 %v6519_v3, %v3429_v52  ;;  %v3432_v17 = vadd.f32 %v3431_v50, %v2886_v19  ;;  %v3433_v30 = vpop.f32.mrb[179].mxu0  ;;  %v6526_v50 = vld [vmem:[#allocation17_spill] sm:$0xff] }
 0x315   : > { %v6527_v46 = vmax.f32 %v5960_v6, %v6526_v50  ;;  %v6531_v6 = vld [vmem:[#allocation19_spill] sm:$0xff] }
 0x316   : > { %v6313_v59 = vmax.f32 %v6521_v15, %v3432_v17  ;;  %v6528_v17 = vld [vmem:[#allocation3_spill] sm:$0xff] }
 0x317   : > { %v6530_v30 = vmax.f32 %v6528_v17, %v6529_v58 }
 0x319   : > { %v2891_v32 = vpop.f32.mrb[180].mxu1  ;;  %v3436_v40 = vpop.f32.mrb[180].mxu0 }
 0x31a   : > { %v2893_v34 = vpop.f32.mrb[181].mxu1  ;;  %v3437_v4 = vadd.f32 %v3436_v40, %v2891_v32  ;;  %v3438_v25 = vpop.f32.mrb[181].mxu0 }
 0x31b   : > { %v2894_v47 = vpop.f32.mrb[182].mxu1  ;;  %v3439_v36 = vpop.f32.mrb[182].mxu0 }
 0x31c   : > { %v2896_v5 = vpop.f32.mrb[183].mxu1  ;;  %v6318_v45 = vmax.f32 %v6523_v24, %v3437_v4  ;;  %v3440_v9 = vadd.f32 %v3439_v36, %v2894_v47  ;;  %v3441_v49 = vpop.f32.mrb[183].mxu0 }
 0x31d   : > { %v6532_v5 = vmax.f32 %v5968_v29, %v6531_v6  ;;  %v6533_v49 = vmax.f32 %v5973_v44, %v6163_v10  ;;  %v6350_v29 = vld [vmem:[%s6449_s2] ss:$0 sm:$0xff] }
 0x31e   : > { %v6323_v12 = vmax.f32 %v6525_v37, %v3440_v9 }
 0x321   : > { %v2899_v54 = vpop.f32.mrb[184].mxu1  ;;  %v3444_v60 = vpop.f32.mrb[184].mxu0 }
 0x322   : > { %v2901_v55 = vpop.f32.mrb[185].mxu1  ;;  %v3445_v22 = vadd.f32 %v3444_v60, %v2899_v54  ;;  %v3446_v7 = vpop.f32.mrb[185].mxu0 }
 0x323   : > { %v2902_v52 = vpop.f32.mrb[186].mxu1  ;;  %v3447_v11 = vpop.f32.mrb[186].mxu0 }
 0x324   : > { %v2904_v19 = vpop.f32.mrb[187].mxu1  ;;  %v6328_v20 = vmax.f32 %v6527_v46, %v3445_v22  ;;  %v3448_v41 = vadd.f32 %v3447_v11, %v2902_v52  ;;  %v3449_v3 = vpop.f32.mrb[187].mxu0 }
 0x326   : > { %v6333_v61 = vmax.f32 %v6530_v30, %v3448_v41 }
 0x329   : > { %v2907_v15 = vpop.f32.mrb[188].mxu1  ;;  %v3452_v32 = vpop.f32.mrb[188].mxu0 }
 0x32a   : > { %v2909_v40 = vpop.f32.mrb[189].mxu1  ;;  %v3453_v34 = vadd.f32 %v3452_v32, %v2907_v15  ;;  %v3454_v4 = vpop.f32.mrb[189].mxu0 }
 0x32b   : > { %v2910_v25 = vpop.f32.mrb[190].mxu1  ;;  %v3455_v47 = vpop.f32.mrb[190].mxu0 }
 0x32c   : > { %v2912_v36 = vpop.f32.mrb[191].mxu1  ;;  %v6338_v62 = vmax.f32 %v6532_v5, %v3453_v34  ;;  %v3456_v24 = vadd.f32 %v3455_v47, %v2910_v25  ;;  %v3457_v9 = vpop.f32.mrb[191].mxu0 }
 0x32e   : > { %v6345_v33 = vmax.f32 %v6533_v49, %v3456_v24 }
 0x331   : > { %v2915_v37 = vpop.f32.mrb[192].mxu1  ;;  %v3460_v54 = vpop.f32.mrb[192].mxu0 }
 0x332   : > { %v2917_v60 = vpop.f32.mrb[193].mxu1  ;;  %v3461_v55 = vadd.f32 %v3460_v54, %v2915_v37  ;;  %v3462_v22 = vpop.f32.mrb[193].mxu0 }
 0x333   : > { %v2918_v7 = vpop.f32.mrb[194].mxu1  ;;  %v3463_v52 = vpop.f32.mrb[194].mxu0 }
 0x334   : > { %v2920_v11 = vpop.f32.mrb[195].mxu1  ;;  %v3589_v19 = vmax.f32 %v6174_v13, %v3461_v55  ;;  %v3464_v44 = vadd.f32 %v3463_v52, %v2918_v7  ;;  %v3465_v10 = vpop.f32.mrb[195].mxu0 }
 0x336   : > { %v3690_v50 = vadd.f32 %v6350_v29, %v3589_v19  ;;  %v3592_v46 = vmax.f32 %v6179_v1, %v3464_v44 }
 0x338   : > { %v3691_v41 = vadd.f32 %v6350_v29, %v3592_v46  ;;  %v3722_v30 = vmax.f32 %v3690_v50, 0.0 }
 0x339   : > { %v2923_v3 = vpop.f32.mrb[196].mxu1  ;;  %v3468_v17 = vpop.f32.mrb[196].mxu0 }
 0x33a   : > { %v2925_v58 = vpop.f32.mrb[197].mxu1  ;;  %v3723_v15 = vmax.f32 %v3691_v41, 0.0  ;;  %v3469_v32 = vadd.f32 %v3468_v17, %v2923_v3  ;;  %v3470_v40 = vpop.f32.mrb[197].mxu0 }
 0x33b   : > { %v2926_v34 = vpop.f32.mrb[198].mxu1  ;;  %v3471_v13 = vpop.f32.mrb[198].mxu0 }
 0x33c   : > { %v2928_v4 = vpop.f32.mrb[199].mxu1  ;;  %v4348_v1 = vpack.c.bf16 %v3723_v15, %v3722_v30  ;;  %v3595_v25 = vmax.f32 %v6188_v8, %v3469_v32  ;;  %v3472_v47 = vadd.f32 %v3471_v13, %v2926_v34  ;;  %v3473_v36 = vpop.f32.mrb[199].mxu0 }
 0x33e   : > { %4349 = vst [vmem:[%s6359_s6] sm:$0xff] %v4348_v1   ;;  %v3692_v6 = vadd.f32 %v6350_v29, %v3595_v25  ;;  %v3598_v5 = vmax.f32 %v6193_v42, %v3472_v47 }
 0x340   : > { %v3693_v24 = vadd.f32 %v6350_v29, %v3598_v5  ;;  %v3724_v54 = vmax.f32 %v3692_v6, 0.0 }
 0x341   : > { %v2931_v9 = vpop.f32.mrb[200].mxu1  ;;  %v3476_v49 = vpop.f32.mrb[200].mxu0 }
 0x342   : > { %v2933_v37 = vpop.f32.mrb[201].mxu1  ;;  %v3725_v60 = vmax.f32 %v3693_v24, 0.0  ;;  %v3477_v55 = vadd.f32 %v3476_v49, %v2931_v9  ;;  %v3478_v22 = vpop.f32.mrb[201].mxu0 }
 0x343   : > { %v2934_v7 = vpop.f32.mrb[202].mxu1  ;;  %v3479_v52 = vpop.f32.mrb[202].mxu0 }
 0x344   : > { %v2936_v8 = vpop.f32.mrb[203].mxu1  ;;  %v4353_v11 = vpack.c.bf16 %v3725_v60, %v3724_v54  ;;  %v3601_v19 = vmax.f32 %v6202_v39, %v3477_v55  ;;  %v3480_v44 = vadd.f32 %v3479_v52, %v2934_v7  ;;  %v3481_v10 = vpop.f32.mrb[203].mxu0 }
 0x346   : > { %4425 = vst [vmem:[%s6359_s6 + $0x8] sm:$0xff] %v4353_v11   ;;  %v3694_v42 = vadd.f32 %v6350_v29, %v3601_v19  ;;  %v3604_v50 = vmax.f32 %v6207_v27, %v3480_v44 }
 0x348   : > { %v3695_v46 = vadd.f32 %v6350_v29, %v3604_v50  ;;  %v3726_v58 = vmax.f32 %v3694_v42, 0.0 }
 0x349   : > { %v2939_v41 = vpop.f32.mrb[204].mxu1  ;;  %v3484_v3 = vpop.f32.mrb[204].mxu0 }
 0x34a   : > { %v2941_v17 = vpop.f32.mrb[205].mxu1  ;;  %v3727_v30 = vmax.f32 %v3695_v46, 0.0  ;;  %v3485_v15 = vadd.f32 %v3484_v3, %v2939_v41  ;;  %v3486_v32 = vpop.f32.mrb[205].mxu0 }
 0x34b   : > { %v2942_v40 = vpop.f32.mrb[206].mxu1  ;;  %v3487_v34 = vpop.f32.mrb[206].mxu0 }
 0x34c   : > { %v2944_v39 = vpop.f32.mrb[207].mxu1  ;;  %v4358_v13 = vpack.c.bf16 %v3727_v30, %v3726_v58  ;;  %v3607_v4 = vmax.f32 %v6216_v14, %v3485_v15  ;;  %v3488_v1 = vadd.f32 %v3487_v34, %v2942_v40  ;;  %v3489_v25 = vpop.f32.mrb[207].mxu0 }
 0x34e   : > { %4426 = vst [vmem:[%s6359_s6 + $0x10] sm:$0xff] %v4358_v13   ;;  %v3696_v27 = vadd.f32 %v6350_v29, %v3607_v4  ;;  %v3610_v47 = vmax.f32 %v6221_v16, %v3488_v1 }
 0x350   : > { %v3697_v36 = vadd.f32 %v6350_v29, %v3610_v47  ;;  %v3728_v9 = vmax.f32 %v3696_v27, 0.0 }
 0x351   : > { %v2947_v6 = vpop.f32.mrb[208].mxu1  ;;  %v3492_v5 = vpop.f32.mrb[208].mxu0 }
 0x352   : > { %v2949_v24 = vpop.f32.mrb[209].mxu1  ;;  %v3729_v49 = vmax.f32 %v3697_v36, 0.0  ;;  %v3493_v37 = vadd.f32 %v3492_v5, %v2947_v6  ;;  %v3494_v54 = vpop.f32.mrb[209].mxu0 }
 0x353   : > { %v2950_v60 = vpop.f32.mrb[210].mxu1  ;;  %v3495_v55 = vpop.f32.mrb[210].mxu0 }
 0x354   : > { %v2952_v14 = vpop.f32.mrb[211].mxu1  ;;  %v4363_v22 = vpack.c.bf16 %v3729_v49, %v3728_v9  ;;  %v3613_v7 = vmax.f32 %v6228_v56, %v3493_v37  ;;  %v3496_v52 = vadd.f32 %v3495_v55, %v2950_v60  ;;  %v3497_v8 = vpop.f32.mrb[211].mxu0 }
 0x356   : > { %4427 = vst [vmem:[%s6359_s6 + $0x18] sm:$0xff] %v4363_v22   ;;  %v3698_v16 = vadd.f32 %v6350_v29, %v3613_v7  ;;  %v3616_v11 = vmax.f32 %v6233_v2, %v3496_v52 }
 0x358   : > { %v3699_v19 = vadd.f32 %v6350_v29, %v3616_v11  ;;  %v3730_v50 = vmax.f32 %v3698_v16, 0.0 }
 0x359   : > { %v2955_v44 = vpop.f32.mrb[212].mxu1  ;;  %v3500_v10 = vpop.f32.mrb[212].mxu0 }
 0x35a   : > { %v2957_v42 = vpop.f32.mrb[213].mxu1  ;;  %v3731_v46 = vmax.f32 %v3699_v19, 0.0  ;;  %v3501_v41 = vadd.f32 %v3500_v10, %v2955_v44  ;;  %v3502_v3 = vpop.f32.mrb[213].mxu0 }
 0x35b   : > { %v2958_v17 = vpop.f32.mrb[214].mxu1  ;;  %v3503_v58 = vpop.f32.mrb[214].mxu0 }
 0x35c   : > { %v2960_v56 = vpop.f32.mrb[215].mxu1  ;;  %v4368_v30 = vpack.c.bf16 %v3731_v46, %v3730_v50  ;;  %v3619_v15 = vmax.f32 %v6238_v23, %v3501_v41  ;;  %v3504_v32 = vadd.f32 %v3503_v58, %v2958_v17  ;;  %v3505_v40 = vpop.f32.mrb[215].mxu0 }
 0x35e   : > { %4428 = vst [vmem:[%s6359_s6 + $0x20] sm:$0xff] %v4368_v30   ;;  %v3700_v2 = vadd.f32 %v6350_v29, %v3619_v15  ;;  %v3622_v34 = vmax.f32 %v6243_v48, %v3504_v32 }
 0x360   : > { %v3701_v39 = vadd.f32 %v6350_v29, %v3622_v34  ;;  %v3732_v25 = vmax.f32 %v3700_v2, 0.0 }
 0x361   : > { %v2963_v13 = vpop.f32.mrb[216].mxu1  ;;  %v3508_v4 = vpop.f32.mrb[216].mxu0 }
 0x362   : > { %v2965_v1 = vpop.f32.mrb[217].mxu1  ;;  %v3733_v27 = vmax.f32 %v3701_v39, 0.0  ;;  %v3509_v47 = vadd.f32 %v3508_v4, %v2963_v13  ;;  %v3510_v36 = vpop.f32.mrb[217].mxu0 }
 0x363   : > { %v2966_v6 = vpop.f32.mrb[218].mxu1  ;;  %v3511_v5 = vpop.f32.mrb[218].mxu0 }
 0x364   : > { %v2968_v23 = vpop.f32.mrb[219].mxu1  ;;  %v4373_v24 = vpack.c.bf16 %v3733_v27, %v3732_v25  ;;  %v3625_v9 = vmax.f32 %v6248_v31, %v3509_v47  ;;  %v3512_v49 = vadd.f32 %v3511_v5, %v2966_v6  ;;  %v3513_v37 = vpop.f32.mrb[219].mxu0 }
 0x366   : > { %4429 = vst [vmem:[%s6359_s6 + $0x28] sm:$0xff] %v4373_v24   ;;  %v3702_v48 = vadd.f32 %v6350_v29, %v3625_v9  ;;  %v3628_v54 = vmax.f32 %v6253_v35, %v3512_v49 }
 0x368   : > { %v3703_v60 = vadd.f32 %v6350_v29, %v3628_v54  ;;  %v3734_v7 = vmax.f32 %v3702_v48, 0.0 }
 0x369   : > { %v2971_v55 = vpop.f32.mrb[220].mxu1  ;;  %v3516_v14 = vpop.f32.mrb[220].mxu0 }
 0x36a   : > { %v2973_v22 = vpop.f32.mrb[221].mxu1  ;;  %v3735_v52 = vmax.f32 %v3703_v60, 0.0  ;;  %v3517_v8 = vadd.f32 %v3516_v14, %v2971_v55  ;;  %v3518_v16 = vpop.f32.mrb[221].mxu0 }
 0x36b   : > { %v2974_v11 = vpop.f32.mrb[222].mxu1  ;;  %v3519_v19 = vpop.f32.mrb[222].mxu0 }
 0x36c   : > { %v2976_v31 = vpop.f32.mrb[223].mxu1  ;;  %v4378_v44 = vpack.c.bf16 %v3735_v52, %v3734_v7  ;;  %v3631_v10 = vmax.f32 %v6258_v63, %v3517_v8  ;;  %v3520_v42 = vadd.f32 %v3519_v19, %v2974_v11  ;;  %v3521_v50 = vpop.f32.mrb[223].mxu0 }
 0x36e   : > { %4430 = vst [vmem:[%s6359_s6 + $0x30] sm:$0xff] %v4378_v44   ;;  %v3704_v35 = vadd.f32 %v6350_v29, %v3631_v10  ;;  %v3634_v46 = vmax.f32 %v6263_v28, %v3520_v42 }
 0x370   : > { %v3705_v41 = vadd.f32 %v6350_v29, %v3634_v46  ;;  %v3736_v56 = vmax.f32 %v3704_v35, 0.0 }
 0x371   : > { %v2979_v3 = vpop.f32.mrb[224].mxu1  ;;  %v3524_v17 = vpop.f32.mrb[224].mxu0 }
 0x372   : > { %v2981_v58 = vpop.f32.mrb[225].mxu1  ;;  %v3737_v30 = vmax.f32 %v3705_v41, 0.0  ;;  %v3525_v15 = vadd.f32 %v3524_v17, %v2979_v3  ;;  %v3526_v32 = vpop.f32.mrb[225].mxu0 }
 0x373   : > { %v2982_v40 = vpop.f32.mrb[226].mxu1  ;;  %v3527_v2 = vpop.f32.mrb[226].mxu0 }
 0x374   : > { %v2984_v63 = vpop.f32.mrb[227].mxu1  ;;  %v4383_v34 = vpack.c.bf16 %v3737_v30, %v3736_v56  ;;  %v3637_v39 = vmax.f32 %v6268_v0, %v3525_v15  ;;  %v3528_v13 = vadd.f32 %v3527_v2, %v2982_v40  ;;  %v3529_v4 = vpop.f32.mrb[227].mxu0 }
 0x376   : > { %4431 = vst [vmem:[%s6359_s6 + $0x38] sm:$0xff] %v4383_v34   ;;  %v3706_v28 = vadd.f32 %v6350_v29, %v3637_v39  ;;  %v3640_v1 = vmax.f32 %v6273_v26, %v3528_v13 }
 0x378   : > { %v3707_v25 = vadd.f32 %v6350_v29, %v3640_v1  ;;  %v3738_v6 = vmax.f32 %v3706_v28, 0.0 }
 0x379   : > { %v2987_v27 = vpop.f32.mrb[228].mxu1  ;;  %v3532_v47 = vpop.f32.mrb[228].mxu0 }
 0x37a   : > { %v2989_v36 = vpop.f32.mrb[229].mxu1  ;;  %v3739_v5 = vmax.f32 %v3707_v25, 0.0  ;;  %v3533_v23 = vadd.f32 %v3532_v47, %v2987_v27  ;;  %v3534_v24 = vpop.f32.mrb[229].mxu0 }
 0x37b   : > { %v2990_v9 = vpop.f32.mrb[230].mxu1  ;;  %v3535_v49 = vpop.f32.mrb[230].mxu0 }
 0x37c   : > { %v2992_v0 = vpop.f32.mrb[231].mxu1  ;;  %v4388_v37 = vpack.c.bf16 %v3739_v5, %v3738_v6  ;;  %v3643_v48 = vmax.f32 %v6278_v51, %v3533_v23  ;;  %v3536_v54 = vadd.f32 %v3535_v49, %v2990_v9  ;;  %v3537_v60 = vpop.f32.mrb[231].mxu0 }
 0x37e   : > { %4432 = vst [vmem:[%s6359_s6 + $0x40] sm:$0xff] %v4388_v37   ;;  %v3708_v26 = vadd.f32 %v6350_v29, %v3643_v48  ;;  %v3646_v55 = vmax.f32 %v6283_v38, %v3536_v54 }
 0x380   : > { %v3709_v14 = vadd.f32 %v6350_v29, %v3646_v55  ;;  %v3740_v8 = vmax.f32 %v3708_v26, 0.0 }
 0x381   : > { %v2995_v22 = vpop.f32.mrb[232].mxu1  ;;  %v3540_v7 = vpop.f32.mrb[232].mxu0 }
 0x382   : > { %v2997_v52 = vpop.f32.mrb[233].mxu1  ;;  %v3741_v16 = vmax.f32 %v3709_v14, 0.0  ;;  %v3541_v11 = vadd.f32 %v3540_v7, %v2995_v22  ;;  %v3542_v19 = vpop.f32.mrb[233].mxu0 }
 0x383   : > { %v2998_v31 = vpop.f32.mrb[234].mxu1  ;;  %v3543_v44 = vpop.f32.mrb[234].mxu0 }
 0x384   : > { %v3000_v51 = vpop.f32.mrb[235].mxu1  ;;  %v4393_v10 = vpack.c.bf16 %v3741_v16, %v3740_v8  ;;  %v3649_v42 = vmax.f32 %v6288_v53, %v3541_v11  ;;  %v3544_v50 = vadd.f32 %v3543_v44, %v2998_v31  ;;  %v3545_v35 = vpop.f32.mrb[235].mxu0 }
 0x386   : > { %4433 = vst [vmem:[%s6359_s6 + $0x48] sm:$0xff] %v4393_v10   ;;  %v3710_v38 = vadd.f32 %v6350_v29, %v3649_v42  ;;  %v3652_v46 = vmax.f32 %v6293_v57, %v3544_v50 }
 0x388   : > { %v3711_v41 = vadd.f32 %v6350_v29, %v3652_v46  ;;  %v3742_v56 = vmax.f32 %v3710_v38, 0.0 }
 0x389   : > { %v3003_v3 = vpop.f32.mrb[236].mxu1  ;;  %v3548_v17 = vpop.f32.mrb[236].mxu0 }
 0x38a   : > { %v3005_v58 = vpop.f32.mrb[237].mxu1  ;;  %v3743_v30 = vmax.f32 %v3711_v41, 0.0  ;;  %v3549_v15 = vadd.f32 %v3548_v17, %v3003_v3  ;;  %v3550_v32 = vpop.f32.mrb[237].mxu0 }
 0x38b   : > { %v3006_v40 = vpop.f32.mrb[238].mxu1  ;;  %v3551_v2 = vpop.f32.mrb[238].mxu0 }
 0x38c   : > { %v3008_v53 = vpop.f32.mrb[239].mxu1  ;;  %v4398_v63 = vpack.c.bf16 %v3743_v30, %v3742_v56  ;;  %v3655_v34 = vmax.f32 %v6298_v21, %v3549_v15  ;;  %v3552_v39 = vadd.f32 %v3551_v2, %v3006_v40  ;;  %v3553_v13 = vpop.f32.mrb[239].mxu0 }
 0x38e   : > { %4434 = vst [vmem:[%s6359_s6 + $0x50] sm:$0xff] %v4398_v63   ;;  %v3712_v57 = vadd.f32 %v6350_v29, %v3655_v34  ;;  %v3658_v4 = vmax.f32 %v6303_v43, %v3552_v39 }
 0x390   : > { %v3713_v28 = vadd.f32 %v6350_v29, %v3658_v4  ;;  %v3744_v47 = vmax.f32 %v3712_v57, 0.0 }
 0x391   : > { %v3011_v1 = vpop.f32.mrb[240].mxu1  ;;  %v3556_v25 = vpop.f32.mrb[240].mxu0 }
 0x392   : > { %v3013_v27 = vpop.f32.mrb[241].mxu1  ;;  %v3745_v36 = vmax.f32 %v3713_v28, 0.0  ;;  %v3557_v6 = vadd.f32 %v3556_v25, %v3011_v1  ;;  %v3558_v5 = vpop.f32.mrb[241].mxu0 }
 0x393   : > { %v3014_v23 = vpop.f32.mrb[242].mxu1  ;;  %v3559_v24 = vpop.f32.mrb[242].mxu0 }
 0x394   : > { %v3016_v21 = vpop.f32.mrb[243].mxu1  ;;  %v4403_v9 = vpack.c.bf16 %v3745_v36, %v3744_v47  ;;  %v3661_v49 = vmax.f32 %v6308_v18, %v3557_v6  ;;  %v3560_v0 = vadd.f32 %v3559_v24, %v3014_v23  ;;  %v3561_v37 = vpop.f32.mrb[243].mxu0 }
 0x396   : > { %4435 = vst [vmem:[%s6359_s6 + $0x58] sm:$0xff] %v4403_v9   ;;  %v3714_v43 = vadd.f32 %v6350_v29, %v3661_v49  ;;  %v3664_v48 = vmax.f32 %v6313_v59, %v3560_v0 }
 0x398   : > { %v3715_v54 = vadd.f32 %v6350_v29, %v3664_v48  ;;  %v3746_v14 = vmax.f32 %v3714_v43, 0.0 }
 0x399   : > { %v3019_v60 = vpop.f32.mrb[244].mxu1  ;;  %v3564_v26 = vpop.f32.mrb[244].mxu0 }
 0x39a   : > { %v3021_v55 = vpop.f32.mrb[245].mxu1  ;;  %v3747_v22 = vmax.f32 %v3715_v54, 0.0  ;;  %v3565_v7 = vadd.f32 %v3564_v26, %v3019_v60  ;;  %v3566_v52 = vpop.f32.mrb[245].mxu0 }
 0x39b   : > { %v3022_v8 = vpop.f32.mrb[246].mxu1  ;;  %v3567_v16 = vpop.f32.mrb[246].mxu0 }
 0x39c   : > { %v3024_v18 = vpop.f32.mrb[247].mxu1  ;;  %v4408_v11 = vpack.c.bf16 %v3747_v22, %v3746_v14  ;;  %v3667_v19 = vmax.f32 %v6318_v45, %v3565_v7  ;;  %v3568_v31 = vadd.f32 %v3567_v16, %v3022_v8  ;;  %v3569_v44 = vpop.f32.mrb[247].mxu0 }
 0x39e   : > { %4436 = vst [vmem:[%s6359_s6 + $0x60] sm:$0xff] %v4408_v11   ;;  %v3716_v59 = vadd.f32 %v6350_v29, %v3667_v19  ;;  %v3670_v51 = vmax.f32 %v6323_v12, %v3568_v31 }
 0x3a0   : > { %v3717_v10 = vadd.f32 %v6350_v29, %v3670_v51  ;;  %v3748_v38 = vmax.f32 %v3716_v59, 0.0 }
 0x3a1   : > { %v3027_v42 = vpop.f32.mrb[248].mxu1  ;;  %v3572_v50 = vpop.f32.mrb[248].mxu0 }
 0x3a2   : > { %v3029_v35 = vpop.f32.mrb[249].mxu1  ;;  %v3749_v46 = vmax.f32 %v3717_v10, 0.0  ;;  %v3573_v41 = vadd.f32 %v3572_v50, %v3027_v42  ;;  %v3574_v3 = vpop.f32.mrb[249].mxu0 }
 0x3a3   : > { %v3030_v17 = vpop.f32.mrb[250].mxu1  ;;  %v3575_v58 = vpop.f32.mrb[250].mxu0 }
 0x3a4   : > { %v3032_v45 = vpop.f32.mrb[251].mxu1  ;;  %v4413_v56 = vpack.c.bf16 %v3749_v46, %v3748_v38  ;;  %v3673_v30 = vmax.f32 %v6328_v20, %v3573_v41  ;;  %v3576_v15 = vadd.f32 %v3575_v58, %v3030_v17  ;;  %v3577_v32 = vpop.f32.mrb[251].mxu0 }
 0x3a6   : > { %4437 = vst [vmem:[%s6359_s6 + $0x68] sm:$0xff] %v4413_v56   ;;  %v3718_v12 = vadd.f32 %v6350_v29, %v3673_v30  ;;  %v3676_v40 = vmax.f32 %v6333_v61, %v3576_v15 }
 0x3a8   : > { %v3719_v2 = vadd.f32 %v6350_v29, %v3676_v40  ;;  %v3750_v39 = vmax.f32 %v3718_v12, 0.0 }
 0x3a9   : > { %v3035_v53 = vpop.f32.mrb[252].mxu1  ;;  %v3580_v63 = vpop.f32.mrb[252].mxu0 }
 0x3aa   : > { %v3037_v34 = vpop.f32.mrb[253].mxu1  ;;  %v3751_v13 = vmax.f32 %v3719_v2, 0.0  ;;  %v3581_v57 = vadd.f32 %v3580_v63, %v3035_v53  ;;  %v3582_v4 = vpop.f32.mrb[253].mxu0 }
 0x3ab   : > { %v3038_v28 = vpop.f32.mrb[254].mxu1  ;;  %v3583_v20 = vpop.f32.mrb[254].mxu0 }
 0x3ac   : > { %v3040_v1 = vpop.f32.mrb[255].mxu1  ;;  %v4418_v25 = vpack.c.bf16 %v3751_v13, %v3750_v39  ;;  %v3679_v27 = vmax.f32 %v6338_v62, %v3581_v57  ;;  %v3584_v47 = vadd.f32 %v3583_v20, %v3038_v28  ;;  %v3585_v36 = vpop.f32.mrb[255].mxu0 }
 0x3ae   : > { %4438 = vst [vmem:[%s6359_s6 + $0x70] sm:$0xff] %v4418_v25   ;;  %v3720_v61 = vadd.f32 %v6350_v29, %v3679_v27  ;;  %v3682_v6 = vmax.f32 %v6345_v33, %v3584_v47 }
 0x3b0   : > { %v3721_v5 = vadd.f32 %v6350_v29, %v3682_v6  ;;  %v3752_v23 = vmax.f32 %v3720_v61, 0.0 }
 0x3b2   : > { %v3753_v24 = vmax.f32 %v3721_v5, 0.0 }
 0x3b4   : > { %v4423_v21 = vpack.c.bf16 %v3753_v24, %v3752_v23 }
 0x3b6   : > { %4439 = vst [vmem:[%s6359_s6 + $0x78] sm:$0xff] %v4423_v21  }
 0x3b7 PF: > { %p10_p9 = scmp.ge.s32.totalorder %s5071_s16, 4   ;;  %s6534_s12 = smov %s5027_s13 }
 0x3b8   : > { %s6535_s13 = smov %s5080_s19  ;;  %s6536_s14 = smov %s5071_s16 }
 0x3b9   :  { %12 = sbr.rel (!%p10_p9) target bundleno = 2 (0x2), region = 90 }

// kernel: net_forward.6
= control target key start
LH: loop header
LB: loop body
LE: loop exit
PB: predicated region body
PF: predicated region fallthrough
CT: control target
= control target key end

     0   :  { %s1864_s12 = smov 0   ;;  %s1866_s13 = smov 0   ;;  %s2251_s0 = inlined_call_operand.vmem [shape: bf16[4,128,384], index: 0, kind: input, shape index: {}]   ;;  %s2252_s1 = inlined_call_operand.vmem [shape: bf16[384,128], index: 1, kind: input, shape index: {}]   ;;  %s2253_s2 = inlined_call_operand.vmem [shape: f32[1,128], index: 2, kind: input, shape index: {}]   ;;  %s2254_s3 = inlined_call_operand.vmem [shape: bf16[128,128], index: 3, kind: output, shape index: {}]  }
   0x1   :  { %s1868_s14 = smov 0  }
   0x2 LB: > { %s1317_s15 = sadd.s32 4294967295, %s1842_s14   ;;  %s1881_s16 = sadd.s32 1, %s1842_s14   ;;  %s1842_s14 = sphi %s1868_s14, %s2257_s14   ;;  %s1838_s13 = sphi %s1866_s13, %s2256_s13   ;;  %s1834_s12 = sphi %s1864_s12, %s2255_s12  }
   0x3   : > { %s17_s17 = ssub.s32 %s1842_s14, %s1881_s16  ;;  %s20_s18 = sadd.s32 1, %s1838_s13 }
   0x4   : > { %p18_p0 = scmp.eq.s32.totalorder %s17_s17, 0  ;;  %p27_p1 = scmp.ne.s32.totalorder %s1838_s13, %s1834_s12 }
   0x5   : > { %p28_p2 = scmp.eq.s32.totalorder %s1842_s14, 0  ;;  %p1320_p4 = scmp.ge.s32.totalorder %s1842_s14, 2 }
   0x6   : > { %s1890_s19 = scalar_select %p18_p0, %s1838_s13, %s20_s18  }
   0x7   : > { %p29_p3 = por %p28_p2, %p27_p1  ;;  %127 = sbr.rel (%p1320_p4) target bundleno = 56 (0x38), region = 24 }
   0xe   : > { %130 = sbr.rel (!%p29_p3) target bundleno = 56 (0x38), region = 28  ;;  %s132_s20 = sand.u32 (%p29_p3), 1, %s1838_s13  }
   0xf   : > { %s1706_s21 = smul.u32 (%p29_p3), 96, %s1842_s14 }
  0x10   : > { %s1705_s22 = smul.u32 (%p29_p3), 384, %s132_s20 }
  0x11   : > { %s1898_s25 = scalar_lea.vmem (%p29_p3), %s2251_s0, %s1706_s21 }
  0x12   : > { %v153_v0 = vld [vmem:[%s1898_s25] sm:$0xff] (%p29_p3)  ;;  %v155_v1 = vld [vmem:[%s1898_s25 + $0xc] sm:$0xff] (%p29_p3)  ;;  %v157_v2 = vld [vmem:[%s1898_s25 + $0x18] sm:$0xff] (%p29_p3)  ;;  %s1903_s26 = scalar_lea.vmem (%p29_p3), [#allocation2], %s1705_s22 }
  0x13   : > { %154 = vst [vmem:[%s1903_s26] sm:$0xff] (%p29_p3), %v153_v0  ;;  %156 = vst [vmem:[%s1903_s26 + $0xc] sm:$0xff] (%p29_p3), %v155_v1  ;;  %v159_v3 = vld [vmem:[%s1898_s25 + $0x24] sm:$0xff] (%p29_p3)  ;;  %v161_v4 = vld [vmem:[%s1898_s25 + $0x30] sm:$0xff] (%p29_p3) }
  0x14   : > { %158 = vst [vmem:[%s1903_s26 + $0x18] sm:$0xff] (%p29_p3), %v157_v2  ;;  %v163_v5 = vld [vmem:[%s1898_s25 + $0x3c] sm:$0xff] (%p29_p3)  ;;  %160 = vst [vmem:[%s1903_s26 + $0x24] sm:$0xff] (%p29_p3), %v159_v3  ;;  %v165_v6 = vld [vmem:[%s1898_s25 + $0x48] sm:$0xff] (%p29_p3) }
  0x15   : > { %162 = vst [vmem:[%s1903_s26 + $0x30] sm:$0xff] %v161_v4  ;;  %164 = vst [vmem:[%s1903_s26 + $0x3c] sm:$0xff] %v163_v5  ;;  %v167_v7 = vld [vmem:[%s1898_s25 + $0x54] sm:$0xff]  ;;  %v169_v8 = vld [vmem:[%s1898_s25 + $0xc0] sm:$0xff] }
  0x16   : > { %166 = vst [vmem:[%s1903_s26 + $0x48] sm:$0xff] %v165_v6  ;;  %168 = vst [vmem:[%s1903_s26 + $0x54] sm:$0xff] %v167_v7  ;;  %v171_v9 = vld [vmem:[%s1898_s25 + $0xcc] sm:$0xff]  ;;  %v173_v10 = vld [vmem:[%s1898_s25 + $0xd8] sm:$0xff] }
  0x17   : > { %170 = vst [vmem:[%s1903_s26 + $0x60] sm:$0xff] %v169_v8  ;;  %v175_v11 = vld [vmem:[%s1898_s25 + $0xe4] sm:$0xff]  ;;  %172 = vst [vmem:[%s1903_s26 + $0x6c] sm:$0xff] %v171_v9  ;;  %v177_v12 = vld [vmem:[%s1898_s25 + $0xf0] sm:$0xff] }
  0x18   : > { %174 = vst [vmem:[%s1903_s26 + $0x78] sm:$0xff] %v173_v10  ;;  %176 = vst [vmem:[%s1903_s26 + $0x84] sm:$0xff] %v175_v11  ;;  %v179_v13 = vld [vmem:[%s1898_s25 + $0xfc] sm:$0xff]  ;;  %v181_v14 = vld [vmem:[%s1898_s25 + $0x108] sm:$0xff] }
  0x19   : > { %178 = vst [vmem:[%s1903_s26 + $0x90] sm:$0xff] %v177_v12  ;;  %180 = vst [vmem:[%s1903_s26 + $0x9c] sm:$0xff] %v179_v13  ;;  %v183_v15 = vld [vmem:[%s1898_s25 + $0x114] sm:$0xff]  ;;  %v185_v16 = vld [vmem:[%s1898_s25 + $0x180] sm:$0xff] }
  0x1a   : > { %182 = vst [vmem:[%s1903_s26 + $0xa8] sm:$0xff] %v181_v14  ;;  %v187_v17 = vld [vmem:[%s1898_s25 + $0x18c] sm:$0xff]  ;;  %184 = vst [vmem:[%s1903_s26 + $0xb4] sm:$0xff] %v183_v15  ;;  %v189_v18 = vld [vmem:[%s1898_s25 + $0x198] sm:$0xff] }
  0x1b   : > { %186 = vst [vmem:[%s1903_s26 + $0xc0] sm:$0xff] %v185_v16  ;;  %188 = vst [vmem:[%s1903_s26 + $0xcc] sm:$0xff] %v187_v17  ;;  %v191_v19 = vld [vmem:[%s1898_s25 + $0x1a4] sm:$0xff]  ;;  %v193_v20 = vld [vmem:[%s1898_s25 + $0x1b0] sm:$0xff] }
  0x1c   : > { %190 = vst [vmem:[%s1903_s26 + $0xd8] sm:$0xff] %v189_v18  ;;  %192 = vst [vmem:[%s1903_s26 + $0xe4] sm:$0xff] %v191_v19  ;;  %v195_v21 = vld [vmem:[%s1898_s25 + $0x1bc] sm:$0xff]  ;;  %v197_v22 = vld [vmem:[%s1898_s25 + $0x1c8] sm:$0xff] }
  0x1d   : > { %194 = vst [vmem:[%s1903_s26 + $0xf0] sm:$0xff] %v193_v20  ;;  %v199_v23 = vld [vmem:[%s1898_s25 + $0x1d4] sm:$0xff]  ;;  %196 = vst [vmem:[%s1903_s26 + $0xfc] sm:$0xff] %v195_v21  ;;  %v201_v24 = vld [vmem:[%s1898_s25 + $0x240] sm:$0xff] }
  0x1e   : > { %198 = vst [vmem:[%s1903_s26 + $0x108] sm:$0xff] %v197_v22  ;;  %200 = vst [vmem:[%s1903_s26 + $0x114] sm:$0xff] %v199_v23  ;;  %v203_v25 = vld [vmem:[%s1898_s25 + $0x24c] sm:$0xff]  ;;  %v205_v26 = vld [vmem:[%s1898_s25 + $0x258] sm:$0xff] }
  0x1f   : > { %202 = vst [vmem:[%s1903_s26 + $0x120] sm:$0xff] %v201_v24  ;;  %204 = vst [vmem:[%s1903_s26 + $0x12c] sm:$0xff] %v203_v25  ;;  %v207_v27 = vld [vmem:[%s1898_s25 + $0x264] sm:$0xff]  ;;  %v209_v28 = vld [vmem:[%s1898_s25 + $0x270] sm:$0xff] }
  0x20   : > { %206 = vst [vmem:[%s1903_s26 + $0x138] sm:$0xff] %v205_v26  ;;  %v211_v29 = vld [vmem:[%s1898_s25 + $0x27c] sm:$0xff]  ;;  %208 = vst [vmem:[%s1903_s26 + $0x144] sm:$0xff] %v207_v27  ;;  %v213_v30 = vld [vmem:[%s1898_s25 + $0x288] sm:$0xff] }
  0x21   : > { %210 = vst [vmem:[%s1903_s26 + $0x150] sm:$0xff] %v209_v28  ;;  %212 = vst [vmem:[%s1903_s26 + $0x15c] sm:$0xff] %v211_v29  ;;  %v215_v31 = vld [vmem:[%s1898_s25 + $0x294] sm:$0xff]  ;;  %v1324_v32 = vld [vmem:[%s1898_s25 + $0x8] sm:$0xf] }
  0x22   : > { %214 = vst [vmem:[%s1903_s26 + $0x168] sm:$0xff] %v213_v30  ;;  %216 = vst [vmem:[%s1903_s26 + $0x174] sm:$0xff] %v215_v31  ;;  %v1326_v33 = vld [vmem:[%s1898_s25 + $0x14] sm:$0xf]  ;;  %v1328_v34 = vld [vmem:[%s1898_s25 + $0x20] sm:$0xf] }
  0x23   : > { %1325 = vst [vmem:[%s1903_s26 + $0x8] sm:$0xf] %v1324_v32  ;;  %v1330_v35 = vld [vmem:[%s1898_s25 + $0x2c] sm:$0xf]  ;;  %1327 = vst [vmem:[%s1903_s26 + $0x14] sm:$0xf] %v1326_v33 }
  0x24   : > { %1329 = vst [vmem:[%s1903_s26 + $0x20] sm:$0xf] %v1328_v34  ;;  %1331 = vst [vmem:[%s1903_s26 + $0x2c] sm:$0xf] %v1330_v35  ;;  %v1332_v36 = vld [vmem:[%s1898_s25 + $0x38] sm:$0xf] }
  0x25   : > { %v1334_v37 = vld [vmem:[%s1898_s25 + $0x44] sm:$0xf]  ;;  %v1336_v38 = vld [vmem:[%s1898_s25 + $0x50] sm:$0xf]  ;;  %1333 = vst [vmem:[%s1903_s26 + $0x38] sm:$0xf] %v1332_v36 }
  0x26   : > { %1335 = vst [vmem:[%s1903_s26 + $0x44] sm:$0xf] %v1334_v37  ;;  %1337 = vst [vmem:[%s1903_s26 + $0x50] sm:$0xf] %v1336_v38  ;;  %v1338_v39 = vld [vmem:[%s1898_s25 + $0x5c] sm:$0xf] }
  0x27   : > { %v1340_v40 = vld [vmem:[%s1898_s25 + $0xc8] sm:$0xf]  ;;  %v1342_v41 = vld [vmem:[%s1898_s25 + $0xd4] sm:$0xf]  ;;  %1339 = vst [vmem:[%s1903_s26 + $0x5c] sm:$0xf] %v1338_v39 }
  0x28   : > { %1341 = vst [vmem:[%s1903_s26 + $0x68] sm:$0xf] %v1340_v40  ;;  %1343 = vst [vmem:[%s1903_s26 + $0x74] sm:$0xf] %v1342_v41  ;;  %v1344_v42 = vld [vmem:[%s1898_s25 + $0xe0] sm:$0xf] }
  0x29   : > { %v1346_v43 = vld [vmem:[%s1898_s25 + $0xec] sm:$0xf]  ;;  %v1348_v44 = vld [vmem:[%s1898_s25 + $0xf8] sm:$0xf]  ;;  %1345 = vst [vmem:[%s1903_s26 + $0x80] sm:$0xf] %v1344_v42 }
  0x2a   : > { %1347 = vst [vmem:[%s1903_s26 + $0x8c] sm:$0xf] %v1346_v43  ;;  %1349 = vst [vmem:[%s1903_s26 + $0x98] sm:$0xf] %v1348_v44  ;;  %v1350_v45 = vld [vmem:[%s1898_s25 + $0x104] sm:$0xf] }
  0x2b   : > { %v1352_v46 = vld [vmem:[%s1898_s25 + $0x110] sm:$0xf]  ;;  %v1354_v47 = vld [vmem:[%s1898_s25 + $0x11c] sm:$0xf]  ;;  %1351 = vst [vmem:[%s1903_s26 + $0xa4] sm:$0xf] %v1350_v45 }
  0x2c   : > { %1353 = vst [vmem:[%s1903_s26 + $0xb0] sm:$0xf] %v1352_v46  ;;  %1355 = vst [vmem:[%s1903_s26 + $0xbc] sm:$0xf] %v1354_v47  ;;  %v1356_v48 = vld [vmem:[%s1898_s25 + $0x188] sm:$0xf] }
  0x2d   : > { %v1358_v49 = vld [vmem:[%s1898_s25 + $0x194] sm:$0xf]  ;;  %v1360_v50 = vld [vmem:[%s1898_s25 + $0x1a0] sm:$0xf]  ;;  %1357 = vst [vmem:[%s1903_s26 + $0xc8] sm:$0xf] %v1356_v48 }
  0x2e   : > { %1359 = vst [vmem:[%s1903_s26 + $0xd4] sm:$0xf] %v1358_v49  ;;  %1361 = vst [vmem:[%s1903_s26 + $0xe0] sm:$0xf] %v1360_v50  ;;  %v1362_v51 = vld [vmem:[%s1898_s25 + $0x1ac] sm:$0xf] }
  0x2f   : > { %v1364_v52 = vld [vmem:[%s1898_s25 + $0x1b8] sm:$0xf]  ;;  %v1366_v53 = vld [vmem:[%s1898_s25 + $0x1c4] sm:$0xf]  ;;  %1363 = vst [vmem:[%s1903_s26 + $0xec] sm:$0xf] %v1362_v51 }
  0x30   : > { %1365 = vst [vmem:[%s1903_s26 + $0xf8] sm:$0xf] %v1364_v52  ;;  %1367 = vst [vmem:[%s1903_s26 + $0x104] sm:$0xf] %v1366_v53  ;;  %v1368_v54 = vld [vmem:[%s1898_s25 + $0x1d0] sm:$0xf] }
  0x31   : > { %v1370_v55 = vld [vmem:[%s1898_s25 + $0x1dc] sm:$0xf]  ;;  %v1372_v56 = vld [vmem:[%s1898_s25 + $0x248] sm:$0xf]  ;;  %1369 = vst [vmem:[%s1903_s26 + $0x110] sm:$0xf] %v1368_v54 }
  0x32   : > { %1371 = vst [vmem:[%s1903_s26 + $0x11c] sm:$0xf] %v1370_v55  ;;  %1373 = vst [vmem:[%s1903_s26 + $0x128] sm:$0xf] %v1372_v56  ;;  %v1374_v57 = vld [vmem:[%s1898_s25 + $0x254] sm:$0xf] }
  0x33   : > { %v1376_v58 = vld [vmem:[%s1898_s25 + $0x260] sm:$0xf]  ;;  %v1378_v59 = vld [vmem:[%s1898_s25 + $0x26c] sm:$0xf]  ;;  %1375 = vst [vmem:[%s1903_s26 + $0x134] sm:$0xf] %v1374_v57 }
  0x34   : > { %1377 = vst [vmem:[%s1903_s26 + $0x140] sm:$0xf] %v1376_v58  ;;  %1379 = vst [vmem:[%s1903_s26 + $0x14c] sm:$0xf] %v1378_v59  ;;  %v1380_v60 = vld [vmem:[%s1898_s25 + $0x278] sm:$0xf] }
  0x35   : > { %v1382_v61 = vld [vmem:[%s1898_s25 + $0x284] sm:$0xf]  ;;  %v1384_v62 = vld [vmem:[%s1898_s25 + $0x290] sm:$0xf]  ;;  %1381 = vst [vmem:[%s1903_s26 + $0x158] sm:$0xf] %v1380_v60 }
  0x36   : > { %1383 = vst [vmem:[%s1903_s26 + $0x164] sm:$0xf] %v1382_v61  ;;  %1385 = vst [vmem:[%s1903_s26 + $0x170] sm:$0xf] %v1384_v62  ;;  %v1386_v63 = vld [vmem:[%s1898_s25 + $0x29c] sm:$0xf] }
  0x37   : > { %1387 = vst [vmem:[%s1903_s26 + $0x17c] sm:$0xf] %v1386_v63 }
  0x38 PF: > { %p1388_p5 = scmp.ge.s32.totalorder %s1842_s14, 1  ;;  %p292_p6 = scmp.lt.s32.totalorder %s1842_s14, 3 }
  0x3a   : > { %p293_p7 = pnand %p1388_p5, %p292_p6 }
  0x3b   : > { %v1732_v0 = vld [vmem:[%s2252_s1 + $0x40] sm:$0xff] (!%p293_p7)   ;;  %v1734_v2 = vld [vmem:[%s2252_s1 + $0x48] sm:$0xff] (!%p293_p7)   ;;  %v1736_v4 = vld [vmem:[%s2252_s1 + $0x50] sm:$0xff] (!%p293_p7)   ;;  %s299_s17 = sand.u32 (!%p293_p7), 1, %s1834_s12  }
  0x3c   : > { %296 = sbr.rel (%p293_p7) target bundleno = 410 (0x19a), region = 54  ;;  %v1733_v1 = vld [vmem:[%s2252_s1] sm:$0xff] (!%p293_p7)   ;;  %1505 = vmatprep.subr.bf16.mxu0 (!%p293_p7), %v1732_v0  ;;  %1689 = vmatprep.subr.bf16.mxu1 (!%p293_p7), %v1732_v0  ;;  %v1735_v3 = vld [vmem:[%s2252_s1 + $0x8] sm:$0xff] (!%p293_p7)   ;;  %v1737_v5 = vld [vmem:[%s2252_s1 + $0x10] sm:$0xff] (!%p293_p7)  }
  0x3d   : > { %1506 = vmatpush3.bf16.msra.mxu0 (!%p293_p7), %v1733_v1  ;;  %1697 = vmatpush3.bf16.msra.mxu1 (!%p293_p7), %v1733_v1  ;;  %v1738_v6 = vld [vmem:[%s2252_s1 + $0x58] sm:$0xff] (!%p293_p7)   ;;  %s1707_s21 = smul.u32 (!%p293_p7), 384, %s299_s17  ;;  %v1740_v8 = vld [vmem:[%s2252_s1 + $0x60] sm:$0xff] (!%p293_p7)   ;;  %v1742_v10 = vld [vmem:[%s2252_s1 + $0x68] sm:$0xff] (!%p293_p7)  }
  0x3e   : > { %1507 = vmatprep.subr.bf16.mxu0 (!%p293_p7), %v1734_v2  ;;  %1690 = vmatprep.subr.bf16.mxu1 (!%p293_p7), %v1734_v2  ;;  %v1739_v7 = vld [vmem:[%s2252_s1 + $0x18] sm:$0xff] (!%p293_p7)   ;;  %v1741_v9 = vld [vmem:[%s2252_s1 + $0x20] sm:$0xff] (!%p293_p7)   ;;  %v1743_v13 = vld [vmem:[%s2252_s1 + $0x28] sm:$0xff] (!%p293_p7)  }
  0x3f   : > { %s2066_s29 = scalar_lea.vmem (!%p293_p7), [#allocation2], %s1707_s21  ;;  %v1744_v14 = vld [vmem:[%s2252_s1 + $0x70] sm:$0xff] (!%p293_p7)   ;;  %v1746_v16 = vld [vmem:[%s2252_s1 + $0x78] sm:$0xff] (!%p293_p7)   ;;  %v1754_v18 = vld [vmem:[%s2252_s1 + $0x80] sm:$0xff] (!%p293_p7)  }
  0x40   : > { %v1750_v11 = vld [vmem:[%s2066_s29 + $0x4] ss:$12 sps:$4 sm:$0xff] (!%p293_p7)   ;;  %v1747_v17 = vld [vmem:[%s2252_s1 + $0x38] sm:$0xff] (!%p293_p7)   ;;  %v1748_v19 = vld [vmem:[%s2066_s29] ss:$12 sps:$4 sm:$0xff] (!%p293_p7)  }
  0x41   : > { %1508 = vmatpush3.bf16.msra.mxu0 (!%p293_p7), %v1735_v3  ;;  %1698 = vmatpush3.bf16.msra.mxu1 (!%p293_p7), %v1735_v3  ;;  %v1753_v12 = vld [vmem:[%s2066_s29 + $0x124] ss:$12 sps:$4 sm:$0xff] (!%p293_p7)   ;;  %v1751_v20 = vld [vmem:[%s2066_s29 + $0x120] ss:$12 sps:$4 sm:$0xff] (!%p293_p7)   ;;  %v1756_v21 = vld [vmem:[%s2066_s29 + $0x1c] ss:$12 sps:$4 sm:$0xff] (!%p293_p7)  }
  0x42   : > { %1509 = vmatprep.subr.bf16.mxu0 (!%p293_p7), %v1736_v4  ;;  %1691 = vmatprep.subr.bf16.mxu1 (!%p293_p7), %v1736_v4  ;;  %v1745_v15 = vld [vmem:[%s2252_s1 + $0x30] sm:$0xff] (!%p293_p7)   ;;  %v1755_v22 = vld [vmem:[%s2252_s1 + $0x88] sm:$0xff] (!%p293_p7)   ;;  %v1760_v24 = vld [vmem:[%s2066_s29 + $0x18] ss:$12 sps:$4 sm:$0xff] (!%p293_p7)  }
  0x43   : > { %874 = vmatprep.mubr.bf16.mxu0 %v1750_v11  ;;  %970 = vmatprep.mubr.bf16.mxu1 %v1753_v12  ;;  %v1758_v23 = vld [vmem:[%s2066_s29 + $0x13c] ss:$12 sps:$4 sm:$0xff]   ;;  %v1762_v25 = vld [vmem:[%s2252_s1 + $0x90] sm:$0xff]   ;;  %v1761_v26 = vld [vmem:[%s2066_s29 + $0x138] ss:$12 sps:$4 sm:$0xff]  }
  0x44   : > { %v1763_v27 = vld [vmem:[%s2252_s1 + $0x98] sm:$0xff]   ;;  %v1764_v28 = vld [vmem:[%s2066_s29 + $0x34] ss:$12 sps:$4 sm:$0xff]   ;;  %v1771_v33 = vld [vmem:[%s2252_s1 + $0xa8] sm:$0xff]  }
  0x45   : > { %1510 = vmatpush3.bf16.msra.mxu0 %v1737_v5  ;;  %1699 = vmatpush3.bf16.msra.mxu1 %v1737_v5  ;;  %v1766_v29 = vld [vmem:[%s2066_s29 + $0x154] ss:$12 sps:$4 sm:$0xff]   ;;  %v1768_v31 = vld [vmem:[%s2066_s29 + $0x30] ss:$12 sps:$4 sm:$0xff]   ;;  %v1772_v34 = vld [vmem:[%s2066_s29 + $0x4c] ss:$12 sps:$4 sm:$0xff]  }
  0x46   : > { %1511 = vmatprep.subr.bf16.mxu0 %v1738_v6  ;;  %1692 = vmatprep.subr.bf16.mxu1 %v1738_v6  ;;  %v1770_v30 = vld [vmem:[%s2252_s1 + $0xa0] sm:$0xff]   ;;  %v1769_v32 = vld [vmem:[%s2066_s29 + $0x150] ss:$12 sps:$4 sm:$0xff]   ;;  %v1774_v35 = vld [vmem:[%s2066_s29 + $0x16c] ss:$12 sps:$4 sm:$0xff]  }
  0x47   : > { %v1778_v36 = vld [vmem:[%s2252_s1 + $0xb0] sm:$0xff]   ;;  %v1779_v40 = vld [vmem:[%s2252_s1 + $0xb8] sm:$0xff]   ;;  %v1783_v42 = vld [vmem:[%s2066_s29 + $0x60] ss:$12 sps:$4 sm:$0xff]  }
  0x48   : > { %v1776_v37 = vld [vmem:[%s2066_s29 + $0x48] ss:$12 sps:$4 sm:$0xff]   ;;  %v1780_v39 = vld [vmem:[%s2066_s29 + $0x64] ss:$12 sps:$4 sm:$0xff]   ;;  %v1784_v43 = vld [vmem:[%s2066_s29 + $0x20] ss:$12 sps:$4 sm:$0xff]  }
  0x49   : > { %1512 = vmatpush3.bf16.msra.mxu0 %v1739_v7  ;;  %1700 = vmatpush3.bf16.msra.mxu1 %v1739_v7  ;;  %v1777_v38 = vld [vmem:[%s2066_s29 + $0x168] ss:$12 sps:$4 sm:$0xff]   ;;  %v1787_v45 = vld [vmem:[%s2066_s29 + $0x38] ss:$12 sps:$4 sm:$0xff]   ;;  %v1789_v47 = vld [vmem:[%s2066_s29 + $0x50] ss:$12 sps:$4 sm:$0xff]  }
  0x4a   : > { %1513 = vmatprep.subr.bf16.mxu0 %v1740_v8  ;;  %1693 = vmatprep.subr.bf16.mxu1 %v1740_v8  ;;  %v1782_v41 = vld [vmem:[%s2066_s29 + $0x8] ss:$12 sps:$4 sm:$0xff]   ;;  %v1788_v46 = vld [vmem:[%s2066_s29 + $0x78] ss:$12 sps:$4 sm:$0xff]   ;;  %v1793_v50 = vld [vmem:[%s2066_s29 + $0x90] ss:$12 sps:$4 sm:$0xff]  }
  0x4b   : > { %v1785_v44 = vld [vmem:[%s2066_s29 + $0x7c] ss:$12 sps:$4 sm:$0xff]   ;;  %v1790_v48 = vld [vmem:[%s2066_s29 + $0x94] ss:$12 sps:$4 sm:$0xff]   ;;  %v1795_v52 = vld [vmem:[%s2066_s29 + $0xac] ss:$12 sps:$4 sm:$0xff]  }
  0x4c   : > { %v1792_v49 = vld [vmem:[%s2066_s29 + $0x68] ss:$12 sps:$4 sm:$0xff]   ;;  %v1794_v51 = vld [vmem:[%s2066_s29 + $0x80] ss:$12 sps:$4 sm:$0xff]   ;;  %v1797_v53 = vld [vmem:[%s2066_s29 + $0x98] ss:$12 sps:$4 sm:$0xff]  }
  0x4d   : > { %1514 = vmatpush3.bf16.msra.mxu0 %v1741_v9  ;;  %1701 = vmatpush3.bf16.msra.mxu1 %v1741_v9  ;;  %v1798_v54 = vld [vmem:[%s2066_s29 + $0xa8] ss:$12 sps:$4 sm:$0xff]   ;;  %v1799_v55 = vld [vmem:[%s2066_s29 + $0xb0] ss:$12 sps:$4 sm:$0xff]   ;;  %v1803_v58 = vld [vmem:[%s2066_s29 + $0xc0] ss:$12 sps:$4 sm:$0xff]  }
  0x4e   : > { %1515 = vmatprep.subr.bf16.mxu0 %v1742_v10  ;;  %1694 = vmatprep.subr.bf16.mxu1 %v1742_v10  ;;  %v1800_v56 = vld [vmem:[%s2066_s29 + $0xc4] ss:$12 sps:$4 sm:$0xff]   ;;  %v1802_v57 = vld [vmem:[%s2066_s29 + $0xc8] ss:$12 sps:$4 sm:$0xff]   ;;  %v1804_v59 = vld [vmem:[%s2066_s29 + $0xe0] ss:$12 sps:$4 sm:$0xff]  }
  0x4f   : > { %v1805_v60 = vld [vmem:[%s2066_s29 + $0xdc] ss:$12 sps:$4 sm:$0xff]   ;;  %v1807_v61 = vld [vmem:[%s2066_s29 + $0xf8] ss:$12 sps:$4 sm:$0xff]   ;;  %v1810_v0 = vld [vmem:[%s2066_s29 + $0xf4] ss:$12 sps:$4 sm:$0xff]  }
  0x50   : > { %v1808_v62 = vld [vmem:[%s2066_s29 + $0xd8] ss:$12 sps:$4 sm:$0xff]   ;;  %v1809_v63 = vld [vmem:[%s2066_s29 + $0x110] ss:$12 sps:$4 sm:$0xff]   ;;  %v1812_v1 = vld [vmem:[%s2066_s29 + $0x128] ss:$12 sps:$4 sm:$0xff]  }
  0x51   : > { %1516 = vmatpush3.bf16.msra.mxu0 %v1743_v13  ;;  %1702 = vmatpush3.bf16.msra.mxu1 %v1743_v13  ;;  %v1813_v2 = vld [vmem:[%s2066_s29 + $0xf0] ss:$12 sps:$4 sm:$0xff]   ;;  %v1814_v3 = vld [vmem:[%s2066_s29 + $0x140] ss:$12 sps:$4 sm:$0xff]   ;;  %v1817_v5 = vld [vmem:[%s2066_s29 + $0x158] ss:$12 sps:$4 sm:$0xff]  }
  0x52   : > { %1517 = vmatprep.subr.bf16.mxu0 %v1744_v14  ;;  %1695 = vmatprep.subr.bf16.mxu1 %v1744_v14  ;;  %v1815_v4 = vld [vmem:[%s2066_s29 + $0x10c] ss:$12 sps:$4 sm:$0xff]   ;;  %v1818_v6 = vld [vmem:[%s2066_s29 + $0x108] ss:$12 sps:$4 sm:$0xff]   ;;  %v1819_v7 = vld [vmem:[%s2066_s29 + $0x170] ss:$12 sps:$4 sm:$0xff]  }
  0x53   : > { %s1389_s29 = sshll.u32 %s1317_s15, 3 }
  0x54   : > { %p324_p8 = scmp.lt.s32.totalorder %s1389_s29, 15 }
  0x55   : > { %1518 = vmatpush3.bf16.msra.mxu0 %v1745_v15  ;;  %1703 = vmatpush3.bf16.msra.mxu1 %v1745_v15 }
  0x56   : > { %1519 = vmatprep.subr.bf16.mxu0 %v1746_v16  ;;  %1696 = vmatprep.subr.bf16.mxu1 %v1746_v16  ;;  %s2259_s29 = smov (!%p324_p8, %s1389_s29), 15 }
  0x57   : > { %s1390_s14 = sshll.u32 %s2259_s29, 2 }
  0x58   : > { %s2224_s11 = scalar_lea.vmem %s2254_s3, %s1390_s14 }
  0x59   : > { %1520 = vmatpush3.bf16.msra.mxu0 %v1747_v17  ;;  %1704 = vmatpush3.bf16.msra.mxu1 %v1747_v17 }
  0x5a   : > { %1641 = vmatprep.subr.bf16.mxu1 %v1754_v18 }
  0x5c   : > { %875 = vmatmul.mubr.bf16.vlgmr.msra.gmra.mrb[0].mxu0 %v1748_v19  ;;  %971 = vmatmul.mubr.bf16.vlgmr.msra.gmra.mrb[0].mxu1 %v1751_v20 }
  0x5d   : > { %1642 = vmatpush3.bf16.msra.mxu1 %v1754_v18  ;;  %882 = vmatprep.mubr.bf16.mxu0 %v1756_v21 }
  0x5e   : > { %1643 = vmatprep.subr.bf16.mxu1 %v1755_v22  ;;  %978 = vmatprep.mubr.bf16.mxu1 %v1758_v23 }
  0x61   : > { %1644 = vmatpush3.bf16.msra.mxu1 %v1755_v22 }
  0x62   : > { %1645 = vmatprep.subr.bf16.mxu1 %v1762_v25 }
  0x64   : > { %883 = vmatmul.mubr.bf16.gmra.mrb[4].mxu0 %v1760_v24  ;;  %979 = vmatmul.mubr.bf16.gmra.mrb[4].mxu1 %v1761_v26 }
  0x65   : > { %1646 = vmatpush3.bf16.msra.mxu1 %v1762_v25  ;;  %890 = vmatprep.mubr.bf16.mxu0 %v1764_v28 }
  0x66   : > { %1647 = vmatprep.subr.bf16.mxu1 %v1763_v27  ;;  %986 = vmatprep.mubr.bf16.mxu1 %v1766_v29 }
  0x69   : > { %1648 = vmatpush3.bf16.msra.mxu1 %v1763_v27 }
  0x6a   : > { %1649 = vmatprep.subr.bf16.mxu1 %v1770_v30 }
  0x6c   : > { %891 = vmatmul.mubr.bf16.gmra.mrb[8].mxu0 %v1768_v31  ;;  %987 = vmatmul.mubr.bf16.gmra.mrb[8].mxu1 %v1769_v32 }
  0x6d   : > { %1650 = vmatpush3.bf16.msra.mxu1 %v1770_v30  ;;  %898 = vmatprep.mubr.bf16.mxu0 %v1772_v34 }
  0x6e   : > { %1651 = vmatprep.subr.bf16.mxu1 %v1771_v33  ;;  %994 = vmatprep.mubr.bf16.mxu1 %v1774_v35 }
  0x71   : > { %1652 = vmatpush3.bf16.msra.mxu1 %v1771_v33 }
  0x72   : > { %1653 = vmatprep.subr.bf16.mxu1 %v1778_v36 }
  0x74   : > { %899 = vmatmul.mubr.bf16.gmra.mrb[12].mxu0 %v1776_v37  ;;  %995 = vmatmul.mubr.bf16.gmra.mrb[12].mxu1 %v1777_v38 }
  0x75   : > { %1654 = vmatpush3.bf16.msra.mxu1 %v1778_v36  ;;  %906 = vmatprep.mubr.bf16.mxu0 %v1780_v39 }
  0x76   : > { %1655 = vmatprep.subr.bf16.mxu1 %v1779_v40  ;;  %1657 = vmatprep.mubr.bf16.mxu1 %v1782_v41 }
  0x79   : > { %1656 = vmatpush3.bf16.msra.mxu1 %v1779_v40 }
  0x7c   : > { %907 = vmatmul.mubr.bf16.gmra.mrb[16].mxu0 %v1783_v42  ;;  %1658 = vmatmul.mubr.bf16.vlgmr.msra.gmra.mrb[16].mxu1 %v1784_v43 }
  0x7d   : > { %914 = vmatprep.mubr.bf16.mxu0 %v1785_v44  ;;  %1661 = vmatprep.mubr.bf16.mxu1 %v1787_v45 }
  0x84   : > { %915 = vmatmul.mubr.bf16.gmra.mrb[20].mxu0 %v1788_v46  ;;  %1662 = vmatmul.mubr.bf16.gmra.mrb[20].mxu1 %v1789_v47 }
  0x85   : > { %922 = vmatprep.mubr.bf16.mxu0 %v1790_v48  ;;  %1665 = vmatprep.mubr.bf16.mxu1 %v1792_v49 }
  0x8c   : > { %923 = vmatmul.mubr.bf16.gmra.mrb[24].mxu0 %v1793_v50  ;;  %1666 = vmatmul.mubr.bf16.gmra.mrb[24].mxu1 %v1794_v51 }
  0x8d   : > { %930 = vmatprep.mubr.bf16.mxu0 %v1795_v52  ;;  %1669 = vmatprep.mubr.bf16.mxu1 %v1797_v53 }
  0x94   : > { %931 = vmatmul.mubr.bf16.gmra.mrb[28].mxu0 %v1798_v54  ;;  %1670 = vmatmul.mubr.bf16.gmra.mrb[28].mxu1 %v1799_v55 }
  0x95   : > { %938 = vmatprep.mubr.bf16.mxu0 %v1800_v56  ;;  %1673 = vmatprep.mubr.bf16.mxu1 %v1802_v57 }
  0x9c   : > { %939 = vmatmul.mubr.bf16.gmra.mrb[32].mxu0 %v1803_v58  ;;  %1674 = vmatmul.mubr.bf16.gmra.mrb[32].mxu1 %v1804_v59 }
  0x9d   : > { %946 = vmatprep.mubr.bf16.mxu0 %v1805_v60  ;;  %1677 = vmatprep.mubr.bf16.mxu1 %v1807_v61 }
  0xa4   : > { %947 = vmatmul.mubr.bf16.gmra.mrb[36].mxu0 %v1808_v62  ;;  %1678 = vmatmul.mubr.bf16.gmra.mrb[36].mxu1 %v1809_v63 }
  0xa5   : > { %954 = vmatprep.mubr.bf16.mxu0 %v1810_v0  ;;  %1681 = vmatprep.mubr.bf16.mxu1 %v1812_v1 }
  0xac   : > { %955 = vmatmul.mubr.bf16.gmra.mrb[40].mxu0 %v1813_v2  ;;  %1682 = vmatmul.mubr.bf16.gmra.mrb[40].mxu1 %v1814_v3 }
  0xad   : > { %962 = vmatprep.mubr.bf16.mxu0 %v1815_v4  ;;  %1685 = vmatprep.mubr.bf16.mxu1 %v1817_v5 }
  0xb4   : > { %963 = vmatmul.mubr.bf16.gmra.mrb[44].mxu0 %v1818_v6  ;;  %1686 = vmatmul.mubr.bf16.gmra.mrb[44].mxu1 %v1819_v7 }
 0x12f   : > { %v1521_v8 = vpop.f32.mrb[0].mxu0  ;;  %v1593_v9 = vpop.f32.mrb[0].mxu1 }
 0x130   : > { %v1522_v10 = vpop.f32.mrb[1].mxu0  ;;  %v1594_v11 = vpop.f32.mrb[1].mxu1 }
 0x131   : > { %v1523_v12 = vadd.f32 %v1522_v10, %v1521_v8  ;;  %v1524_v13 = vpop.f32.mrb[2].mxu0  ;;  %v2155_v14 = vadd.f32 %v1594_v11, %v1593_v9  ;;  %v1596_v15 = vpop.f32.mrb[2].mxu1 }
 0x132   : > { %v1525_v16 = vpop.f32.mrb[3].mxu0  ;;  %v1597_v17 = vpop.f32.mrb[3].mxu1 }
 0x133   : > { %v1526_v18 = vadd.f32 %v1525_v16, %v1524_v13  ;;  %v2157_v19 = vadd.f32 %v1597_v17, %v1596_v15 }
 0x137   : > { %v1527_v20 = vpop.f32.mrb[4].mxu0  ;;  %v1599_v21 = vpop.f32.mrb[4].mxu1 }
 0x138   : > { %v1528_v22 = vpop.f32.mrb[5].mxu0  ;;  %v1600_v23 = vpop.f32.mrb[5].mxu1 }
 0x139   : > { %v1529_v24 = vadd.f32 %v1528_v22, %v1527_v20  ;;  %v1530_v25 = vpop.f32.mrb[6].mxu0  ;;  %v2159_v26 = vadd.f32 %v1600_v23, %v1599_v21  ;;  %v1602_v27 = vpop.f32.mrb[6].mxu1 }
 0x13a   : > { %v1531_v28 = vpop.f32.mrb[7].mxu0  ;;  %v1603_v29 = vpop.f32.mrb[7].mxu1 }
 0x13b   : > { %v1532_v30 = vadd.f32 %v1531_v28, %v1530_v25  ;;  %v2161_v31 = vadd.f32 %v1603_v29, %v1602_v27 }
 0x13f   : > { %v1533_v32 = vpop.f32.mrb[8].mxu0  ;;  %v1605_v33 = vpop.f32.mrb[8].mxu1 }
 0x140   : > { %v1534_v34 = vpop.f32.mrb[9].mxu0  ;;  %v1606_v35 = vpop.f32.mrb[9].mxu1 }
 0x141   : > { %v1535_v36 = vadd.f32 %v1534_v34, %v1533_v32  ;;  %v1536_v37 = vpop.f32.mrb[10].mxu0  ;;  %v2163_v38 = vadd.f32 %v1606_v35, %v1605_v33  ;;  %v1608_v39 = vpop.f32.mrb[10].mxu1 }
 0x142   : > { %v1537_v40 = vpop.f32.mrb[11].mxu0  ;;  %v1609_v41 = vpop.f32.mrb[11].mxu1 }
 0x143   : > { %v1538_v42 = vadd.f32 %v1537_v40, %v1536_v37  ;;  %v2165_v43 = vadd.f32 %v1609_v41, %v1608_v39 }
 0x147   : > { %v1539_v44 = vpop.f32.mrb[12].mxu0  ;;  %v1611_v45 = vpop.f32.mrb[12].mxu1 }
 0x148   : > { %v1540_v46 = vpop.f32.mrb[13].mxu0  ;;  %v1612_v47 = vpop.f32.mrb[13].mxu1 }
 0x149   : > { %v1541_v48 = vadd.f32 %v1540_v46, %v1539_v44  ;;  %v1542_v49 = vpop.f32.mrb[14].mxu0  ;;  %v2167_v50 = vadd.f32 %v1612_v47, %v1611_v45  ;;  %v1614_v51 = vpop.f32.mrb[14].mxu1 }
 0x14a   : > { %v1543_v52 = vpop.f32.mrb[15].mxu0  ;;  %v1615_v53 = vpop.f32.mrb[15].mxu1 }
 0x14b   : > { %v1544_v54 = vadd.f32 %v1543_v52, %v1542_v49  ;;  %v2169_v55 = vadd.f32 %v1615_v53, %v1614_v51 }
 0x14f   : > { %v1545_v56 = vpop.f32.mrb[16].mxu0  ;;  %v1659_v57 = vpop.f32.mrb[16].mxu1 }
 0x150   : > { %v2171_v58 = vadd.f32 %v1659_v57, %v1529_v24  ;;  %v1546_v59 = vpop.f32.mrb[17].mxu0  ;;  %v1037_v60 = vpop.f32.mrb[17].mxu1 }
 0x151   : > { %v1547_v61 = vadd.f32 %v1546_v59, %v1545_v56  ;;  %v2173_v62 = vadd.f32 %v1523_v12, %v1037_v60  ;;  %v1548_v63 = vpop.f32.mrb[18].mxu0  ;;  %v1660_v0 = vpop.f32.mrb[18].mxu1 }
 0x152   : > { %v2175_v1 = vadd.f32 %v1660_v0, %v1532_v30  ;;  %v1549_v2 = vpop.f32.mrb[19].mxu0  ;;  %v1040_v3 = vpop.f32.mrb[19].mxu1 }
 0x153   : > { %v1550_v4 = vadd.f32 %v1549_v2, %v1548_v63  ;;  %v2177_v5 = vadd.f32 %v1526_v18, %v1040_v3 }
 0x157   : > { %v1551_v6 = vpop.f32.mrb[20].mxu0  ;;  %v1663_v7 = vpop.f32.mrb[20].mxu1 }
 0x158   : > { %v2179_v8 = vadd.f32 %v1663_v7, %v1541_v48  ;;  %v1552_v9 = vpop.f32.mrb[21].mxu0  ;;  %v1053_v10 = vpop.f32.mrb[21].mxu1 }
 0x159   : > { %v1553_v11 = vadd.f32 %v1552_v9, %v1551_v6  ;;  %v2181_v13 = vadd.f32 %v1535_v36, %v1053_v10  ;;  %v1554_v12 = vpop.f32.mrb[22].mxu0  ;;  %v1664_v15 = vpop.f32.mrb[22].mxu1 }
 0x15a   : > { %v2183_v16 = vadd.f32 %v1664_v15, %v1544_v54  ;;  %v1555_v17 = vpop.f32.mrb[23].mxu0  ;;  %v1056_v20 = vpop.f32.mrb[23].mxu1 }
 0x15b   : > { %v1556_v21 = vadd.f32 %v1555_v17, %v1554_v12  ;;  %v2185_v22 = vadd.f32 %v1538_v42, %v1056_v20 }
 0x15f   : > { %v1557_v18 = vpop.f32.mrb[24].mxu0  ;;  %v1667_v23 = vpop.f32.mrb[24].mxu1 }
 0x160   : > { %v1078_v24 = vadd.f32 %v1667_v23, %v1553_v11  ;;  %v1558_v25 = vpop.f32.mrb[25].mxu0  ;;  %v1069_v27 = vpop.f32.mrb[25].mxu1 }
 0x161   : > { %v1559_v28 = vadd.f32 %v1558_v25, %v1557_v18  ;;  %v1070_v29 = vadd.f32 %v1547_v61, %v1069_v27  ;;  %v1560_v30 = vpop.f32.mrb[26].mxu0  ;;  %v1668_v32 = vpop.f32.mrb[26].mxu1 }
 0x162   : > { %v1170_v33 = vmax.f32 %v2171_v58, %v1078_v24  ;;  %v1081_v34 = vadd.f32 %v1668_v32, %v1556_v21  ;;  %v1561_v35 = vpop.f32.mrb[27].mxu0  ;;  %v1072_v36 = vpop.f32.mrb[27].mxu1 }
 0x163   : > { %v1164_v37 = vmax.f32 %v2173_v62, %v1070_v29  ;;  %v1562_v39 = vadd.f32 %v1561_v35, %v1560_v30  ;;  %v1073_v40 = vadd.f32 %v1550_v4, %v1072_v36 }
 0x164   : > { %v1173_v41 = vmax.f32 %v2175_v1, %v1081_v34 }
 0x165   : > { %v1167_v42 = vmax.f32 %v2177_v5, %v1073_v40 }
 0x167   : > { %v1563_v44 = vpop.f32.mrb[28].mxu0  ;;  %v1671_v45 = vpop.f32.mrb[28].mxu1 }
 0x168   : > { %v1564_v46 = vpop.f32.mrb[29].mxu0  ;;  %v1085_v47 = vpop.f32.mrb[29].mxu1 }
 0x169   : > { %v1565_v48 = vadd.f32 %v1564_v46, %v1563_v44  ;;  %v2191_v49 = vadd.f32 %v1559_v28, %v1085_v47  ;;  %v1566_v51 = vpop.f32.mrb[30].mxu0  ;;  %v1672_v52 = vpop.f32.mrb[30].mxu1 }
 0x16a   : > { %v1567_v53 = vpop.f32.mrb[31].mxu0  ;;  %v1088_v54 = vpop.f32.mrb[31].mxu1 }
 0x16b   : > { %v2193_v56 = vadd.f32 %v1671_v45, %v1565_v48  ;;  %v1176_v57 = vmax.f32 %v2181_v13, %v2191_v49  ;;  %v1568_v58 = vadd.f32 %v1567_v53, %v1566_v51  ;;  %v2197_v59 = vadd.f32 %v1562_v39, %v1088_v54 }
 0x16d   : > { %v1182_v60 = vmax.f32 %v2179_v8, %v2193_v56  ;;  %v2201_v61 = vadd.f32 %v1672_v52, %v1568_v58  ;;  %v1179_v62 = vmax.f32 %v2185_v22, %v2197_v59 }
 0x16f   : > { %v1185_v63 = vmax.f32 %v2183_v16, %v2201_v61  ;;  %v1569_v0 = vpop.f32.mrb[32].mxu0  ;;  %v1675_v1 = vpop.f32.mrb[32].mxu1 }
 0x170   : > { %v1570_v2 = vpop.f32.mrb[33].mxu0  ;;  %v1101_v3 = vpop.f32.mrb[33].mxu1 }
 0x171   : > { %v1571_v4 = vadd.f32 %v1570_v2, %v1569_v0  ;;  %v1572_v5 = vpop.f32.mrb[34].mxu0  ;;  %v1676_v6 = vpop.f32.mrb[34].mxu1 }
 0x172   : > { %v1573_v7 = vpop.f32.mrb[35].mxu0  ;;  %v1104_v9 = vpop.f32.mrb[35].mxu1 }
 0x173   : > { %v1102_v10 = vadd.f32 %v1571_v4, %v1101_v3  ;;  %v1574_v11 = vadd.f32 %v1573_v7, %v1572_v5 }
 0x175   : > { %v1165_v13 = vmax.f32 %v1164_v37, %v1102_v10  ;;  %v1105_v12 = vadd.f32 %v1574_v11, %v1104_v9 }
 0x177   : > { %v1168_v15 = vmax.f32 %v1167_v42, %v1105_v12  ;;  %v1575_v17 = vpop.f32.mrb[36].mxu0  ;;  %v2207_v20 = vpop.f32.mrb[36].mxu1  ;;  %v1463_v42 = vld [vmem:[%s2253_s2] ss:$0 sm:$0xff] }
 0x178   : > { %v1576_v21 = vpop.f32.mrb[37].mxu0  ;;  %v1117_v22 = vpop.f32.mrb[37].mxu1 }
 0x179   : > { %v1577_v18 = vadd.f32 %v1576_v21, %v1575_v17  ;;  %v1578_v23 = vpop.f32.mrb[38].mxu0  ;;  %v2209_v24 = vpop.f32.mrb[38].mxu1 }
 0x17a   : > { %v1579_v25 = vpop.f32.mrb[39].mxu0  ;;  %v1120_v27 = vpop.f32.mrb[39].mxu1 }
 0x17b   : > { %v1110_v28 = vadd.f32 %v1675_v1, %v1577_v18  ;;  %v1580_v29 = vadd.f32 %v1579_v25, %v1578_v23 }
 0x17d   : > { %v1113_v30 = vadd.f32 %v1676_v6, %v1580_v29  ;;  %v1171_v32 = vmax.f32 %v1170_v33, %v1110_v28 }
 0x17f   : > { %v1581_v34 = vpop.f32.mrb[40].mxu0  ;;  %v1683_v35 = vpop.f32.mrb[40].mxu1  ;;  %v1174_v36 = vmax.f32 %v1173_v41, %v1113_v30 }
 0x180   : > { %v1142_v37 = vadd.f32 %v1683_v35, %v2159_v26  ;;  %v1582_v39 = vpop.f32.mrb[41].mxu0  ;;  %v1133_v40 = vpop.f32.mrb[41].mxu1 }
 0x181   : > { %v1583_v44 = vadd.f32 %v1582_v39, %v1581_v34  ;;  %v1134_v45 = vadd.f32 %v2155_v14, %v1133_v40  ;;  %v1584_v46 = vpop.f32.mrb[42].mxu0  ;;  %v1684_v47 = vpop.f32.mrb[42].mxu1 }
 0x182   : > { %v1172_v48 = vmax.f32 %v1171_v32, %v1142_v37  ;;  %v1145_v33 = vadd.f32 %v1684_v47, %v2161_v31  ;;  %v1585_v49 = vpop.f32.mrb[43].mxu0  ;;  %v1136_v51 = vpop.f32.mrb[43].mxu1 }
 0x183   : > { %v1118_v41 = vadd.f32 %v1583_v44, %v1117_v22  ;;  %v1166_v52 = vmax.f32 %v1165_v13, %v1134_v45  ;;  %v1586_v26 = vadd.f32 %v1585_v49, %v1584_v46  ;;  %v1137_v53 = vadd.f32 %v2157_v19, %v1136_v51 }
 0x184   : > { %v1197_v54 = vadd.f32 %v1463_v42, %v1172_v48  ;;  %v1175_v58 = vmax.f32 %v1174_v36, %v1145_v33 }
 0x185   : > { %v1195_v59 = vadd.f32 %v1463_v42, %v1166_v52  ;;  %v1121_v0 = vadd.f32 %v1586_v26, %v1120_v27  ;;  %v1169_v1 = vmax.f32 %v1168_v15, %v1137_v53  ;;  %v1177_v2 = vmax.f32 %v1176_v57, %v1118_v41 }
 0x186   : > { %v1198_v14 = vadd.f32 %v1463_v42, %v1175_v58  ;;  %v1205_v31 = vmax.f32 %v1197_v54, 0.0 }
 0x187   : > { %v1196_v3 = vadd.f32 %v1463_v42, %v1169_v1  ;;  %v1587_v4 = vpop.f32.mrb[44].mxu0  ;;  %v1687_v5 = vpop.f32.mrb[44].mxu1  ;;  %v1180_v6 = vmax.f32 %v1179_v62, %v1121_v0  ;;  %v1203_v13 = vmax.f32 %v1195_v59, 0.0 }
 0x188   : > { %v1206_v7 = vmax.f32 %v1198_v14, 0.0  ;;  %v1158_v9 = vadd.f32 %v1687_v5, %v2167_v50  ;;  %v1588_v10 = vpop.f32.mrb[45].mxu0  ;;  %v1149_v11 = vpop.f32.mrb[45].mxu1 }
 0x189   : > { %v1204_v19 = vmax.f32 %v1196_v3, 0.0  ;;  %v1589_v57 = vadd.f32 %v1588_v10, %v1587_v4  ;;  %v1150_v12 = vadd.f32 %v2163_v38, %v1149_v11  ;;  %v1590_v15 = vpop.f32.mrb[46].mxu0  ;;  %v1688_v62 = vpop.f32.mrb[46].mxu1 }
 0x18a   : > { %v1490_v17 = vpack.c.bf16 %v1206_v7, %v1205_v31  ;;  %v1161_v21 = vadd.f32 %v1688_v62, %v2169_v55  ;;  %v1591_v50 = vpop.f32.mrb[47].mxu0  ;;  %v1152_v22 = vpop.f32.mrb[47].mxu1 }
 0x18b   : > { %v1485_v18 = vpack.c.bf16 %v1204_v19, %v1203_v13  ;;  %v1126_v23 = vadd.f32 %v2207_v20, %v1589_v57  ;;  %v1178_v25 = vmax.f32 %v1177_v2, %v1150_v12  ;;  %v1592_v27 = vadd.f32 %v1591_v50, %v1590_v15 }
 0x18c   : > { %1502 = vst [vmem:[%s2224_s11 + $0x8] sm:$0xff] %v1490_v17   ;;  %v1153_v28 = vadd.f32 %v2165_v43, %v1152_v22 }
 0x18d   : > { %1486 = vst [vmem:[%s2224_s11] sm:$0xff] %v1485_v18   ;;  %v1183_v38 = vmax.f32 %v1182_v60, %v1126_v23  ;;  %v1129_v29 = vadd.f32 %v2209_v24, %v1592_v27  ;;  %v1199_v55 = vadd.f32 %v1463_v42, %v1178_v25 }
 0x18e   : > { %v1181_v30 = vmax.f32 %v1180_v6, %v1153_v28 }
 0x18f   : > { %v1184_v32 = vmax.f32 %v1183_v38, %v1158_v9  ;;  %v1186_v20 = vmax.f32 %v1185_v63, %v1129_v29  ;;  %v1207_v43 = vmax.f32 %v1199_v55, 0.0 }
 0x190   : > { %v1200_v34 = vadd.f32 %v1463_v42, %v1181_v30 }
 0x191   : > { %v1201_v35 = vadd.f32 %v1463_v42, %v1184_v32  ;;  %v1187_v36 = vmax.f32 %v1186_v20, %v1161_v21 }
 0x192   : > { %v1208_v37 = vmax.f32 %v1200_v34, 0.0 }
 0x193   : > { %v1202_v39 = vadd.f32 %v1463_v42, %v1187_v36  ;;  %v1209_v8 = vmax.f32 %v1201_v35, 0.0 }
 0x194   : > { %v1495_v40 = vpack.c.bf16 %v1208_v37, %v1207_v43 }
 0x195   : > { %v1210_v56 = vmax.f32 %v1202_v39, 0.0 }
 0x196   : > { %1503 = vst [vmem:[%s2224_s11 + $0x10] sm:$0xff] %v1495_v40  }
 0x197   : > { %v1500_v60 = vpack.c.bf16 %v1210_v56, %v1209_v8 }
 0x199   : > { %1504 = vst [vmem:[%s2224_s11 + $0x18] sm:$0xff] %v1500_v60  }
 0x19a PF: > { %p10_p9 = scmp.ge.s32.totalorder %s1881_s16, 4   ;;  %s2255_s12 = smov %s1838_s13 }
 0x19b   : > { %s2256_s13 = smov %s1890_s19  ;;  %s2257_s14 = smov %s1881_s16 }
 0x19c   :  { %12 = sbr.rel (!%p10_p9) target bundleno = 2 (0x2), region = 99 }

// kernel: net_forward.7
= control target key start
LH: loop header
LB: loop body
LE: loop exit
PB: predicated region body
PF: predicated region fallthrough
CT: control target
= control target key end

     0   :  { %vm6494_vm0 = vmmov 0   ;;  %s8458_s1 = inlined_call_operand.vmem [shape: bf16[4608,256], index: 1, kind: input, shape index: {}]   ;;  %s8459_s0 = inlined_call_operand.vmem [shape: bf16[16,4608], index: 0, kind: input, shape index: {}]   ;;  %s8460_s3 = inlined_call_operand.vmem [shape: bf16[256,128], index: 3, kind: input, shape index: {}]   ;;  %s8461_s5 = inlined_call_operand.vmem [shape: bf16[128,128], index: 5, kind: input, shape index: {}]   ;;  %s8462_s2 = inlined_call_operand.vmem [shape: f32[1,256], index: 2, kind: input, shape index: {}]   ;;  %s8463_s4 = inlined_call_operand.vmem [shape: f32[1,128], index: 4, kind: input, shape index: {}]   ;;  %s8464_s6 = inlined_call_operand.vmem [shape: f32[1,128], index: 6, kind: input, shape index: {}]   ;;  %s8465_s7 = inlined_call_operand.vmem [shape: f32[16,128], index: 7, kind: output, shape index: {}]  }
   0x1   :  { %v5551_v0 = vld [vmem:[%s8458_s1 + $0x4] ss:$8 sps:$4 sm:$0xff]   ;;  %v5555_v2 = vld [vmem:[%s8458_s1] ss:$8 sps:$4 sm:$0xff]   ;;  %v5557_v4 = vld [vmem:[%s8458_s1 + $0x14] ss:$8 sps:$4 sm:$0xff]  }
   0x2   :  { %v5553_v1 = vld [vmem:[%s8458_s1 + $0x804] ss:$8 sps:$4 sm:$0xff]   ;;  %3711 = vmatprep.subr.bf16.mxu1 %v5551_v0  ;;  %v5556_v3 = vld [vmem:[%s8458_s1 + $0x800] ss:$8 sps:$4 sm:$0xff]   ;;  %v5559_v5 = vld [vmem:[%s8458_s1 + $0x814] ss:$8 sps:$4 sm:$0xff]  }
   0x3   :  { %4055 = vmatprep.subr.bf16.mxu0 %v5553_v1  ;;  %3712 = vmatpush1.bf16.msra.mxu1 %v5555_v2  ;;  %v5561_v6 = vld [vmem:[%s8458_s1 + $0x10] ss:$8 sps:$4 sm:$0xff]   ;;  %v5563_v8 = vld [vmem:[%s8458_s1 + $0x24] ss:$8 sps:$4 sm:$0xff]   ;;  %v5567_v10 = vld [vmem:[%s8458_s1 + $0x20] ss:$8 sps:$4 sm:$0xff]  }
   0x4   :  { %4056 = vmatpush1.bf16.msra.mxu0 %v5556_v3  ;;  %3713 = vmatprep.subr.bf16.mxu1 %v5557_v4  ;;  %v5562_v7 = vld [vmem:[%s8458_s1 + $0x810] ss:$8 sps:$4 sm:$0xff]   ;;  %v5565_v9 = vld [vmem:[%s8458_s1 + $0x824] ss:$8 sps:$4 sm:$0xff]   ;;  %v5568_v11 = vld [vmem:[%s8458_s1 + $0x820] ss:$8 sps:$4 sm:$0xff]  }
   0x5   :  { %4057 = vmatprep.subr.bf16.mxu0 %v5559_v5  ;;  %v5569_v12 = vld [vmem:[%s8458_s1 + $0x34] ss:$8 sps:$4 sm:$0xff]   ;;  %v5573_v14 = vld [vmem:[%s8458_s1 + $0x30] ss:$8 sps:$4 sm:$0xff]   ;;  %v5575_v16 = vld [vmem:[%s8458_s1 + $0x44] ss:$8 sps:$4 sm:$0xff]  }
   0x6   :  { %v5571_v13 = vld [vmem:[%s8458_s1 + $0x834] ss:$8 sps:$4 sm:$0xff]   ;;  %v5574_v15 = vld [vmem:[%s8458_s1 + $0x830] ss:$8 sps:$4 sm:$0xff]   ;;  %v5577_v17 = vld [vmem:[%s8458_s1 + $0x844] ss:$8 sps:$4 sm:$0xff]  }
   0x7   :  { %3714 = vmatpush1.bf16.msra.mxu1 %v5561_v6  ;;  %v5579_v18 = vld [vmem:[%s8458_s1 + $0x40] ss:$8 sps:$4 sm:$0xff]   ;;  %v5581_v20 = vld [vmem:[%s8458_s1 + $0x54] ss:$8 sps:$4 sm:$0xff]   ;;  %v5585_v22 = vld [vmem:[%s8458_s1 + $0x50] ss:$8 sps:$4 sm:$0xff]  }
   0x8   :  { %4058 = vmatpush1.bf16.msra.mxu0 %v5562_v7  ;;  %3715 = vmatprep.subr.bf16.mxu1 %v5563_v8  ;;  %v5580_v19 = vld [vmem:[%s8458_s1 + $0x840] ss:$8 sps:$4 sm:$0xff]   ;;  %v5583_v21 = vld [vmem:[%s8458_s1 + $0x854] ss:$8 sps:$4 sm:$0xff]   ;;  %v5586_v23 = vld [vmem:[%s8458_s1 + $0x850] ss:$8 sps:$4 sm:$0xff]  }
   0x9   :  { %4059 = vmatprep.subr.bf16.mxu0 %v5565_v9  ;;  %v5587_v24 = vld [vmem:[%s8458_s1 + $0x64] ss:$8 sps:$4 sm:$0xff]   ;;  %v5591_v26 = vld [vmem:[%s8458_s1 + $0x60] ss:$8 sps:$4 sm:$0xff]   ;;  %v5593_v28 = vld [vmem:[%s8458_s1 + $0x74] ss:$8 sps:$4 sm:$0xff]  }
   0xa   :  { %v5589_v25 = vld [vmem:[%s8458_s1 + $0x864] ss:$8 sps:$4 sm:$0xff]   ;;  %v5592_v27 = vld [vmem:[%s8458_s1 + $0x860] ss:$8 sps:$4 sm:$0xff]   ;;  %v5595_v29 = vld [vmem:[%s8458_s1 + $0x874] ss:$8 sps:$4 sm:$0xff]  }
   0xb   :  { %3716 = vmatpush1.bf16.msra.mxu1 %v5567_v10  ;;  %v5597_v30 = vld [vmem:[%s8458_s1 + $0x70] ss:$8 sps:$4 sm:$0xff]   ;;  %v5599_v32 = vld [vmem:[%s8458_s1 + $0x84] ss:$8 sps:$4 sm:$0xff]   ;;  %v5603_v34 = vld [vmem:[%s8458_s1 + $0x80] ss:$8 sps:$4 sm:$0xff]  }
   0xc   :  { %4060 = vmatpush1.bf16.msra.mxu0 %v5568_v11  ;;  %3717 = vmatprep.subr.bf16.mxu1 %v5569_v12  ;;  %v5598_v31 = vld [vmem:[%s8458_s1 + $0x870] ss:$8 sps:$4 sm:$0xff]   ;;  %v5601_v33 = vld [vmem:[%s8458_s1 + $0x884] ss:$8 sps:$4 sm:$0xff]   ;;  %v5604_v35 = vld [vmem:[%s8458_s1 + $0x880] ss:$8 sps:$4 sm:$0xff]  }
   0xd   :  { %4061 = vmatprep.subr.bf16.mxu0 %v5571_v13  ;;  %v5605_v36 = vld [vmem:[%s8458_s1 + $0x94] ss:$8 sps:$4 sm:$0xff]   ;;  %v5609_v38 = vld [vmem:[%s8458_s1 + $0x90] ss:$8 sps:$4 sm:$0xff]   ;;  %v5611_v40 = vld [vmem:[%s8458_s1 + $0xa4] ss:$8 sps:$4 sm:$0xff]  }
   0xe   :  { %v5607_v37 = vld [vmem:[%s8458_s1 + $0x894] ss:$8 sps:$4 sm:$0xff]   ;;  %v5610_v39 = vld [vmem:[%s8458_s1 + $0x890] ss:$8 sps:$4 sm:$0xff]   ;;  %v5613_v41 = vld [vmem:[%s8458_s1 + $0x8a4] ss:$8 sps:$4 sm:$0xff]  }
   0xf   :  { %3718 = vmatpush1.bf16.msra.mxu1 %v5573_v14  ;;  %v5615_v42 = vld [vmem:[%s8458_s1 + $0xa0] ss:$8 sps:$4 sm:$0xff]   ;;  %v5617_v44 = vld [vmem:[%s8458_s1 + $0xb4] ss:$8 sps:$4 sm:$0xff]   ;;  %v5621_v46 = vld [vmem:[%s8458_s1 + $0xb0] ss:$8 sps:$4 sm:$0xff]  }
  0x10   :  { %4062 = vmatpush1.bf16.msra.mxu0 %v5574_v15  ;;  %3719 = vmatprep.subr.bf16.mxu1 %v5575_v16  ;;  %v5616_v43 = vld [vmem:[%s8458_s1 + $0x8a0] ss:$8 sps:$4 sm:$0xff]   ;;  %v5619_v45 = vld [vmem:[%s8458_s1 + $0x8b4] ss:$8 sps:$4 sm:$0xff]   ;;  %v5622_v47 = vld [vmem:[%s8458_s1 + $0x8b0] ss:$8 sps:$4 sm:$0xff]  }
  0x11   :  { %4063 = vmatprep.subr.bf16.mxu0 %v5577_v17  ;;  %v5649_v48 = vld [vmem:[%s8459_s0 + $0x4] ss:$144 sps:$4 sm:$0xff]   ;;  %v5627_v52 = vld [vmem:[%s8458_s1 + $0xc0] ss:$8 sps:$4 sm:$0xff]   ;;  %v5633_v56 = vld [vmem:[%s8458_s1 + $0xd0] ss:$8 sps:$4 sm:$0xff]  }
  0x12   :  { %v5623_v49 = vld [vmem:[%s8458_s1 + $0xc4] ss:$8 sps:$4 sm:$0xff]   ;;  %3743 = vmatprep.mubr.bf16.mxu1 %v5649_v48  ;;  %v5628_v53 = vld [vmem:[%s8458_s1 + $0x8c0] ss:$8 sps:$4 sm:$0xff]   ;;  %v5629_v54 = vld [vmem:[%s8458_s1 + $0xd4] ss:$8 sps:$4 sm:$0xff]  }
  0x13   :  { %3720 = vmatpush1.bf16.msra.mxu1 %v5579_v18  ;;  %v5625_v50 = vld [vmem:[%s8458_s1 + $0x8c4] ss:$8 sps:$4 sm:$0xff]   ;;  %v5631_v55 = vld [vmem:[%s8458_s1 + $0x8d4] ss:$8 sps:$4 sm:$0xff]   ;;  %v5634_v57 = vld [vmem:[%s8458_s1 + $0x8d0] ss:$8 sps:$4 sm:$0xff]  }
  0x14   :  { %4064 = vmatpush1.bf16.msra.mxu0 %v5580_v19  ;;  %3721 = vmatprep.subr.bf16.mxu1 %v5581_v20  ;;  %v5655_v51 = vld [vmem:[%s8459_s0 + $0x44] ss:$144 sps:$4 sm:$0xff]   ;;  %v5639_v60 = vld [vmem:[%s8458_s1 + $0xe0] ss:$8 sps:$4 sm:$0xff]   ;;  %v5645_v0 = vld [vmem:[%s8458_s1 + $0xf0] ss:$8 sps:$4 sm:$0xff]  }
  0x15   :  { %4065 = vmatprep.subr.bf16.mxu0 %v5583_v21  ;;  %4087 = vmatprep.mubr.bf16.mxu0 %v5655_v51  ;;  %v5635_v58 = vld [vmem:[%s8458_s1 + $0xe4] ss:$8 sps:$4 sm:$0xff]   ;;  %v5640_v61 = vld [vmem:[%s8458_s1 + $0x8e0] ss:$8 sps:$4 sm:$0xff]   ;;  %v5641_v62 = vld [vmem:[%s8458_s1 + $0xf4] ss:$8 sps:$4 sm:$0xff]  }
  0x16   :  { %v5637_v59 = vld [vmem:[%s8458_s1 + $0x8e4] ss:$8 sps:$4 sm:$0xff]   ;;  %v5643_v63 = vld [vmem:[%s8458_s1 + $0x8f4] ss:$8 sps:$4 sm:$0xff]   ;;  %v5646_v1 = vld [vmem:[%s8458_s1 + $0x8f0] ss:$8 sps:$4 sm:$0xff]  }
  0x17   :  { %3722 = vmatpush1.bf16.msra.mxu1 %v5585_v22  ;;  %v5652_v2 = vld [vmem:[%s8458_s1 + $0x104] ss:$8 sps:$4 sm:$0xff]   ;;  %v5647_v4 = vld [vmem:[%s8459_s0] ss:$144 sps:$4 sm:$0xff]   ;;  %v5661_v8 = vld [vmem:[%s8458_s1 + $0x114] ss:$8 sps:$4 sm:$0xff]  }
  0x18   :  { %4066 = vmatpush1.bf16.msra.mxu0 %v5586_v23  ;;  %3723 = vmatprep.subr.bf16.mxu1 %v5587_v24  ;;  %v5658_v3 = vld [vmem:[%s8458_s1 + $0x904] ss:$8 sps:$4 sm:$0xff]   ;;  %v5650_v5 = vld [vmem:[%s8458_s1 + $0x100] ss:$8 sps:$4 sm:$0xff]   ;;  %v5664_v9 = vld [vmem:[%s8458_s1 + $0x914] ss:$8 sps:$4 sm:$0xff]  }
  0x19   :  { %4067 = vmatprep.subr.bf16.mxu0 %v5589_v25  ;;  %v5653_v6 = vld [vmem:[%s8459_s0 + $0x40] ss:$144 sps:$4 sm:$0xff]   ;;  %v5667_v12 = vld [vmem:[%s8458_s1 + $0x124] ss:$8 sps:$4 sm:$0xff]   ;;  %v5673_v16 = vld [vmem:[%s8458_s1 + $0x134] ss:$8 sps:$4 sm:$0xff]  }
  0x1a   :  { %v5656_v7 = vld [vmem:[%s8458_s1 + $0x900] ss:$8 sps:$4 sm:$0xff]   ;;  %v5659_v10 = vld [vmem:[%s8458_s1 + $0x110] ss:$8 sps:$4 sm:$0xff]   ;;  %v5670_v13 = vld [vmem:[%s8458_s1 + $0x924] ss:$8 sps:$4 sm:$0xff]  }
  0x1b   :  { %3724 = vmatpush1.bf16.msra.mxu1 %v5591_v26  ;;  %v5662_v11 = vld [vmem:[%s8458_s1 + $0x910] ss:$8 sps:$4 sm:$0xff]   ;;  %v5665_v14 = vld [vmem:[%s8458_s1 + $0x120] ss:$8 sps:$4 sm:$0xff]   ;;  %v5676_v17 = vld [vmem:[%s8458_s1 + $0x934] ss:$8 sps:$4 sm:$0xff]  }
  0x1c   :  { %4068 = vmatpush1.bf16.msra.mxu0 %v5592_v27  ;;  %3725 = vmatprep.subr.bf16.mxu1 %v5593_v28  ;;  %v5668_v15 = vld [vmem:[%s8458_s1 + $0x920] ss:$8 sps:$4 sm:$0xff]   ;;  %v5671_v18 = vld [vmem:[%s8458_s1 + $0x130] ss:$8 sps:$4 sm:$0xff]   ;;  %v5679_v20 = vld [vmem:[%s8458_s1 + $0x144] ss:$8 sps:$4 sm:$0xff]  }
  0x1d   :  { %4069 = vmatprep.subr.bf16.mxu0 %v5595_v29  ;;  %v5674_v19 = vld [vmem:[%s8458_s1 + $0x930] ss:$8 sps:$4 sm:$0xff]   ;;  %v5682_v21 = vld [vmem:[%s8458_s1 + $0x944] ss:$8 sps:$4 sm:$0xff]   ;;  %v5677_v22 = vld [vmem:[%s8458_s1 + $0x140] ss:$8 sps:$4 sm:$0xff]  }
  0x1e   :  { %v5680_v23 = vld [vmem:[%s8458_s1 + $0x940] ss:$8 sps:$4 sm:$0xff]   ;;  %v5685_v24 = vld [vmem:[%s8458_s1 + $0x154] ss:$8 sps:$4 sm:$0xff]   ;;  %v5683_v26 = vld [vmem:[%s8458_s1 + $0x150] ss:$8 sps:$4 sm:$0xff]  }
  0x1f   :  { %3726 = vmatpush1.bf16.msra.mxu1 %v5597_v30  ;;  %v5688_v25 = vld [vmem:[%s8458_s1 + $0x954] ss:$8 sps:$4 sm:$0xff]   ;;  %v5686_v27 = vld [vmem:[%s8458_s1 + $0x950] ss:$8 sps:$4 sm:$0xff]   ;;  %v5691_v28 = vld [vmem:[%s8458_s1 + $0x164] ss:$8 sps:$4 sm:$0xff]  }
  0x20   :  { %4070 = vmatpush1.bf16.msra.mxu0 %v5598_v31  ;;  %3727 = vmatprep.subr.bf16.mxu1 %v5599_v32  ;;  %v5694_v29 = vld [vmem:[%s8458_s1 + $0x964] ss:$8 sps:$4 sm:$0xff]   ;;  %v5689_v30 = vld [vmem:[%s8458_s1 + $0x160] ss:$8 sps:$4 sm:$0xff]   ;;  %v5697_v32 = vld [vmem:[%s8458_s1 + $0x174] ss:$8 sps:$4 sm:$0xff]  }
  0x21   :  { %4071 = vmatprep.subr.bf16.mxu0 %v5601_v33  ;;  %v5692_v31 = vld [vmem:[%s8458_s1 + $0x960] ss:$8 sps:$4 sm:$0xff]   ;;  %v5700_v33 = vld [vmem:[%s8458_s1 + $0x974] ss:$8 sps:$4 sm:$0xff]  }
  0x22   :  { %v5713_v48 = vld [vmem:[%s8458_s1 + $0x1a0] ss:$8 sps:$4 sm:$0xff]   ;;  %v5724_v51 = vld [vmem:[%s8458_s1 + $0x9b4] ss:$8 sps:$4 sm:$0xff]  }
  0x23   :  { %3728 = vmatpush1.bf16.msra.mxu1 %v5603_v34  ;;  %v5751_v34 = vld [vmem:[%s8459_s0 + $0xc] ss:$144 sps:$4 sm:$0xff]  }
  0x24   :  { %4072 = vmatpush1.bf16.msra.mxu0 %v5604_v35  ;;  %3729 = vmatprep.subr.bf16.mxu1 %v5605_v36  ;;  %v5695_v35 = vld [vmem:[%s8458_s1 + $0x170] ss:$8 sps:$4 sm:$0xff]  }
  0x25   :  { %4073 = vmatprep.subr.bf16.mxu0 %v5607_v37  ;;  %v5698_v36 = vld [vmem:[%s8458_s1 + $0x970] ss:$8 sps:$4 sm:$0xff]   ;;  %v5757_v37 = vld [vmem:[%s8459_s0 + $0x4c] ss:$144 sps:$4 sm:$0xff]  }
  0x27   :  { %3730 = vmatpush1.bf16.msra.mxu1 %v5609_v38  ;;  %v5703_v38 = vld [vmem:[%s8458_s1 + $0x184] ss:$8 sps:$4 sm:$0xff]  }
  0x28   :  { %4074 = vmatpush1.bf16.msra.mxu0 %v5610_v39  ;;  %3731 = vmatprep.subr.bf16.mxu1 %v5611_v40  ;;  %v5706_v39 = vld [vmem:[%s8458_s1 + $0x984] ss:$8 sps:$4 sm:$0xff]   ;;  %v5701_v40 = vld [vmem:[%s8458_s1 + $0x180] ss:$8 sps:$4 sm:$0xff]  }
  0x29   :  { %4075 = vmatprep.subr.bf16.mxu0 %v5613_v41  ;;  %v5704_v41 = vld [vmem:[%s8458_s1 + $0x980] ss:$8 sps:$4 sm:$0xff]  }
  0x2b   :  { %3732 = vmatpush1.bf16.msra.mxu1 %v5615_v42  ;;  %v5709_v42 = vld [vmem:[%s8458_s1 + $0x194] ss:$8 sps:$4 sm:$0xff]  }
  0x2c   :  { %4076 = vmatpush1.bf16.msra.mxu0 %v5616_v43  ;;  %3733 = vmatprep.subr.bf16.mxu1 %v5617_v44  ;;  %v5712_v43 = vld [vmem:[%s8458_s1 + $0x994] ss:$8 sps:$4 sm:$0xff]   ;;  %v5707_v44 = vld [vmem:[%s8458_s1 + $0x190] ss:$8 sps:$4 sm:$0xff]  }
  0x2d   :  { %4077 = vmatprep.subr.bf16.mxu0 %v5619_v45  ;;  %v5710_v45 = vld [vmem:[%s8458_s1 + $0x990] ss:$8 sps:$4 sm:$0xff]  }
  0x2f   :  { %3734 = vmatpush1.bf16.msra.mxu1 %v5621_v46  ;;  %v5715_v46 = vld [vmem:[%s8458_s1 + $0x1a4] ss:$8 sps:$4 sm:$0xff]  }
  0x30   :  { %4078 = vmatpush1.bf16.msra.mxu0 %v5622_v47  ;;  %3735 = vmatprep.subr.bf16.mxu1 %v5623_v49  ;;  %v5718_v47 = vld [vmem:[%s8458_s1 + $0x9a4] ss:$8 sps:$4 sm:$0xff]   ;;  %v5716_v49 = vld [vmem:[%s8458_s1 + $0x9a0] ss:$8 sps:$4 sm:$0xff]  }
  0x31   :  { %4079 = vmatprep.subr.bf16.mxu0 %v5625_v50  ;;  %v5721_v50 = vld [vmem:[%s8458_s1 + $0x1b4] ss:$8 sps:$4 sm:$0xff]  }
  0x33   :  { %3736 = vmatpush1.bf16.msra.mxu1 %v5627_v52  ;;  %v5719_v52 = vld [vmem:[%s8458_s1 + $0x1b0] ss:$8 sps:$4 sm:$0xff]  }
  0x34   :  { %4080 = vmatpush1.bf16.msra.mxu0 %v5628_v53  ;;  %3737 = vmatprep.subr.bf16.mxu1 %v5629_v54  ;;  %v5722_v53 = vld [vmem:[%s8458_s1 + $0x9b0] ss:$8 sps:$4 sm:$0xff]   ;;  %v5727_v54 = vld [vmem:[%s8458_s1 + $0x1c4] ss:$8 sps:$4 sm:$0xff]  }
  0x35   :  { %4081 = vmatprep.subr.bf16.mxu0 %v5631_v55  ;;  %v5730_v55 = vld [vmem:[%s8458_s1 + $0x9c4] ss:$8 sps:$4 sm:$0xff]  }
  0x37   :  { %3738 = vmatpush1.bf16.msra.mxu1 %v5633_v56  ;;  %v5725_v56 = vld [vmem:[%s8458_s1 + $0x1c0] ss:$8 sps:$4 sm:$0xff]  }
  0x38   :  { %4082 = vmatpush1.bf16.msra.mxu0 %v5634_v57  ;;  %3739 = vmatprep.subr.bf16.mxu1 %v5635_v58  ;;  %v5728_v57 = vld [vmem:[%s8458_s1 + $0x9c0] ss:$8 sps:$4 sm:$0xff]   ;;  %v5733_v58 = vld [vmem:[%s8458_s1 + $0x1d4] ss:$8 sps:$4 sm:$0xff]  }
  0x39   :  { %4083 = vmatprep.subr.bf16.mxu0 %v5637_v59  ;;  %v5736_v59 = vld [vmem:[%s8458_s1 + $0x9d4] ss:$8 sps:$4 sm:$0xff]  }
  0x3b   :  { %3740 = vmatpush1.bf16.msra.mxu1 %v5639_v60  ;;  %v5731_v60 = vld [vmem:[%s8458_s1 + $0x1d0] ss:$8 sps:$4 sm:$0xff]  }
  0x3c   :  { %4084 = vmatpush1.bf16.msra.mxu0 %v5640_v61  ;;  %3741 = vmatprep.subr.bf16.mxu1 %v5641_v62  ;;  %v5734_v61 = vld [vmem:[%s8458_s1 + $0x9d0] ss:$8 sps:$4 sm:$0xff]   ;;  %v5739_v62 = vld [vmem:[%s8458_s1 + $0x1e4] ss:$8 sps:$4 sm:$0xff]  }
  0x3d   :  { %4085 = vmatprep.subr.bf16.mxu0 %v5643_v63  ;;  %v5742_v63 = vld [vmem:[%s8458_s1 + $0x9e4] ss:$8 sps:$4 sm:$0xff]  }
  0x3f   :  { %3742 = vmatpush1.bf16.msra.mxu1 %v5645_v0  ;;  %v5737_v0 = vld [vmem:[%s8458_s1 + $0x1e0] ss:$8 sps:$4 sm:$0xff]  }
  0x40   :  { %4086 = vmatpush1.bf16.msra.mxu0 %v5646_v1  ;;  %3754 = vmatprep.subr.bf16.mxu1 %v5652_v2  ;;  %v5740_v1 = vld [vmem:[%s8458_s1 + $0x9e0] ss:$8 sps:$4 sm:$0xff]   ;;  %v5745_v2 = vld [vmem:[%s8458_s1 + $0x1f4] ss:$8 sps:$4 sm:$0xff]  }
  0x41   :  { %4098 = vmatprep.subr.bf16.mxu0 %v5658_v3  ;;  %v5748_v3 = vld [vmem:[%s8458_s1 + $0x9f4] ss:$8 sps:$4 sm:$0xff]  }
  0x42   :  { %3744 = vmatmul.mubr.bf16.vlgmr.msra.gmra.mrb[0].mxu1 %v5647_v4  ;;  %v5743_v4 = vld [vmem:[%s8458_s1 + $0x1f0] ss:$8 sps:$4 sm:$0xff]  }
  0x43   :  { %4088 = vmatmul.mubr.bf16.vlgmr.msra.gmra.mrb[0].mxu0 %v5653_v6  ;;  %3755 = vmatpush1.bf16.msra.mxu1 %v5650_v5  ;;  %v5746_v5 = vld [vmem:[%s8458_s1 + $0x9f0] ss:$8 sps:$4 sm:$0xff]   ;;  %v5754_v6 = vld [vmem:[%s8458_s1 + $0x204] ss:$8 sps:$4 sm:$0xff]  }
  0x44   :  { %4099 = vmatpush1.bf16.msra.mxu0 %v5656_v7  ;;  %3756 = vmatprep.subr.bf16.mxu1 %v5661_v8  ;;  %v5760_v7 = vld [vmem:[%s8458_s1 + $0xa04] ss:$8 sps:$4 sm:$0xff]   ;;  %v5749_v8 = vld [vmem:[%s8459_s0 + $0x8] ss:$144 sps:$4 sm:$0xff]  }
  0x45   :  { %4100 = vmatprep.subr.bf16.mxu0 %v5664_v9  ;;  %3786 = vmatprep.mubr.bf16.mxu1 %v5751_v34  ;;  %v5752_v9 = vld [vmem:[%s8458_s1 + $0x200] ss:$8 sps:$4 sm:$0xff]   ;;  %v5793_v34 = vld [vmem:[%s8458_s1 + $0x264] ss:$8 sps:$4 sm:$0xff]  }
  0x46   :  { %4130 = vmatprep.mubr.bf16.mxu0 %v5757_v37  ;;  %v5794_v37 = vld [vmem:[%s8458_s1 + $0xa60] ss:$8 sps:$4 sm:$0xff]  }
  0x47   :  { %3757 = vmatpush1.bf16.msra.mxu1 %v5659_v10  ;;  %v5755_v10 = vld [vmem:[%s8459_s0 + $0x48] ss:$144 sps:$4 sm:$0xff]  }
  0x48   :  { %4101 = vmatpush1.bf16.msra.mxu0 %v5662_v11  ;;  %3758 = vmatprep.subr.bf16.mxu1 %v5667_v12  ;;  %v5758_v11 = vld [vmem:[%s8458_s1 + $0xa00] ss:$8 sps:$4 sm:$0xff]   ;;  %v5763_v12 = vld [vmem:[%s8458_s1 + $0x214] ss:$8 sps:$4 sm:$0xff]  }
  0x49   :  { %4102 = vmatprep.subr.bf16.mxu0 %v5670_v13  ;;  %v5766_v13 = vld [vmem:[%s8458_s1 + $0xa14] ss:$8 sps:$4 sm:$0xff]  }
  0x4b   :  { %3759 = vmatpush1.bf16.msra.mxu1 %v5665_v14  ;;  %v5761_v14 = vld [vmem:[%s8458_s1 + $0x210] ss:$8 sps:$4 sm:$0xff]  }
  0x4c   :  { %4103 = vmatpush1.bf16.msra.mxu0 %v5668_v15  ;;  %3760 = vmatprep.subr.bf16.mxu1 %v5673_v16  ;;  %v5764_v15 = vld [vmem:[%s8458_s1 + $0xa10] ss:$8 sps:$4 sm:$0xff]   ;;  %v5769_v16 = vld [vmem:[%s8458_s1 + $0x224] ss:$8 sps:$4 sm:$0xff]  }
  0x4d   :  { %4104 = vmatprep.subr.bf16.mxu0 %v5676_v17  ;;  %v5772_v17 = vld [vmem:[%s8458_s1 + $0xa24] ss:$8 sps:$4 sm:$0xff]  }
  0x4f   :  { %3761 = vmatpush1.bf16.msra.mxu1 %v5671_v18  ;;  %v5767_v18 = vld [vmem:[%s8458_s1 + $0x220] ss:$8 sps:$4 sm:$0xff]  }
  0x50   :  { %4105 = vmatpush1.bf16.msra.mxu0 %v5674_v19  ;;  %3762 = vmatprep.subr.bf16.mxu1 %v5679_v20  ;;  %v5853_v19 = vld [vmem:[%s8459_s0 + $0x14] ss:$144 sps:$4 sm:$0xff]   ;;  %v5770_v20 = vld [vmem:[%s8458_s1 + $0xa20] ss:$8 sps:$4 sm:$0xff]  }
  0x51   :  { %4106 = vmatprep.subr.bf16.mxu0 %v5682_v21  ;;  %v5775_v21 = vld [vmem:[%s8458_s1 + $0x234] ss:$8 sps:$4 sm:$0xff]  }
  0x53   :  { %3763 = vmatpush1.bf16.msra.mxu1 %v5677_v22  ;;  %v5778_v22 = vld [vmem:[%s8458_s1 + $0xa34] ss:$8 sps:$4 sm:$0xff]  }
  0x54   :  { %4107 = vmatpush1.bf16.msra.mxu0 %v5680_v23  ;;  %3764 = vmatprep.subr.bf16.mxu1 %v5685_v24  ;;  %v5859_v23 = vld [vmem:[%s8459_s0 + $0x54] ss:$144 sps:$4 sm:$0xff]   ;;  %v5773_v24 = vld [vmem:[%s8458_s1 + $0x230] ss:$8 sps:$4 sm:$0xff]  }
  0x55   :  { %4108 = vmatprep.subr.bf16.mxu0 %v5688_v25  ;;  %v5776_v25 = vld [vmem:[%s8458_s1 + $0xa30] ss:$8 sps:$4 sm:$0xff]  }
  0x57   :  { %3765 = vmatpush1.bf16.msra.mxu1 %v5683_v26  ;;  %v5781_v26 = vld [vmem:[%s8458_s1 + $0x244] ss:$8 sps:$4 sm:$0xff]  }
  0x58   :  { %4109 = vmatpush1.bf16.msra.mxu0 %v5686_v27  ;;  %3766 = vmatprep.subr.bf16.mxu1 %v5691_v28  ;;  %v5784_v27 = vld [vmem:[%s8458_s1 + $0xa44] ss:$8 sps:$4 sm:$0xff]   ;;  %v5779_v28 = vld [vmem:[%s8458_s1 + $0x240] ss:$8 sps:$4 sm:$0xff]  }
  0x59   :  { %4110 = vmatprep.subr.bf16.mxu0 %v5694_v29  ;;  %v5782_v29 = vld [vmem:[%s8458_s1 + $0xa40] ss:$8 sps:$4 sm:$0xff]  }
  0x5b   :  { %3767 = vmatpush1.bf16.msra.mxu1 %v5689_v30  ;;  %v5787_v30 = vld [vmem:[%s8458_s1 + $0x254] ss:$8 sps:$4 sm:$0xff]  }
  0x5c   :  { %4111 = vmatpush1.bf16.msra.mxu0 %v5692_v31  ;;  %3768 = vmatprep.subr.bf16.mxu1 %v5697_v32  ;;  %v5790_v31 = vld [vmem:[%s8458_s1 + $0xa54] ss:$8 sps:$4 sm:$0xff]   ;;  %v5785_v32 = vld [vmem:[%s8458_s1 + $0x250] ss:$8 sps:$4 sm:$0xff]  }
  0x5d   :  { %4112 = vmatprep.subr.bf16.mxu0 %v5700_v33  ;;  %v5788_v33 = vld [vmem:[%s8458_s1 + $0xa50] ss:$8 sps:$4 sm:$0xff]  }
  0x5f   :  { %3769 = vmatpush1.bf16.msra.mxu1 %v5695_v35  ;;  %v5796_v35 = vld [vmem:[%s8458_s1 + $0xa64] ss:$8 sps:$4 sm:$0xff]  }
  0x60   :  { %4113 = vmatpush1.bf16.msra.mxu0 %v5698_v36  ;;  %3770 = vmatprep.subr.bf16.mxu1 %v5703_v38  ;;  %v5791_v36 = vld [vmem:[%s8458_s1 + $0x260] ss:$8 sps:$4 sm:$0xff]   ;;  %v5799_v38 = vld [vmem:[%s8458_s1 + $0x274] ss:$8 sps:$4 sm:$0xff]  }
  0x61   :  { %4114 = vmatprep.subr.bf16.mxu0 %v5706_v39  ;;  %v5802_v39 = vld [vmem:[%s8458_s1 + $0xa74] ss:$8 sps:$4 sm:$0xff]  }
  0x63   :  { %3771 = vmatpush1.bf16.msra.mxu1 %v5701_v40  ;;  %v5797_v40 = vld [vmem:[%s8458_s1 + $0x270] ss:$8 sps:$4 sm:$0xff]  }
  0x64   :  { %4115 = vmatpush1.bf16.msra.mxu0 %v5704_v41  ;;  %3772 = vmatprep.subr.bf16.mxu1 %v5709_v42  ;;  %v5800_v41 = vld [vmem:[%s8458_s1 + $0xa70] ss:$8 sps:$4 sm:$0xff]   ;;  %v5805_v42 = vld [vmem:[%s8458_s1 + $0x284] ss:$8 sps:$4 sm:$0xff]  }
  0x65   :  { %4116 = vmatprep.subr.bf16.mxu0 %v5712_v43  ;;  %v5808_v43 = vld [vmem:[%s8458_s1 + $0xa84] ss:$8 sps:$4 sm:$0xff]  }
  0x67   :  { %3773 = vmatpush1.bf16.msra.mxu1 %v5707_v44  ;;  %v5803_v44 = vld [vmem:[%s8458_s1 + $0x280] ss:$8 sps:$4 sm:$0xff]  }
  0x68   :  { %4117 = vmatpush1.bf16.msra.mxu0 %v5710_v45  ;;  %3774 = vmatprep.subr.bf16.mxu1 %v5715_v46  ;;  %v5806_v45 = vld [vmem:[%s8458_s1 + $0xa80] ss:$8 sps:$4 sm:$0xff]   ;;  %v5811_v46 = vld [vmem:[%s8458_s1 + $0x294] ss:$8 sps:$4 sm:$0xff]  }
  0x69   :  { %4118 = vmatprep.subr.bf16.mxu0 %v5718_v47  ;;  %v5814_v47 = vld [vmem:[%s8458_s1 + $0xa94] ss:$8 sps:$4 sm:$0xff]  }
  0x6b   :  { %3775 = vmatpush1.bf16.msra.mxu1 %v5713_v48  ;;  %v5809_v48 = vld [vmem:[%s8458_s1 + $0x290] ss:$8 sps:$4 sm:$0xff]  }
  0x6c   :  { %4119 = vmatpush1.bf16.msra.mxu0 %v5716_v49  ;;  %3776 = vmatprep.subr.bf16.mxu1 %v5721_v50  ;;  %v5812_v49 = vld [vmem:[%s8458_s1 + $0xa90] ss:$8 sps:$4 sm:$0xff]   ;;  %v5817_v50 = vld [vmem:[%s8458_s1 + $0x2a4] ss:$8 sps:$4 sm:$0xff]  }
  0x6d   :  { %4120 = vmatprep.subr.bf16.mxu0 %v5724_v51  ;;  %v5820_v51 = vld [vmem:[%s8458_s1 + $0xaa4] ss:$8 sps:$4 sm:$0xff]  }
  0x6f   :  { %3777 = vmatpush1.bf16.msra.mxu1 %v5719_v52  ;;  %v5815_v52 = vld [vmem:[%s8458_s1 + $0x2a0] ss:$8 sps:$4 sm:$0xff]  }
  0x70   :  { %4121 = vmatpush1.bf16.msra.mxu0 %v5722_v53  ;;  %3778 = vmatprep.subr.bf16.mxu1 %v5727_v54  ;;  %v5818_v53 = vld [vmem:[%s8458_s1 + $0xaa0] ss:$8 sps:$4 sm:$0xff]   ;;  %v5823_v54 = vld [vmem:[%s8458_s1 + $0x2b4] ss:$8 sps:$4 sm:$0xff]  }
  0x71   :  { %4122 = vmatprep.subr.bf16.mxu0 %v5730_v55  ;;  %v5826_v55 = vld [vmem:[%s8458_s1 + $0xab4] ss:$8 sps:$4 sm:$0xff]  }
  0x73   :  { %3779 = vmatpush1.bf16.msra.mxu1 %v5725_v56  ;;  %v5821_v56 = vld [vmem:[%s8458_s1 + $0x2b0] ss:$8 sps:$4 sm:$0xff]  }
  0x74   :  { %4123 = vmatpush1.bf16.msra.mxu0 %v5728_v57  ;;  %3780 = vmatprep.subr.bf16.mxu1 %v5733_v58  ;;  %v5824_v57 = vld [vmem:[%s8458_s1 + $0xab0] ss:$8 sps:$4 sm:$0xff]   ;;  %v5829_v58 = vld [vmem:[%s8458_s1 + $0x2c4] ss:$8 sps:$4 sm:$0xff]  }
  0x75   :  { %4124 = vmatprep.subr.bf16.mxu0 %v5736_v59  ;;  %v5832_v59 = vld [vmem:[%s8458_s1 + $0xac4] ss:$8 sps:$4 sm:$0xff]  }
  0x77   :  { %3781 = vmatpush1.bf16.msra.mxu1 %v5731_v60  ;;  %v5827_v60 = vld [vmem:[%s8458_s1 + $0x2c0] ss:$8 sps:$4 sm:$0xff]  }
  0x78   :  { %4125 = vmatpush1.bf16.msra.mxu0 %v5734_v61  ;;  %3782 = vmatprep.subr.bf16.mxu1 %v5739_v62  ;;  %v5830_v61 = vld [vmem:[%s8458_s1 + $0xac0] ss:$8 sps:$4 sm:$0xff]   ;;  %v5835_v62 = vld [vmem:[%s8458_s1 + $0x2d4] ss:$8 sps:$4 sm:$0xff]  }
  0x79   :  { %4126 = vmatprep.subr.bf16.mxu0 %v5742_v63  ;;  %v5838_v63 = vld [vmem:[%s8458_s1 + $0xad4] ss:$8 sps:$4 sm:$0xff]  }
  0x7b   :  { %3783 = vmatpush1.bf16.msra.mxu1 %v5737_v0  ;;  %v5833_v0 = vld [vmem:[%s8458_s1 + $0x2d0] ss:$8 sps:$4 sm:$0xff]  }
  0x7c   :  { %4127 = vmatpush1.bf16.msra.mxu0 %v5740_v1  ;;  %3784 = vmatprep.subr.bf16.mxu1 %v5745_v2  ;;  %v5836_v1 = vld [vmem:[%s8458_s1 + $0xad0] ss:$8 sps:$4 sm:$0xff]   ;;  %v5841_v2 = vld [vmem:[%s8458_s1 + $0x2e4] ss:$8 sps:$4 sm:$0xff]  }
  0x7d   :  { %4128 = vmatprep.subr.bf16.mxu0 %v5748_v3  ;;  %v5844_v3 = vld [vmem:[%s8458_s1 + $0xae4] ss:$8 sps:$4 sm:$0xff]  }
  0x7f   :  { %3785 = vmatpush1.bf16.msra.mxu1 %v5743_v4  ;;  %v5839_v4 = vld [vmem:[%s8458_s1 + $0x2e0] ss:$8 sps:$4 sm:$0xff]  }
  0x80   :  { %4129 = vmatpush1.bf16.msra.mxu0 %v5746_v5  ;;  %3797 = vmatprep.subr.bf16.mxu1 %v5754_v6  ;;  %v5842_v5 = vld [vmem:[%s8458_s1 + $0xae0] ss:$8 sps:$4 sm:$0xff]   ;;  %v5847_v6 = vld [vmem:[%s8458_s1 + $0x2f4] ss:$8 sps:$4 sm:$0xff]  }
  0x81   :  { %4141 = vmatprep.subr.bf16.mxu0 %v5760_v7  ;;  %v5850_v7 = vld [vmem:[%s8458_s1 + $0xaf4] ss:$8 sps:$4 sm:$0xff]  }
  0x82   :  { %3787 = vmatmul.mubr.bf16.vlgmr.msra.gmra.mrb[0].mxu1 %v5749_v8  ;;  %v5845_v8 = vld [vmem:[%s8458_s1 + $0x2f0] ss:$8 sps:$4 sm:$0xff]  }
  0x83   :  { %4131 = vmatmul.mubr.bf16.vlgmr.msra.gmra.mrb[0].mxu0 %v5755_v10  ;;  %3798 = vmatpush1.bf16.msra.mxu1 %v5752_v9  ;;  %v5848_v9 = vld [vmem:[%s8458_s1 + $0xaf0] ss:$8 sps:$4 sm:$0xff]   ;;  %v5856_v10 = vld [vmem:[%s8458_s1 + $0x304] ss:$8 sps:$4 sm:$0xff]  }
  0x84   :  { %4142 = vmatpush1.bf16.msra.mxu0 %v5758_v11  ;;  %3799 = vmatprep.subr.bf16.mxu1 %v5763_v12  ;;  %v5862_v11 = vld [vmem:[%s8458_s1 + $0xb04] ss:$8 sps:$4 sm:$0xff]   ;;  %v5851_v12 = vld [vmem:[%s8459_s0 + $0x10] ss:$144 sps:$4 sm:$0xff]  }
  0x85   :  { %4143 = vmatprep.subr.bf16.mxu0 %v5766_v13  ;;  %3829 = vmatprep.mubr.bf16.mxu1 %v5853_v19  ;;  %v5854_v13 = vld [vmem:[%s8458_s1 + $0x300] ss:$8 sps:$4 sm:$0xff]   ;;  %v5961_v19 = vld [vmem:[%s8459_s0 + $0x5c] ss:$144 sps:$4 sm:$0xff]  }
  0x86   :  { %4173 = vmatprep.mubr.bf16.mxu0 %v5859_v23  ;;  %v5874_v23 = vld [vmem:[%s8458_s1 + $0xb24] ss:$8 sps:$4 sm:$0xff]  }
  0x87   :  { %3800 = vmatpush1.bf16.msra.mxu1 %v5761_v14  ;;  %v5857_v14 = vld [vmem:[%s8459_s0 + $0x50] ss:$144 sps:$4 sm:$0xff]  }
  0x88   :  { %4144 = vmatpush1.bf16.msra.mxu0 %v5764_v15  ;;  %3801 = vmatprep.subr.bf16.mxu1 %v5769_v16  ;;  %v5860_v15 = vld [vmem:[%s8458_s1 + $0xb00] ss:$8 sps:$4 sm:$0xff]   ;;  %v5865_v16 = vld [vmem:[%s8458_s1 + $0x314] ss:$8 sps:$4 sm:$0xff]  }
  0x89   :  { %4145 = vmatprep.subr.bf16.mxu0 %v5772_v17  ;;  %v5868_v17 = vld [vmem:[%s8458_s1 + $0xb14] ss:$8 sps:$4 sm:$0xff]  }
  0x8b   :  { %3802 = vmatpush1.bf16.msra.mxu1 %v5767_v18  ;;  %v5955_v18 = vld [vmem:[%s8459_s0 + $0x1c] ss:$144 sps:$4 sm:$0xff]  }
  0x8c   :  { %4146 = vmatpush1.bf16.msra.mxu0 %v5770_v20  ;;  %3803 = vmatprep.subr.bf16.mxu1 %v5775_v21  ;;  %v5863_v20 = vld [vmem:[%s8458_s1 + $0x310] ss:$8 sps:$4 sm:$0xff]  }
  0x8d   :  { %4147 = vmatprep.subr.bf16.mxu0 %v5778_v22  ;;  %v5866_v21 = vld [vmem:[%s8458_s1 + $0xb10] ss:$8 sps:$4 sm:$0xff]   ;;  %v5871_v22 = vld [vmem:[%s8458_s1 + $0x324] ss:$8 sps:$4 sm:$0xff]  }
  0x8f   :  { %3804 = vmatpush1.bf16.msra.mxu1 %v5773_v24  ;;  %v5869_v24 = vld [vmem:[%s8458_s1 + $0x320] ss:$8 sps:$4 sm:$0xff]  }
  0x90   :  { %4148 = vmatpush1.bf16.msra.mxu0 %v5776_v25  ;;  %3805 = vmatprep.subr.bf16.mxu1 %v5781_v26  ;;  %v5872_v25 = vld [vmem:[%s8458_s1 + $0xb20] ss:$8 sps:$4 sm:$0xff]   ;;  %v5877_v26 = vld [vmem:[%s8458_s1 + $0x334] ss:$8 sps:$4 sm:$0xff]  }
  0x91   :  { %4149 = vmatprep.subr.bf16.mxu0 %v5784_v27  ;;  %v5880_v27 = vld [vmem:[%s8458_s1 + $0xb34] ss:$8 sps:$4 sm:$0xff]  }
  0x93   :  { %3806 = vmatpush1.bf16.msra.mxu1 %v5779_v28  ;;  %v5875_v28 = vld [vmem:[%s8458_s1 + $0x330] ss:$8 sps:$4 sm:$0xff]  }
  0x94   :  { %4150 = vmatpush1.bf16.msra.mxu0 %v5782_v29  ;;  %3807 = vmatprep.subr.bf16.mxu1 %v5787_v30  ;;  %v5878_v29 = vld [vmem:[%s8458_s1 + $0xb30] ss:$8 sps:$4 sm:$0xff]   ;;  %v5883_v30 = vld [vmem:[%s8458_s1 + $0x344] ss:$8 sps:$4 sm:$0xff]  }
  0x95   :  { %4151 = vmatprep.subr.bf16.mxu0 %v5790_v31  ;;  %v5886_v31 = vld [vmem:[%s8458_s1 + $0xb44] ss:$8 sps:$4 sm:$0xff]  }
  0x97   :  { %3808 = vmatpush1.bf16.msra.mxu1 %v5785_v32  ;;  %v5881_v32 = vld [vmem:[%s8458_s1 + $0x340] ss:$8 sps:$4 sm:$0xff]  }
  0x98   :  { %4152 = vmatpush1.bf16.msra.mxu0 %v5788_v33  ;;  %3809 = vmatprep.subr.bf16.mxu1 %v5793_v34  ;;  %v5884_v33 = vld [vmem:[%s8458_s1 + $0xb40] ss:$8 sps:$4 sm:$0xff]   ;;  %v5889_v34 = vld [vmem:[%s8458_s1 + $0x354] ss:$8 sps:$4 sm:$0xff]  }
  0x99   :  { %4153 = vmatprep.subr.bf16.mxu0 %v5796_v35  ;;  %v5892_v35 = vld [vmem:[%s8458_s1 + $0xb54] ss:$8 sps:$4 sm:$0xff]  }
  0x9b   :  { %3810 = vmatpush1.bf16.msra.mxu1 %v5791_v36  ;;  %v5887_v36 = vld [vmem:[%s8458_s1 + $0x350] ss:$8 sps:$4 sm:$0xff]  }
  0x9c   :  { %4154 = vmatpush1.bf16.msra.mxu0 %v5794_v37  ;;  %3811 = vmatprep.subr.bf16.mxu1 %v5799_v38  ;;  %v5890_v37 = vld [vmem:[%s8458_s1 + $0xb50] ss:$8 sps:$4 sm:$0xff]   ;;  %v5895_v38 = vld [vmem:[%s8458_s1 + $0x364] ss:$8 sps:$4 sm:$0xff]  }
  0x9d   :  { %4155 = vmatprep.subr.bf16.mxu0 %v5802_v39  ;;  %v5898_v39 = vld [vmem:[%s8458_s1 + $0xb64] ss:$8 sps:$4 sm:$0xff]  }
  0x9f   :  { %3812 = vmatpush1.bf16.msra.mxu1 %v5797_v40  ;;  %v5893_v40 = vld [vmem:[%s8458_s1 + $0x360] ss:$8 sps:$4 sm:$0xff]  }
  0xa0   :  { %4156 = vmatpush1.bf16.msra.mxu0 %v5800_v41  ;;  %3813 = vmatprep.subr.bf16.mxu1 %v5805_v42  ;;  %v5896_v41 = vld [vmem:[%s8458_s1 + $0xb60] ss:$8 sps:$4 sm:$0xff]   ;;  %v5901_v42 = vld [vmem:[%s8458_s1 + $0x374] ss:$8 sps:$4 sm:$0xff]  }
  0xa1   :  { %4157 = vmatprep.subr.bf16.mxu0 %v5808_v43  ;;  %v5904_v43 = vld [vmem:[%s8458_s1 + $0xb74] ss:$8 sps:$4 sm:$0xff]  }
  0xa3   :  { %3814 = vmatpush1.bf16.msra.mxu1 %v5803_v44  ;;  %v5899_v44 = vld [vmem:[%s8458_s1 + $0x370] ss:$8 sps:$4 sm:$0xff]  }
  0xa4   :  { %4158 = vmatpush1.bf16.msra.mxu0 %v5806_v45  ;;  %3815 = vmatprep.subr.bf16.mxu1 %v5811_v46  ;;  %v5902_v45 = vld [vmem:[%s8458_s1 + $0xb70] ss:$8 sps:$4 sm:$0xff]   ;;  %v5907_v46 = vld [vmem:[%s8458_s1 + $0x384] ss:$8 sps:$4 sm:$0xff]  }
  0xa5   :  { %4159 = vmatprep.subr.bf16.mxu0 %v5814_v47  ;;  %v5910_v47 = vld [vmem:[%s8458_s1 + $0xb84] ss:$8 sps:$4 sm:$0xff]  }
  0xa7   :  { %3816 = vmatpush1.bf16.msra.mxu1 %v5809_v48  ;;  %v5905_v48 = vld [vmem:[%s8458_s1 + $0x380] ss:$8 sps:$4 sm:$0xff]  }
  0xa8   :  { %4160 = vmatpush1.bf16.msra.mxu0 %v5812_v49  ;;  %3817 = vmatprep.subr.bf16.mxu1 %v5817_v50  ;;  %v5908_v49 = vld [vmem:[%s8458_s1 + $0xb80] ss:$8 sps:$4 sm:$0xff]   ;;  %v5913_v50 = vld [vmem:[%s8458_s1 + $0x394] ss:$8 sps:$4 sm:$0xff]  }
  0xa9   :  { %4161 = vmatprep.subr.bf16.mxu0 %v5820_v51  ;;  %v5916_v51 = vld [vmem:[%s8458_s1 + $0xb94] ss:$8 sps:$4 sm:$0xff]  }
  0xab   :  { %3818 = vmatpush1.bf16.msra.mxu1 %v5815_v52  ;;  %v5911_v52 = vld [vmem:[%s8458_s1 + $0x390] ss:$8 sps:$4 sm:$0xff]  }
  0xac   :  { %4162 = vmatpush1.bf16.msra.mxu0 %v5818_v53  ;;  %3819 = vmatprep.subr.bf16.mxu1 %v5823_v54  ;;  %v5914_v53 = vld [vmem:[%s8458_s1 + $0xb90] ss:$8 sps:$4 sm:$0xff]   ;;  %v5919_v54 = vld [vmem:[%s8458_s1 + $0x3a4] ss:$8 sps:$4 sm:$0xff]  }
  0xad   :  { %4163 = vmatprep.subr.bf16.mxu0 %v5826_v55  ;;  %v5922_v55 = vld [vmem:[%s8458_s1 + $0xba4] ss:$8 sps:$4 sm:$0xff]  }
  0xaf   :  { %3820 = vmatpush1.bf16.msra.mxu1 %v5821_v56  ;;  %v5917_v56 = vld [vmem:[%s8458_s1 + $0x3a0] ss:$8 sps:$4 sm:$0xff]  }
  0xb0   :  { %4164 = vmatpush1.bf16.msra.mxu0 %v5824_v57  ;;  %3821 = vmatprep.subr.bf16.mxu1 %v5829_v58  ;;  %v5920_v57 = vld [vmem:[%s8458_s1 + $0xba0] ss:$8 sps:$4 sm:$0xff]   ;;  %v5925_v58 = vld [vmem:[%s8458_s1 + $0x3b4] ss:$8 sps:$4 sm:$0xff]  }
  0xb1   :  { %4165 = vmatprep.subr.bf16.mxu0 %v5832_v59  ;;  %v5928_v59 = vld [vmem:[%s8458_s1 + $0xbb4] ss:$8 sps:$4 sm:$0xff]  }
  0xb3   :  { %3822 = vmatpush1.bf16.msra.mxu1 %v5827_v60  ;;  %v5923_v60 = vld [vmem:[%s8458_s1 + $0x3b0] ss:$8 sps:$4 sm:$0xff]  }
  0xb4   :  { %4166 = vmatpush1.bf16.msra.mxu0 %v5830_v61  ;;  %3823 = vmatprep.subr.bf16.mxu1 %v5835_v62  ;;  %v5926_v61 = vld [vmem:[%s8458_s1 + $0xbb0] ss:$8 sps:$4 sm:$0xff]   ;;  %v5931_v62 = vld [vmem:[%s8458_s1 + $0x3c4] ss:$8 sps:$4 sm:$0xff]  }
  0xb5   :  { %4167 = vmatprep.subr.bf16.mxu0 %v5838_v63  ;;  %v5934_v63 = vld [vmem:[%s8458_s1 + $0xbc4] ss:$8 sps:$4 sm:$0xff]  }
  0xb7   :  { %3824 = vmatpush1.bf16.msra.mxu1 %v5833_v0  ;;  %v5929_v0 = vld [vmem:[%s8458_s1 + $0x3c0] ss:$8 sps:$4 sm:$0xff]  }
  0xb8   :  { %4168 = vmatpush1.bf16.msra.mxu0 %v5836_v1  ;;  %3825 = vmatprep.subr.bf16.mxu1 %v5841_v2  ;;  %v5932_v1 = vld [vmem:[%s8458_s1 + $0xbc0] ss:$8 sps:$4 sm:$0xff]   ;;  %v5937_v2 = vld [vmem:[%s8458_s1 + $0x3d4] ss:$8 sps:$4 sm:$0xff]  }
  0xb9   :  { %4169 = vmatprep.subr.bf16.mxu0 %v5844_v3  ;;  %v5940_v3 = vld [vmem:[%s8458_s1 + $0xbd4] ss:$8 sps:$4 sm:$0xff]  }
  0xbb   :  { %3826 = vmatpush1.bf16.msra.mxu1 %v5839_v4  ;;  %v5935_v4 = vld [vmem:[%s8458_s1 + $0x3d0] ss:$8 sps:$4 sm:$0xff]  }
  0xbc   :  { %4170 = vmatpush1.bf16.msra.mxu0 %v5842_v5  ;;  %3827 = vmatprep.subr.bf16.mxu1 %v5847_v6  ;;  %v5938_v5 = vld [vmem:[%s8458_s1 + $0xbd0] ss:$8 sps:$4 sm:$0xff]   ;;  %v5943_v6 = vld [vmem:[%s8458_s1 + $0x3e4] ss:$8 sps:$4 sm:$0xff]  }
  0xbd   :  { %4171 = vmatprep.subr.bf16.mxu0 %v5850_v7  ;;  %v5946_v7 = vld [vmem:[%s8458_s1 + $0xbe4] ss:$8 sps:$4 sm:$0xff]  }
  0xbf   :  { %3828 = vmatpush1.bf16.msra.mxu1 %v5845_v8  ;;  %v5941_v8 = vld [vmem:[%s8458_s1 + $0x3e0] ss:$8 sps:$4 sm:$0xff]  }
  0xc0   :  { %4172 = vmatpush1.bf16.msra.mxu0 %v5848_v9  ;;  %3840 = vmatprep.subr.bf16.mxu1 %v5856_v10  ;;  %v5944_v9 = vld [vmem:[%s8458_s1 + $0xbe0] ss:$8 sps:$4 sm:$0xff]   ;;  %v5949_v10 = vld [vmem:[%s8458_s1 + $0x3f4] ss:$8 sps:$4 sm:$0xff]  }
  0xc1   :  { %4184 = vmatprep.subr.bf16.mxu0 %v5862_v11  ;;  %v5952_v11 = vld [vmem:[%s8458_s1 + $0xbf4] ss:$8 sps:$4 sm:$0xff]  }
  0xc2   :  { %3830 = vmatmul.mubr.bf16.vlgmr.msra.gmra.mrb[0].mxu1 %v5851_v12  ;;  %v5947_v12 = vld [vmem:[%s8458_s1 + $0x3f0] ss:$8 sps:$4 sm:$0xff]  }
  0xc3   :  { %4174 = vmatmul.mubr.bf16.vlgmr.msra.gmra.mrb[0].mxu0 %v5857_v14  ;;  %3841 = vmatpush1.bf16.msra.mxu1 %v5854_v13  ;;  %v5950_v13 = vld [vmem:[%s8458_s1 + $0xbf0] ss:$8 sps:$4 sm:$0xff]   ;;  %v5958_v14 = vld [vmem:[%s8458_s1 + $0x404] ss:$8 sps:$4 sm:$0xff]  }
  0xc4   :  { %4185 = vmatpush1.bf16.msra.mxu0 %v5860_v15  ;;  %3842 = vmatprep.subr.bf16.mxu1 %v5865_v16  ;;  %v5964_v15 = vld [vmem:[%s8458_s1 + $0xc04] ss:$8 sps:$4 sm:$0xff]   ;;  %v5953_v16 = vld [vmem:[%s8459_s0 + $0x18] ss:$144 sps:$4 sm:$0xff]  }
  0xc5   :  { %4186 = vmatprep.subr.bf16.mxu0 %v5868_v17  ;;  %3872 = vmatprep.mubr.bf16.mxu1 %v5955_v18  ;;  %v5956_v17 = vld [vmem:[%s8458_s1 + $0x400] ss:$8 sps:$4 sm:$0xff]  }
  0xc6   :  { %4216 = vmatprep.mubr.bf16.mxu0 %v5961_v19  ;;  %v5959_v18 = vld [vmem:[%s8459_s0 + $0x58] ss:$144 sps:$4 sm:$0xff]  }
  0xc7   :  { %3843 = vmatpush1.bf16.msra.mxu1 %v5863_v20  ;;  %v5962_v19 = vld [vmem:[%s8458_s1 + $0xc00] ss:$8 sps:$4 sm:$0xff]   ;;  %v5967_v20 = vld [vmem:[%s8458_s1 + $0x414] ss:$8 sps:$4 sm:$0xff]  }
  0xc8   :  { %4187 = vmatpush1.bf16.msra.mxu0 %v5866_v21  ;;  %3844 = vmatprep.subr.bf16.mxu1 %v5871_v22  ;;  %v5970_v21 = vld [vmem:[%s8458_s1 + $0xc14] ss:$8 sps:$4 sm:$0xff]  }
  0xc9   :  { %4188 = vmatprep.subr.bf16.mxu0 %v5874_v23  ;;  %v6057_v22 = vld [vmem:[%s8459_s0 + $0x24] ss:$144 sps:$4 sm:$0xff]  }
  0xca   :  { %v6063_v23 = vld [vmem:[%s8459_s0 + $0x64] ss:$144 sps:$4 sm:$0xff]  }
  0xcb   :  { %3845 = vmatpush1.bf16.msra.mxu1 %v5869_v24  ;;  %v5965_v24 = vld [vmem:[%s8458_s1 + $0x410] ss:$8 sps:$4 sm:$0xff]  }
  0xcc   :  { %4189 = vmatpush1.bf16.msra.mxu0 %v5872_v25  ;;  %3846 = vmatprep.subr.bf16.mxu1 %v5877_v26  ;;  %v5968_v25 = vld [vmem:[%s8458_s1 + $0xc10] ss:$8 sps:$4 sm:$0xff]   ;;  %v5973_v26 = vld [vmem:[%s8458_s1 + $0x424] ss:$8 sps:$4 sm:$0xff]  }
  0xcd   :  { %4190 = vmatprep.subr.bf16.mxu0 %v5880_v27  ;;  %v5976_v27 = vld [vmem:[%s8458_s1 + $0xc24] ss:$8 sps:$4 sm:$0xff]  }
  0xcf   :  { %3847 = vmatpush1.bf16.msra.mxu1 %v5875_v28  ;;  %v5971_v28 = vld [vmem:[%s8458_s1 + $0x420] ss:$8 sps:$4 sm:$0xff]  }
  0xd0   :  { %4191 = vmatpush1.bf16.msra.mxu0 %v5878_v29  ;;  %3848 = vmatprep.subr.bf16.mxu1 %v5883_v30  ;;  %v5974_v29 = vld [vmem:[%s8458_s1 + $0xc20] ss:$8 sps:$4 sm:$0xff]   ;;  %v5979_v30 = vld [vmem:[%s8458_s1 + $0x434] ss:$8 sps:$4 sm:$0xff]  }
  0xd1   :  { %4192 = vmatprep.subr.bf16.mxu0 %v5886_v31  ;;  %v5982_v31 = vld [vmem:[%s8458_s1 + $0xc34] ss:$8 sps:$4 sm:$0xff]  }
  0xd3   :  { %3849 = vmatpush1.bf16.msra.mxu1 %v5881_v32  ;;  %v5977_v32 = vld [vmem:[%s8458_s1 + $0x430] ss:$8 sps:$4 sm:$0xff]  }
  0xd4   :  { %4193 = vmatpush1.bf16.msra.mxu0 %v5884_v33  ;;  %3850 = vmatprep.subr.bf16.mxu1 %v5889_v34  ;;  %v5980_v33 = vld [vmem:[%s8458_s1 + $0xc30] ss:$8 sps:$4 sm:$0xff]   ;;  %v5985_v34 = vld [vmem:[%s8458_s1 + $0x444] ss:$8 sps:$4 sm:$0xff]  }
  0xd5   :  { %4194 = vmatprep.subr.bf16.mxu0 %v5892_v35  ;;  %v5988_v35 = vld [vmem:[%s8458_s1 + $0xc44] ss:$8 sps:$4 sm:$0xff]  }
  0xd7   :  { %3851 = vmatpush1.bf16.msra.mxu1 %v5887_v36  ;;  %v5983_v36 = vld [vmem:[%s8458_s1 + $0x440] ss:$8 sps:$4 sm:$0xff]  }
  0xd8   :  { %4195 = vmatpush1.bf16.msra.mxu0 %v5890_v37  ;;  %3852 = vmatprep.subr.bf16.mxu1 %v5895_v38  ;;  %v5986_v37 = vld [vmem:[%s8458_s1 + $0xc40] ss:$8 sps:$4 sm:$0xff]   ;;  %v5991_v38 = vld [vmem:[%s8458_s1 + $0x454] ss:$8 sps:$4 sm:$0xff]  }
  0xd9   :  { %4196 = vmatprep.subr.bf16.mxu0 %v5898_v39  ;;  %v5994_v39 = vld [vmem:[%s8458_s1 + $0xc54] ss:$8 sps:$4 sm:$0xff]  }
  0xdb   :  { %3853 = vmatpush1.bf16.msra.mxu1 %v5893_v40  ;;  %v5989_v40 = vld [vmem:[%s8458_s1 + $0x450] ss:$8 sps:$4 sm:$0xff]  }
  0xdc   :  { %4197 = vmatpush1.bf16.msra.mxu0 %v5896_v41  ;;  %3854 = vmatprep.subr.bf16.mxu1 %v5901_v42  ;;  %v5992_v41 = vld [vmem:[%s8458_s1 + $0xc50] ss:$8 sps:$4 sm:$0xff]   ;;  %v5997_v42 = vld [vmem:[%s8458_s1 + $0x464] ss:$8 sps:$4 sm:$0xff]  }
  0xdd   :  { %4198 = vmatprep.subr.bf16.mxu0 %v5904_v43  ;;  %v6000_v43 = vld [vmem:[%s8458_s1 + $0xc64] ss:$8 sps:$4 sm:$0xff]  }
  0xdf   :  { %3855 = vmatpush1.bf16.msra.mxu1 %v5899_v44  ;;  %v5995_v44 = vld [vmem:[%s8458_s1 + $0x460] ss:$8 sps:$4 sm:$0xff]  }
  0xe0   :  { %4199 = vmatpush1.bf16.msra.mxu0 %v5902_v45  ;;  %3856 = vmatprep.subr.bf16.mxu1 %v5907_v46  ;;  %v5998_v45 = vld [vmem:[%s8458_s1 + $0xc60] ss:$8 sps:$4 sm:$0xff]   ;;  %v6003_v46 = vld [vmem:[%s8458_s1 + $0x474] ss:$8 sps:$4 sm:$0xff]  }
  0xe1   :  { %4200 = vmatprep.subr.bf16.mxu0 %v5910_v47  ;;  %v6006_v47 = vld [vmem:[%s8458_s1 + $0xc74] ss:$8 sps:$4 sm:$0xff]  }
  0xe3   :  { %3857 = vmatpush1.bf16.msra.mxu1 %v5905_v48  ;;  %v6001_v48 = vld [vmem:[%s8458_s1 + $0x470] ss:$8 sps:$4 sm:$0xff]  }
  0xe4   :  { %4201 = vmatpush1.bf16.msra.mxu0 %v5908_v49  ;;  %3858 = vmatprep.subr.bf16.mxu1 %v5913_v50  ;;  %v6004_v49 = vld [vmem:[%s8458_s1 + $0xc70] ss:$8 sps:$4 sm:$0xff]   ;;  %v6009_v50 = vld [vmem:[%s8458_s1 + $0x484] ss:$8 sps:$4 sm:$0xff]  }
  0xe5   :  { %4202 = vmatprep.subr.bf16.mxu0 %v5916_v51  ;;  %v6012_v51 = vld [vmem:[%s8458_s1 + $0xc84] ss:$8 sps:$4 sm:$0xff]  }
  0xe7   :  { %3859 = vmatpush1.bf16.msra.mxu1 %v5911_v52  ;;  %v6007_v52 = vld [vmem:[%s8458_s1 + $0x480] ss:$8 sps:$4 sm:$0xff]  }
  0xe8   :  { %4203 = vmatpush1.bf16.msra.mxu0 %v5914_v53  ;;  %3860 = vmatprep.subr.bf16.mxu1 %v5919_v54  ;;  %v6010_v53 = vld [vmem:[%s8458_s1 + $0xc80] ss:$8 sps:$4 sm:$0xff]   ;;  %v6015_v54 = vld [vmem:[%s8458_s1 + $0x494] ss:$8 sps:$4 sm:$0xff]  }
  0xe9   :  { %4204 = vmatprep.subr.bf16.mxu0 %v5922_v55  ;;  %v6018_v55 = vld [vmem:[%s8458_s1 + $0xc94] ss:$8 sps:$4 sm:$0xff]  }
  0xeb   :  { %3861 = vmatpush1.bf16.msra.mxu1 %v5917_v56  ;;  %v6013_v56 = vld [vmem:[%s8458_s1 + $0x490] ss:$8 sps:$4 sm:$0xff]  }
  0xec   :  { %4205 = vmatpush1.bf16.msra.mxu0 %v5920_v57  ;;  %3862 = vmatprep.subr.bf16.mxu1 %v5925_v58  ;;  %v6016_v57 = vld [vmem:[%s8458_s1 + $0xc90] ss:$8 sps:$4 sm:$0xff]   ;;  %v6021_v58 = vld [vmem:[%s8458_s1 + $0x4a4] ss:$8 sps:$4 sm:$0xff]  }
  0xed   :  { %4206 = vmatprep.subr.bf16.mxu0 %v5928_v59  ;;  %v6024_v59 = vld [vmem:[%s8458_s1 + $0xca4] ss:$8 sps:$4 sm:$0xff]  }
  0xef   :  { %3863 = vmatpush1.bf16.msra.mxu1 %v5923_v60  ;;  %v6019_v60 = vld [vmem:[%s8458_s1 + $0x4a0] ss:$8 sps:$4 sm:$0xff]  }
  0xf0   :  { %4207 = vmatpush1.bf16.msra.mxu0 %v5926_v61  ;;  %3864 = vmatprep.subr.bf16.mxu1 %v5931_v62  ;;  %v6022_v61 = vld [vmem:[%s8458_s1 + $0xca0] ss:$8 sps:$4 sm:$0xff]   ;;  %v6027_v62 = vld [vmem:[%s8458_s1 + $0x4b4] ss:$8 sps:$4 sm:$0xff]  }
  0xf1   :  { %4208 = vmatprep.subr.bf16.mxu0 %v5934_v63  ;;  %v6030_v63 = vld [vmem:[%s8458_s1 + $0xcb4] ss:$8 sps:$4 sm:$0xff]  }
  0xf3   :  { %3865 = vmatpush1.bf16.msra.mxu1 %v5929_v0  ;;  %v6025_v0 = vld [vmem:[%s8458_s1 + $0x4b0] ss:$8 sps:$4 sm:$0xff]  }
  0xf4   :  { %4209 = vmatpush1.bf16.msra.mxu0 %v5932_v1  ;;  %3866 = vmatprep.subr.bf16.mxu1 %v5937_v2  ;;  %v6028_v1 = vld [vmem:[%s8458_s1 + $0xcb0] ss:$8 sps:$4 sm:$0xff]   ;;  %v6033_v2 = vld [vmem:[%s8458_s1 + $0x4c4] ss:$8 sps:$4 sm:$0xff]  }
  0xf5   :  { %4210 = vmatprep.subr.bf16.mxu0 %v5940_v3  ;;  %v6036_v3 = vld [vmem:[%s8458_s1 + $0xcc4] ss:$8 sps:$4 sm:$0xff]  }
  0xf7   :  { %3867 = vmatpush1.bf16.msra.mxu1 %v5935_v4  ;;  %v6031_v4 = vld [vmem:[%s8458_s1 + $0x4c0] ss:$8 sps:$4 sm:$0xff]  }
  0xf8   :  { %4211 = vmatpush1.bf16.msra.mxu0 %v5938_v5  ;;  %3868 = vmatprep.subr.bf16.mxu1 %v5943_v6  ;;  %v6034_v5 = vld [vmem:[%s8458_s1 + $0xcc0] ss:$8 sps:$4 sm:$0xff]   ;;  %v6039_v6 = vld [vmem:[%s8458_s1 + $0x4d4] ss:$8 sps:$4 sm:$0xff]  }
  0xf9   :  { %4212 = vmatprep.subr.bf16.mxu0 %v5946_v7  ;;  %v6042_v7 = vld [vmem:[%s8458_s1 + $0xcd4] ss:$8 sps:$4 sm:$0xff]  }
  0xfb   :  { %3869 = vmatpush1.bf16.msra.mxu1 %v5941_v8  ;;  %v6037_v8 = vld [vmem:[%s8458_s1 + $0x4d0] ss:$8 sps:$4 sm:$0xff]  }
  0xfc   :  { %4213 = vmatpush1.bf16.msra.mxu0 %v5944_v9  ;;  %3870 = vmatprep.subr.bf16.mxu1 %v5949_v10  ;;  %v6040_v9 = vld [vmem:[%s8458_s1 + $0xcd0] ss:$8 sps:$4 sm:$0xff]   ;;  %v6045_v10 = vld [vmem:[%s8458_s1 + $0x4e4] ss:$8 sps:$4 sm:$0xff]  }
  0xfd   :  { %4214 = vmatprep.subr.bf16.mxu0 %v5952_v11  ;;  %v6048_v11 = vld [vmem:[%s8458_s1 + $0xce4] ss:$8 sps:$4 sm:$0xff]  }
  0xff   :  { %3871 = vmatpush1.bf16.msra.mxu1 %v5947_v12  ;;  %v6043_v12 = vld [vmem:[%s8458_s1 + $0x4e0] ss:$8 sps:$4 sm:$0xff]  }
 0x100   :  { %4215 = vmatpush1.bf16.msra.mxu0 %v5950_v13  ;;  %3883 = vmatprep.subr.bf16.mxu1 %v5958_v14  ;;  %v6046_v13 = vld [vmem:[%s8458_s1 + $0xce0] ss:$8 sps:$4 sm:$0xff]   ;;  %v6051_v14 = vld [vmem:[%s8458_s1 + $0x4f4] ss:$8 sps:$4 sm:$0xff]  }
 0x101   :  { %4227 = vmatprep.subr.bf16.mxu0 %v5964_v15  ;;  %v6054_v15 = vld [vmem:[%s8458_s1 + $0xcf4] ss:$8 sps:$4 sm:$0xff]  }
 0x102   :  { %3873 = vmatmul.mubr.bf16.vlgmr.msra.gmra.mrb[0].mxu1 %v5953_v16  ;;  %v6049_v16 = vld [vmem:[%s8458_s1 + $0x4f0] ss:$8 sps:$4 sm:$0xff]  }
 0x103   :  { %4217 = vmatmul.mubr.bf16.vlgmr.msra.gmra.mrb[0].mxu0 %v5959_v18  ;;  %3884 = vmatpush1.bf16.msra.mxu1 %v5956_v17  ;;  %v6052_v17 = vld [vmem:[%s8458_s1 + $0xcf0] ss:$8 sps:$4 sm:$0xff]   ;;  %v6060_v18 = vld [vmem:[%s8458_s1 + $0x504] ss:$8 sps:$4 sm:$0xff]  }
 0x104   :  { %4228 = vmatpush1.bf16.msra.mxu0 %v5962_v19  ;;  %3885 = vmatprep.subr.bf16.mxu1 %v5967_v20  ;;  %v6055_v19 = vld [vmem:[%s8459_s0 + $0x20] ss:$144 sps:$4 sm:$0xff]  }
 0x105   :  { %4229 = vmatprep.subr.bf16.mxu0 %v5970_v21  ;;  %3915 = vmatprep.mubr.bf16.mxu1 %v6057_v22  ;;  %v6061_v20 = vld [vmem:[%s8459_s0 + $0x60] ss:$144 sps:$4 sm:$0xff]   ;;  %v6066_v21 = vld [vmem:[%s8458_s1 + $0xd04] ss:$8 sps:$4 sm:$0xff]  }
 0x106   :  { %4259 = vmatprep.mubr.bf16.mxu0 %v6063_v23  ;;  %v6058_v22 = vld [vmem:[%s8458_s1 + $0x500] ss:$8 sps:$4 sm:$0xff]  }
 0x107   :  { %3886 = vmatpush1.bf16.msra.mxu1 %v5965_v24  ;;  %v6064_v23 = vld [vmem:[%s8458_s1 + $0xd00] ss:$8 sps:$4 sm:$0xff]   ;;  %v6069_v24 = vld [vmem:[%s8458_s1 + $0x514] ss:$8 sps:$4 sm:$0xff]  }
 0x108   :  { %4230 = vmatpush1.bf16.msra.mxu0 %v5968_v25  ;;  %3887 = vmatprep.subr.bf16.mxu1 %v5973_v26  ;;  %v6072_v25 = vld [vmem:[%s8458_s1 + $0xd14] ss:$8 sps:$4 sm:$0xff]  }
 0x109   :  { %4231 = vmatprep.subr.bf16.mxu0 %v5976_v27  ;;  %v6159_v26 = vld [vmem:[%s8459_s0 + $0x2c] ss:$144 sps:$4 sm:$0xff]  }
 0x10a   :  { %v6165_v27 = vld [vmem:[%s8459_s0 + $0x6c] ss:$144 sps:$4 sm:$0xff]  }
 0x10b   :  { %3888 = vmatpush1.bf16.msra.mxu1 %v5971_v28  ;;  %v6067_v28 = vld [vmem:[%s8458_s1 + $0x510] ss:$8 sps:$4 sm:$0xff]  }
 0x10c   :  { %4232 = vmatpush1.bf16.msra.mxu0 %v5974_v29  ;;  %3889 = vmatprep.subr.bf16.mxu1 %v5979_v30  ;;  %v6070_v29 = vld [vmem:[%s8458_s1 + $0xd10] ss:$8 sps:$4 sm:$0xff]   ;;  %v6075_v30 = vld [vmem:[%s8458_s1 + $0x524] ss:$8 sps:$4 sm:$0xff]  }
 0x10d   :  { %4233 = vmatprep.subr.bf16.mxu0 %v5982_v31  ;;  %v6078_v31 = vld [vmem:[%s8458_s1 + $0xd24] ss:$8 sps:$4 sm:$0xff]  }
 0x10f   :  { %3890 = vmatpush1.bf16.msra.mxu1 %v5977_v32  ;;  %v6073_v32 = vld [vmem:[%s8458_s1 + $0x520] ss:$8 sps:$4 sm:$0xff]  }
 0x110   :  { %4234 = vmatpush1.bf16.msra.mxu0 %v5980_v33  ;;  %3891 = vmatprep.subr.bf16.mxu1 %v5985_v34  ;;  %v6076_v33 = vld [vmem:[%s8458_s1 + $0xd20] ss:$8 sps:$4 sm:$0xff]   ;;  %v6081_v34 = vld [vmem:[%s8458_s1 + $0x534] ss:$8 sps:$4 sm:$0xff]  }
 0x111   :  { %4235 = vmatprep.subr.bf16.mxu0 %v5988_v35  ;;  %v6084_v35 = vld [vmem:[%s8458_s1 + $0xd34] ss:$8 sps:$4 sm:$0xff]  }
 0x113   :  { %3892 = vmatpush1.bf16.msra.mxu1 %v5983_v36  ;;  %v6079_v36 = vld [vmem:[%s8458_s1 + $0x530] ss:$8 sps:$4 sm:$0xff]  }
 0x114   :  { %4236 = vmatpush1.bf16.msra.mxu0 %v5986_v37  ;;  %3893 = vmatprep.subr.bf16.mxu1 %v5991_v38  ;;  %v6082_v37 = vld [vmem:[%s8458_s1 + $0xd30] ss:$8 sps:$4 sm:$0xff]   ;;  %v6087_v38 = vld [vmem:[%s8458_s1 + $0x544] ss:$8 sps:$4 sm:$0xff]  }
 0x115   :  { %4237 = vmatprep.subr.bf16.mxu0 %v5994_v39  ;;  %v6090_v39 = vld [vmem:[%s8458_s1 + $0xd44] ss:$8 sps:$4 sm:$0xff]  }
 0x117   :  { %3894 = vmatpush1.bf16.msra.mxu1 %v5989_v40  ;;  %v6085_v40 = vld [vmem:[%s8458_s1 + $0x540] ss:$8 sps:$4 sm:$0xff]  }
 0x118   :  { %4238 = vmatpush1.bf16.msra.mxu0 %v5992_v41  ;;  %3895 = vmatprep.subr.bf16.mxu1 %v5997_v42  ;;  %v6088_v41 = vld [vmem:[%s8458_s1 + $0xd40] ss:$8 sps:$4 sm:$0xff]   ;;  %v6093_v42 = vld [vmem:[%s8458_s1 + $0x554] ss:$8 sps:$4 sm:$0xff]  }
 0x119   :  { %4239 = vmatprep.subr.bf16.mxu0 %v6000_v43  ;;  %v6096_v43 = vld [vmem:[%s8458_s1 + $0xd54] ss:$8 sps:$4 sm:$0xff]  }
 0x11b   :  { %3896 = vmatpush1.bf16.msra.mxu1 %v5995_v44  ;;  %v6091_v44 = vld [vmem:[%s8458_s1 + $0x550] ss:$8 sps:$4 sm:$0xff]  }
 0x11c   :  { %4240 = vmatpush1.bf16.msra.mxu0 %v5998_v45  ;;  %3897 = vmatprep.subr.bf16.mxu1 %v6003_v46  ;;  %v6094_v45 = vld [vmem:[%s8458_s1 + $0xd50] ss:$8 sps:$4 sm:$0xff]   ;;  %v6099_v46 = vld [vmem:[%s8458_s1 + $0x564] ss:$8 sps:$4 sm:$0xff]  }
 0x11d   :  { %4241 = vmatprep.subr.bf16.mxu0 %v6006_v47  ;;  %v6102_v47 = vld [vmem:[%s8458_s1 + $0xd64] ss:$8 sps:$4 sm:$0xff]  }
 0x11f   :  { %3898 = vmatpush1.bf16.msra.mxu1 %v6001_v48  ;;  %v6097_v48 = vld [vmem:[%s8458_s1 + $0x560] ss:$8 sps:$4 sm:$0xff]  }
 0x120   :  { %4242 = vmatpush1.bf16.msra.mxu0 %v6004_v49  ;;  %3899 = vmatprep.subr.bf16.mxu1 %v6009_v50  ;;  %v6100_v49 = vld [vmem:[%s8458_s1 + $0xd60] ss:$8 sps:$4 sm:$0xff]   ;;  %v6105_v50 = vld [vmem:[%s8458_s1 + $0x574] ss:$8 sps:$4 sm:$0xff]  }
 0x121   :  { %4243 = vmatprep.subr.bf16.mxu0 %v6012_v51  ;;  %v6108_v51 = vld [vmem:[%s8458_s1 + $0xd74] ss:$8 sps:$4 sm:$0xff]  }
 0x123   :  { %3900 = vmatpush1.bf16.msra.mxu1 %v6007_v52  ;;  %v6103_v52 = vld [vmem:[%s8458_s1 + $0x570] ss:$8 sps:$4 sm:$0xff]  }
 0x124   :  { %4244 = vmatpush1.bf16.msra.mxu0 %v6010_v53  ;;  %3901 = vmatprep.subr.bf16.mxu1 %v6015_v54  ;;  %v6106_v53 = vld [vmem:[%s8458_s1 + $0xd70] ss:$8 sps:$4 sm:$0xff]   ;;  %v6111_v54 = vld [vmem:[%s8458_s1 + $0x584] ss:$8 sps:$4 sm:$0xff]  }
 0x125   :  { %4245 = vmatprep.subr.bf16.mxu0 %v6018_v55  ;;  %v6114_v55 = vld [vmem:[%s8458_s1 + $0xd84] ss:$8 sps:$4 sm:$0xff]  }
 0x127   :  { %3902 = vmatpush1.bf16.msra.mxu1 %v6013_v56  ;;  %v6109_v56 = vld [vmem:[%s8458_s1 + $0x580] ss:$8 sps:$4 sm:$0xff]  }
 0x128   :  { %4246 = vmatpush1.bf16.msra.mxu0 %v6016_v57  ;;  %3903 = vmatprep.subr.bf16.mxu1 %v6021_v58  ;;  %v6112_v57 = vld [vmem:[%s8458_s1 + $0xd80] ss:$8 sps:$4 sm:$0xff]   ;;  %v6117_v58 = vld [vmem:[%s8458_s1 + $0x594] ss:$8 sps:$4 sm:$0xff]  }
 0x129   :  { %4247 = vmatprep.subr.bf16.mxu0 %v6024_v59  ;;  %v6120_v59 = vld [vmem:[%s8458_s1 + $0xd94] ss:$8 sps:$4 sm:$0xff]  }
 0x12b   :  { %3904 = vmatpush1.bf16.msra.mxu1 %v6019_v60  ;;  %v6115_v60 = vld [vmem:[%s8458_s1 + $0x590] ss:$8 sps:$4 sm:$0xff]  }
 0x12c   :  { %4248 = vmatpush1.bf16.msra.mxu0 %v6022_v61  ;;  %3905 = vmatprep.subr.bf16.mxu1 %v6027_v62  ;;  %v6118_v61 = vld [vmem:[%s8458_s1 + $0xd90] ss:$8 sps:$4 sm:$0xff]   ;;  %v6123_v62 = vld [vmem:[%s8458_s1 + $0x5a4] ss:$8 sps:$4 sm:$0xff]  }
 0x12d   :  { %4249 = vmatprep.subr.bf16.mxu0 %v6030_v63  ;;  %v6126_v63 = vld [vmem:[%s8458_s1 + $0xda4] ss:$8 sps:$4 sm:$0xff]  }
 0x12f   :  { %3906 = vmatpush1.bf16.msra.mxu1 %v6025_v0  ;;  %v6121_v0 = vld [vmem:[%s8458_s1 + $0x5a0] ss:$8 sps:$4 sm:$0xff]  }
 0x130   :  { %4250 = vmatpush1.bf16.msra.mxu0 %v6028_v1  ;;  %3907 = vmatprep.subr.bf16.mxu1 %v6033_v2  ;;  %v6124_v1 = vld [vmem:[%s8458_s1 + $0xda0] ss:$8 sps:$4 sm:$0xff]   ;;  %v6129_v2 = vld [vmem:[%s8458_s1 + $0x5b4] ss:$8 sps:$4 sm:$0xff]  }
 0x131   :  { %4251 = vmatprep.subr.bf16.mxu0 %v6036_v3  ;;  %v6132_v3 = vld [vmem:[%s8458_s1 + $0xdb4] ss:$8 sps:$4 sm:$0xff]  }
 0x133   :  { %3908 = vmatpush1.bf16.msra.mxu1 %v6031_v4  ;;  %v6127_v4 = vld [vmem:[%s8458_s1 + $0x5b0] ss:$8 sps:$4 sm:$0xff]  }
 0x134   :  { %4252 = vmatpush1.bf16.msra.mxu0 %v6034_v5  ;;  %3909 = vmatprep.subr.bf16.mxu1 %v6039_v6  ;;  %v6130_v5 = vld [vmem:[%s8458_s1 + $0xdb0] ss:$8 sps:$4 sm:$0xff]   ;;  %v6135_v6 = vld [vmem:[%s8458_s1 + $0x5c4] ss:$8 sps:$4 sm:$0xff]  }
 0x135   :  { %4253 = vmatprep.subr.bf16.mxu0 %v6042_v7  ;;  %v6138_v7 = vld [vmem:[%s8458_s1 + $0xdc4] ss:$8 sps:$4 sm:$0xff]  }
 0x137   :  { %3910 = vmatpush1.bf16.msra.mxu1 %v6037_v8  ;;  %v6133_v8 = vld [vmem:[%s8458_s1 + $0x5c0] ss:$8 sps:$4 sm:$0xff]  }
 0x138   :  { %4254 = vmatpush1.bf16.msra.mxu0 %v6040_v9  ;;  %3911 = vmatprep.subr.bf16.mxu1 %v6045_v10  ;;  %v6136_v9 = vld [vmem:[%s8458_s1 + $0xdc0] ss:$8 sps:$4 sm:$0xff]   ;;  %v6141_v10 = vld [vmem:[%s8458_s1 + $0x5d4] ss:$8 sps:$4 sm:$0xff]  }
 0x139   :  { %4255 = vmatprep.subr.bf16.mxu0 %v6048_v11  ;;  %v6144_v11 = vld [vmem:[%s8458_s1 + $0xdd4] ss:$8 sps:$4 sm:$0xff]  }
 0x13b   :  { %3912 = vmatpush1.bf16.msra.mxu1 %v6043_v12  ;;  %v6139_v12 = vld [vmem:[%s8458_s1 + $0x5d0] ss:$8 sps:$4 sm:$0xff]  }
 0x13c   :  { %4256 = vmatpush1.bf16.msra.mxu0 %v6046_v13  ;;  %3913 = vmatprep.subr.bf16.mxu1 %v6051_v14  ;;  %v6142_v13 = vld [vmem:[%s8458_s1 + $0xdd0] ss:$8 sps:$4 sm:$0xff]   ;;  %v6147_v14 = vld [vmem:[%s8458_s1 + $0x5e4] ss:$8 sps:$4 sm:$0xff]  }
 0x13d   :  { %4257 = vmatprep.subr.bf16.mxu0 %v6054_v15  ;;  %v6150_v15 = vld [vmem:[%s8458_s1 + $0xde4] ss:$8 sps:$4 sm:$0xff]  }
 0x13f   :  { %3914 = vmatpush1.bf16.msra.mxu1 %v6049_v16  ;;  %v6145_v16 = vld [vmem:[%s8458_s1 + $0x5e0] ss:$8 sps:$4 sm:$0xff]  }
 0x140   :  { %4258 = vmatpush1.bf16.msra.mxu0 %v6052_v17  ;;  %3926 = vmatprep.subr.bf16.mxu1 %v6060_v18  ;;  %v6148_v17 = vld [vmem:[%s8458_s1 + $0xde0] ss:$8 sps:$4 sm:$0xff]   ;;  %v6153_v18 = vld [vmem:[%s8458_s1 + $0x5f4] ss:$8 sps:$4 sm:$0xff]  }
 0x141   :  { %4270 = vmatprep.subr.bf16.mxu0 %v6066_v21  ;;  %v6154_v21 = vld [vmem:[%s8458_s1 + $0xdf0] ss:$8 sps:$4 sm:$0xff]  }
 0x142   :  { %3916 = vmatmul.mubr.bf16.vlgmr.msra.gmra.mrb[0].mxu1 %v6055_v19  ;;  %v6156_v19 = vld [vmem:[%s8458_s1 + $0xdf4] ss:$8 sps:$4 sm:$0xff]  }
 0x143   :  { %4260 = vmatmul.mubr.bf16.vlgmr.msra.gmra.mrb[0].mxu0 %v6061_v20  ;;  %3927 = vmatpush1.bf16.msra.mxu1 %v6058_v22  ;;  %v6151_v20 = vld [vmem:[%s8458_s1 + $0x5f0] ss:$8 sps:$4 sm:$0xff]   ;;  %v6162_v22 = vld [vmem:[%s8458_s1 + $0x604] ss:$8 sps:$4 sm:$0xff]  }
 0x144   :  { %4271 = vmatpush1.bf16.msra.mxu0 %v6064_v23  ;;  %3928 = vmatprep.subr.bf16.mxu1 %v6069_v24  ;;  %v6157_v23 = vld [vmem:[%s8459_s0 + $0x28] ss:$144 sps:$4 sm:$0xff]  }
 0x145   :  { %4272 = vmatprep.subr.bf16.mxu0 %v6072_v25  ;;  %3958 = vmatprep.mubr.bf16.mxu1 %v6159_v26  ;;  %v6163_v24 = vld [vmem:[%s8459_s0 + $0x68] ss:$144 sps:$4 sm:$0xff]   ;;  %v6168_v25 = vld [vmem:[%s8458_s1 + $0xe04] ss:$8 sps:$4 sm:$0xff]  }
 0x146   :  { %4302 = vmatprep.mubr.bf16.mxu0 %v6165_v27  ;;  %v6160_v26 = vld [vmem:[%s8458_s1 + $0x600] ss:$8 sps:$4 sm:$0xff]  }
 0x147   :  { %3929 = vmatpush1.bf16.msra.mxu1 %v6067_v28  ;;  %v6166_v27 = vld [vmem:[%s8458_s1 + $0xe00] ss:$8 sps:$4 sm:$0xff]   ;;  %v6171_v28 = vld [vmem:[%s8458_s1 + $0x614] ss:$8 sps:$4 sm:$0xff]  }
 0x148   :  { %4273 = vmatpush1.bf16.msra.mxu0 %v6070_v29  ;;  %3930 = vmatprep.subr.bf16.mxu1 %v6075_v30  ;;  %v6174_v29 = vld [vmem:[%s8458_s1 + $0xe14] ss:$8 sps:$4 sm:$0xff]  }
 0x149   :  { %4274 = vmatprep.subr.bf16.mxu0 %v6078_v31  ;;  %v6261_v30 = vld [vmem:[%s8459_s0 + $0x34] ss:$144 sps:$4 sm:$0xff]  }
 0x14a   :  { %v6267_v31 = vld [vmem:[%s8459_s0 + $0x74] ss:$144 sps:$4 sm:$0xff]  }
 0x14b   :  { %3931 = vmatpush1.bf16.msra.mxu1 %v6073_v32  ;;  %v6169_v32 = vld [vmem:[%s8458_s1 + $0x610] ss:$8 sps:$4 sm:$0xff]  }
 0x14c   :  { %4275 = vmatpush1.bf16.msra.mxu0 %v6076_v33  ;;  %3932 = vmatprep.subr.bf16.mxu1 %v6081_v34  ;;  %v6172_v33 = vld [vmem:[%s8458_s1 + $0xe10] ss:$8 sps:$4 sm:$0xff]   ;;  %v6177_v34 = vld [vmem:[%s8458_s1 + $0x624] ss:$8 sps:$4 sm:$0xff]  }
 0x14d   :  { %4276 = vmatprep.subr.bf16.mxu0 %v6084_v35  ;;  %v6180_v35 = vld [vmem:[%s8458_s1 + $0xe24] ss:$8 sps:$4 sm:$0xff]  }
 0x14f   :  { %3933 = vmatpush1.bf16.msra.mxu1 %v6079_v36  ;;  %v6175_v36 = vld [vmem:[%s8458_s1 + $0x620] ss:$8 sps:$4 sm:$0xff]  }
 0x150   :  { %4277 = vmatpush1.bf16.msra.mxu0 %v6082_v37  ;;  %3934 = vmatprep.subr.bf16.mxu1 %v6087_v38  ;;  %v6178_v37 = vld [vmem:[%s8458_s1 + $0xe20] ss:$8 sps:$4 sm:$0xff]   ;;  %v6183_v38 = vld [vmem:[%s8458_s1 + $0x634] ss:$8 sps:$4 sm:$0xff]  }
 0x151   :  { %4278 = vmatprep.subr.bf16.mxu0 %v6090_v39  ;;  %v6186_v39 = vld [vmem:[%s8458_s1 + $0xe34] ss:$8 sps:$4 sm:$0xff]  }
 0x153   :  { %3935 = vmatpush1.bf16.msra.mxu1 %v6085_v40  ;;  %v6181_v40 = vld [vmem:[%s8458_s1 + $0x630] ss:$8 sps:$4 sm:$0xff]  }
 0x154   :  { %4279 = vmatpush1.bf16.msra.mxu0 %v6088_v41  ;;  %3936 = vmatprep.subr.bf16.mxu1 %v6093_v42  ;;  %v6184_v41 = vld [vmem:[%s8458_s1 + $0xe30] ss:$8 sps:$4 sm:$0xff]   ;;  %v6189_v42 = vld [vmem:[%s8458_s1 + $0x644] ss:$8 sps:$4 sm:$0xff]  }
 0x155   :  { %4280 = vmatprep.subr.bf16.mxu0 %v6096_v43  ;;  %v6192_v43 = vld [vmem:[%s8458_s1 + $0xe44] ss:$8 sps:$4 sm:$0xff]  }
 0x157   :  { %3937 = vmatpush1.bf16.msra.mxu1 %v6091_v44  ;;  %v6187_v44 = vld [vmem:[%s8458_s1 + $0x640] ss:$8 sps:$4 sm:$0xff]  }
 0x158   :  { %4281 = vmatpush1.bf16.msra.mxu0 %v6094_v45  ;;  %3938 = vmatprep.subr.bf16.mxu1 %v6099_v46  ;;  %v6190_v45 = vld [vmem:[%s8458_s1 + $0xe40] ss:$8 sps:$4 sm:$0xff]   ;;  %v6195_v46 = vld [vmem:[%s8458_s1 + $0x654] ss:$8 sps:$4 sm:$0xff]  }
 0x159   :  { %4282 = vmatprep.subr.bf16.mxu0 %v6102_v47  ;;  %v6198_v47 = vld [vmem:[%s8458_s1 + $0xe54] ss:$8 sps:$4 sm:$0xff]  }
 0x15b   :  { %3939 = vmatpush1.bf16.msra.mxu1 %v6097_v48  ;;  %v6193_v48 = vld [vmem:[%s8458_s1 + $0x650] ss:$8 sps:$4 sm:$0xff]  }
 0x15c   :  { %4283 = vmatpush1.bf16.msra.mxu0 %v6100_v49  ;;  %3940 = vmatprep.subr.bf16.mxu1 %v6105_v50  ;;  %v6196_v49 = vld [vmem:[%s8458_s1 + $0xe50] ss:$8 sps:$4 sm:$0xff]   ;;  %v6201_v50 = vld [vmem:[%s8458_s1 + $0x664] ss:$8 sps:$4 sm:$0xff]  }
 0x15d   :  { %4284 = vmatprep.subr.bf16.mxu0 %v6108_v51  ;;  %v6204_v51 = vld [vmem:[%s8458_s1 + $0xe64] ss:$8 sps:$4 sm:$0xff]  }
 0x15f   :  { %3941 = vmatpush1.bf16.msra.mxu1 %v6103_v52  ;;  %v6199_v52 = vld [vmem:[%s8458_s1 + $0x660] ss:$8 sps:$4 sm:$0xff]  }
 0x160   :  { %4285 = vmatpush1.bf16.msra.mxu0 %v6106_v53  ;;  %3942 = vmatprep.subr.bf16.mxu1 %v6111_v54  ;;  %v6202_v53 = vld [vmem:[%s8458_s1 + $0xe60] ss:$8 sps:$4 sm:$0xff]   ;;  %v6207_v54 = vld [vmem:[%s8458_s1 + $0x674] ss:$8 sps:$4 sm:$0xff]  }
 0x161   :  { %4286 = vmatprep.subr.bf16.mxu0 %v6114_v55  ;;  %v6210_v55 = vld [vmem:[%s8458_s1 + $0xe74] ss:$8 sps:$4 sm:$0xff]  }
 0x163   :  { %3943 = vmatpush1.bf16.msra.mxu1 %v6109_v56  ;;  %v6205_v56 = vld [vmem:[%s8458_s1 + $0x670] ss:$8 sps:$4 sm:$0xff]  }
 0x164   :  { %4287 = vmatpush1.bf16.msra.mxu0 %v6112_v57  ;;  %3944 = vmatprep.subr.bf16.mxu1 %v6117_v58  ;;  %v6208_v57 = vld [vmem:[%s8458_s1 + $0xe70] ss:$8 sps:$4 sm:$0xff]   ;;  %v6213_v58 = vld [vmem:[%s8458_s1 + $0x684] ss:$8 sps:$4 sm:$0xff]  }
 0x165   :  { %4288 = vmatprep.subr.bf16.mxu0 %v6120_v59  ;;  %v6216_v59 = vld [vmem:[%s8458_s1 + $0xe84] ss:$8 sps:$4 sm:$0xff]  }
 0x167   :  { %3945 = vmatpush1.bf16.msra.mxu1 %v6115_v60  ;;  %v6211_v60 = vld [vmem:[%s8458_s1 + $0x680] ss:$8 sps:$4 sm:$0xff]  }
 0x168   :  { %4289 = vmatpush1.bf16.msra.mxu0 %v6118_v61  ;;  %3946 = vmatprep.subr.bf16.mxu1 %v6123_v62  ;;  %v6214_v61 = vld [vmem:[%s8458_s1 + $0xe80] ss:$8 sps:$4 sm:$0xff]   ;;  %v6219_v62 = vld [vmem:[%s8458_s1 + $0x694] ss:$8 sps:$4 sm:$0xff]  }
 0x169   :  { %4290 = vmatprep.subr.bf16.mxu0 %v6126_v63  ;;  %v6222_v63 = vld [vmem:[%s8458_s1 + $0xe94] ss:$8 sps:$4 sm:$0xff]  }
 0x16b   :  { %3947 = vmatpush1.bf16.msra.mxu1 %v6121_v0  ;;  %v6217_v0 = vld [vmem:[%s8458_s1 + $0x690] ss:$8 sps:$4 sm:$0xff]  }
 0x16c   :  { %4291 = vmatpush1.bf16.msra.mxu0 %v6124_v1  ;;  %3948 = vmatprep.subr.bf16.mxu1 %v6129_v2  ;;  %v6220_v1 = vld [vmem:[%s8458_s1 + $0xe90] ss:$8 sps:$4 sm:$0xff]   ;;  %v6225_v2 = vld [vmem:[%s8458_s1 + $0x6a4] ss:$8 sps:$4 sm:$0xff]  }
 0x16d   :  { %4292 = vmatprep.subr.bf16.mxu0 %v6132_v3  ;;  %v6228_v3 = vld [vmem:[%s8458_s1 + $0xea4] ss:$8 sps:$4 sm:$0xff]  }
 0x16f   :  { %3949 = vmatpush1.bf16.msra.mxu1 %v6127_v4  ;;  %v6223_v4 = vld [vmem:[%s8458_s1 + $0x6a0] ss:$8 sps:$4 sm:$0xff]  }
 0x170   :  { %4293 = vmatpush1.bf16.msra.mxu0 %v6130_v5  ;;  %3950 = vmatprep.subr.bf16.mxu1 %v6135_v6  ;;  %v6226_v5 = vld [vmem:[%s8458_s1 + $0xea0] ss:$8 sps:$4 sm:$0xff]   ;;  %v6231_v6 = vld [vmem:[%s8458_s1 + $0x6b4] ss:$8 sps:$4 sm:$0xff]  }
 0x171   :  { %4294 = vmatprep.subr.bf16.mxu0 %v6138_v7  ;;  %v6234_v7 = vld [vmem:[%s8458_s1 + $0xeb4] ss:$8 sps:$4 sm:$0xff]  }
 0x173   :  { %3951 = vmatpush1.bf16.msra.mxu1 %v6133_v8  ;;  %v6229_v8 = vld [vmem:[%s8458_s1 + $0x6b0] ss:$8 sps:$4 sm:$0xff]  }
 0x174   :  { %4295 = vmatpush1.bf16.msra.mxu0 %v6136_v9  ;;  %3952 = vmatprep.subr.bf16.mxu1 %v6141_v10  ;;  %v6232_v9 = vld [vmem:[%s8458_s1 + $0xeb0] ss:$8 sps:$4 sm:$0xff]   ;;  %v6237_v10 = vld [vmem:[%s8458_s1 + $0x6c4] ss:$8 sps:$4 sm:$0xff]  }
 0x175   :  { %4296 = vmatprep.subr.bf16.mxu0 %v6144_v11  ;;  %v6240_v11 = vld [vmem:[%s8458_s1 + $0xec4] ss:$8 sps:$4 sm:$0xff]  }
 0x177   :  { %3953 = vmatpush1.bf16.msra.mxu1 %v6139_v12  ;;  %v6235_v12 = vld [vmem:[%s8458_s1 + $0x6c0] ss:$8 sps:$4 sm:$0xff]  }
 0x178   :  { %4297 = vmatpush1.bf16.msra.mxu0 %v6142_v13  ;;  %3954 = vmatprep.subr.bf16.mxu1 %v6147_v14  ;;  %v6238_v13 = vld [vmem:[%s8458_s1 + $0xec0] ss:$8 sps:$4 sm:$0xff]   ;;  %v6243_v14 = vld [vmem:[%s8458_s1 + $0x6d4] ss:$8 sps:$4 sm:$0xff]  }
 0x179   :  { %4298 = vmatprep.subr.bf16.mxu0 %v6150_v15  ;;  %v6246_v15 = vld [vmem:[%s8458_s1 + $0xed4] ss:$8 sps:$4 sm:$0xff]  }
 0x17b   :  { %3955 = vmatpush1.bf16.msra.mxu1 %v6145_v16  ;;  %v6241_v16 = vld [vmem:[%s8458_s1 + $0x6d0] ss:$8 sps:$4 sm:$0xff]  }
 0x17c   :  { %4299 = vmatpush1.bf16.msra.mxu0 %v6148_v17  ;;  %3956 = vmatprep.subr.bf16.mxu1 %v6153_v18  ;;  %v6244_v17 = vld [vmem:[%s8458_s1 + $0xed0] ss:$8 sps:$4 sm:$0xff]   ;;  %v6249_v18 = vld [vmem:[%s8458_s1 + $0x6e4] ss:$8 sps:$4 sm:$0xff]  }
 0x17d   :  { %4300 = vmatprep.subr.bf16.mxu0 %v6156_v19  ;;  %v6252_v19 = vld [vmem:[%s8458_s1 + $0xee4] ss:$8 sps:$4 sm:$0xff]  }
 0x17f   :  { %3957 = vmatpush1.bf16.msra.mxu1 %v6151_v20  ;;  %v6247_v20 = vld [vmem:[%s8458_s1 + $0x6e0] ss:$8 sps:$4 sm:$0xff]  }
 0x180   :  { %4301 = vmatpush1.bf16.msra.mxu0 %v6154_v21  ;;  %3969 = vmatprep.subr.bf16.mxu1 %v6162_v22  ;;  %v6250_v21 = vld [vmem:[%s8458_s1 + $0xee0] ss:$8 sps:$4 sm:$0xff]   ;;  %v6255_v22 = vld [vmem:[%s8458_s1 + $0x6f4] ss:$8 sps:$4 sm:$0xff]  }
 0x181   :  { %4313 = vmatprep.subr.bf16.mxu0 %v6168_v25  ;;  %v6256_v25 = vld [vmem:[%s8458_s1 + $0xef0] ss:$8 sps:$4 sm:$0xff]  }
 0x182   :  { %3959 = vmatmul.mubr.bf16.vlgmr.msra.gmra.mrb[0].mxu1 %v6157_v23  ;;  %v6258_v23 = vld [vmem:[%s8458_s1 + $0xef4] ss:$8 sps:$4 sm:$0xff]  }
 0x183   :  { %4303 = vmatmul.mubr.bf16.vlgmr.msra.gmra.mrb[0].mxu0 %v6163_v24  ;;  %3970 = vmatpush1.bf16.msra.mxu1 %v6160_v26  ;;  %v6253_v24 = vld [vmem:[%s8458_s1 + $0x6f0] ss:$8 sps:$4 sm:$0xff]   ;;  %v6264_v26 = vld [vmem:[%s8458_s1 + $0x704] ss:$8 sps:$4 sm:$0xff]  }
 0x184   :  { %4314 = vmatpush1.bf16.msra.mxu0 %v6166_v27  ;;  %3971 = vmatprep.subr.bf16.mxu1 %v6171_v28  ;;  %v6270_v27 = vld [vmem:[%s8458_s1 + $0xf04] ss:$8 sps:$4 sm:$0xff]   ;;  %v6259_v28 = vld [vmem:[%s8459_s0 + $0x30] ss:$144 sps:$4 sm:$0xff]  }
 0x185   :  { %4315 = vmatprep.subr.bf16.mxu0 %v6174_v29  ;;  %4001 = vmatprep.mubr.bf16.mxu1 %v6261_v30  ;;  %v6265_v29 = vld [vmem:[%s8459_s0 + $0x70] ss:$144 sps:$4 sm:$0xff]  }
 0x186   :  { %4345 = vmatprep.mubr.bf16.mxu0 %v6267_v31  ;;  %v6262_v30 = vld [vmem:[%s8458_s1 + $0x700] ss:$8 sps:$4 sm:$0xff]  }
 0x187   :  { %3972 = vmatpush1.bf16.msra.mxu1 %v6169_v32  ;;  %v6268_v31 = vld [vmem:[%s8458_s1 + $0xf00] ss:$8 sps:$4 sm:$0xff]   ;;  %v6273_v32 = vld [vmem:[%s8458_s1 + $0x714] ss:$8 sps:$4 sm:$0xff]  }
 0x188   :  { %4316 = vmatpush1.bf16.msra.mxu0 %v6172_v33  ;;  %3973 = vmatprep.subr.bf16.mxu1 %v6177_v34  ;;  %v6276_v33 = vld [vmem:[%s8458_s1 + $0xf14] ss:$8 sps:$4 sm:$0xff]  }
 0x189   :  { %4317 = vmatprep.subr.bf16.mxu0 %v6180_v35  ;;  %v6363_v34 = vld [vmem:[%s8459_s0 + $0x3c] ss:$144 sps:$4 sm:$0xff]  }
 0x18a   :  { %v6366_v35 = vld [vmem:[%s8459_s0 + $0x7c] ss:$144 sps:$4 sm:$0xff]  }
 0x18b   :  { %3974 = vmatpush1.bf16.msra.mxu1 %v6175_v36  ;;  %v6271_v36 = vld [vmem:[%s8458_s1 + $0x710] ss:$8 sps:$4 sm:$0xff]  }
 0x18c   :  { %4318 = vmatpush1.bf16.msra.mxu0 %v6178_v37  ;;  %3975 = vmatprep.subr.bf16.mxu1 %v6183_v38  ;;  %v6274_v37 = vld [vmem:[%s8458_s1 + $0xf10] ss:$8 sps:$4 sm:$0xff]   ;;  %v6279_v38 = vld [vmem:[%s8458_s1 + $0x724] ss:$8 sps:$4 sm:$0xff]  }
 0x18d   :  { %4319 = vmatprep.subr.bf16.mxu0 %v6186_v39  ;;  %v6282_v39 = vld [vmem:[%s8458_s1 + $0xf24] ss:$8 sps:$4 sm:$0xff]  }
 0x18f   :  { %3976 = vmatpush1.bf16.msra.mxu1 %v6181_v40  ;;  %v6277_v40 = vld [vmem:[%s8458_s1 + $0x720] ss:$8 sps:$4 sm:$0xff]  }
 0x190   :  { %4320 = vmatpush1.bf16.msra.mxu0 %v6184_v41  ;;  %3977 = vmatprep.subr.bf16.mxu1 %v6189_v42  ;;  %v6280_v41 = vld [vmem:[%s8458_s1 + $0xf20] ss:$8 sps:$4 sm:$0xff]   ;;  %v6285_v42 = vld [vmem:[%s8458_s1 + $0x734] ss:$8 sps:$4 sm:$0xff]  }
 0x191   :  { %4321 = vmatprep.subr.bf16.mxu0 %v6192_v43  ;;  %v6288_v43 = vld [vmem:[%s8458_s1 + $0xf34] ss:$8 sps:$4 sm:$0xff]  }
 0x193   :  { %3978 = vmatpush1.bf16.msra.mxu1 %v6187_v44  ;;  %v6283_v44 = vld [vmem:[%s8458_s1 + $0x730] ss:$8 sps:$4 sm:$0xff]  }
 0x194   :  { %4322 = vmatpush1.bf16.msra.mxu0 %v6190_v45  ;;  %3979 = vmatprep.subr.bf16.mxu1 %v6195_v46  ;;  %v6286_v45 = vld [vmem:[%s8458_s1 + $0xf30] ss:$8 sps:$4 sm:$0xff]   ;;  %v6291_v46 = vld [vmem:[%s8458_s1 + $0x744] ss:$8 sps:$4 sm:$0xff]  }
 0x195   :  { %4323 = vmatprep.subr.bf16.mxu0 %v6198_v47  ;;  %v6294_v47 = vld [vmem:[%s8458_s1 + $0xf44] ss:$8 sps:$4 sm:$0xff]  }
 0x197   :  { %3980 = vmatpush1.bf16.msra.mxu1 %v6193_v48  ;;  %v6289_v48 = vld [vmem:[%s8458_s1 + $0x740] ss:$8 sps:$4 sm:$0xff]  }
 0x198   :  { %4324 = vmatpush1.bf16.msra.mxu0 %v6196_v49  ;;  %3981 = vmatprep.subr.bf16.mxu1 %v6201_v50  ;;  %v6292_v49 = vld [vmem:[%s8458_s1 + $0xf40] ss:$8 sps:$4 sm:$0xff]   ;;  %v6297_v50 = vld [vmem:[%s8458_s1 + $0x754] ss:$8 sps:$4 sm:$0xff]  }
 0x199   :  { %4325 = vmatprep.subr.bf16.mxu0 %v6204_v51  ;;  %v6300_v51 = vld [vmem:[%s8458_s1 + $0xf54] ss:$8 sps:$4 sm:$0xff]  }
 0x19b   :  { %3982 = vmatpush1.bf16.msra.mxu1 %v6199_v52  ;;  %v6295_v52 = vld [vmem:[%s8458_s1 + $0x750] ss:$8 sps:$4 sm:$0xff]  }
 0x19c   :  { %4326 = vmatpush1.bf16.msra.mxu0 %v6202_v53  ;;  %3983 = vmatprep.subr.bf16.mxu1 %v6207_v54  ;;  %v6298_v53 = vld [vmem:[%s8458_s1 + $0xf50] ss:$8 sps:$4 sm:$0xff]   ;;  %v6303_v54 = vld [vmem:[%s8458_s1 + $0x764] ss:$8 sps:$4 sm:$0xff]  }
 0x19d   :  { %4327 = vmatprep.subr.bf16.mxu0 %v6210_v55  ;;  %v6306_v55 = vld [vmem:[%s8458_s1 + $0xf64] ss:$8 sps:$4 sm:$0xff]  }
 0x19f   :  { %3984 = vmatpush1.bf16.msra.mxu1 %v6205_v56  ;;  %v6301_v56 = vld [vmem:[%s8458_s1 + $0x760] ss:$8 sps:$4 sm:$0xff]  }
 0x1a0   :  { %4328 = vmatpush1.bf16.msra.mxu0 %v6208_v57  ;;  %3985 = vmatprep.subr.bf16.mxu1 %v6213_v58  ;;  %v6304_v57 = vld [vmem:[%s8458_s1 + $0xf60] ss:$8 sps:$4 sm:$0xff]   ;;  %v6309_v58 = vld [vmem:[%s8458_s1 + $0x774] ss:$8 sps:$4 sm:$0xff]  }
 0x1a1   :  { %4329 = vmatprep.subr.bf16.mxu0 %v6216_v59  ;;  %v6312_v59 = vld [vmem:[%s8458_s1 + $0xf74] ss:$8 sps:$4 sm:$0xff]  }
 0x1a3   :  { %3986 = vmatpush1.bf16.msra.mxu1 %v6211_v60  ;;  %v6307_v60 = vld [vmem:[%s8458_s1 + $0x770] ss:$8 sps:$4 sm:$0xff]  }
 0x1a4   :  { %4330 = vmatpush1.bf16.msra.mxu0 %v6214_v61  ;;  %3987 = vmatprep.subr.bf16.mxu1 %v6219_v62  ;;  %v6310_v61 = vld [vmem:[%s8458_s1 + $0xf70] ss:$8 sps:$4 sm:$0xff]   ;;  %v6315_v62 = vld [vmem:[%s8458_s1 + $0x784] ss:$8 sps:$4 sm:$0xff]  }
 0x1a5   :  { %4331 = vmatprep.subr.bf16.mxu0 %v6222_v63  ;;  %v6318_v63 = vld [vmem:[%s8458_s1 + $0xf84] ss:$8 sps:$4 sm:$0xff]  }
 0x1a7   :  { %3988 = vmatpush1.bf16.msra.mxu1 %v6217_v0  ;;  %v6313_v0 = vld [vmem:[%s8458_s1 + $0x780] ss:$8 sps:$4 sm:$0xff]  }
 0x1a8   :  { %4332 = vmatpush1.bf16.msra.mxu0 %v6220_v1  ;;  %3989 = vmatprep.subr.bf16.mxu1 %v6225_v2  ;;  %v6316_v1 = vld [vmem:[%s8458_s1 + $0xf80] ss:$8 sps:$4 sm:$0xff]   ;;  %v6321_v2 = vld [vmem:[%s8458_s1 + $0x794] ss:$8 sps:$4 sm:$0xff]  }
 0x1a9   :  { %4333 = vmatprep.subr.bf16.mxu0 %v6228_v3  ;;  %v6324_v3 = vld [vmem:[%s8458_s1 + $0xf94] ss:$8 sps:$4 sm:$0xff]  }
 0x1ab   :  { %3990 = vmatpush1.bf16.msra.mxu1 %v6223_v4  ;;  %v6319_v4 = vld [vmem:[%s8458_s1 + $0x790] ss:$8 sps:$4 sm:$0xff]  }
 0x1ac   :  { %4334 = vmatpush1.bf16.msra.mxu0 %v6226_v5  ;;  %3991 = vmatprep.subr.bf16.mxu1 %v6231_v6  ;;  %v6322_v5 = vld [vmem:[%s8458_s1 + $0xf90] ss:$8 sps:$4 sm:$0xff]   ;;  %v6327_v6 = vld [vmem:[%s8458_s1 + $0x7a4] ss:$8 sps:$4 sm:$0xff]  }
 0x1ad   :  { %4335 = vmatprep.subr.bf16.mxu0 %v6234_v7  ;;  %v6330_v7 = vld [vmem:[%s8458_s1 + $0xfa4] ss:$8 sps:$4 sm:$0xff]  }
 0x1af   :  { %3992 = vmatpush1.bf16.msra.mxu1 %v6229_v8  ;;  %v6325_v8 = vld [vmem:[%s8458_s1 + $0x7a0] ss:$8 sps:$4 sm:$0xff]  }
 0x1b0   :  { %4336 = vmatpush1.bf16.msra.mxu0 %v6232_v9  ;;  %3993 = vmatprep.subr.bf16.mxu1 %v6237_v10  ;;  %v6328_v9 = vld [vmem:[%s8458_s1 + $0xfa0] ss:$8 sps:$4 sm:$0xff]   ;;  %v6333_v10 = vld [vmem:[%s8458_s1 + $0x7b4] ss:$8 sps:$4 sm:$0xff]  }
 0x1b1   :  { %4337 = vmatprep.subr.bf16.mxu0 %v6240_v11  ;;  %v6336_v11 = vld [vmem:[%s8458_s1 + $0xfb4] ss:$8 sps:$4 sm:$0xff]  }
 0x1b3   :  { %3994 = vmatpush1.bf16.msra.mxu1 %v6235_v12  ;;  %v6331_v12 = vld [vmem:[%s8458_s1 + $0x7b0] ss:$8 sps:$4 sm:$0xff]  }
 0x1b4   :  { %4338 = vmatpush1.bf16.msra.mxu0 %v6238_v13  ;;  %3995 = vmatprep.subr.bf16.mxu1 %v6243_v14  ;;  %v6334_v13 = vld [vmem:[%s8458_s1 + $0xfb0] ss:$8 sps:$4 sm:$0xff]   ;;  %v6339_v14 = vld [vmem:[%s8458_s1 + $0x7c4] ss:$8 sps:$4 sm:$0xff]  }
 0x1b5   :  { %4339 = vmatprep.subr.bf16.mxu0 %v6246_v15  ;;  %v6342_v15 = vld [vmem:[%s8458_s1 + $0xfc4] ss:$8 sps:$4 sm:$0xff]  }
 0x1b7   :  { %3996 = vmatpush1.bf16.msra.mxu1 %v6241_v16  ;;  %v6337_v16 = vld [vmem:[%s8458_s1 + $0x7c0] ss:$8 sps:$4 sm:$0xff]  }
 0x1b8   :  { %4340 = vmatpush1.bf16.msra.mxu0 %v6244_v17  ;;  %3997 = vmatprep.subr.bf16.mxu1 %v6249_v18  ;;  %v6340_v17 = vld [vmem:[%s8458_s1 + $0xfc0] ss:$8 sps:$4 sm:$0xff]   ;;  %v6345_v18 = vld [vmem:[%s8458_s1 + $0x7d4] ss:$8 sps:$4 sm:$0xff]  }
 0x1b9   :  { %4341 = vmatprep.subr.bf16.mxu0 %v6252_v19  ;;  %v6348_v19 = vld [vmem:[%s8458_s1 + $0xfd4] ss:$8 sps:$4 sm:$0xff]  }
 0x1bb   :  { %3998 = vmatpush1.bf16.msra.mxu1 %v6247_v20  ;;  %v6343_v20 = vld [vmem:[%s8458_s1 + $0x7d0] ss:$8 sps:$4 sm:$0xff]  }
 0x1bc   :  { %4342 = vmatpush1.bf16.msra.mxu0 %v6250_v21  ;;  %3999 = vmatprep.subr.bf16.mxu1 %v6255_v22  ;;  %v6346_v21 = vld [vmem:[%s8458_s1 + $0xfd0] ss:$8 sps:$4 sm:$0xff]   ;;  %v6351_v22 = vld [vmem:[%s8458_s1 + $0x7e4] ss:$8 sps:$4 sm:$0xff]  }
 0x1bd   :  { %4343 = vmatprep.subr.bf16.mxu0 %v6258_v23  ;;  %v6354_v23 = vld [vmem:[%s8458_s1 + $0xfe4] ss:$8 sps:$4 sm:$0xff]  }
 0x1bf   :  { %4000 = vmatpush1.bf16.msra.mxu1 %v6253_v24  ;;  %v6349_v24 = vld [vmem:[%s8458_s1 + $0x7e0] ss:$8 sps:$4 sm:$0xff]  }
 0x1c0   :  { %4344 = vmatpush1.bf16.msra.mxu0 %v6256_v25  ;;  %4012 = vmatprep.subr.bf16.mxu1 %v6264_v26  ;;  %v6352_v25 = vld [vmem:[%s8458_s1 + $0xfe0] ss:$8 sps:$4 sm:$0xff]   ;;  %v6357_v26 = vld [vmem:[%s8458_s1 + $0x7f4] ss:$8 sps:$4 sm:$0xff]  }
 0x1c1   :  { %4356 = vmatprep.subr.bf16.mxu0 %v6270_v27  ;;  %v6360_v27 = vld [vmem:[%s8458_s1 + $0xff4] ss:$8 sps:$4 sm:$0xff]  }
 0x1c2   :  { %4002 = vmatmul.mubr.bf16.vlgmr.msra.gmra.mrb[0].mxu1 %v6259_v28  ;;  %v6355_v28 = vld [vmem:[%s8458_s1 + $0x7f0] ss:$8 sps:$4 sm:$0xff]  }
 0x1c3   :  { %4346 = vmatmul.mubr.bf16.vlgmr.msra.gmra.mrb[0].mxu0 %v6265_v29  ;;  %4013 = vmatpush1.bf16.msra.mxu1 %v6262_v30  ;;  %v6358_v29 = vld [vmem:[%s8458_s1 + $0xff0] ss:$8 sps:$4 sm:$0xff]   ;;  %v6369_v30 = vld [vmem:[%s8458_s1 + $0x1004] ss:$8 sps:$4 sm:$0xff]  }
 0x1c4   :  { %4357 = vmatpush1.bf16.msra.mxu0 %v6268_v31  ;;  %4014 = vmatprep.subr.bf16.mxu1 %v6273_v32  ;;  %v6361_v31 = vld [vmem:[%s8459_s0 + $0x38] ss:$144 sps:$4 sm:$0xff]  }
 0x1c5   :  { %4358 = vmatprep.subr.bf16.mxu0 %v6276_v33  ;;  %4044 = vmatprep.mubr.bf16.mxu1 %v6363_v34  ;;  %v6364_v32 = vld [vmem:[%s8459_s0 + $0x78] ss:$144 sps:$4 sm:$0xff]   ;;  %v6417_v34 = vld [vmem:[%s8459_s0 + $0x84] ss:$144 sps:$4 sm:$0xff]  }
 0x1c6   :  { %4388 = vmatprep.mubr.bf16.mxu0 %v6366_v35  ;;  %v6367_v33 = vld [vmem:[%s8458_s1 + $0x1000] ss:$8 sps:$4 sm:$0xff]   ;;  %v6372_v35 = vld [vmem:[%s8458_s1 + $0x1014] ss:$8 sps:$4 sm:$0xff]  }
 0x1c7   :  { %4015 = vmatpush1.bf16.msra.mxu1 %v6271_v36  ;;  %v6370_v36 = vld [vmem:[%s8458_s1 + $0x1010] ss:$8 sps:$4 sm:$0xff]  }
 0x1c8   :  { %4359 = vmatpush1.bf16.msra.mxu0 %v6274_v37  ;;  %4016 = vmatprep.subr.bf16.mxu1 %v6279_v38  ;;  %v6375_v37 = vld [vmem:[%s8458_s1 + $0x1024] ss:$8 sps:$4 sm:$0xff]   ;;  %v6373_v38 = vld [vmem:[%s8458_s1 + $0x1020] ss:$8 sps:$4 sm:$0xff]  }
 0x1c9   :  { %4360 = vmatprep.subr.bf16.mxu0 %v6282_v39  ;;  %v6378_v39 = vld [vmem:[%s8458_s1 + $0x1034] ss:$8 sps:$4 sm:$0xff]  }
 0x1cb   :  { %4017 = vmatpush1.bf16.msra.mxu1 %v6277_v40  ;;  %v6376_v40 = vld [vmem:[%s8458_s1 + $0x1030] ss:$8 sps:$4 sm:$0xff]  }
 0x1cc   :  { %4361 = vmatpush1.bf16.msra.mxu0 %v6280_v41  ;;  %4018 = vmatprep.subr.bf16.mxu1 %v6285_v42  ;;  %v6381_v41 = vld [vmem:[%s8458_s1 + $0x1044] ss:$8 sps:$4 sm:$0xff]   ;;  %v6379_v42 = vld [vmem:[%s8458_s1 + $0x1040] ss:$8 sps:$4 sm:$0xff]  }
 0x1cd   :  { %4362 = vmatprep.subr.bf16.mxu0 %v6288_v43  ;;  %v6384_v43 = vld [vmem:[%s8458_s1 + $0x1054] ss:$8 sps:$4 sm:$0xff]  }
 0x1cf   :  { %4019 = vmatpush1.bf16.msra.mxu1 %v6283_v44  ;;  %v6382_v44 = vld [vmem:[%s8458_s1 + $0x1050] ss:$8 sps:$4 sm:$0xff]  }
 0x1d0   :  { %4363 = vmatpush1.bf16.msra.mxu0 %v6286_v45  ;;  %4020 = vmatprep.subr.bf16.mxu1 %v6291_v46  ;;  %v6387_v45 = vld [vmem:[%s8458_s1 + $0x1064] ss:$8 sps:$4 sm:$0xff]   ;;  %v6385_v46 = vld [vmem:[%s8458_s1 + $0x1060] ss:$8 sps:$4 sm:$0xff]  }
 0x1d1   :  { %4364 = vmatprep.subr.bf16.mxu0 %v6294_v47  ;;  %v6390_v47 = vld [vmem:[%s8458_s1 + $0x1074] ss:$8 sps:$4 sm:$0xff]  }
 0x1d3   :  { %4021 = vmatpush1.bf16.msra.mxu1 %v6289_v48  ;;  %v6388_v48 = vld [vmem:[%s8458_s1 + $0x1070] ss:$8 sps:$4 sm:$0xff]  }
 0x1d4   :  { %4365 = vmatpush1.bf16.msra.mxu0 %v6292_v49  ;;  %4022 = vmatprep.subr.bf16.mxu1 %v6297_v50  ;;  %v6393_v49 = vld [vmem:[%s8458_s1 + $0x1084] ss:$8 sps:$4 sm:$0xff]   ;;  %v6391_v50 = vld [vmem:[%s8458_s1 + $0x1080] ss:$8 sps:$4 sm:$0xff]  }
 0x1d5   :  { %4366 = vmatprep.subr.bf16.mxu0 %v6300_v51  ;;  %v6396_v51 = vld [vmem:[%s8458_s1 + $0x1094] ss:$8 sps:$4 sm:$0xff]  }
 0x1d7   :  { %4023 = vmatpush1.bf16.msra.mxu1 %v6295_v52  ;;  %v6394_v52 = vld [vmem:[%s8458_s1 + $0x1090] ss:$8 sps:$4 sm:$0xff]  }
 0x1d8   :  { %4367 = vmatpush1.bf16.msra.mxu0 %v6298_v53  ;;  %4024 = vmatprep.subr.bf16.mxu1 %v6303_v54  ;;  %v6399_v53 = vld [vmem:[%s8458_s1 + $0x10a4] ss:$8 sps:$4 sm:$0xff]   ;;  %v6397_v54 = vld [vmem:[%s8458_s1 + $0x10a0] ss:$8 sps:$4 sm:$0xff]  }
 0x1d9   :  { %4368 = vmatprep.subr.bf16.mxu0 %v6306_v55  ;;  %v6402_v55 = vld [vmem:[%s8458_s1 + $0x10b4] ss:$8 sps:$4 sm:$0xff]  }
 0x1db   :  { %4025 = vmatpush1.bf16.msra.mxu1 %v6301_v56  ;;  %v6400_v56 = vld [vmem:[%s8458_s1 + $0x10b0] ss:$8 sps:$4 sm:$0xff]  }
 0x1dc   :  { %4369 = vmatpush1.bf16.msra.mxu0 %v6304_v57  ;;  %4026 = vmatprep.subr.bf16.mxu1 %v6309_v58  ;;  %v6405_v57 = vld [vmem:[%s8458_s1 + $0x10c4] ss:$8 sps:$4 sm:$0xff]   ;;  %v6403_v58 = vld [vmem:[%s8458_s1 + $0x10c0] ss:$8 sps:$4 sm:$0xff]  }
 0x1dd   :  { %4370 = vmatprep.subr.bf16.mxu0 %v6312_v59  ;;  %v6408_v59 = vld [vmem:[%s8458_s1 + $0x10d4] ss:$8 sps:$4 sm:$0xff]  }
 0x1df   :  { %4027 = vmatpush1.bf16.msra.mxu1 %v6307_v60  ;;  %v6406_v60 = vld [vmem:[%s8458_s1 + $0x10d0] ss:$8 sps:$4 sm:$0xff]  }
 0x1e0   :  { %4371 = vmatpush1.bf16.msra.mxu0 %v6310_v61  ;;  %4028 = vmatprep.subr.bf16.mxu1 %v6315_v62  ;;  %v6411_v61 = vld [vmem:[%s8458_s1 + $0x10e4] ss:$8 sps:$4 sm:$0xff]   ;;  %v6409_v62 = vld [vmem:[%s8458_s1 + $0x10e0] ss:$8 sps:$4 sm:$0xff]  }
 0x1e1   :  { %4372 = vmatprep.subr.bf16.mxu0 %v6318_v63  ;;  %v6414_v63 = vld [vmem:[%s8458_s1 + $0x10f4] ss:$8 sps:$4 sm:$0xff]  }
 0x1e3   :  { %4029 = vmatpush1.bf16.msra.mxu1 %v6313_v0  ;;  %v6412_v0 = vld [vmem:[%s8458_s1 + $0x10f0] ss:$8 sps:$4 sm:$0xff]  }
 0x1e4   :  { %4373 = vmatpush1.bf16.msra.mxu0 %v6316_v1  ;;  %4030 = vmatprep.subr.bf16.mxu1 %v6321_v2  ;;  %v6420_v1 = vld [vmem:[%s8458_s1 + $0x1104] ss:$8 sps:$4 sm:$0xff]   ;;  %v6415_v2 = vld [vmem:[%s8459_s0 + $0x80] ss:$144 sps:$4 sm:$0xff]  }
 0x1e5   :  { %4374 = vmatprep.subr.bf16.mxu0 %v6324_v3  ;;  %v6418_v3 = vld [vmem:[%s8458_s1 + $0x1100] ss:$8 sps:$4 sm:$0xff]  }
 0x1e7   :  { %4031 = vmatpush1.bf16.msra.mxu1 %v6319_v4  ;;  %v6468_v4 = vld [vmem:[%s8459_s0 + $0x8c] ss:$144 sps:$4 sm:$0xff]  }
 0x1e8   :  { %4375 = vmatpush1.bf16.msra.mxu0 %v6322_v5  ;;  %4032 = vmatprep.subr.bf16.mxu1 %v6327_v6  ;;  %v6423_v5 = vld [vmem:[%s8458_s1 + $0x1114] ss:$8 sps:$4 sm:$0xff]   ;;  %v6421_v6 = vld [vmem:[%s8458_s1 + $0x1110] ss:$8 sps:$4 sm:$0xff]  }
 0x1e9   :  { %4376 = vmatprep.subr.bf16.mxu0 %v6330_v7  ;;  %v6426_v7 = vld [vmem:[%s8458_s1 + $0x1124] ss:$8 sps:$4 sm:$0xff]  }
 0x1eb   :  { %4033 = vmatpush1.bf16.msra.mxu1 %v6325_v8  ;;  %v6424_v8 = vld [vmem:[%s8458_s1 + $0x1120] ss:$8 sps:$4 sm:$0xff]  }
 0x1ec   :  { %4377 = vmatpush1.bf16.msra.mxu0 %v6328_v9  ;;  %4034 = vmatprep.subr.bf16.mxu1 %v6333_v10  ;;  %v6429_v9 = vld [vmem:[%s8458_s1 + $0x1134] ss:$8 sps:$4 sm:$0xff]   ;;  %v6427_v10 = vld [vmem:[%s8458_s1 + $0x1130] ss:$8 sps:$4 sm:$0xff]  }
 0x1ed   :  { %4378 = vmatprep.subr.bf16.mxu0 %v6336_v11  ;;  %v6432_v11 = vld [vmem:[%s8458_s1 + $0x1144] ss:$8 sps:$4 sm:$0xff]  }
 0x1ef   :  { %4035 = vmatpush1.bf16.msra.mxu1 %v6331_v12  ;;  %v6430_v12 = vld [vmem:[%s8458_s1 + $0x1140] ss:$8 sps:$4 sm:$0xff]  }
 0x1f0   :  { %4379 = vmatpush1.bf16.msra.mxu0 %v6334_v13  ;;  %4036 = vmatprep.subr.bf16.mxu1 %v6339_v14  ;;  %v6435_v13 = vld [vmem:[%s8458_s1 + $0x1154] ss:$8 sps:$4 sm:$0xff]   ;;  %v6433_v14 = vld [vmem:[%s8458_s1 + $0x1150] ss:$8 sps:$4 sm:$0xff]  }
 0x1f1   :  { %4380 = vmatprep.subr.bf16.mxu0 %v6342_v15  ;;  %v6438_v15 = vld [vmem:[%s8458_s1 + $0x1164] ss:$8 sps:$4 sm:$0xff]  }
 0x1f3   :  { %4037 = vmatpush1.bf16.msra.mxu1 %v6337_v16  ;;  %v6436_v16 = vld [vmem:[%s8458_s1 + $0x1160] ss:$8 sps:$4 sm:$0xff]  }
 0x1f4   :  { %4381 = vmatpush1.bf16.msra.mxu0 %v6340_v17  ;;  %4038 = vmatprep.subr.bf16.mxu1 %v6345_v18  ;;  %v6441_v17 = vld [vmem:[%s8458_s1 + $0x1174] ss:$8 sps:$4 sm:$0xff]   ;;  %v6439_v18 = vld [vmem:[%s8458_s1 + $0x1170] ss:$8 sps:$4 sm:$0xff]  }
 0x1f5   :  { %4382 = vmatprep.subr.bf16.mxu0 %v6348_v19  ;;  %v6444_v19 = vld [vmem:[%s8458_s1 + $0x1184] ss:$8 sps:$4 sm:$0xff]  }
 0x1f7   :  { %4039 = vmatpush1.bf16.msra.mxu1 %v6343_v20  ;;  %v6469_v20 = vld [vmem:[%s8460_s3 + $0x40] sm:$0xff]  }
 0x1f8   :  { %4383 = vmatpush1.bf16.msra.mxu0 %v6346_v21  ;;  %4040 = vmatprep.subr.bf16.mxu1 %v6351_v22  ;;  %v6470_v21 = vld [vmem:[%s8460_s3] sm:$0xff]   ;;  %v6471_v22 = vld [vmem:[%s8460_s3 + $0x48] sm:$0xff]  }
 0x1f9   :  { %4384 = vmatprep.subr.bf16.mxu0 %v6354_v23  ;;  %v6472_v23 = vld [vmem:[%s8460_s3 + $0x8] sm:$0xff]  }
 0x1fb   :  { %4041 = vmatpush1.bf16.msra.mxu1 %v6349_v24  ;;  %v6473_v24 = vld [vmem:[%s8460_s3 + $0x50] sm:$0xff]  }
 0x1fc   :  { %4385 = vmatpush1.bf16.msra.mxu0 %v6352_v25  ;;  %4042 = vmatprep.subr.bf16.mxu1 %v6357_v26  ;;  %v6442_v25 = vld [vmem:[%s8458_s1 + $0x1180] ss:$8 sps:$4 sm:$0xff]   ;;  %v6447_v26 = vld [vmem:[%s8458_s1 + $0x1194] ss:$8 sps:$4 sm:$0xff]  }
 0x1fd   :  { %4386 = vmatprep.subr.bf16.mxu0 %v6360_v27  ;;  %v6445_v27 = vld [vmem:[%s8458_s1 + $0x1190] ss:$8 sps:$4 sm:$0xff]  }
 0x1ff   :  { %4043 = vmatpush1.bf16.msra.mxu1 %v6355_v28  ;;  %v6474_v28 = vld [vmem:[%s8460_s3 + $0x10] sm:$0xff]  }
 0x200   :  { %4387 = vmatpush1.bf16.msra.mxu0 %v6358_v29  ;;  %5426 = vmatprep.subr.bf16.mxu1 %v6469_v20  ;;  %v6450_v29 = vld [vmem:[%s8458_s1 + $0x11a4] ss:$8 sps:$4 sm:$0xff]   ;;  %v6487_v20 = vld [vmem:[%s8461_s5 + $0x10] sm:$0xff]  }
 0x201   :  { %4399 = vmatprep.subr.bf16.mxu0 %v6369_v30  ;;  %v6475_v30 = vld [vmem:[%s8460_s3 + $0x58] sm:$0xff]  }
 0x202   :  { %4045 = vmatmul.mubr.bf16.vlgmr.msra.gmra.mrb[0].mxu1 %v6361_v31  ;;  %v6476_v31 = vld [vmem:[%s8460_s3 + $0x18] sm:$0xff]  }
 0x203   :  { %4389 = vmatmul.mubr.bf16.vlgmr.msra.gmra.mrb[0].mxu0 %v6364_v32  ;;  %5427 = vmatpush3.bf16.msra.mxu1 %v6470_v21  ;;  %v6477_v32 = vld [vmem:[%s8460_s3 + $0x60] sm:$0xff]   ;;  %v6488_v21 = vld [vmem:[%s8461_s5 + $0x18] sm:$0xff]  }
 0x204   :  { %4400 = vmatpush1.bf16.msra.mxu0 %v6367_v33  ;;  %4431 = vmatprep.mubr.bf16.mxu0 %v6417_v34  ;;  %v6448_v33 = vld [vmem:[%s8458_s1 + $0x11a0] ss:$8 sps:$4 sm:$0xff]   ;;  %v6453_v34 = vld [vmem:[%s8458_s1 + $0x11b4] ss:$8 sps:$4 sm:$0xff]  }
 0x205   :  { %4401 = vmatprep.subr.bf16.mxu0 %v6372_v35  ;;  %5428 = vmatprep.subr.bf16.mxu1 %v6471_v22  ;;  %v6478_v35 = vld [vmem:[%s8460_s3 + $0x20] sm:$0xff]  }
 0x206   :  { %v6489_v22 = vld [vmem:[%s8461_s5 + $0x20] sm:$0xff]  }
 0x207   :  { %5429 = vmatpush3.bf16.msra.mxu1 %v6472_v23  ;;  %v6490_v23 = vld [vmem:[%s8461_s5 + $0x28] sm:$0xff]  }
 0x208   :  { %4402 = vmatpush1.bf16.msra.mxu0 %v6370_v36  ;;  %5430 = vmatprep.subr.bf16.mxu1 %v6473_v24  ;;  %v6479_v36 = vld [vmem:[%s8460_s3 + $0x68] sm:$0xff]   ;;  %v6491_v24 = vld [vmem:[%s8461_s5 + $0x30] sm:$0xff]  }
 0x209   :  { %4403 = vmatprep.subr.bf16.mxu0 %v6375_v37  ;;  %v6451_v37 = vld [vmem:[%s8458_s1 + $0x11b0] ss:$8 sps:$4 sm:$0xff]  }
 0x20b   :  { %5431 = vmatpush3.bf16.msra.mxu1 %v6474_v28 }
 0x20c   :  { %4404 = vmatpush1.bf16.msra.mxu0 %v6373_v38  ;;  %5432 = vmatprep.subr.bf16.mxu1 %v6475_v30  ;;  %v6456_v38 = vld [vmem:[%s8458_s1 + $0x11c4] ss:$8 sps:$4 sm:$0xff]  }
 0x20d   :  { %4405 = vmatprep.subr.bf16.mxu0 %v6378_v39  ;;  %v6454_v39 = vld [vmem:[%s8458_s1 + $0x11c0] ss:$8 sps:$4 sm:$0xff]  }
 0x20f   :  { %5433 = vmatpush3.bf16.msra.mxu1 %v6476_v31 }
 0x210   :  { %4406 = vmatpush1.bf16.msra.mxu0 %v6376_v40  ;;  %5434 = vmatprep.subr.bf16.mxu1 %v6477_v32  ;;  %v6459_v40 = vld [vmem:[%s8458_s1 + $0x11d4] ss:$8 sps:$4 sm:$0xff]  }
 0x211   :  { %4407 = vmatprep.subr.bf16.mxu0 %v6381_v41  ;;  %v6457_v41 = vld [vmem:[%s8458_s1 + $0x11d0] ss:$8 sps:$4 sm:$0xff]  }
 0x213   :  { %5435 = vmatpush3.bf16.msra.mxu1 %v6478_v35 }
 0x214   :  { %4408 = vmatpush1.bf16.msra.mxu0 %v6379_v42  ;;  %5436 = vmatprep.subr.bf16.mxu1 %v6479_v36  ;;  %v6462_v42 = vld [vmem:[%s8458_s1 + $0x11e4] ss:$8 sps:$4 sm:$0xff]  }
 0x215   :  { %4409 = vmatprep.subr.bf16.mxu0 %v6384_v43  ;;  %v6460_v43 = vld [vmem:[%s8458_s1 + $0x11e0] ss:$8 sps:$4 sm:$0xff]  }
 0x218   :  { %4410 = vmatpush1.bf16.msra.mxu0 %v6382_v44  ;;  %v6465_v44 = vld [vmem:[%s8458_s1 + $0x11f4] ss:$8 sps:$4 sm:$0xff]  }
 0x219   :  { %4411 = vmatprep.subr.bf16.mxu0 %v6387_v45  ;;  %v6463_v45 = vld [vmem:[%s8458_s1 + $0x11f0] ss:$8 sps:$4 sm:$0xff]  }
 0x21c   :  { %4412 = vmatpush1.bf16.msra.mxu0 %v6385_v46  ;;  %v6466_v46 = vld [vmem:[%s8459_s0 + $0x88] ss:$144 sps:$4 sm:$0xff]  }
 0x21d   :  { %4413 = vmatprep.subr.bf16.mxu0 %v6390_v47  ;;  %v6480_v47 = vld [vmem:[%s8460_s3 + $0x28] sm:$0xff]  }
 0x21e   :  { %5437 = vmatpush3.bf16.msra.mxu1 %v6480_v47 }
 0x220   :  { %4414 = vmatpush1.bf16.msra.mxu0 %v6388_v48 }
 0x221   :  { %4415 = vmatprep.subr.bf16.mxu0 %v6393_v49 }
 0x224   :  { %4416 = vmatpush1.bf16.msra.mxu0 %v6391_v50  ;;  %v6481_v50 = vld [vmem:[%s8460_s3 + $0x70] sm:$0xff]  }
 0x225   :  { %4417 = vmatprep.subr.bf16.mxu0 %v6396_v51  ;;  %5438 = vmatprep.subr.bf16.mxu1 %v6481_v50 }
 0x228   :  { %4418 = vmatpush1.bf16.msra.mxu0 %v6394_v52  ;;  %v6482_v52 = vld [vmem:[%s8460_s3 + $0x30] sm:$0xff]  }
 0x229   :  { %4419 = vmatprep.subr.bf16.mxu0 %v6399_v53  ;;  %5439 = vmatpush3.bf16.msra.mxu1 %v6482_v52 }
 0x22c   :  { %4420 = vmatpush1.bf16.msra.mxu0 %v6397_v54  ;;  %v6483_v54 = vld [vmem:[%s8460_s3 + $0x78] sm:$0xff]  }
 0x22d   :  { %4421 = vmatprep.subr.bf16.mxu0 %v6402_v55  ;;  %v6484_v55 = vld [vmem:[%s8460_s3 + $0x38] sm:$0xff]   ;;  %5440 = vmatprep.subr.bf16.mxu1 %v6483_v54 }
 0x22e   :  { %5441 = vmatpush3.bf16.msra.mxu1 %v6484_v55 }
 0x230   :  { %4422 = vmatpush1.bf16.msra.mxu0 %v6400_v56  ;;  %v6493_v56 = vmov 0.0  }
 0x231   :  { %4423 = vmatprep.subr.bf16.mxu0 %v6405_v57  ;;  %5457 = vmatprep.subr.bf16.mxu1 %v6493_v56  ;;  %v641_v57 = vlaneseq }
 0x234   :  { %4424 = vmatpush1.bf16.msra.mxu0 %v6403_v58  ;;  %v642_v58 = vshrl.u32 %v641_v57, 7 }
 0x235   :  { %4425 = vmatprep.subr.bf16.mxu0 %v6408_v59 }
 0x236   :  { %v643_v59 = vsub.s32 0, %v642_v58 }
 0x238   :  { %4426 = vmatpush1.bf16.msra.mxu0 %v6406_v60  ;;  %v639_v60 = vld [vmem:[%s8462_s2] sm:$0x3] }
 0x239   :  { %4427 = vmatprep.subr.bf16.mxu0 %v6411_v61  ;;  %v647_v61 = vsub.s32 1, %v642_v58 }
 0x23c   :  { %4428 = vmatpush1.bf16.msra.mxu0 %v6409_v62  ;;  %v644_v62 = vrot.slane %v639_v60, %v643_v59 }
 0x23d   :  { %4429 = vmatprep.subr.bf16.mxu0 %v6414_v63  ;;  %v648_v63 = vrot.slane %v639_v60, %v647_v61 }
 0x240   :  { %4430 = vmatpush1.bf16.msra.mxu0 %v6412_v0 }
 0x241   :  { %4442 = vmatprep.subr.bf16.mxu0 %v6420_v1 }
 0x243   :  { %4432 = vmatmul.mubr.bf16.vlgmr.msra.gmra.mrb[0].mxu0 %v6415_v2 }
 0x244   :  { %4443 = vmatpush1.bf16.msra.mxu0 %v6418_v3  ;;  %4474 = vmatprep.mubr.bf16.mxu0 %v6468_v4 }
 0x245   :  { %4444 = vmatprep.subr.bf16.mxu0 %v6423_v5 }
 0x248   :  { %4445 = vmatpush1.bf16.msra.mxu0 %v6421_v6 }
 0x249   :  { %4446 = vmatprep.subr.bf16.mxu0 %v6426_v7 }
 0x24c   :  { %4447 = vmatpush1.bf16.msra.mxu0 %v6424_v8 }
 0x24d   :  { %4448 = vmatprep.subr.bf16.mxu0 %v6429_v9 }
 0x250   :  { %4449 = vmatpush1.bf16.msra.mxu0 %v6427_v10 }
 0x251   :  { %4450 = vmatprep.subr.bf16.mxu0 %v6432_v11 }
 0x254   :  { %4451 = vmatpush1.bf16.msra.mxu0 %v6430_v12 }
 0x255   :  { %4452 = vmatprep.subr.bf16.mxu0 %v6435_v13 }
 0x258   :  { %4453 = vmatpush1.bf16.msra.mxu0 %v6433_v14 }
 0x259   :  { %4454 = vmatprep.subr.bf16.mxu0 %v6438_v15 }
 0x25c   :  { %4455 = vmatpush1.bf16.msra.mxu0 %v6436_v16 }
 0x25d   :  { %4456 = vmatprep.subr.bf16.mxu0 %v6441_v17 }
 0x260   :  { %4457 = vmatpush1.bf16.msra.mxu0 %v6439_v18  ;;  %v6485_v18 = vld [vmem:[%s8461_s5] sm:$0xff]  }
 0x261   :  { %4458 = vmatprep.subr.bf16.mxu0 %v6444_v19  ;;  %v6486_v19 = vld [vmem:[%s8461_s5 + $0x8] sm:$0xff]  }
 0x264   :  { %4459 = vmatpush1.bf16.msra.mxu0 %v6442_v25  ;;  %v6492_v25 = vld [vmem:[%s8461_s5 + $0x38] sm:$0xff]  }
 0x265   :  { %4460 = vmatprep.subr.bf16.mxu0 %v6447_v26 }
 0x268   :  { %4461 = vmatpush1.bf16.msra.mxu0 %v6445_v27  ;;  %v5400_v27 = vld [vmem:[%s8463_s4] ss:$0 sm:$0xff] }
 0x269   :  { %4462 = vmatprep.subr.bf16.mxu0 %v6450_v29 }
 0x26c   :  { %4463 = vmatpush1.bf16.msra.mxu0 %v6448_v33 }
 0x26d   :  { %4464 = vmatprep.subr.bf16.mxu0 %v6453_v34 }
 0x270   :  { %4465 = vmatpush1.bf16.msra.mxu0 %v6451_v37 }
 0x271   :  { %4466 = vmatprep.subr.bf16.mxu0 %v6456_v38  ;;  %v5417_v38 = vld [vmem:[%s8464_s6] ss:$0 sm:$0xff] }
 0x274   :  { %4467 = vmatpush1.bf16.msra.mxu0 %v6454_v39 }
 0x275   :  { %4468 = vmatprep.subr.bf16.mxu0 %v6459_v40 }
 0x278   :  { %4469 = vmatpush1.bf16.msra.mxu0 %v6457_v41 }
 0x279   :  { %4470 = vmatprep.subr.bf16.mxu0 %v6462_v42 }
 0x27c   :  { %4471 = vmatpush1.bf16.msra.mxu0 %v6460_v43 }
 0x27d   :  { %4472 = vmatprep.subr.bf16.mxu0 %v6465_v44 }
 0x280   :  { %4473 = vmatpush1.bf16.msra.mxu0 %v6463_v45 }
 0x283   :  { %4475 = vmatmul.mubr.bf16.vlgmr.msra.gmra.mrb[0].mxu0 %v6466_v46 }
 0x2d5   :  { %v4046_v48 = vpop.f32.mrb[0].mxu1 }
 0x2d6   :  { %v4048_v49 = vpop.f32.mrb[1].mxu1  ;;  %v5477_v0 = vadd.f32 %v4046_v48, %v644_v62 }
 0x2d7   :  { %v4050_v51 = vpop.f32.mrb[2].mxu1  ;;  %v5479_v1 = vadd.f32 %v4048_v49, %v648_v63 }
 0x2d8   :  { %v4052_v53 = vpop.f32.mrb[3].mxu1  ;;  %v5481_v3 = vadd.f32 %v4050_v51, %v644_v62 }
 0x2d9   :  { %v5483_v6 = vadd.f32 %v4052_v53, %v648_v63 }
 0x356   :  { %v4476_v2 = vpop.f32.mrb[0].mxu0 }
 0x357   :  { %v5478_v4 = vadd.f32 %v5477_v0, %v4476_v2  ;;  %v4478_v5 = vpop.f32.mrb[1].mxu0 }
 0x358   :  { %v5480_v7 = vadd.f32 %v5479_v1, %v4478_v5  ;;  %v4480_v8 = vpop.f32.mrb[2].mxu0 }
 0x359   :  { %v5482_v9 = vadd.f32 %v5481_v3, %v4480_v8  ;;  %v4482_v10 = vpop.f32.mrb[3].mxu0  ;;  %v4485_v12 = vmax.f32 %v5478_v4, 0.0 }
 0x35a   :  { %v5484_v11 = vadd.f32 %v5483_v6, %v4482_v10  ;;  %v4486_v14 = vmax.f32 %v5480_v7, 0.0 }
 0x35b   :  { %v4487_v13 = vmax.f32 %v5482_v9, 0.0 }
 0x35c   :  { %v4488_v15 = vmax.f32 %v5484_v11, 0.0 }
 0x35d   :  { %v4489_v16 = vpack.c.bf16 %v4487_v13, %v4485_v12 }
 0x35e   :  { %v4490_v17 = vpack.c.bf16 %v4488_v15, %v4486_v14 }
 0x360   :  { %4658 = vmatprep.mubr.bf16.mxu1 %v4490_v17 }
 0x361   :  { %4659 = vmatmul.mubr.bf16.vlgmr.msra.gmra.mrb[4].mxu1 %v4489_v16 }
 0x362   :  { %5458 = vmatpush3.bf16.msra.mxu1 %v6485_v18  ;;  %5473 = vmatprep.mubr.msk.bf16.mxu1 %vm6494_vm0, %v6493_v56 }
 0x363   :  { %5459 = vmatprep.subr.bf16.mxu1 %v6493_v56 }
 0x366   :  { %5460 = vmatpush3.bf16.msra.mxu1 %v6486_v19 }
 0x367   :  { %5461 = vmatprep.subr.bf16.mxu1 %v6493_v56 }
 0x36a   :  { %5462 = vmatpush3.bf16.msra.mxu1 %v6487_v20 }
 0x36b   :  { %5463 = vmatprep.subr.bf16.mxu1 %v6493_v56 }
 0x36e   :  { %5464 = vmatpush3.bf16.msra.mxu1 %v6488_v21 }
 0x36f   :  { %5465 = vmatprep.subr.bf16.mxu1 %v6493_v56 }
 0x372   :  { %5466 = vmatpush3.bf16.msra.mxu1 %v6489_v22 }
 0x373   :  { %5467 = vmatprep.subr.bf16.mxu1 %v6493_v56 }
 0x376   :  { %5468 = vmatpush3.bf16.msra.mxu1 %v6490_v23 }
 0x377   :  { %5469 = vmatprep.subr.bf16.mxu1 %v6493_v56 }
 0x37a   :  { %5470 = vmatpush3.bf16.msra.mxu1 %v6491_v24 }
 0x37b   :  { %5471 = vmatprep.subr.bf16.mxu1 %v6493_v56 }
 0x37e   :  { %5472 = vmatpush3.bf16.msra.mxu1 %v6492_v25 }
 0x434   :  { %v5442_v26 = vpop.f32.mrb[4].mxu1 }
 0x435   :  { %v5443_v28 = vpop.f32.mrb[5].mxu1 }
 0x436   :  { %v5444_v29 = vadd.f32 %v5443_v28, %v5442_v26  ;;  %v5445_v30 = vpop.f32.mrb[6].mxu1 }
 0x437   :  { %v5446_v31 = vpop.f32.mrb[7].mxu1 }
 0x438   :  { %v4661_v32 = vadd.f32 %v5444_v29, %v5400_v27  ;;  %v5447_v33 = vadd.f32 %v5446_v31, %v5445_v30 }
 0x43a   :  { %v4664_v34 = vadd.f32 %v5447_v33, %v5400_v27  ;;  %v4667_v35 = vmax.f32 %v4661_v32, 0.0 }
 0x43c   :  { %v4668_v36 = vmax.f32 %v4664_v34, 0.0 }
 0x43e   :  { %v4669_v37 = vpack.c.bf16 %v4668_v36, %v4667_v35 }
 0x440   :  { %5474 = vmatmul.mubr.bf16.vlgmr.msra.gmra.mrb[8].mxu1 %v4669_v37 }
 0x513   :  { %v4775_v39 = vpop.f32.mrb[8].mxu1 }
 0x514   :  { %v4776_v40 = vadd.f32 %v5417_v38, %v4775_v39  ;;  %v5475_v41 = vpop.f32.mrb[9].mxu1 }
 0x515   :  { %v4778_v42 = vpop.f32.mrb[10].mxu1 }
 0x516   :  { %4782 = vst [vmem:[%s8465_s7] sm:$0xff] %v4776_v40  ;;  %v4779_v43 = vadd.f32 %v5417_v38, %v4778_v42  ;;  %v5476_v44 = vpop.f32.mrb[11].mxu1 }
 0x518   :  { %4783 = vst [vmem:[%s8465_s7 + $0x8] sm:$0xff] %v4779_v43 }

</bundles_post_ra>
